<compile_context>
chip_gen: v5e
topology: v5e:2x2
jax: 0.10.0
libtpu: 0.0.40
codegen_flags: <defaults>
</compile_context>

<pallas_src>
import functools
import math

import jax
import jax.numpy as jnp
from jax.experimental import pallas as pl
from jax.experimental.pallas import tpu as pltpu


def _round_up(x, m):
    return ((x + m - 1) // m) * m


def _alif_recurrent_kernel(i_ref, w_rec_ref, w_out_ref, b_out_ref,
                           y_out_ref, v_out_ref, z_out_ref, a_out_ref,
                           v_sc, a_sc, z_sc, y_sc, tsls_sc,
                           *, alpha, k_out, thr, beta, dt, n_refractory,
                           n_rec, tb, unroll):
    n_rec_p = v_sc.shape[1]

    # State init at the first time block (matches __init__:
    # v = a = z = y = 0, time_since_last_spike = n_refractory).
    @pl.when(pl.program_id(0) == 0)
    def _():
        v_sc[...] = jnp.zeros_like(v_sc)
        a_sc[...] = jnp.zeros_like(a_sc)
        z_sc[...] = jnp.zeros_like(z_sc)
        y_sc[...] = jnp.zeros_like(y_sc)
        tsls_sc[...] = jnp.full(tsls_sc.shape, n_refractory, tsls_sc.dtype)

    # Lane-validity mask for the padded recurrent lanes — keeps the global
    # refractory any() and the spike test faithful to the unpadded model.
    valid = jax.lax.broadcasted_iota(jnp.int32, (1, n_rec_p), 1) < n_rec

    # Weights / bias stay resident in VMEM; load once per time block.
    w_rec = w_rec_ref[...]
    w_out = w_out_ref[...]
    b_out = b_out_ref[...]

    def step(s, carry):
        v, a, z, y, tsls = carry
        i_t = i_ref[pl.ds(s, 1), :]                   # (1, n_rec_p) input current

        # --- update_state ---
        v_new = (alpha * v + i_t
                 + jnp.dot(z, w_rec, preferred_element_type=jnp.float32))
        v_new = jnp.where(z == 1.0, v_new - thr, v_new)   # v[z_prev == 1] -= thr
        a_new = alpha * a + z

        refr_mask = jnp.logical_and(tsls < n_refractory, valid)
        any_refr = jnp.any(refr_mask)          # global branch, as in reference

        # Refractory branch (taken when ANY neuron is refractory).
        tsls_rb = jnp.where(refr_mask, tsls + dt, tsls)
        z_rb = (tsls_rb > n_refractory).astype(jnp.float32)

        # Spiking branch.
        z_sb = jnp.logical_and(v_new >= thr + beta * a_new,
                               valid).astype(jnp.float32)
        tsls_sb = jnp.where(z_sb == 1.0, 0.0, tsls)

        z_new = jnp.where(any_refr, z_rb, z_sb)
        tsls_new = jnp.where(any_refr, tsls_rb, tsls_sb)

        # --- readout: y = k*y + z @ w_out + b ; softmax deferred to post-pass ---
        y_new = (k_out * y
                 + jnp.dot(z_new, w_out, preferred_element_type=jnp.float32)
                 + b_out)

        # Per-step rows into the lane-dense (TB, n_pad) output blocks.
        v_out_ref[pl.ds(s, 1), :] = v_new
        z_out_ref[pl.ds(s, 1), :] = z_new
        a_out_ref[pl.ds(s, 1), :] = a_new
        y_out_ref[pl.ds(s, 1), :] = y_new
        return (v_new, a_new, z_new, y_new, tsls_new)

    carry = (v_sc[...], a_sc[...], z_sc[...], y_sc[...], tsls_sc[...])
    v, a, z, y, tsls = jax.lax.fori_loop(0, tb, step, carry, unroll=unroll)

    # Carry state to the next time block.
    v_sc[...] = v
    a_sc[...] = a
    z_sc[...] = z
    y_sc[...] = y
    tsls_sc[...] = tsls

    # TODO(synk): training=True path (compute_grads e-prop eligibility traces)
    # only mutates parameter .grad buffers and does not affect forward outputs;
    # not implemented in-kernel.


def alif_forward(x, w_in, w_rec, w_out, b_out, *,
                 tau_m, tau_a, tau_out, thr, dt, n_refractory, beta, tb=32):
    del tau_m  # module overwrites alpha with exp(-dt/tau_a); tau_m is dead code
    f32 = jnp.float32
    T, n_in = x.shape
    n_rec = w_in.shape[1]
    n_out = w_out.shape[1]

    alpha = math.exp(-dt / tau_a)
    k_out = math.exp(-dt / tau_out)

    # Padded (lane-dense) sizes and time blocking.
    n_rec_p = _round_up(n_rec, 128)
    n_out_p = _round_up(n_out, 128)
    tb = max(8, min(tb, _round_up(T, 8)))
    t_pad = _round_up(T, tb)
    n_blocks = t_pad // tb

    # Zero-padded parameters (padded rows/cols contribute nothing).
    w_in_p = jnp.zeros((n_in, n_rec_p), f32).at[:, :n_rec].set(w_in.astype(f32))
    w_rec_p = jnp.zeros((n_rec_p, n_rec_p), f32).at[:n_rec, :n_rec].set(
        w_rec.astype(f32))
    w_out_p = jnp.zeros((n_rec_p, n_out_p), f32).at[:n_rec, :n_out].set(
        w_out.astype(f32))
    b_out_p = jnp.zeros((1, n_out_p), f32).at[0, :n_out].set(b_out.astype(f32))
    x_p = jnp.zeros((t_pad, n_in), f32).at[:T, :].set(x.astype(f32))

    # Hoisted input projection: one dense matmul at full MXU occupancy instead
    # of T separate M=1 matmuls inside the serial recurrence.
    i_cur = jnp.dot(x_p, w_in_p, preferred_element_type=f32,
                    precision=jax.lax.Precision.HIGHEST)

    kernel = functools.partial(
        _alif_recurrent_kernel, alpha=alpha, k_out=k_out, thr=float(thr),
        beta=float(beta), dt=float(dt), n_refractory=float(n_refractory),
        n_rec=n_rec, tb=tb, unroll=(tb <= 32))

    out_shapes = (
        jax.ShapeDtypeStruct((t_pad, n_out_p), f32),   # y (pre-softmax readout)
        jax.ShapeDtypeStruct((t_pad, n_rec_p), f32),   # voltage
        jax.ShapeDtypeStruct((t_pad, n_rec_p), f32),   # spikes
        jax.ShapeDtypeStruct((t_pad, n_rec_p), f32),   # adaptation
    )

    grid_spec = pltpu.PrefetchScalarGridSpec(
        num_scalar_prefetch=0,
        grid=(n_blocks,),
        in_specs=[
            pl.BlockSpec((tb, n_rec_p), lambda b: (b, 0)),       # input currents
            pl.BlockSpec((n_rec_p, n_rec_p), lambda b: (0, 0)),  # w_rec
            pl.BlockSpec((n_rec_p, n_out_p), lambda b: (0, 0)),  # w_out
            pl.BlockSpec((1, n_out_p), lambda b: (0, 0)),        # b_out
        ],
        out_specs=[
            pl.BlockSpec((tb, n_out_p), lambda b: (b, 0)),
            pl.BlockSpec((tb, n_rec_p), lambda b: (b, 0)),
            pl.BlockSpec((tb, n_rec_p), lambda b: (b, 0)),
            pl.BlockSpec((tb, n_rec_p), lambda b: (b, 0)),
        ],
        scratch_shapes=[
            pltpu.VMEM((1, n_rec_p), f32),   # v
            pltpu.VMEM((1, n_rec_p), f32),   # a
            pltpu.VMEM((1, n_rec_p), f32),   # z
            pltpu.VMEM((1, n_out_p), f32),   # y
            pltpu.VMEM((1, n_rec_p), f32),   # time_since_last_spike
        ],
    )

    y_seq, v_seq, z_seq, a_seq = pl.pallas_call(
        kernel,
        out_shape=out_shapes,
        grid_spec=grid_spec,
        compiler_params=pltpu.CompilerParams(
            dimension_semantics=("arbitrary",)),   # serial recurrence over time
    )(i_cur, w_rec_p, w_out_p, b_out_p)

    # Softmax over the readout, vectorized over all timesteps (outside the
    # serial recurrence — only y itself is recurrent).
    y_seq = y_seq[:T, :n_out]
    outputs = jax.nn.softmax(y_seq, axis=-1)

    return (outputs,
            v_seq[:T, :n_rec],
            z_seq[:T, :n_rec],
            a_seq[:T, :n_rec])


if __name__ == "__main__":
    # Small shapes consistent with the module.
    n_in, n_rec, n_out, T = 16, 32, 8, 64
    tau_m, tau_a, tau_out = 20.0, 200.0, 20.0
    thr, dt, n_refractory, beta = 0.6, 1.0, 2.0, 0.07

    key = jax.random.PRNGKey(0)
    k1, k2, k3, kx = jax.random.split(key, 4)

    # Deterministic parameter init mirroring __init__ (uniform / sqrt fan-in).
    w_in = jax.random.uniform(k1, (n_in, n_rec), jnp.float32) / math.sqrt(n_in)
    w_rec = jax.random.uniform(k2, (n_rec, n_rec), jnp.float32) / math.sqrt(n_rec)
    w_rec = w_rec * (1.0 - jnp.eye(n_rec, dtype=jnp.float32))   # fill_diagonal_(0)
    w_out = jax.random.uniform(k3, (n_rec, n_out), jnp.float32) / math.sqrt(n_rec)
    b_out = jnp.zeros((n_out,), jnp.float32)

    # Spike-train style input.
    x = (jax.random.uniform(kx, (T, n_in)) < 0.3).astype(jnp.float32)

    outputs, voltage, spikes, adaptation = alif_forward(
        x, w_in, w_rec, w_out, b_out,
        tau_m=tau_m, tau_a=tau_a, tau_out=tau_out,
        thr=thr, dt=dt, n_refractory=n_refractory, beta=beta)

    jax.block_until_ready((outputs, voltage, spikes, adaptation))
    print("KERNEL_OK")
</pallas_src>

<mosaic_0001>
module attributes {stable_mosaic.version = 11 : i64} {
  func.func @_alif_recurrent_kernel(%arg0: i32, %arg1: memref<32x128xf32, #tpu.memory_space<vmem>>, %arg2: memref<128x128xf32, #tpu.memory_space<vmem>>, %arg3: memref<128x128xf32, #tpu.memory_space<vmem>>, %arg4: memref<1x128xf32, #tpu.memory_space<vmem>>, %arg5: memref<32x128xf32, #tpu.memory_space<vmem>>, %arg6: memref<32x128xf32, #tpu.memory_space<vmem>>, %arg7: memref<32x128xf32, #tpu.memory_space<vmem>>, %arg8: memref<32x128xf32, #tpu.memory_space<vmem>>, %arg9: memref<1x128xf32, #tpu.memory_space<vmem>>, %arg10: memref<1x128xf32, #tpu.memory_space<vmem>>, %arg11: memref<1x128xf32, #tpu.memory_space<vmem>>, %arg12: memref<1x128xf32, #tpu.memory_space<vmem>>, %arg13: memref<1x128xf32, #tpu.memory_space<vmem>>) attributes {dimension_semantics = [#tpu.dimension_semantics<arbitrary>], iteration_bounds = array<i64: 2>, scalar_prefetch = 0 : i64, scratch_operands = 5 : i64, tpu.core_type = #tpu.core_type<tc>, window_params = [{transform_indices = @transform_0, window_bounds = array<i64: 32, 128>}, {pipeline_mode = #tpu.pipeline_mode<synchronous>, transform_indices = @transform_1, window_bounds = array<i64: 128, 128>}, {pipeline_mode = #tpu.pipeline_mode<synchronous>, transform_indices = @transform_2, window_bounds = array<i64: 128, 128>}, {pipeline_mode = #tpu.pipeline_mode<synchronous>, transform_indices = @transform_3, window_bounds = array<i64: 1, 128>}, {transform_indices = @transform_4, window_bounds = array<i64: 32, 128>}, {transform_indices = @transform_5, window_bounds = array<i64: 32, 128>}, {transform_indices = @transform_6, window_bounds = array<i64: 32, 128>}, {transform_indices = @transform_7, window_bounds = array<i64: 32, 128>}]} {
    %c0_i32 = arith.constant 0 : i32
    %0 = arith.cmpi eq, %arg0, %c0_i32 : i32
    %1 = arith.extui %0 : i1 to i32
    %c0_i32_0 = arith.constant 0 : i32
    %2 = arith.cmpi ne, %1, %c0_i32_0 : i32
    scf.if %2 {
      %cst_763 = arith.constant 0.000000e+00 : f32
      %1939 = vector.broadcast %cst_763 : f32 to vector<1x128xf32>
      %c0_764 = arith.constant 0 : index
      %c0_765 = arith.constant 0 : index
      %1940 = vector.load %arg9[%c0_764, %c0_765] : memref<1x128xf32, #tpu.memory_space<vmem>>, vector<1x128xf32>
      tpu.vector_store %arg9[%c0_764, %c0_765], %1939 {strides = array<i32>} : memref<1x128xf32, #tpu.memory_space<vmem>>, vector<1x128xf32>,
      %cst_766 = arith.constant 0.000000e+00 : f32
      %1941 = vector.broadcast %cst_766 : f32 to vector<1x128xf32>
      %c0_767 = arith.constant 0 : index
      %c0_768 = arith.constant 0 : index
      %1942 = vector.load %arg10[%c0_767, %c0_768] : memref<1x128xf32, #tpu.memory_space<vmem>>, vector<1x128xf32>
      tpu.vector_store %arg10[%c0_767, %c0_768], %1941 {strides = array<i32>} : memref<1x128xf32, #tpu.memory_space<vmem>>, vector<1x128xf32>,
      %cst_769 = arith.constant 0.000000e+00 : f32
      %1943 = vector.broadcast %cst_769 : f32 to vector<1x128xf32>
      %c0_770 = arith.constant 0 : index
      %c0_771 = arith.constant 0 : index
      %1944 = vector.load %arg11[%c0_770, %c0_771] : memref<1x128xf32, #tpu.memory_space<vmem>>, vector<1x128xf32>
      tpu.vector_store %arg11[%c0_770, %c0_771], %1943 {strides = array<i32>} : memref<1x128xf32, #tpu.memory_space<vmem>>, vector<1x128xf32>,
      %cst_772 = arith.constant 0.000000e+00 : f32
      %1945 = vector.broadcast %cst_772 : f32 to vector<1x128xf32>
      %c0_773 = arith.constant 0 : index
      %c0_774 = arith.constant 0 : index
      %1946 = vector.load %arg12[%c0_773, %c0_774] : memref<1x128xf32, #tpu.memory_space<vmem>>, vector<1x128xf32>
      tpu.vector_store %arg12[%c0_773, %c0_774], %1945 {strides = array<i32>} : memref<1x128xf32, #tpu.memory_space<vmem>>, vector<1x128xf32>,
      %cst_775 = arith.constant 2.000000e+00 : f32
      %1947 = vector.broadcast %cst_775 : f32 to vector<1x128xf32>
      %c0_776 = arith.constant 0 : index
      %c0_777 = arith.constant 0 : index
      %1948 = vector.load %arg13[%c0_776, %c0_777] : memref<1x128xf32, #tpu.memory_space<vmem>>, vector<1x128xf32>
      tpu.vector_store %arg13[%c0_776, %c0_777], %1947 {strides = array<i32>} : memref<1x128xf32, #tpu.memory_space<vmem>>, vector<1x128xf32>,
    } else {
    }
    %3 = tpu.iota {dimensions = array<i32: 1>} : vector<1x128xi32>
    %c32_i32 = arith.constant 32 : i32
    %4 = vector.broadcast %c32_i32 : i32 to vector<1x128xi32>
    %5 = arith.cmpi slt, %3, %4 : vector<1x128xi32>
    %c0 = arith.constant 0 : index
    %c0_1 = arith.constant 0 : index
    %6 = vector.load %arg2[%c0, %c0_1] : memref<128x128xf32, #tpu.memory_space<vmem>>, vector<128x128xf32>
    %c0_2 = arith.constant 0 : index
    %c0_3 = arith.constant 0 : index
    %7 = vector.load %arg3[%c0_2, %c0_3] : memref<128x128xf32, #tpu.memory_space<vmem>>, vector<128x128xf32>
    %c0_4 = arith.constant 0 : index
    %c0_5 = arith.constant 0 : index
    %8 = vector.load %arg4[%c0_4, %c0_5] : memref<1x128xf32, #tpu.memory_space<vmem>>, vector<1x128xf32>
    %c0_6 = arith.constant 0 : index
    %c0_7 = arith.constant 0 : index
    %9 = vector.load %arg9[%c0_6, %c0_7] : memref<1x128xf32, #tpu.memory_space<vmem>>, vector<1x128xf32>
    %c0_8 = arith.constant 0 : index
    %c0_9 = arith.constant 0 : index
    %10 = vector.load %arg10[%c0_8, %c0_9] : memref<1x128xf32, #tpu.memory_space<vmem>>, vector<1x128xf32>
    %c0_10 = arith.constant 0 : index
    %c0_11 = arith.constant 0 : index
    %11 = vector.load %arg11[%c0_10, %c0_11] : memref<1x128xf32, #tpu.memory_space<vmem>>, vector<1x128xf32>
    %c0_12 = arith.constant 0 : index
    %c0_13 = arith.constant 0 : index
    %12 = vector.load %arg12[%c0_12, %c0_13] : memref<1x128xf32, #tpu.memory_space<vmem>>, vector<1x128xf32>
    %c0_14 = arith.constant 0 : index
    %c0_15 = arith.constant 0 : index
    %13 = vector.load %arg13[%c0_14, %c0_15] : memref<1x128xf32, #tpu.memory_space<vmem>>, vector<1x128xf32>
    %c0_i32_16 = arith.constant 0 : i32
    %14 = arith.index_cast %c0_i32_16 : i32 to index
    %c0_17 = arith.constant 0 : index
    %15 = vector.load %arg1[%14, %c0_17] : memref<32x128xf32, #tpu.memory_space<vmem>>, vector<1x128xf32>
    %cst = arith.constant 0.995012462 : f32
    %16 = vector.broadcast %cst : f32 to vector<1x128xf32>
    %17 = arith.mulf %16, %9 : vector<1x128xf32>
    %18 = arith.addf %17, %15 : vector<1x128xf32>
    %cst_18 = arith.constant dense<0.000000e+00> : vector<1x128xf32>
    %19 = tpu.matmul %11, %6, %cst_18 {dimension_numbers = #tpu.dot_dimension_numbers<[1], [0], [0], [1], [0, 0, 1, 1], [], []>} : vector<1x128xf32>, vector<128x128xf32>, vector<1x128xf32> -> vector<1x128xf32>
    %20 = arith.addf %18, %19 : vector<1x128xf32>
    %cst_19 = arith.constant 1.000000e+00 : f32
    %21 = vector.broadcast %cst_19 : f32 to vector<1x128xf32>
    %22 = arith.cmpf oeq, %11, %21 : vector<1x128xf32>
    %cst_20 = arith.constant 6.000000e-01 : f32
    %23 = vector.broadcast %cst_20 : f32 to vector<1x128xf32>
    %24 = arith.subf %20, %23 : vector<1x128xf32>
    %25 = arith.select %22, %24, %20 : vector<1x128xi1>, vector<1x128xf32>
    %cst_21 = arith.constant 0.995012462 : f32
    %26 = vector.broadcast %cst_21 : f32 to vector<1x128xf32>
    %27 = arith.mulf %26, %10 : vector<1x128xf32>
    %28 = arith.addf %27, %11 : vector<1x128xf32>
    %cst_22 = arith.constant 2.000000e+00 : f32
    %29 = vector.broadcast %cst_22 : f32 to vector<1x128xf32>
    %30 = arith.cmpf olt, %13, %29 : vector<1x128xf32>
    %31 = arith.andi %30, %5 : vector<1x128xi1>
    %cst_23 = arith.constant 1.000000e+00 : f32
    %cst_24 = arith.constant 0.000000e+00 : f32
    %32 = vector.broadcast %cst_23 : f32 to vector<1x128xf32>
    %33 = vector.broadcast %cst_24 : f32 to vector<1x128xf32>
    %34 = arith.select %31, %32, %33 : vector<1x128xi1>, vector<1x128xf32>
    %35 = vector.shape_cast %34 : vector<1x128xf32> to vector<1x1x128xf32>
    %cst_25 = arith.constant dense<0xFF800000> : vector<1xf32>
    %36 = vector.multi_reduction <maximumf>, %35, %cst_25 [1, 2] : vector<1x1x128xf32> to vector<1xf32>
    %37 = vector.shape_cast %36 : vector<1xf32> to vector<1x1x1xf32>
    %38 = vector.extract %37[0, 0, 0] : f32 from vector<1x1x1xf32>
    %cst_26 = arith.constant 0.000000e+00 : f32
    %39 = arith.cmpf ogt, %38, %cst_26 : f32
    %cst_27 = arith.constant 1.000000e+00 : f32
    %40 = vector.broadcast %cst_27 : f32 to vector<1x128xf32>
    %41 = arith.addf %13, %40 : vector<1x128xf32>
    %42 = arith.select %31, %41, %13 : vector<1x128xi1>, vector<1x128xf32>
    %cst_28 = arith.constant 2.000000e+00 : f32
    %43 = vector.broadcast %cst_28 : f32 to vector<1x128xf32>
    %44 = arith.cmpf ogt, %42, %43 : vector<1x128xf32>
    %45 = arith.extui %44 : vector<1x128xi1> to vector<1x128xi32>
    %46 = arith.sitofp %45 : vector<1x128xi32> to vector<1x128xf32>
    %cst_29 = arith.constant 7.000000e-02 : f32
    %47 = vector.broadcast %cst_29 : f32 to vector<1x128xf32>
    %48 = arith.mulf %47, %28 : vector<1x128xf32>
    %cst_30 = arith.constant 6.000000e-01 : f32
    %49 = vector.broadcast %cst_30 : f32 to vector<1x128xf32>
    %50 = arith.addf %49, %48 : vector<1x128xf32>
    %51 = arith.cmpf oge, %25, %50 : vector<1x128xf32>
    %52 = arith.andi %51, %5 : vector<1x128xi1>
    %53 = arith.extui %52 : vector<1x128xi1> to vector<1x128xi32>
    %54 = arith.sitofp %53 : vector<1x128xi32> to vector<1x128xf32>
    %cst_31 = arith.constant 1.000000e+00 : f32
    %55 = vector.broadcast %cst_31 : f32 to vector<1x128xf32>
    %56 = arith.cmpf oeq, %54, %55 : vector<1x128xf32>
    %cst_32 = arith.constant 0.000000e+00 : f32
    %57 = vector.broadcast %cst_32 : f32 to vector<1x128xf32>
    %58 = arith.select %56, %57, %13 : vector<1x128xi1>, vector<1x128xf32>
    %59 = arith.select %39, %46, %54 : vector<1x128xf32>
    %60 = arith.select %39, %42, %58 : vector<1x128xf32>
    %cst_33 = arith.constant 0.951229453 : f32
    %61 = vector.broadcast %cst_33 : f32 to vector<1x128xf32>
    %62 = arith.mulf %61, %12 : vector<1x128xf32>
    %cst_34 = arith.constant dense<0.000000e+00> : vector<1x128xf32>
    %63 = tpu.matmul %59, %7, %cst_34 {dimension_numbers = #tpu.dot_dimension_numbers<[1], [0], [0], [1], [0, 0, 1, 1], [], []>} : vector<1x128xf32>, vector<128x128xf32>, vector<1x128xf32> -> vector<1x128xf32>
    %64 = arith.addf %62, %63 : vector<1x128xf32>
    %65 = arith.addf %64, %8 : vector<1x128xf32>
    %66 = arith.index_cast %c0_i32_16 : i32 to index
    %c0_35 = arith.constant 0 : index
    %67 = vector.load %arg6[%66, %c0_35] : memref<32x128xf32, #tpu.memory_space<vmem>>, vector<1x128xf32>
    tpu.vector_store %arg6[%66, %c0_35], %25 {strides = array<i32>} : memref<32x128xf32, #tpu.memory_space<vmem>>, vector<1x128xf32>,
    %68 = arith.index_cast %c0_i32_16 : i32 to index
    %c0_36 = arith.constant 0 : index
    %69 = vector.load %arg7[%68, %c0_36] : memref<32x128xf32, #tpu.memory_space<vmem>>, vector<1x128xf32>
    tpu.vector_store %arg7[%68, %c0_36], %59 {strides = array<i32>} : memref<32x128xf32, #tpu.memory_space<vmem>>, vector<1x128xf32>,
    %70 = arith.index_cast %c0_i32_16 : i32 to index
    %c0_37 = arith.constant 0 : index
    %71 = vector.load %arg8[%70, %c0_37] : memref<32x128xf32, #tpu.memory_space<vmem>>, vector<1x128xf32>
    tpu.vector_store %arg8[%70, %c0_37], %28 {strides = array<i32>} : memref<32x128xf32, #tpu.memory_space<vmem>>, vector<1x128xf32>,
    %72 = arith.index_cast %c0_i32_16 : i32 to index
    %c0_38 = arith.constant 0 : index
    %73 = vector.load %arg5[%72, %c0_38] : memref<32x128xf32, #tpu.memory_space<vmem>>, vector<1x128xf32>
    tpu.vector_store %arg5[%72, %c0_38], %65 {strides = array<i32>} : memref<32x128xf32, #tpu.memory_space<vmem>>, vector<1x128xf32>,
    %c1_i32 = arith.constant 1 : i32
    %74 = arith.index_cast %c1_i32 : i32 to index
    %c0_39 = arith.constant 0 : index
    %75 = vector.load %arg1[%74, %c0_39] : memref<32x128xf32, #tpu.memory_space<vmem>>, vector<1x128xf32>
    %cst_40 = arith.constant 0.995012462 : f32
    %76 = vector.broadcast %cst_40 : f32 to vector<1x128xf32>
    %77 = arith.mulf %76, %25 : vector<1x128xf32>
    %78 = arith.addf %77, %75 : vector<1x128xf32>
    %cst_41 = arith.constant dense<0.000000e+00> : vector<1x128xf32>
    %79 = tpu.matmul %59, %6, %cst_41 {dimension_numbers = #tpu.dot_dimension_numbers<[1], [0], [0], [1], [0, 0, 1, 1], [], []>} : vector<1x128xf32>, vector<128x128xf32>, vector<1x128xf32> -> vector<1x128xf32>
    %80 = arith.addf %78, %79 : vector<1x128xf32>
    %cst_42 = arith.constant 1.000000e+00 : f32
    %81 = vector.broadcast %cst_42 : f32 to vector<1x128xf32>
    %82 = arith.cmpf oeq, %59, %81 : vector<1x128xf32>
    %cst_43 = arith.constant 6.000000e-01 : f32
    %83 = vector.broadcast %cst_43 : f32 to vector<1x128xf32>
    %84 = arith.subf %80, %83 : vector<1x128xf32>
    %85 = arith.select %82, %84, %80 : vector<1x128xi1>, vector<1x128xf32>
    %cst_44 = arith.constant 0.995012462 : f32
    %86 = vector.broadcast %cst_44 : f32 to vector<1x128xf32>
    %87 = arith.mulf %86, %28 : vector<1x128xf32>
    %88 = arith.addf %87, %59 : vector<1x128xf32>
    %cst_45 = arith.constant 2.000000e+00 : f32
    %89 = vector.broadcast %cst_45 : f32 to vector<1x128xf32>
    %90 = arith.cmpf olt, %60, %89 : vector<1x128xf32>
    %91 = arith.andi %90, %5 : vector<1x128xi1>
    %cst_46 = arith.constant 1.000000e+00 : f32
    %cst_47 = arith.constant 0.000000e+00 : f32
    %92 = vector.broadcast %cst_46 : f32 to vector<1x128xf32>
    %93 = vector.broadcast %cst_47 : f32 to vector<1x128xf32>
    %94 = arith.select %91, %92, %93 : vector<1x128xi1>, vector<1x128xf32>
    %95 = vector.shape_cast %94 : vector<1x128xf32> to vector<1x1x128xf32>
    %cst_48 = arith.constant dense<0xFF800000> : vector<1xf32>
    %96 = vector.multi_reduction <maximumf>, %95, %cst_48 [1, 2] : vector<1x1x128xf32> to vector<1xf32>
    %97 = vector.shape_cast %96 : vector<1xf32> to vector<1x1x1xf32>
    %98 = vector.extract %97[0, 0, 0] : f32 from vector<1x1x1xf32>
    %cst_49 = arith.constant 0.000000e+00 : f32
    %99 = arith.cmpf ogt, %98, %cst_49 : f32
    %cst_50 = arith.constant 1.000000e+00 : f32
    %100 = vector.broadcast %cst_50 : f32 to vector<1x128xf32>
    %101 = arith.addf %60, %100 : vector<1x128xf32>
    %102 = arith.select %91, %101, %60 : vector<1x128xi1>, vector<1x128xf32>
    %cst_51 = arith.constant 2.000000e+00 : f32
    %103 = vector.broadcast %cst_51 : f32 to vector<1x128xf32>
    %104 = arith.cmpf ogt, %102, %103 : vector<1x128xf32>
    %105 = arith.extui %104 : vector<1x128xi1> to vector<1x128xi32>
    %106 = arith.sitofp %105 : vector<1x128xi32> to vector<1x128xf32>
    %cst_52 = arith.constant 7.000000e-02 : f32
    %107 = vector.broadcast %cst_52 : f32 to vector<1x128xf32>
    %108 = arith.mulf %107, %88 : vector<1x128xf32>
    %cst_53 = arith.constant 6.000000e-01 : f32
    %109 = vector.broadcast %cst_53 : f32 to vector<1x128xf32>
    %110 = arith.addf %109, %108 : vector<1x128xf32>
    %111 = arith.cmpf oge, %85, %110 : vector<1x128xf32>
    %112 = arith.andi %111, %5 : vector<1x128xi1>
    %113 = arith.extui %112 : vector<1x128xi1> to vector<1x128xi32>
    %114 = arith.sitofp %113 : vector<1x128xi32> to vector<1x128xf32>
    %cst_54 = arith.constant 1.000000e+00 : f32
    %115 = vector.broadcast %cst_54 : f32 to vector<1x128xf32>
    %116 = arith.cmpf oeq, %114, %115 : vector<1x128xf32>
    %cst_55 = arith.constant 0.000000e+00 : f32
    %117 = vector.broadcast %cst_55 : f32 to vector<1x128xf32>
    %118 = arith.select %116, %117, %60 : vector<1x128xi1>, vector<1x128xf32>
    %119 = arith.select %99, %106, %114 : vector<1x128xf32>
    %120 = arith.select %99, %102, %118 : vector<1x128xf32>
    %cst_56 = arith.constant 0.951229453 : f32
    %121 = vector.broadcast %cst_56 : f32 to vector<1x128xf32>
    %122 = arith.mulf %121, %65 : vector<1x128xf32>
    %cst_57 = arith.constant dense<0.000000e+00> : vector<1x128xf32>
    %123 = tpu.matmul %119, %7, %cst_57 {dimension_numbers = #tpu.dot_dimension_numbers<[1], [0], [0], [1], [0, 0, 1, 1], [], []>} : vector<1x128xf32>, vector<128x128xf32>, vector<1x128xf32> -> vector<1x128xf32>
    %124 = arith.addf %122, %123 : vector<1x128xf32>
    %125 = arith.addf %124, %8 : vector<1x128xf32>
    %126 = arith.index_cast %c1_i32 : i32 to index
    %c0_58 = arith.constant 0 : index
    %127 = vector.load %arg6[%126, %c0_58] : memref<32x128xf32, #tpu.memory_space<vmem>>, vector<1x128xf32>
    tpu.vector_store %arg6[%126, %c0_58], %85 {strides = array<i32>} : memref<32x128xf32, #tpu.memory_space<vmem>>, vector<1x128xf32>,
    %128 = arith.index_cast %c1_i32 : i32 to index
    %c0_59 = arith.constant 0 : index
    %129 = vector.load %arg7[%128, %c0_59] : memref<32x128xf32, #tpu.memory_space<vmem>>, vector<1x128xf32>
    tpu.vector_store %arg7[%128, %c0_59], %119 {strides = array<i32>} : memref<32x128xf32, #tpu.memory_space<vmem>>, vector<1x128xf32>,
    %130 = arith.index_cast %c1_i32 : i32 to index
    %c0_60 = arith.constant 0 : index
    %131 = vector.load %arg8[%130, %c0_60] : memref<32x128xf32, #tpu.memory_space<vmem>>, vector<1x128xf32>
    tpu.vector_store %arg8[%130, %c0_60], %88 {strides = array<i32>} : memref<32x128xf32, #tpu.memory_space<vmem>>, vector<1x128xf32>,
    %132 = arith.index_cast %c1_i32 : i32 to index
    %c0_61 = arith.constant 0 : index
    %133 = vector.load %arg5[%132, %c0_61] : memref<32x128xf32, #tpu.memory_space<vmem>>, vector<1x128xf32>
    tpu.vector_store %arg5[%132, %c0_61], %125 {strides = array<i32>} : memref<32x128xf32, #tpu.memory_space<vmem>>, vector<1x128xf32>,
    %c2_i32 = arith.constant 2 : i32
    %134 = arith.index_cast %c2_i32 : i32 to index
    %c0_62 = arith.constant 0 : index
    %135 = vector.load %arg1[%134, %c0_62] : memref<32x128xf32, #tpu.memory_space<vmem>>, vector<1x128xf32>
    %cst_63 = arith.constant 0.995012462 : f32
    %136 = vector.broadcast %cst_63 : f32 to vector<1x128xf32>
    %137 = arith.mulf %136, %85 : vector<1x128xf32>
    %138 = arith.addf %137, %135 : vector<1x128xf32>
    %cst_64 = arith.constant dense<0.000000e+00> : vector<1x128xf32>
    %139 = tpu.matmul %119, %6, %cst_64 {dimension_numbers = #tpu.dot_dimension_numbers<[1], [0], [0], [1], [0, 0, 1, 1], [], []>} : vector<1x128xf32>, vector<128x128xf32>, vector<1x128xf32> -> vector<1x128xf32>
    %140 = arith.addf %138, %139 : vector<1x128xf32>
    %cst_65 = arith.constant 1.000000e+00 : f32
    %141 = vector.broadcast %cst_65 : f32 to vector<1x128xf32>
    %142 = arith.cmpf oeq, %119, %141 : vector<1x128xf32>
    %cst_66 = arith.constant 6.000000e-01 : f32
    %143 = vector.broadcast %cst_66 : f32 to vector<1x128xf32>
    %144 = arith.subf %140, %143 : vector<1x128xf32>
    %145 = arith.select %142, %144, %140 : vector<1x128xi1>, vector<1x128xf32>
    %cst_67 = arith.constant 0.995012462 : f32
    %146 = vector.broadcast %cst_67 : f32 to vector<1x128xf32>
    %147 = arith.mulf %146, %88 : vector<1x128xf32>
    %148 = arith.addf %147, %119 : vector<1x128xf32>
    %cst_68 = arith.constant 2.000000e+00 : f32
    %149 = vector.broadcast %cst_68 : f32 to vector<1x128xf32>
    %150 = arith.cmpf olt, %120, %149 : vector<1x128xf32>
    %151 = arith.andi %150, %5 : vector<1x128xi1>
    %cst_69 = arith.constant 1.000000e+00 : f32
    %cst_70 = arith.constant 0.000000e+00 : f32
    %152 = vector.broadcast %cst_69 : f32 to vector<1x128xf32>
    %153 = vector.broadcast %cst_70 : f32 to vector<1x128xf32>
    %154 = arith.select %151, %152, %153 : vector<1x128xi1>, vector<1x128xf32>
    %155 = vector.shape_cast %154 : vector<1x128xf32> to vector<1x1x128xf32>
    %cst_71 = arith.constant dense<0xFF800000> : vector<1xf32>
    %156 = vector.multi_reduction <maximumf>, %155, %cst_71 [1, 2] : vector<1x1x128xf32> to vector<1xf32>
    %157 = vector.shape_cast %156 : vector<1xf32> to vector<1x1x1xf32>
    %158 = vector.extract %157[0, 0, 0] : f32 from vector<1x1x1xf32>
    %cst_72 = arith.constant 0.000000e+00 : f32
    %159 = arith.cmpf ogt, %158, %cst_72 : f32
    %cst_73 = arith.constant 1.000000e+00 : f32
    %160 = vector.broadcast %cst_73 : f32 to vector<1x128xf32>
    %161 = arith.addf %120, %160 : vector<1x128xf32>
    %162 = arith.select %151, %161, %120 : vector<1x128xi1>, vector<1x128xf32>
    %cst_74 = arith.constant 2.000000e+00 : f32
    %163 = vector.broadcast %cst_74 : f32 to vector<1x128xf32>
    %164 = arith.cmpf ogt, %162, %163 : vector<1x128xf32>
    %165 = arith.extui %164 : vector<1x128xi1> to vector<1x128xi32>
    %166 = arith.sitofp %165 : vector<1x128xi32> to vector<1x128xf32>
    %cst_75 = arith.constant 7.000000e-02 : f32
    %167 = vector.broadcast %cst_75 : f32 to vector<1x128xf32>
    %168 = arith.mulf %167, %148 : vector<1x128xf32>
    %cst_76 = arith.constant 6.000000e-01 : f32
    %169 = vector.broadcast %cst_76 : f32 to vector<1x128xf32>
    %170 = arith.addf %169, %168 : vector<1x128xf32>
    %171 = arith.cmpf oge, %145, %170 : vector<1x128xf32>
    %172 = arith.andi %171, %5 : vector<1x128xi1>
    %173 = arith.extui %172 : vector<1x128xi1> to vector<1x128xi32>
    %174 = arith.sitofp %173 : vector<1x128xi32> to vector<1x128xf32>
    %cst_77 = arith.constant 1.000000e+00 : f32
    %175 = vector.broadcast %cst_77 : f32 to vector<1x128xf32>
    %176 = arith.cmpf oeq, %174, %175 : vector<1x128xf32>
    %cst_78 = arith.constant 0.000000e+00 : f32
    %177 = vector.broadcast %cst_78 : f32 to vector<1x128xf32>
    %178 = arith.select %176, %177, %120 : vector<1x128xi1>, vector<1x128xf32>
    %179 = arith.select %159, %166, %174 : vector<1x128xf32>
    %180 = arith.select %159, %162, %178 : vector<1x128xf32>
    %cst_79 = arith.constant 0.951229453 : f32
    %181 = vector.broadcast %cst_79 : f32 to vector<1x128xf32>
    %182 = arith.mulf %181, %125 : vector<1x128xf32>
    %cst_80 = arith.constant dense<0.000000e+00> : vector<1x128xf32>
    %183 = tpu.matmul %179, %7, %cst_80 {dimension_numbers = #tpu.dot_dimension_numbers<[1], [0], [0], [1], [0, 0, 1, 1], [], []>} : vector<1x128xf32>, vector<128x128xf32>, vector<1x128xf32> -> vector<1x128xf32>
    %184 = arith.addf %182, %183 : vector<1x128xf32>
    %185 = arith.addf %184, %8 : vector<1x128xf32>
    %186 = arith.index_cast %c2_i32 : i32 to index
    %c0_81 = arith.constant 0 : index
    %187 = vector.load %arg6[%186, %c0_81] : memref<32x128xf32, #tpu.memory_space<vmem>>, vector<1x128xf32>
    tpu.vector_store %arg6[%186, %c0_81], %145 {strides = array<i32>} : memref<32x128xf32, #tpu.memory_space<vmem>>, vector<1x128xf32>,
    %188 = arith.index_cast %c2_i32 : i32 to index
    %c0_82 = arith.constant 0 : index
    %189 = vector.load %arg7[%188, %c0_82] : memref<32x128xf32, #tpu.memory_space<vmem>>, vector<1x128xf32>
    tpu.vector_store %arg7[%188, %c0_82], %179 {strides = array<i32>} : memref<32x128xf32, #tpu.memory_space<vmem>>, vector<1x128xf32>,
    %190 = arith.index_cast %c2_i32 : i32 to index
    %c0_83 = arith.constant 0 : index
    %191 = vector.load %arg8[%190, %c0_83] : memref<32x128xf32, #tpu.memory_space<vmem>>, vector<1x128xf32>
    tpu.vector_store %arg8[%190, %c0_83], %148 {strides = array<i32>} : memref<32x128xf32, #tpu.memory_space<vmem>>, vector<1x128xf32>,
    %192 = arith.index_cast %c2_i32 : i32 to index
    %c0_84 = arith.constant 0 : index
    %193 = vector.load %arg5[%192, %c0_84] : memref<32x128xf32, #tpu.memory_space<vmem>>, vector<1x128xf32>
    tpu.vector_store %arg5[%192, %c0_84], %185 {strides = array<i32>} : memref<32x128xf32, #tpu.memory_space<vmem>>, vector<1x128xf32>,
    %c3_i32 = arith.constant 3 : i32
    %194 = arith.index_cast %c3_i32 : i32 to index
    %c0_85 = arith.constant 0 : index
    %195 = vector.load %arg1[%194, %c0_85] : memref<32x128xf32, #tpu.memory_space<vmem>>, vector<1x128xf32>
    %cst_86 = arith.constant 0.995012462 : f32
    %196 = vector.broadcast %cst_86 : f32 to vector<1x128xf32>
    %197 = arith.mulf %196, %145 : vector<1x128xf32>
    %198 = arith.addf %197, %195 : vector<1x128xf32>
    %cst_87 = arith.constant dense<0.000000e+00> : vector<1x128xf32>
    %199 = tpu.matmul %179, %6, %cst_87 {dimension_numbers = #tpu.dot_dimension_numbers<[1], [0], [0], [1], [0, 0, 1, 1], [], []>} : vector<1x128xf32>, vector<128x128xf32>, vector<1x128xf32> -> vector<1x128xf32>
    %200 = arith.addf %198, %199 : vector<1x128xf32>
    %cst_88 = arith.constant 1.000000e+00 : f32
    %201 = vector.broadcast %cst_88 : f32 to vector<1x128xf32>
    %202 = arith.cmpf oeq, %179, %201 : vector<1x128xf32>
    %cst_89 = arith.constant 6.000000e-01 : f32
    %203 = vector.broadcast %cst_89 : f32 to vector<1x128xf32>
    %204 = arith.subf %200, %203 : vector<1x128xf32>
    %205 = arith.select %202, %204, %200 : vector<1x128xi1>, vector<1x128xf32>
    %cst_90 = arith.constant 0.995012462 : f32
    %206 = vector.broadcast %cst_90 : f32 to vector<1x128xf32>
    %207 = arith.mulf %206, %148 : vector<1x128xf32>
    %208 = arith.addf %207, %179 : vector<1x128xf32>
    %cst_91 = arith.constant 2.000000e+00 : f32
    %209 = vector.broadcast %cst_91 : f32 to vector<1x128xf32>
    %210 = arith.cmpf olt, %180, %209 : vector<1x128xf32>
    %211 = arith.andi %210, %5 : vector<1x128xi1>
    %cst_92 = arith.constant 1.000000e+00 : f32
    %cst_93 = arith.constant 0.000000e+00 : f32
    %212 = vector.broadcast %cst_92 : f32 to vector<1x128xf32>
    %213 = vector.broadcast %cst_93 : f32 to vector<1x128xf32>
    %214 = arith.select %211, %212, %213 : vector<1x128xi1>, vector<1x128xf32>
    %215 = vector.shape_cast %214 : vector<1x128xf32> to vector<1x1x128xf32>
    %cst_94 = arith.constant dense<0xFF800000> : vector<1xf32>
    %216 = vector.multi_reduction <maximumf>, %215, %cst_94 [1, 2] : vector<1x1x128xf32> to vector<1xf32>
    %217 = vector.shape_cast %216 : vector<1xf32> to vector<1x1x1xf32>
    %218 = vector.extract %217[0, 0, 0] : f32 from vector<1x1x1xf32>
    %cst_95 = arith.constant 0.000000e+00 : f32
    %219 = arith.cmpf ogt, %218, %cst_95 : f32
    %cst_96 = arith.constant 1.000000e+00 : f32
    %220 = vector.broadcast %cst_96 : f32 to vector<1x128xf32>
    %221 = arith.addf %180, %220 : vector<1x128xf32>
    %222 = arith.select %211, %221, %180 : vector<1x128xi1>, vector<1x128xf32>
    %cst_97 = arith.constant 2.000000e+00 : f32
    %223 = vector.broadcast %cst_97 : f32 to vector<1x128xf32>
    %224 = arith.cmpf ogt, %222, %223 : vector<1x128xf32>
    %225 = arith.extui %224 : vector<1x128xi1> to vector<1x128xi32>
    %226 = arith.sitofp %225 : vector<1x128xi32> to vector<1x128xf32>
    %cst_98 = arith.constant 7.000000e-02 : f32
    %227 = vector.broadcast %cst_98 : f32 to vector<1x128xf32>
    %228 = arith.mulf %227, %208 : vector<1x128xf32>
    %cst_99 = arith.constant 6.000000e-01 : f32
    %229 = vector.broadcast %cst_99 : f32 to vector<1x128xf32>
    %230 = arith.addf %229, %228 : vector<1x128xf32>
    %231 = arith.cmpf oge, %205, %230 : vector<1x128xf32>
    %232 = arith.andi %231, %5 : vector<1x128xi1>
    %233 = arith.extui %232 : vector<1x128xi1> to vector<1x128xi32>
    %234 = arith.sitofp %233 : vector<1x128xi32> to vector<1x128xf32>
    %cst_100 = arith.constant 1.000000e+00 : f32
    %235 = vector.broadcast %cst_100 : f32 to vector<1x128xf32>
    %236 = arith.cmpf oeq, %234, %235 : vector<1x128xf32>
    %cst_101 = arith.constant 0.000000e+00 : f32
    %237 = vector.broadcast %cst_101 : f32 to vector<1x128xf32>
    %238 = arith.select %236, %237, %180 : vector<1x128xi1>, vector<1x128xf32>
    %239 = arith.select %219, %226, %234 : vector<1x128xf32>
    %240 = arith.select %219, %222, %238 : vector<1x128xf32>
    %cst_102 = arith.constant 0.951229453 : f32
    %241 = vector.broadcast %cst_102 : f32 to vector<1x128xf32>
    %242 = arith.mulf %241, %185 : vector<1x128xf32>
    %cst_103 = arith.constant dense<0.000000e+00> : vector<1x128xf32>
    %243 = tpu.matmul %239, %7, %cst_103 {dimension_numbers = #tpu.dot_dimension_numbers<[1], [0], [0], [1], [0, 0, 1, 1], [], []>} : vector<1x128xf32>, vector<128x128xf32>, vector<1x128xf32> -> vector<1x128xf32>
    %244 = arith.addf %242, %243 : vector<1x128xf32>
    %245 = arith.addf %244, %8 : vector<1x128xf32>
    %246 = arith.index_cast %c3_i32 : i32 to index
    %c0_104 = arith.constant 0 : index
    %247 = vector.load %arg6[%246, %c0_104] : memref<32x128xf32, #tpu.memory_space<vmem>>, vector<1x128xf32>
    tpu.vector_store %arg6[%246, %c0_104], %205 {strides = array<i32>} : memref<32x128xf32, #tpu.memory_space<vmem>>, vector<1x128xf32>,
    %248 = arith.index_cast %c3_i32 : i32 to index
    %c0_105 = arith.constant 0 : index
    %249 = vector.load %arg7[%248, %c0_105] : memref<32x128xf32, #tpu.memory_space<vmem>>, vector<1x128xf32>
    tpu.vector_store %arg7[%248, %c0_105], %239 {strides = array<i32>} : memref<32x128xf32, #tpu.memory_space<vmem>>, vector<1x128xf32>,
    %250 = arith.index_cast %c3_i32 : i32 to index
    %c0_106 = arith.constant 0 : index
    %251 = vector.load %arg8[%250, %c0_106] : memref<32x128xf32, #tpu.memory_space<vmem>>, vector<1x128xf32>
    tpu.vector_store %arg8[%250, %c0_106], %208 {strides = array<i32>} : memref<32x128xf32, #tpu.memory_space<vmem>>, vector<1x128xf32>,
    %252 = arith.index_cast %c3_i32 : i32 to index
    %c0_107 = arith.constant 0 : index
    %253 = vector.load %arg5[%252, %c0_107] : memref<32x128xf32, #tpu.memory_space<vmem>>, vector<1x128xf32>
    tpu.vector_store %arg5[%252, %c0_107], %245 {strides = array<i32>} : memref<32x128xf32, #tpu.memory_space<vmem>>, vector<1x128xf32>,
    %c4_i32 = arith.constant 4 : i32
    %254 = arith.index_cast %c4_i32 : i32 to index
    %c0_108 = arith.constant 0 : index
    %255 = vector.load %arg1[%254, %c0_108] : memref<32x128xf32, #tpu.memory_space<vmem>>, vector<1x128xf32>
    %cst_109 = arith.constant 0.995012462 : f32
    %256 = vector.broadcast %cst_109 : f32 to vector<1x128xf32>
    %257 = arith.mulf %256, %205 : vector<1x128xf32>
    %258 = arith.addf %257, %255 : vector<1x128xf32>
    %cst_110 = arith.constant dense<0.000000e+00> : vector<1x128xf32>
    %259 = tpu.matmul %239, %6, %cst_110 {dimension_numbers = #tpu.dot_dimension_numbers<[1], [0], [0], [1], [0, 0, 1, 1], [], []>} : vector<1x128xf32>, vector<128x128xf32>, vector<1x128xf32> -> vector<1x128xf32>
    %260 = arith.addf %258, %259 : vector<1x128xf32>
    %cst_111 = arith.constant 1.000000e+00 : f32
    %261 = vector.broadcast %cst_111 : f32 to vector<1x128xf32>
    %262 = arith.cmpf oeq, %239, %261 : vector<1x128xf32>
    %cst_112 = arith.constant 6.000000e-01 : f32
    %263 = vector.broadcast %cst_112 : f32 to vector<1x128xf32>
    %264 = arith.subf %260, %263 : vector<1x128xf32>
    %265 = arith.select %262, %264, %260 : vector<1x128xi1>, vector<1x128xf32>
    %cst_113 = arith.constant 0.995012462 : f32
    %266 = vector.broadcast %cst_113 : f32 to vector<1x128xf32>
    %267 = arith.mulf %266, %208 : vector<1x128xf32>
    %268 = arith.addf %267, %239 : vector<1x128xf32>
    %cst_114 = arith.constant 2.000000e+00 : f32
    %269 = vector.broadcast %cst_114 : f32 to vector<1x128xf32>
    %270 = arith.cmpf olt, %240, %269 : vector<1x128xf32>
    %271 = arith.andi %270, %5 : vector<1x128xi1>
    %cst_115 = arith.constant 1.000000e+00 : f32
    %cst_116 = arith.constant 0.000000e+00 : f32
    %272 = vector.broadcast %cst_115 : f32 to vector<1x128xf32>
    %273 = vector.broadcast %cst_116 : f32 to vector<1x128xf32>
    %274 = arith.select %271, %272, %273 : vector<1x128xi1>, vector<1x128xf32>
    %275 = vector.shape_cast %274 : vector<1x128xf32> to vector<1x1x128xf32>
    %cst_117 = arith.constant dense<0xFF800000> : vector<1xf32>
    %276 = vector.multi_reduction <maximumf>, %275, %cst_117 [1, 2] : vector<1x1x128xf32> to vector<1xf32>
    %277 = vector.shape_cast %276 : vector<1xf32> to vector<1x1x1xf32>
    %278 = vector.extract %277[0, 0, 0] : f32 from vector<1x1x1xf32>
    %cst_118 = arith.constant 0.000000e+00 : f32
    %279 = arith.cmpf ogt, %278, %cst_118 : f32
    %cst_119 = arith.constant 1.000000e+00 : f32
    %280 = vector.broadcast %cst_119 : f32 to vector<1x128xf32>
    %281 = arith.addf %240, %280 : vector<1x128xf32>
    %282 = arith.select %271, %281, %240 : vector<1x128xi1>, vector<1x128xf32>
    %cst_120 = arith.constant 2.000000e+00 : f32
    %283 = vector.broadcast %cst_120 : f32 to vector<1x128xf32>
    %284 = arith.cmpf ogt, %282, %283 : vector<1x128xf32>
    %285 = arith.extui %284 : vector<1x128xi1> to vector<1x128xi32>
    %286 = arith.sitofp %285 : vector<1x128xi32> to vector<1x128xf32>
    %cst_121 = arith.constant 7.000000e-02 : f32
    %287 = vector.broadcast %cst_121 : f32 to vector<1x128xf32>
    %288 = arith.mulf %287, %268 : vector<1x128xf32>
    %cst_122 = arith.constant 6.000000e-01 : f32
    %289 = vector.broadcast %cst_122 : f32 to vector<1x128xf32>
    %290 = arith.addf %289, %288 : vector<1x128xf32>
    %291 = arith.cmpf oge, %265, %290 : vector<1x128xf32>
    %292 = arith.andi %291, %5 : vector<1x128xi1>
    %293 = arith.extui %292 : vector<1x128xi1> to vector<1x128xi32>
    %294 = arith.sitofp %293 : vector<1x128xi32> to vector<1x128xf32>
    %cst_123 = arith.constant 1.000000e+00 : f32
    %295 = vector.broadcast %cst_123 : f32 to vector<1x128xf32>
    %296 = arith.cmpf oeq, %294, %295 : vector<1x128xf32>
    %cst_124 = arith.constant 0.000000e+00 : f32
    %297 = vector.broadcast %cst_124 : f32 to vector<1x128xf32>
    %298 = arith.select %296, %297, %240 : vector<1x128xi1>, vector<1x128xf32>
    %299 = arith.select %279, %286, %294 : vector<1x128xf32>
    %300 = arith.select %279, %282, %298 : vector<1x128xf32>
    %cst_125 = arith.constant 0.951229453 : f32
    %301 = vector.broadcast %cst_125 : f32 to vector<1x128xf32>
    %302 = arith.mulf %301, %245 : vector<1x128xf32>
    %cst_126 = arith.constant dense<0.000000e+00> : vector<1x128xf32>
    %303 = tpu.matmul %299, %7, %cst_126 {dimension_numbers = #tpu.dot_dimension_numbers<[1], [0], [0], [1], [0, 0, 1, 1], [], []>} : vector<1x128xf32>, vector<128x128xf32>, vector<1x128xf32> -> vector<1x128xf32>
    %304 = arith.addf %302, %303 : vector<1x128xf32>
    %305 = arith.addf %304, %8 : vector<1x128xf32>
    %306 = arith.index_cast %c4_i32 : i32 to index
    %c0_127 = arith.constant 0 : index
    %307 = vector.load %arg6[%306, %c0_127] : memref<32x128xf32, #tpu.memory_space<vmem>>, vector<1x128xf32>
    tpu.vector_store %arg6[%306, %c0_127], %265 {strides = array<i32>} : memref<32x128xf32, #tpu.memory_space<vmem>>, vector<1x128xf32>,
    %308 = arith.index_cast %c4_i32 : i32 to index
    %c0_128 = arith.constant 0 : index
    %309 = vector.load %arg7[%308, %c0_128] : memref<32x128xf32, #tpu.memory_space<vmem>>, vector<1x128xf32>
    tpu.vector_store %arg7[%308, %c0_128], %299 {strides = array<i32>} : memref<32x128xf32, #tpu.memory_space<vmem>>, vector<1x128xf32>,
    %310 = arith.index_cast %c4_i32 : i32 to index
    %c0_129 = arith.constant 0 : index
    %311 = vector.load %arg8[%310, %c0_129] : memref<32x128xf32, #tpu.memory_space<vmem>>, vector<1x128xf32>
    tpu.vector_store %arg8[%310, %c0_129], %268 {strides = array<i32>} : memref<32x128xf32, #tpu.memory_space<vmem>>, vector<1x128xf32>,
    %312 = arith.index_cast %c4_i32 : i32 to index
    %c0_130 = arith.constant 0 : index
    %313 = vector.load %arg5[%312, %c0_130] : memref<32x128xf32, #tpu.memory_space<vmem>>, vector<1x128xf32>
    tpu.vector_store %arg5[%312, %c0_130], %305 {strides = array<i32>} : memref<32x128xf32, #tpu.memory_space<vmem>>, vector<1x128xf32>,
    %c5_i32 = arith.constant 5 : i32
    %314 = arith.index_cast %c5_i32 : i32 to index
    %c0_131 = arith.constant 0 : index
    %315 = vector.load %arg1[%314, %c0_131] : memref<32x128xf32, #tpu.memory_space<vmem>>, vector<1x128xf32>
    %cst_132 = arith.constant 0.995012462 : f32
    %316 = vector.broadcast %cst_132 : f32 to vector<1x128xf32>
    %317 = arith.mulf %316, %265 : vector<1x128xf32>
    %318 = arith.addf %317, %315 : vector<1x128xf32>
    %cst_133 = arith.constant dense<0.000000e+00> : vector<1x128xf32>
    %319 = tpu.matmul %299, %6, %cst_133 {dimension_numbers = #tpu.dot_dimension_numbers<[1], [0], [0], [1], [0, 0, 1, 1], [], []>} : vector<1x128xf32>, vector<128x128xf32>, vector<1x128xf32> -> vector<1x128xf32>
    %320 = arith.addf %318, %319 : vector<1x128xf32>
    %cst_134 = arith.constant 1.000000e+00 : f32
    %321 = vector.broadcast %cst_134 : f32 to vector<1x128xf32>
    %322 = arith.cmpf oeq, %299, %321 : vector<1x128xf32>
    %cst_135 = arith.constant 6.000000e-01 : f32
    %323 = vector.broadcast %cst_135 : f32 to vector<1x128xf32>
    %324 = arith.subf %320, %323 : vector<1x128xf32>
    %325 = arith.select %322, %324, %320 : vector<1x128xi1>, vector<1x128xf32>
    %cst_136 = arith.constant 0.995012462 : f32
    %326 = vector.broadcast %cst_136 : f32 to vector<1x128xf32>
    %327 = arith.mulf %326, %268 : vector<1x128xf32>
    %328 = arith.addf %327, %299 : vector<1x128xf32>
    %cst_137 = arith.constant 2.000000e+00 : f32
    %329 = vector.broadcast %cst_137 : f32 to vector<1x128xf32>
    %330 = arith.cmpf olt, %300, %329 : vector<1x128xf32>
    %331 = arith.andi %330, %5 : vector<1x128xi1>
    %cst_138 = arith.constant 1.000000e+00 : f32
    %cst_139 = arith.constant 0.000000e+00 : f32
    %332 = vector.broadcast %cst_138 : f32 to vector<1x128xf32>
    %333 = vector.broadcast %cst_139 : f32 to vector<1x128xf32>
    %334 = arith.select %331, %332, %333 : vector<1x128xi1>, vector<1x128xf32>
    %335 = vector.shape_cast %334 : vector<1x128xf32> to vector<1x1x128xf32>
    %cst_140 = arith.constant dense<0xFF800000> : vector<1xf32>
    %336 = vector.multi_reduction <maximumf>, %335, %cst_140 [1, 2] : vector<1x1x128xf32> to vector<1xf32>
    %337 = vector.shape_cast %336 : vector<1xf32> to vector<1x1x1xf32>
    %338 = vector.extract %337[0, 0, 0] : f32 from vector<1x1x1xf32>
    %cst_141 = arith.constant 0.000000e+00 : f32
    %339 = arith.cmpf ogt, %338, %cst_141 : f32
    %cst_142 = arith.constant 1.000000e+00 : f32
    %340 = vector.broadcast %cst_142 : f32 to vector<1x128xf32>
    %341 = arith.addf %300, %340 : vector<1x128xf32>
    %342 = arith.select %331, %341, %300 : vector<1x128xi1>, vector<1x128xf32>
    %cst_143 = arith.constant 2.000000e+00 : f32
    %343 = vector.broadcast %cst_143 : f32 to vector<1x128xf32>
    %344 = arith.cmpf ogt, %342, %343 : vector<1x128xf32>
    %345 = arith.extui %344 : vector<1x128xi1> to vector<1x128xi32>
    %346 = arith.sitofp %345 : vector<1x128xi32> to vector<1x128xf32>
    %cst_144 = arith.constant 7.000000e-02 : f32
    %347 = vector.broadcast %cst_144 : f32 to vector<1x128xf32>
    %348 = arith.mulf %347, %328 : vector<1x128xf32>
    %cst_145 = arith.constant 6.000000e-01 : f32
    %349 = vector.broadcast %cst_145 : f32 to vector<1x128xf32>
    %350 = arith.addf %349, %348 : vector<1x128xf32>
    %351 = arith.cmpf oge, %325, %350 : vector<1x128xf32>
    %352 = arith.andi %351, %5 : vector<1x128xi1>
    %353 = arith.extui %352 : vector<1x128xi1> to vector<1x128xi32>
    %354 = arith.sitofp %353 : vector<1x128xi32> to vector<1x128xf32>
    %cst_146 = arith.constant 1.000000e+00 : f32
    %355 = vector.broadcast %cst_146 : f32 to vector<1x128xf32>
    %356 = arith.cmpf oeq, %354, %355 : vector<1x128xf32>
    %cst_147 = arith.constant 0.000000e+00 : f32
    %357 = vector.broadcast %cst_147 : f32 to vector<1x128xf32>
    %358 = arith.select %356, %357, %300 : vector<1x128xi1>, vector<1x128xf32>
    %359 = arith.select %339, %346, %354 : vector<1x128xf32>
    %360 = arith.select %339, %342, %358 : vector<1x128xf32>
    %cst_148 = arith.constant 0.951229453 : f32
    %361 = vector.broadcast %cst_148 : f32 to vector<1x128xf32>
    %362 = arith.mulf %361, %305 : vector<1x128xf32>
    %cst_149 = arith.constant dense<0.000000e+00> : vector<1x128xf32>
    %363 = tpu.matmul %359, %7, %cst_149 {dimension_numbers = #tpu.dot_dimension_numbers<[1], [0], [0], [1], [0, 0, 1, 1], [], []>} : vector<1x128xf32>, vector<128x128xf32>, vector<1x128xf32> -> vector<1x128xf32>
    %364 = arith.addf %362, %363 : vector<1x128xf32>
    %365 = arith.addf %364, %8 : vector<1x128xf32>
    %366 = arith.index_cast %c5_i32 : i32 to index
    %c0_150 = arith.constant 0 : index
    %367 = vector.load %arg6[%366, %c0_150] : memref<32x128xf32, #tpu.memory_space<vmem>>, vector<1x128xf32>
    tpu.vector_store %arg6[%366, %c0_150], %325 {strides = array<i32>} : memref<32x128xf32, #tpu.memory_space<vmem>>, vector<1x128xf32>,
    %368 = arith.index_cast %c5_i32 : i32 to index
    %c0_151 = arith.constant 0 : index
    %369 = vector.load %arg7[%368, %c0_151] : memref<32x128xf32, #tpu.memory_space<vmem>>, vector<1x128xf32>
    tpu.vector_store %arg7[%368, %c0_151], %359 {strides = array<i32>} : memref<32x128xf32, #tpu.memory_space<vmem>>, vector<1x128xf32>,
    %370 = arith.index_cast %c5_i32 : i32 to index
    %c0_152 = arith.constant 0 : index
    %371 = vector.load %arg8[%370, %c0_152] : memref<32x128xf32, #tpu.memory_space<vmem>>, vector<1x128xf32>
    tpu.vector_store %arg8[%370, %c0_152], %328 {strides = array<i32>} : memref<32x128xf32, #tpu.memory_space<vmem>>, vector<1x128xf32>,
    %372 = arith.index_cast %c5_i32 : i32 to index
    %c0_153 = arith.constant 0 : index
    %373 = vector.load %arg5[%372, %c0_153] : memref<32x128xf32, #tpu.memory_space<vmem>>, vector<1x128xf32>
    tpu.vector_store %arg5[%372, %c0_153], %365 {strides = array<i32>} : memref<32x128xf32, #tpu.memory_space<vmem>>, vector<1x128xf32>,
    %c6_i32 = arith.constant 6 : i32
    %374 = arith.index_cast %c6_i32 : i32 to index
    %c0_154 = arith.constant 0 : index
    %375 = vector.load %arg1[%374, %c0_154] : memref<32x128xf32, #tpu.memory_space<vmem>>, vector<1x128xf32>
    %cst_155 = arith.constant 0.995012462 : f32
    %376 = vector.broadcast %cst_155 : f32 to vector<1x128xf32>
    %377 = arith.mulf %376, %325 : vector<1x128xf32>
    %378 = arith.addf %377, %375 : vector<1x128xf32>
    %cst_156 = arith.constant dense<0.000000e+00> : vector<1x128xf32>
    %379 = tpu.matmul %359, %6, %cst_156 {dimension_numbers = #tpu.dot_dimension_numbers<[1], [0], [0], [1], [0, 0, 1, 1], [], []>} : vector<1x128xf32>, vector<128x128xf32>, vector<1x128xf32> -> vector<1x128xf32>
    %380 = arith.addf %378, %379 : vector<1x128xf32>
    %cst_157 = arith.constant 1.000000e+00 : f32
    %381 = vector.broadcast %cst_157 : f32 to vector<1x128xf32>
    %382 = arith.cmpf oeq, %359, %381 : vector<1x128xf32>
    %cst_158 = arith.constant 6.000000e-01 : f32
    %383 = vector.broadcast %cst_158 : f32 to vector<1x128xf32>
    %384 = arith.subf %380, %383 : vector<1x128xf32>
    %385 = arith.select %382, %384, %380 : vector<1x128xi1>, vector<1x128xf32>
    %cst_159 = arith.constant 0.995012462 : f32
    %386 = vector.broadcast %cst_159 : f32 to vector<1x128xf32>
    %387 = arith.mulf %386, %328 : vector<1x128xf32>
    %388 = arith.addf %387, %359 : vector<1x128xf32>
    %cst_160 = arith.constant 2.000000e+00 : f32
    %389 = vector.broadcast %cst_160 : f32 to vector<1x128xf32>
    %390 = arith.cmpf olt, %360, %389 : vector<1x128xf32>
    %391 = arith.andi %390, %5 : vector<1x128xi1>
    %cst_161 = arith.constant 1.000000e+00 : f32
    %cst_162 = arith.constant 0.000000e+00 : f32
    %392 = vector.broadcast %cst_161 : f32 to vector<1x128xf32>
    %393 = vector.broadcast %cst_162 : f32 to vector<1x128xf32>
    %394 = arith.select %391, %392, %393 : vector<1x128xi1>, vector<1x128xf32>
    %395 = vector.shape_cast %394 : vector<1x128xf32> to vector<1x1x128xf32>
    %cst_163 = arith.constant dense<0xFF800000> : vector<1xf32>
    %396 = vector.multi_reduction <maximumf>, %395, %cst_163 [1, 2] : vector<1x1x128xf32> to vector<1xf32>
    %397 = vector.shape_cast %396 : vector<1xf32> to vector<1x1x1xf32>
    %398 = vector.extract %397[0, 0, 0] : f32 from vector<1x1x1xf32>
    %cst_164 = arith.constant 0.000000e+00 : f32
    %399 = arith.cmpf ogt, %398, %cst_164 : f32
    %cst_165 = arith.constant 1.000000e+00 : f32
    %400 = vector.broadcast %cst_165 : f32 to vector<1x128xf32>
    %401 = arith.addf %360, %400 : vector<1x128xf32>
    %402 = arith.select %391, %401, %360 : vector<1x128xi1>, vector<1x128xf32>
    %cst_166 = arith.constant 2.000000e+00 : f32
    %403 = vector.broadcast %cst_166 : f32 to vector<1x128xf32>
    %404 = arith.cmpf ogt, %402, %403 : vector<1x128xf32>
    %405 = arith.extui %404 : vector<1x128xi1> to vector<1x128xi32>
    %406 = arith.sitofp %405 : vector<1x128xi32> to vector<1x128xf32>
    %cst_167 = arith.constant 7.000000e-02 : f32
    %407 = vector.broadcast %cst_167 : f32 to vector<1x128xf32>
    %408 = arith.mulf %407, %388 : vector<1x128xf32>
    %cst_168 = arith.constant 6.000000e-01 : f32
    %409 = vector.broadcast %cst_168 : f32 to vector<1x128xf32>
    %410 = arith.addf %409, %408 : vector<1x128xf32>
    %411 = arith.cmpf oge, %385, %410 : vector<1x128xf32>
    %412 = arith.andi %411, %5 : vector<1x128xi1>
    %413 = arith.extui %412 : vector<1x128xi1> to vector<1x128xi32>
    %414 = arith.sitofp %413 : vector<1x128xi32> to vector<1x128xf32>
    %cst_169 = arith.constant 1.000000e+00 : f32
    %415 = vector.broadcast %cst_169 : f32 to vector<1x128xf32>
    %416 = arith.cmpf oeq, %414, %415 : vector<1x128xf32>
    %cst_170 = arith.constant 0.000000e+00 : f32
    %417 = vector.broadcast %cst_170 : f32 to vector<1x128xf32>
    %418 = arith.select %416, %417, %360 : vector<1x128xi1>, vector<1x128xf32>
    %419 = arith.select %399, %406, %414 : vector<1x128xf32>
    %420 = arith.select %399, %402, %418 : vector<1x128xf32>
    %cst_171 = arith.constant 0.951229453 : f32
    %421 = vector.broadcast %cst_171 : f32 to vector<1x128xf32>
    %422 = arith.mulf %421, %365 : vector<1x128xf32>
    %cst_172 = arith.constant dense<0.000000e+00> : vector<1x128xf32>
    %423 = tpu.matmul %419, %7, %cst_172 {dimension_numbers = #tpu.dot_dimension_numbers<[1], [0], [0], [1], [0, 0, 1, 1], [], []>} : vector<1x128xf32>, vector<128x128xf32>, vector<1x128xf32> -> vector<1x128xf32>
    %424 = arith.addf %422, %423 : vector<1x128xf32>
    %425 = arith.addf %424, %8 : vector<1x128xf32>
    %426 = arith.index_cast %c6_i32 : i32 to index
    %c0_173 = arith.constant 0 : index
    %427 = vector.load %arg6[%426, %c0_173] : memref<32x128xf32, #tpu.memory_space<vmem>>, vector<1x128xf32>
    tpu.vector_store %arg6[%426, %c0_173], %385 {strides = array<i32>} : memref<32x128xf32, #tpu.memory_space<vmem>>, vector<1x128xf32>,
    %428 = arith.index_cast %c6_i32 : i32 to index
    %c0_174 = arith.constant 0 : index
    %429 = vector.load %arg7[%428, %c0_174] : memref<32x128xf32, #tpu.memory_space<vmem>>, vector<1x128xf32>
    tpu.vector_store %arg7[%428, %c0_174], %419 {strides = array<i32>} : memref<32x128xf32, #tpu.memory_space<vmem>>, vector<1x128xf32>,
    %430 = arith.index_cast %c6_i32 : i32 to index
    %c0_175 = arith.constant 0 : index
    %431 = vector.load %arg8[%430, %c0_175] : memref<32x128xf32, #tpu.memory_space<vmem>>, vector<1x128xf32>
    tpu.vector_store %arg8[%430, %c0_175], %388 {strides = array<i32>} : memref<32x128xf32, #tpu.memory_space<vmem>>, vector<1x128xf32>,
    %432 = arith.index_cast %c6_i32 : i32 to index
    %c0_176 = arith.constant 0 : index
    %433 = vector.load %arg5[%432, %c0_176] : memref<32x128xf32, #tpu.memory_space<vmem>>, vector<1x128xf32>
    tpu.vector_store %arg5[%432, %c0_176], %425 {strides = array<i32>} : memref<32x128xf32, #tpu.memory_space<vmem>>, vector<1x128xf32>,
    %c7_i32 = arith.constant 7 : i32
    %434 = arith.index_cast %c7_i32 : i32 to index
    %c0_177 = arith.constant 0 : index
    %435 = vector.load %arg1[%434, %c0_177] : memref<32x128xf32, #tpu.memory_space<vmem>>, vector<1x128xf32>
    %cst_178 = arith.constant 0.995012462 : f32
    %436 = vector.broadcast %cst_178 : f32 to vector<1x128xf32>
    %437 = arith.mulf %436, %385 : vector<1x128xf32>
    %438 = arith.addf %437, %435 : vector<1x128xf32>
    %cst_179 = arith.constant dense<0.000000e+00> : vector<1x128xf32>
    %439 = tpu.matmul %419, %6, %cst_179 {dimension_numbers = #tpu.dot_dimension_numbers<[1], [0], [0], [1], [0, 0, 1, 1], [], []>} : vector<1x128xf32>, vector<128x128xf32>, vector<1x128xf32> -> vector<1x128xf32>
    %440 = arith.addf %438, %439 : vector<1x128xf32>
    %cst_180 = arith.constant 1.000000e+00 : f32
    %441 = vector.broadcast %cst_180 : f32 to vector<1x128xf32>
    %442 = arith.cmpf oeq, %419, %441 : vector<1x128xf32>
    %cst_181 = arith.constant 6.000000e-01 : f32
    %443 = vector.broadcast %cst_181 : f32 to vector<1x128xf32>
    %444 = arith.subf %440, %443 : vector<1x128xf32>
    %445 = arith.select %442, %444, %440 : vector<1x128xi1>, vector<1x128xf32>
    %cst_182 = arith.constant 0.995012462 : f32
    %446 = vector.broadcast %cst_182 : f32 to vector<1x128xf32>
    %447 = arith.mulf %446, %388 : vector<1x128xf32>
    %448 = arith.addf %447, %419 : vector<1x128xf32>
    %cst_183 = arith.constant 2.000000e+00 : f32
    %449 = vector.broadcast %cst_183 : f32 to vector<1x128xf32>
    %450 = arith.cmpf olt, %420, %449 : vector<1x128xf32>
    %451 = arith.andi %450, %5 : vector<1x128xi1>
    %cst_184 = arith.constant 1.000000e+00 : f32
    %cst_185 = arith.constant 0.000000e+00 : f32
    %452 = vector.broadcast %cst_184 : f32 to vector<1x128xf32>
    %453 = vector.broadcast %cst_185 : f32 to vector<1x128xf32>
    %454 = arith.select %451, %452, %453 : vector<1x128xi1>, vector<1x128xf32>
    %455 = vector.shape_cast %454 : vector<1x128xf32> to vector<1x1x128xf32>
    %cst_186 = arith.constant dense<0xFF800000> : vector<1xf32>
    %456 = vector.multi_reduction <maximumf>, %455, %cst_186 [1, 2] : vector<1x1x128xf32> to vector<1xf32>
    %457 = vector.shape_cast %456 : vector<1xf32> to vector<1x1x1xf32>
    %458 = vector.extract %457[0, 0, 0] : f32 from vector<1x1x1xf32>
    %cst_187 = arith.constant 0.000000e+00 : f32
    %459 = arith.cmpf ogt, %458, %cst_187 : f32
    %cst_188 = arith.constant 1.000000e+00 : f32
    %460 = vector.broadcast %cst_188 : f32 to vector<1x128xf32>
    %461 = arith.addf %420, %460 : vector<1x128xf32>
    %462 = arith.select %451, %461, %420 : vector<1x128xi1>, vector<1x128xf32>
    %cst_189 = arith.constant 2.000000e+00 : f32
    %463 = vector.broadcast %cst_189 : f32 to vector<1x128xf32>
    %464 = arith.cmpf ogt, %462, %463 : vector<1x128xf32>
    %465 = arith.extui %464 : vector<1x128xi1> to vector<1x128xi32>
    %466 = arith.sitofp %465 : vector<1x128xi32> to vector<1x128xf32>
    %cst_190 = arith.constant 7.000000e-02 : f32
    %467 = vector.broadcast %cst_190 : f32 to vector<1x128xf32>
    %468 = arith.mulf %467, %448 : vector<1x128xf32>
    %cst_191 = arith.constant 6.000000e-01 : f32
    %469 = vector.broadcast %cst_191 : f32 to vector<1x128xf32>
    %470 = arith.addf %469, %468 : vector<1x128xf32>
    %471 = arith.cmpf oge, %445, %470 : vector<1x128xf32>
    %472 = arith.andi %471, %5 : vector<1x128xi1>
    %473 = arith.extui %472 : vector<1x128xi1> to vector<1x128xi32>
    %474 = arith.sitofp %473 : vector<1x128xi32> to vector<1x128xf32>
    %cst_192 = arith.constant 1.000000e+00 : f32
    %475 = vector.broadcast %cst_192 : f32 to vector<1x128xf32>
    %476 = arith.cmpf oeq, %474, %475 : vector<1x128xf32>
    %cst_193 = arith.constant 0.000000e+00 : f32
    %477 = vector.broadcast %cst_193 : f32 to vector<1x128xf32>
    %478 = arith.select %476, %477, %420 : vector<1x128xi1>, vector<1x128xf32>
    %479 = arith.select %459, %466, %474 : vector<1x128xf32>
    %480 = arith.select %459, %462, %478 : vector<1x128xf32>
    %cst_194 = arith.constant 0.951229453 : f32
    %481 = vector.broadcast %cst_194 : f32 to vector<1x128xf32>
    %482 = arith.mulf %481, %425 : vector<1x128xf32>
    %cst_195 = arith.constant dense<0.000000e+00> : vector<1x128xf32>
    %483 = tpu.matmul %479, %7, %cst_195 {dimension_numbers = #tpu.dot_dimension_numbers<[1], [0], [0], [1], [0, 0, 1, 1], [], []>} : vector<1x128xf32>, vector<128x128xf32>, vector<1x128xf32> -> vector<1x128xf32>
    %484 = arith.addf %482, %483 : vector<1x128xf32>
    %485 = arith.addf %484, %8 : vector<1x128xf32>
    %486 = arith.index_cast %c7_i32 : i32 to index
    %c0_196 = arith.constant 0 : index
    %487 = vector.load %arg6[%486, %c0_196] : memref<32x128xf32, #tpu.memory_space<vmem>>, vector<1x128xf32>
    tpu.vector_store %arg6[%486, %c0_196], %445 {strides = array<i32>} : memref<32x128xf32, #tpu.memory_space<vmem>>, vector<1x128xf32>,
    %488 = arith.index_cast %c7_i32 : i32 to index
    %c0_197 = arith.constant 0 : index
    %489 = vector.load %arg7[%488, %c0_197] : memref<32x128xf32, #tpu.memory_space<vmem>>, vector<1x128xf32>
    tpu.vector_store %arg7[%488, %c0_197], %479 {strides = array<i32>} : memref<32x128xf32, #tpu.memory_space<vmem>>, vector<1x128xf32>,
    %490 = arith.index_cast %c7_i32 : i32 to index
    %c0_198 = arith.constant 0 : index
    %491 = vector.load %arg8[%490, %c0_198] : memref<32x128xf32, #tpu.memory_space<vmem>>, vector<1x128xf32>
    tpu.vector_store %arg8[%490, %c0_198], %448 {strides = array<i32>} : memref<32x128xf32, #tpu.memory_space<vmem>>, vector<1x128xf32>,
    %492 = arith.index_cast %c7_i32 : i32 to index
    %c0_199 = arith.constant 0 : index
    %493 = vector.load %arg5[%492, %c0_199] : memref<32x128xf32, #tpu.memory_space<vmem>>, vector<1x128xf32>
    tpu.vector_store %arg5[%492, %c0_199], %485 {strides = array<i32>} : memref<32x128xf32, #tpu.memory_space<vmem>>, vector<1x128xf32>,
    %c8_i32 = arith.constant 8 : i32
    %494 = arith.index_cast %c8_i32 : i32 to index
    %c0_200 = arith.constant 0 : index
    %495 = vector.load %arg1[%494, %c0_200] : memref<32x128xf32, #tpu.memory_space<vmem>>, vector<1x128xf32>
    %cst_201 = arith.constant 0.995012462 : f32
    %496 = vector.broadcast %cst_201 : f32 to vector<1x128xf32>
    %497 = arith.mulf %496, %445 : vector<1x128xf32>
    %498 = arith.addf %497, %495 : vector<1x128xf32>
    %cst_202 = arith.constant dense<0.000000e+00> : vector<1x128xf32>
    %499 = tpu.matmul %479, %6, %cst_202 {dimension_numbers = #tpu.dot_dimension_numbers<[1], [0], [0], [1], [0, 0, 1, 1], [], []>} : vector<1x128xf32>, vector<128x128xf32>, vector<1x128xf32> -> vector<1x128xf32>
    %500 = arith.addf %498, %499 : vector<1x128xf32>
    %cst_203 = arith.constant 1.000000e+00 : f32
    %501 = vector.broadcast %cst_203 : f32 to vector<1x128xf32>
    %502 = arith.cmpf oeq, %479, %501 : vector<1x128xf32>
    %cst_204 = arith.constant 6.000000e-01 : f32
    %503 = vector.broadcast %cst_204 : f32 to vector<1x128xf32>
    %504 = arith.subf %500, %503 : vector<1x128xf32>
    %505 = arith.select %502, %504, %500 : vector<1x128xi1>, vector<1x128xf32>
    %cst_205 = arith.constant 0.995012462 : f32
    %506 = vector.broadcast %cst_205 : f32 to vector<1x128xf32>
    %507 = arith.mulf %506, %448 : vector<1x128xf32>
    %508 = arith.addf %507, %479 : vector<1x128xf32>
    %cst_206 = arith.constant 2.000000e+00 : f32
    %509 = vector.broadcast %cst_206 : f32 to vector<1x128xf32>
    %510 = arith.cmpf olt, %480, %509 : vector<1x128xf32>
    %511 = arith.andi %510, %5 : vector<1x128xi1>
    %cst_207 = arith.constant 1.000000e+00 : f32
    %cst_208 = arith.constant 0.000000e+00 : f32
    %512 = vector.broadcast %cst_207 : f32 to vector<1x128xf32>
    %513 = vector.broadcast %cst_208 : f32 to vector<1x128xf32>
    %514 = arith.select %511, %512, %513 : vector<1x128xi1>, vector<1x128xf32>
    %515 = vector.shape_cast %514 : vector<1x128xf32> to vector<1x1x128xf32>
    %cst_209 = arith.constant dense<0xFF800000> : vector<1xf32>
    %516 = vector.multi_reduction <maximumf>, %515, %cst_209 [1, 2] : vector<1x1x128xf32> to vector<1xf32>
    %517 = vector.shape_cast %516 : vector<1xf32> to vector<1x1x1xf32>
    %518 = vector.extract %517[0, 0, 0] : f32 from vector<1x1x1xf32>
    %cst_210 = arith.constant 0.000000e+00 : f32
    %519 = arith.cmpf ogt, %518, %cst_210 : f32
    %cst_211 = arith.constant 1.000000e+00 : f32
    %520 = vector.broadcast %cst_211 : f32 to vector<1x128xf32>
    %521 = arith.addf %480, %520 : vector<1x128xf32>
    %522 = arith.select %511, %521, %480 : vector<1x128xi1>, vector<1x128xf32>
    %cst_212 = arith.constant 2.000000e+00 : f32
    %523 = vector.broadcast %cst_212 : f32 to vector<1x128xf32>
    %524 = arith.cmpf ogt, %522, %523 : vector<1x128xf32>
    %525 = arith.extui %524 : vector<1x128xi1> to vector<1x128xi32>
    %526 = arith.sitofp %525 : vector<1x128xi32> to vector<1x128xf32>
    %cst_213 = arith.constant 7.000000e-02 : f32
    %527 = vector.broadcast %cst_213 : f32 to vector<1x128xf32>
    %528 = arith.mulf %527, %508 : vector<1x128xf32>
    %cst_214 = arith.constant 6.000000e-01 : f32
    %529 = vector.broadcast %cst_214 : f32 to vector<1x128xf32>
    %530 = arith.addf %529, %528 : vector<1x128xf32>
    %531 = arith.cmpf oge, %505, %530 : vector<1x128xf32>
    %532 = arith.andi %531, %5 : vector<1x128xi1>
    %533 = arith.extui %532 : vector<1x128xi1> to vector<1x128xi32>
    %534 = arith.sitofp %533 : vector<1x128xi32> to vector<1x128xf32>
    %cst_215 = arith.constant 1.000000e+00 : f32
    %535 = vector.broadcast %cst_215 : f32 to vector<1x128xf32>
    %536 = arith.cmpf oeq, %534, %535 : vector<1x128xf32>
    %cst_216 = arith.constant 0.000000e+00 : f32
    %537 = vector.broadcast %cst_216 : f32 to vector<1x128xf32>
    %538 = arith.select %536, %537, %480 : vector<1x128xi1>, vector<1x128xf32>
    %539 = arith.select %519, %526, %534 : vector<1x128xf32>
    %540 = arith.select %519, %522, %538 : vector<1x128xf32>
    %cst_217 = arith.constant 0.951229453 : f32
    %541 = vector.broadcast %cst_217 : f32 to vector<1x128xf32>
    %542 = arith.mulf %541, %485 : vector<1x128xf32>
    %cst_218 = arith.constant dense<0.000000e+00> : vector<1x128xf32>
    %543 = tpu.matmul %539, %7, %cst_218 {dimension_numbers = #tpu.dot_dimension_numbers<[1], [0], [0], [1], [0, 0, 1, 1], [], []>} : vector<1x128xf32>, vector<128x128xf32>, vector<1x128xf32> -> vector<1x128xf32>
    %544 = arith.addf %542, %543 : vector<1x128xf32>
    %545 = arith.addf %544, %8 : vector<1x128xf32>
    %546 = arith.index_cast %c8_i32 : i32 to index
    %c0_219 = arith.constant 0 : index
    %547 = vector.load %arg6[%546, %c0_219] : memref<32x128xf32, #tpu.memory_space<vmem>>, vector<1x128xf32>
    tpu.vector_store %arg6[%546, %c0_219], %505 {strides = array<i32>} : memref<32x128xf32, #tpu.memory_space<vmem>>, vector<1x128xf32>,
    %548 = arith.index_cast %c8_i32 : i32 to index
    %c0_220 = arith.constant 0 : index
    %549 = vector.load %arg7[%548, %c0_220] : memref<32x128xf32, #tpu.memory_space<vmem>>, vector<1x128xf32>
    tpu.vector_store %arg7[%548, %c0_220], %539 {strides = array<i32>} : memref<32x128xf32, #tpu.memory_space<vmem>>, vector<1x128xf32>,
    %550 = arith.index_cast %c8_i32 : i32 to index
    %c0_221 = arith.constant 0 : index
    %551 = vector.load %arg8[%550, %c0_221] : memref<32x128xf32, #tpu.memory_space<vmem>>, vector<1x128xf32>
    tpu.vector_store %arg8[%550, %c0_221], %508 {strides = array<i32>} : memref<32x128xf32, #tpu.memory_space<vmem>>, vector<1x128xf32>,
    %552 = arith.index_cast %c8_i32 : i32 to index
    %c0_222 = arith.constant 0 : index
    %553 = vector.load %arg5[%552, %c0_222] : memref<32x128xf32, #tpu.memory_space<vmem>>, vector<1x128xf32>
    tpu.vector_store %arg5[%552, %c0_222], %545 {strides = array<i32>} : memref<32x128xf32, #tpu.memory_space<vmem>>, vector<1x128xf32>,
    %c9_i32 = arith.constant 9 : i32
    %554 = arith.index_cast %c9_i32 : i32 to index
    %c0_223 = arith.constant 0 : index
    %555 = vector.load %arg1[%554, %c0_223] : memref<32x128xf32, #tpu.memory_space<vmem>>, vector<1x128xf32>
    %cst_224 = arith.constant 0.995012462 : f32
    %556 = vector.broadcast %cst_224 : f32 to vector<1x128xf32>
    %557 = arith.mulf %556, %505 : vector<1x128xf32>
    %558 = arith.addf %557, %555 : vector<1x128xf32>
    %cst_225 = arith.constant dense<0.000000e+00> : vector<1x128xf32>
    %559 = tpu.matmul %539, %6, %cst_225 {dimension_numbers = #tpu.dot_dimension_numbers<[1], [0], [0], [1], [0, 0, 1, 1], [], []>} : vector<1x128xf32>, vector<128x128xf32>, vector<1x128xf32> -> vector<1x128xf32>
    %560 = arith.addf %558, %559 : vector<1x128xf32>
    %cst_226 = arith.constant 1.000000e+00 : f32
    %561 = vector.broadcast %cst_226 : f32 to vector<1x128xf32>
    %562 = arith.cmpf oeq, %539, %561 : vector<1x128xf32>
    %cst_227 = arith.constant 6.000000e-01 : f32
    %563 = vector.broadcast %cst_227 : f32 to vector<1x128xf32>
    %564 = arith.subf %560, %563 : vector<1x128xf32>
    %565 = arith.select %562, %564, %560 : vector<1x128xi1>, vector<1x128xf32>
    %cst_228 = arith.constant 0.995012462 : f32
    %566 = vector.broadcast %cst_228 : f32 to vector<1x128xf32>
    %567 = arith.mulf %566, %508 : vector<1x128xf32>
    %568 = arith.addf %567, %539 : vector<1x128xf32>
    %cst_229 = arith.constant 2.000000e+00 : f32
    %569 = vector.broadcast %cst_229 : f32 to vector<1x128xf32>
    %570 = arith.cmpf olt, %540, %569 : vector<1x128xf32>
    %571 = arith.andi %570, %5 : vector<1x128xi1>
    %cst_230 = arith.constant 1.000000e+00 : f32
    %cst_231 = arith.constant 0.000000e+00 : f32
    %572 = vector.broadcast %cst_230 : f32 to vector<1x128xf32>
    %573 = vector.broadcast %cst_231 : f32 to vector<1x128xf32>
    %574 = arith.select %571, %572, %573 : vector<1x128xi1>, vector<1x128xf32>
    %575 = vector.shape_cast %574 : vector<1x128xf32> to vector<1x1x128xf32>
    %cst_232 = arith.constant dense<0xFF800000> : vector<1xf32>
    %576 = vector.multi_reduction <maximumf>, %575, %cst_232 [1, 2] : vector<1x1x128xf32> to vector<1xf32>
    %577 = vector.shape_cast %576 : vector<1xf32> to vector<1x1x1xf32>
    %578 = vector.extract %577[0, 0, 0] : f32 from vector<1x1x1xf32>
    %cst_233 = arith.constant 0.000000e+00 : f32
    %579 = arith.cmpf ogt, %578, %cst_233 : f32
    %cst_234 = arith.constant 1.000000e+00 : f32
    %580 = vector.broadcast %cst_234 : f32 to vector<1x128xf32>
    %581 = arith.addf %540, %580 : vector<1x128xf32>
    %582 = arith.select %571, %581, %540 : vector<1x128xi1>, vector<1x128xf32>
    %cst_235 = arith.constant 2.000000e+00 : f32
    %583 = vector.broadcast %cst_235 : f32 to vector<1x128xf32>
    %584 = arith.cmpf ogt, %582, %583 : vector<1x128xf32>
    %585 = arith.extui %584 : vector<1x128xi1> to vector<1x128xi32>
    %586 = arith.sitofp %585 : vector<1x128xi32> to vector<1x128xf32>
    %cst_236 = arith.constant 7.000000e-02 : f32
    %587 = vector.broadcast %cst_236 : f32 to vector<1x128xf32>
    %588 = arith.mulf %587, %568 : vector<1x128xf32>
    %cst_237 = arith.constant 6.000000e-01 : f32
    %589 = vector.broadcast %cst_237 : f32 to vector<1x128xf32>
    %590 = arith.addf %589, %588 : vector<1x128xf32>
    %591 = arith.cmpf oge, %565, %590 : vector<1x128xf32>
    %592 = arith.andi %591, %5 : vector<1x128xi1>
    %593 = arith.extui %592 : vector<1x128xi1> to vector<1x128xi32>
    %594 = arith.sitofp %593 : vector<1x128xi32> to vector<1x128xf32>
    %cst_238 = arith.constant 1.000000e+00 : f32
    %595 = vector.broadcast %cst_238 : f32 to vector<1x128xf32>
    %596 = arith.cmpf oeq, %594, %595 : vector<1x128xf32>
    %cst_239 = arith.constant 0.000000e+00 : f32
    %597 = vector.broadcast %cst_239 : f32 to vector<1x128xf32>
    %598 = arith.select %596, %597, %540 : vector<1x128xi1>, vector<1x128xf32>
    %599 = arith.select %579, %586, %594 : vector<1x128xf32>
    %600 = arith.select %579, %582, %598 : vector<1x128xf32>
    %cst_240 = arith.constant 0.951229453 : f32
    %601 = vector.broadcast %cst_240 : f32 to vector<1x128xf32>
    %602 = arith.mulf %601, %545 : vector<1x128xf32>
    %cst_241 = arith.constant dense<0.000000e+00> : vector<1x128xf32>
    %603 = tpu.matmul %599, %7, %cst_241 {dimension_numbers = #tpu.dot_dimension_numbers<[1], [0], [0], [1], [0, 0, 1, 1], [], []>} : vector<1x128xf32>, vector<128x128xf32>, vector<1x128xf32> -> vector<1x128xf32>
    %604 = arith.addf %602, %603 : vector<1x128xf32>
    %605 = arith.addf %604, %8 : vector<1x128xf32>
    %606 = arith.index_cast %c9_i32 : i32 to index
    %c0_242 = arith.constant 0 : index
    %607 = vector.load %arg6[%606, %c0_242] : memref<32x128xf32, #tpu.memory_space<vmem>>, vector<1x128xf32>
    tpu.vector_store %arg6[%606, %c0_242], %565 {strides = array<i32>} : memref<32x128xf32, #tpu.memory_space<vmem>>, vector<1x128xf32>,
    %608 = arith.index_cast %c9_i32 : i32 to index
    %c0_243 = arith.constant 0 : index
    %609 = vector.load %arg7[%608, %c0_243] : memref<32x128xf32, #tpu.memory_space<vmem>>, vector<1x128xf32>
    tpu.vector_store %arg7[%608, %c0_243], %599 {strides = array<i32>} : memref<32x128xf32, #tpu.memory_space<vmem>>, vector<1x128xf32>,
    %610 = arith.index_cast %c9_i32 : i32 to index
    %c0_244 = arith.constant 0 : index
    %611 = vector.load %arg8[%610, %c0_244] : memref<32x128xf32, #tpu.memory_space<vmem>>, vector<1x128xf32>
    tpu.vector_store %arg8[%610, %c0_244], %568 {strides = array<i32>} : memref<32x128xf32, #tpu.memory_space<vmem>>, vector<1x128xf32>,
    %612 = arith.index_cast %c9_i32 : i32 to index
    %c0_245 = arith.constant 0 : index
    %613 = vector.load %arg5[%612, %c0_245] : memref<32x128xf32, #tpu.memory_space<vmem>>, vector<1x128xf32>
    tpu.vector_store %arg5[%612, %c0_245], %605 {strides = array<i32>} : memref<32x128xf32, #tpu.memory_space<vmem>>, vector<1x128xf32>,
    %c10_i32 = arith.constant 10 : i32
    %614 = arith.index_cast %c10_i32 : i32 to index
    %c0_246 = arith.constant 0 : index
    %615 = vector.load %arg1[%614, %c0_246] : memref<32x128xf32, #tpu.memory_space<vmem>>, vector<1x128xf32>
    %cst_247 = arith.constant 0.995012462 : f32
    %616 = vector.broadcast %cst_247 : f32 to vector<1x128xf32>
    %617 = arith.mulf %616, %565 : vector<1x128xf32>
    %618 = arith.addf %617, %615 : vector<1x128xf32>
    %cst_248 = arith.constant dense<0.000000e+00> : vector<1x128xf32>
    %619 = tpu.matmul %599, %6, %cst_248 {dimension_numbers = #tpu.dot_dimension_numbers<[1], [0], [0], [1], [0, 0, 1, 1], [], []>} : vector<1x128xf32>, vector<128x128xf32>, vector<1x128xf32> -> vector<1x128xf32>
    %620 = arith.addf %618, %619 : vector<1x128xf32>
    %cst_249 = arith.constant 1.000000e+00 : f32
    %621 = vector.broadcast %cst_249 : f32 to vector<1x128xf32>
    %622 = arith.cmpf oeq, %599, %621 : vector<1x128xf32>
    %cst_250 = arith.constant 6.000000e-01 : f32
    %623 = vector.broadcast %cst_250 : f32 to vector<1x128xf32>
    %624 = arith.subf %620, %623 : vector<1x128xf32>
    %625 = arith.select %622, %624, %620 : vector<1x128xi1>, vector<1x128xf32>
    %cst_251 = arith.constant 0.995012462 : f32
    %626 = vector.broadcast %cst_251 : f32 to vector<1x128xf32>
    %627 = arith.mulf %626, %568 : vector<1x128xf32>
    %628 = arith.addf %627, %599 : vector<1x128xf32>
    %cst_252 = arith.constant 2.000000e+00 : f32
    %629 = vector.broadcast %cst_252 : f32 to vector<1x128xf32>
    %630 = arith.cmpf olt, %600, %629 : vector<1x128xf32>
    %631 = arith.andi %630, %5 : vector<1x128xi1>
    %cst_253 = arith.constant 1.000000e+00 : f32
    %cst_254 = arith.constant 0.000000e+00 : f32
    %632 = vector.broadcast %cst_253 : f32 to vector<1x128xf32>
    %633 = vector.broadcast %cst_254 : f32 to vector<1x128xf32>
    %634 = arith.select %631, %632, %633 : vector<1x128xi1>, vector<1x128xf32>
    %635 = vector.shape_cast %634 : vector<1x128xf32> to vector<1x1x128xf32>
    %cst_255 = arith.constant dense<0xFF800000> : vector<1xf32>
    %636 = vector.multi_reduction <maximumf>, %635, %cst_255 [1, 2] : vector<1x1x128xf32> to vector<1xf32>
    %637 = vector.shape_cast %636 : vector<1xf32> to vector<1x1x1xf32>
    %638 = vector.extract %637[0, 0, 0] : f32 from vector<1x1x1xf32>
    %cst_256 = arith.constant 0.000000e+00 : f32
    %639 = arith.cmpf ogt, %638, %cst_256 : f32
    %cst_257 = arith.constant 1.000000e+00 : f32
    %640 = vector.broadcast %cst_257 : f32 to vector<1x128xf32>
    %641 = arith.addf %600, %640 : vector<1x128xf32>
    %642 = arith.select %631, %641, %600 : vector<1x128xi1>, vector<1x128xf32>
    %cst_258 = arith.constant 2.000000e+00 : f32
    %643 = vector.broadcast %cst_258 : f32 to vector<1x128xf32>
    %644 = arith.cmpf ogt, %642, %643 : vector<1x128xf32>
    %645 = arith.extui %644 : vector<1x128xi1> to vector<1x128xi32>
    %646 = arith.sitofp %645 : vector<1x128xi32> to vector<1x128xf32>
    %cst_259 = arith.constant 7.000000e-02 : f32
    %647 = vector.broadcast %cst_259 : f32 to vector<1x128xf32>
    %648 = arith.mulf %647, %628 : vector<1x128xf32>
    %cst_260 = arith.constant 6.000000e-01 : f32
    %649 = vector.broadcast %cst_260 : f32 to vector<1x128xf32>
    %650 = arith.addf %649, %648 : vector<1x128xf32>
    %651 = arith.cmpf oge, %625, %650 : vector<1x128xf32>
    %652 = arith.andi %651, %5 : vector<1x128xi1>
    %653 = arith.extui %652 : vector<1x128xi1> to vector<1x128xi32>
    %654 = arith.sitofp %653 : vector<1x128xi32> to vector<1x128xf32>
    %cst_261 = arith.constant 1.000000e+00 : f32
    %655 = vector.broadcast %cst_261 : f32 to vector<1x128xf32>
    %656 = arith.cmpf oeq, %654, %655 : vector<1x128xf32>
    %cst_262 = arith.constant 0.000000e+00 : f32
    %657 = vector.broadcast %cst_262 : f32 to vector<1x128xf32>
    %658 = arith.select %656, %657, %600 : vector<1x128xi1>, vector<1x128xf32>
    %659 = arith.select %639, %646, %654 : vector<1x128xf32>
    %660 = arith.select %639, %642, %658 : vector<1x128xf32>
    %cst_263 = arith.constant 0.951229453 : f32
    %661 = vector.broadcast %cst_263 : f32 to vector<1x128xf32>
    %662 = arith.mulf %661, %605 : vector<1x128xf32>
    %cst_264 = arith.constant dense<0.000000e+00> : vector<1x128xf32>
    %663 = tpu.matmul %659, %7, %cst_264 {dimension_numbers = #tpu.dot_dimension_numbers<[1], [0], [0], [1], [0, 0, 1, 1], [], []>} : vector<1x128xf32>, vector<128x128xf32>, vector<1x128xf32> -> vector<1x128xf32>
    %664 = arith.addf %662, %663 : vector<1x128xf32>
    %665 = arith.addf %664, %8 : vector<1x128xf32>
    %666 = arith.index_cast %c10_i32 : i32 to index
    %c0_265 = arith.constant 0 : index
    %667 = vector.load %arg6[%666, %c0_265] : memref<32x128xf32, #tpu.memory_space<vmem>>, vector<1x128xf32>
    tpu.vector_store %arg6[%666, %c0_265], %625 {strides = array<i32>} : memref<32x128xf32, #tpu.memory_space<vmem>>, vector<1x128xf32>,
    %668 = arith.index_cast %c10_i32 : i32 to index
    %c0_266 = arith.constant 0 : index
    %669 = vector.load %arg7[%668, %c0_266] : memref<32x128xf32, #tpu.memory_space<vmem>>, vector<1x128xf32>
    tpu.vector_store %arg7[%668, %c0_266], %659 {strides = array<i32>} : memref<32x128xf32, #tpu.memory_space<vmem>>, vector<1x128xf32>,
    %670 = arith.index_cast %c10_i32 : i32 to index
    %c0_267 = arith.constant 0 : index
    %671 = vector.load %arg8[%670, %c0_267] : memref<32x128xf32, #tpu.memory_space<vmem>>, vector<1x128xf32>
    tpu.vector_store %arg8[%670, %c0_267], %628 {strides = array<i32>} : memref<32x128xf32, #tpu.memory_space<vmem>>, vector<1x128xf32>,
    %672 = arith.index_cast %c10_i32 : i32 to index
    %c0_268 = arith.constant 0 : index
    %673 = vector.load %arg5[%672, %c0_268] : memref<32x128xf32, #tpu.memory_space<vmem>>, vector<1x128xf32>
    tpu.vector_store %arg5[%672, %c0_268], %665 {strides = array<i32>} : memref<32x128xf32, #tpu.memory_space<vmem>>, vector<1x128xf32>,
    %c11_i32 = arith.constant 11 : i32
    %674 = arith.index_cast %c11_i32 : i32 to index
    %c0_269 = arith.constant 0 : index
    %675 = vector.load %arg1[%674, %c0_269] : memref<32x128xf32, #tpu.memory_space<vmem>>, vector<1x128xf32>
    %cst_270 = arith.constant 0.995012462 : f32
    %676 = vector.broadcast %cst_270 : f32 to vector<1x128xf32>
    %677 = arith.mulf %676, %625 : vector<1x128xf32>
    %678 = arith.addf %677, %675 : vector<1x128xf32>
    %cst_271 = arith.constant dense<0.000000e+00> : vector<1x128xf32>
    %679 = tpu.matmul %659, %6, %cst_271 {dimension_numbers = #tpu.dot_dimension_numbers<[1], [0], [0], [1], [0, 0, 1, 1], [], []>} : vector<1x128xf32>, vector<128x128xf32>, vector<1x128xf32> -> vector<1x128xf32>
    %680 = arith.addf %678, %679 : vector<1x128xf32>
    %cst_272 = arith.constant 1.000000e+00 : f32
    %681 = vector.broadcast %cst_272 : f32 to vector<1x128xf32>
    %682 = arith.cmpf oeq, %659, %681 : vector<1x128xf32>
    %cst_273 = arith.constant 6.000000e-01 : f32
    %683 = vector.broadcast %cst_273 : f32 to vector<1x128xf32>
    %684 = arith.subf %680, %683 : vector<1x128xf32>
    %685 = arith.select %682, %684, %680 : vector<1x128xi1>, vector<1x128xf32>
    %cst_274 = arith.constant 0.995012462 : f32
    %686 = vector.broadcast %cst_274 : f32 to vector<1x128xf32>
    %687 = arith.mulf %686, %628 : vector<1x128xf32>
    %688 = arith.addf %687, %659 : vector<1x128xf32>
    %cst_275 = arith.constant 2.000000e+00 : f32
    %689 = vector.broadcast %cst_275 : f32 to vector<1x128xf32>
    %690 = arith.cmpf olt, %660, %689 : vector<1x128xf32>
    %691 = arith.andi %690, %5 : vector<1x128xi1>
    %cst_276 = arith.constant 1.000000e+00 : f32
    %cst_277 = arith.constant 0.000000e+00 : f32
    %692 = vector.broadcast %cst_276 : f32 to vector<1x128xf32>
    %693 = vector.broadcast %cst_277 : f32 to vector<1x128xf32>
    %694 = arith.select %691, %692, %693 : vector<1x128xi1>, vector<1x128xf32>
    %695 = vector.shape_cast %694 : vector<1x128xf32> to vector<1x1x128xf32>
    %cst_278 = arith.constant dense<0xFF800000> : vector<1xf32>
    %696 = vector.multi_reduction <maximumf>, %695, %cst_278 [1, 2] : vector<1x1x128xf32> to vector<1xf32>
    %697 = vector.shape_cast %696 : vector<1xf32> to vector<1x1x1xf32>
    %698 = vector.extract %697[0, 0, 0] : f32 from vector<1x1x1xf32>
    %cst_279 = arith.constant 0.000000e+00 : f32
    %699 = arith.cmpf ogt, %698, %cst_279 : f32
    %cst_280 = arith.constant 1.000000e+00 : f32
    %700 = vector.broadcast %cst_280 : f32 to vector<1x128xf32>
    %701 = arith.addf %660, %700 : vector<1x128xf32>
    %702 = arith.select %691, %701, %660 : vector<1x128xi1>, vector<1x128xf32>
    %cst_281 = arith.constant 2.000000e+00 : f32
    %703 = vector.broadcast %cst_281 : f32 to vector<1x128xf32>
    %704 = arith.cmpf ogt, %702, %703 : vector<1x128xf32>
    %705 = arith.extui %704 : vector<1x128xi1> to vector<1x128xi32>
    %706 = arith.sitofp %705 : vector<1x128xi32> to vector<1x128xf32>
    %cst_282 = arith.constant 7.000000e-02 : f32
    %707 = vector.broadcast %cst_282 : f32 to vector<1x128xf32>
    %708 = arith.mulf %707, %688 : vector<1x128xf32>
    %cst_283 = arith.constant 6.000000e-01 : f32
    %709 = vector.broadcast %cst_283 : f32 to vector<1x128xf32>
    %710 = arith.addf %709, %708 : vector<1x128xf32>
    %711 = arith.cmpf oge, %685, %710 : vector<1x128xf32>
    %712 = arith.andi %711, %5 : vector<1x128xi1>
    %713 = arith.extui %712 : vector<1x128xi1> to vector<1x128xi32>
    %714 = arith.sitofp %713 : vector<1x128xi32> to vector<1x128xf32>
    %cst_284 = arith.constant 1.000000e+00 : f32
    %715 = vector.broadcast %cst_284 : f32 to vector<1x128xf32>
    %716 = arith.cmpf oeq, %714, %715 : vector<1x128xf32>
    %cst_285 = arith.constant 0.000000e+00 : f32
    %717 = vector.broadcast %cst_285 : f32 to vector<1x128xf32>
    %718 = arith.select %716, %717, %660 : vector<1x128xi1>, vector<1x128xf32>
    %719 = arith.select %699, %706, %714 : vector<1x128xf32>
    %720 = arith.select %699, %702, %718 : vector<1x128xf32>
    %cst_286 = arith.constant 0.951229453 : f32
    %721 = vector.broadcast %cst_286 : f32 to vector<1x128xf32>
    %722 = arith.mulf %721, %665 : vector<1x128xf32>
    %cst_287 = arith.constant dense<0.000000e+00> : vector<1x128xf32>
    %723 = tpu.matmul %719, %7, %cst_287 {dimension_numbers = #tpu.dot_dimension_numbers<[1], [0], [0], [1], [0, 0, 1, 1], [], []>} : vector<1x128xf32>, vector<128x128xf32>, vector<1x128xf32> -> vector<1x128xf32>
    %724 = arith.addf %722, %723 : vector<1x128xf32>
    %725 = arith.addf %724, %8 : vector<1x128xf32>
    %726 = arith.index_cast %c11_i32 : i32 to index
    %c0_288 = arith.constant 0 : index
    %727 = vector.load %arg6[%726, %c0_288] : memref<32x128xf32, #tpu.memory_space<vmem>>, vector<1x128xf32>
    tpu.vector_store %arg6[%726, %c0_288], %685 {strides = array<i32>} : memref<32x128xf32, #tpu.memory_space<vmem>>, vector<1x128xf32>,
    %728 = arith.index_cast %c11_i32 : i32 to index
    %c0_289 = arith.constant 0 : index
    %729 = vector.load %arg7[%728, %c0_289] : memref<32x128xf32, #tpu.memory_space<vmem>>, vector<1x128xf32>
    tpu.vector_store %arg7[%728, %c0_289], %719 {strides = array<i32>} : memref<32x128xf32, #tpu.memory_space<vmem>>, vector<1x128xf32>,
    %730 = arith.index_cast %c11_i32 : i32 to index
    %c0_290 = arith.constant 0 : index
    %731 = vector.load %arg8[%730, %c0_290] : memref<32x128xf32, #tpu.memory_space<vmem>>, vector<1x128xf32>
    tpu.vector_store %arg8[%730, %c0_290], %688 {strides = array<i32>} : memref<32x128xf32, #tpu.memory_space<vmem>>, vector<1x128xf32>,
    %732 = arith.index_cast %c11_i32 : i32 to index
    %c0_291 = arith.constant 0 : index
    %733 = vector.load %arg5[%732, %c0_291] : memref<32x128xf32, #tpu.memory_space<vmem>>, vector<1x128xf32>
    tpu.vector_store %arg5[%732, %c0_291], %725 {strides = array<i32>} : memref<32x128xf32, #tpu.memory_space<vmem>>, vector<1x128xf32>,
    %c12_i32 = arith.constant 12 : i32
    %734 = arith.index_cast %c12_i32 : i32 to index
    %c0_292 = arith.constant 0 : index
    %735 = vector.load %arg1[%734, %c0_292] : memref<32x128xf32, #tpu.memory_space<vmem>>, vector<1x128xf32>
    %cst_293 = arith.constant 0.995012462 : f32
    %736 = vector.broadcast %cst_293 : f32 to vector<1x128xf32>
    %737 = arith.mulf %736, %685 : vector<1x128xf32>
    %738 = arith.addf %737, %735 : vector<1x128xf32>
    %cst_294 = arith.constant dense<0.000000e+00> : vector<1x128xf32>
    %739 = tpu.matmul %719, %6, %cst_294 {dimension_numbers = #tpu.dot_dimension_numbers<[1], [0], [0], [1], [0, 0, 1, 1], [], []>} : vector<1x128xf32>, vector<128x128xf32>, vector<1x128xf32> -> vector<1x128xf32>
    %740 = arith.addf %738, %739 : vector<1x128xf32>
    %cst_295 = arith.constant 1.000000e+00 : f32
    %741 = vector.broadcast %cst_295 : f32 to vector<1x128xf32>
    %742 = arith.cmpf oeq, %719, %741 : vector<1x128xf32>
    %cst_296 = arith.constant 6.000000e-01 : f32
    %743 = vector.broadcast %cst_296 : f32 to vector<1x128xf32>
    %744 = arith.subf %740, %743 : vector<1x128xf32>
    %745 = arith.select %742, %744, %740 : vector<1x128xi1>, vector<1x128xf32>
    %cst_297 = arith.constant 0.995012462 : f32
    %746 = vector.broadcast %cst_297 : f32 to vector<1x128xf32>
    %747 = arith.mulf %746, %688 : vector<1x128xf32>
    %748 = arith.addf %747, %719 : vector<1x128xf32>
    %cst_298 = arith.constant 2.000000e+00 : f32
    %749 = vector.broadcast %cst_298 : f32 to vector<1x128xf32>
    %750 = arith.cmpf olt, %720, %749 : vector<1x128xf32>
    %751 = arith.andi %750, %5 : vector<1x128xi1>
    %cst_299 = arith.constant 1.000000e+00 : f32
    %cst_300 = arith.constant 0.000000e+00 : f32
    %752 = vector.broadcast %cst_299 : f32 to vector<1x128xf32>
    %753 = vector.broadcast %cst_300 : f32 to vector<1x128xf32>
    %754 = arith.select %751, %752, %753 : vector<1x128xi1>, vector<1x128xf32>
    %755 = vector.shape_cast %754 : vector<1x128xf32> to vector<1x1x128xf32>
    %cst_301 = arith.constant dense<0xFF800000> : vector<1xf32>
    %756 = vector.multi_reduction <maximumf>, %755, %cst_301 [1, 2] : vector<1x1x128xf32> to vector<1xf32>
    %757 = vector.shape_cast %756 : vector<1xf32> to vector<1x1x1xf32>
    %758 = vector.extract %757[0, 0, 0] : f32 from vector<1x1x1xf32>
    %cst_302 = arith.constant 0.000000e+00 : f32
    %759 = arith.cmpf ogt, %758, %cst_302 : f32
    %cst_303 = arith.constant 1.000000e+00 : f32
    %760 = vector.broadcast %cst_303 : f32 to vector<1x128xf32>
    %761 = arith.addf %720, %760 : vector<1x128xf32>
    %762 = arith.select %751, %761, %720 : vector<1x128xi1>, vector<1x128xf32>
    %cst_304 = arith.constant 2.000000e+00 : f32
    %763 = vector.broadcast %cst_304 : f32 to vector<1x128xf32>
    %764 = arith.cmpf ogt, %762, %763 : vector<1x128xf32>
    %765 = arith.extui %764 : vector<1x128xi1> to vector<1x128xi32>
    %766 = arith.sitofp %765 : vector<1x128xi32> to vector<1x128xf32>
    %cst_305 = arith.constant 7.000000e-02 : f32
    %767 = vector.broadcast %cst_305 : f32 to vector<1x128xf32>
    %768 = arith.mulf %767, %748 : vector<1x128xf32>
    %cst_306 = arith.constant 6.000000e-01 : f32
    %769 = vector.broadcast %cst_306 : f32 to vector<1x128xf32>
    %770 = arith.addf %769, %768 : vector<1x128xf32>
    %771 = arith.cmpf oge, %745, %770 : vector<1x128xf32>
    %772 = arith.andi %771, %5 : vector<1x128xi1>
    %773 = arith.extui %772 : vector<1x128xi1> to vector<1x128xi32>
    %774 = arith.sitofp %773 : vector<1x128xi32> to vector<1x128xf32>
    %cst_307 = arith.constant 1.000000e+00 : f32
    %775 = vector.broadcast %cst_307 : f32 to vector<1x128xf32>
    %776 = arith.cmpf oeq, %774, %775 : vector<1x128xf32>
    %cst_308 = arith.constant 0.000000e+00 : f32
    %777 = vector.broadcast %cst_308 : f32 to vector<1x128xf32>
    %778 = arith.select %776, %777, %720 : vector<1x128xi1>, vector<1x128xf32>
    %779 = arith.select %759, %766, %774 : vector<1x128xf32>
    %780 = arith.select %759, %762, %778 : vector<1x128xf32>
    %cst_309 = arith.constant 0.951229453 : f32
    %781 = vector.broadcast %cst_309 : f32 to vector<1x128xf32>
    %782 = arith.mulf %781, %725 : vector<1x128xf32>
    %cst_310 = arith.constant dense<0.000000e+00> : vector<1x128xf32>
    %783 = tpu.matmul %779, %7, %cst_310 {dimension_numbers = #tpu.dot_dimension_numbers<[1], [0], [0], [1], [0, 0, 1, 1], [], []>} : vector<1x128xf32>, vector<128x128xf32>, vector<1x128xf32> -> vector<1x128xf32>
    %784 = arith.addf %782, %783 : vector<1x128xf32>
    %785 = arith.addf %784, %8 : vector<1x128xf32>
    %786 = arith.index_cast %c12_i32 : i32 to index
    %c0_311 = arith.constant 0 : index
    %787 = vector.load %arg6[%786, %c0_311] : memref<32x128xf32, #tpu.memory_space<vmem>>, vector<1x128xf32>
    tpu.vector_store %arg6[%786, %c0_311], %745 {strides = array<i32>} : memref<32x128xf32, #tpu.memory_space<vmem>>, vector<1x128xf32>,
    %788 = arith.index_cast %c12_i32 : i32 to index
    %c0_312 = arith.constant 0 : index
    %789 = vector.load %arg7[%788, %c0_312] : memref<32x128xf32, #tpu.memory_space<vmem>>, vector<1x128xf32>
    tpu.vector_store %arg7[%788, %c0_312], %779 {strides = array<i32>} : memref<32x128xf32, #tpu.memory_space<vmem>>, vector<1x128xf32>,
    %790 = arith.index_cast %c12_i32 : i32 to index
    %c0_313 = arith.constant 0 : index
    %791 = vector.load %arg8[%790, %c0_313] : memref<32x128xf32, #tpu.memory_space<vmem>>, vector<1x128xf32>
    tpu.vector_store %arg8[%790, %c0_313], %748 {strides = array<i32>} : memref<32x128xf32, #tpu.memory_space<vmem>>, vector<1x128xf32>,
    %792 = arith.index_cast %c12_i32 : i32 to index
    %c0_314 = arith.constant 0 : index
    %793 = vector.load %arg5[%792, %c0_314] : memref<32x128xf32, #tpu.memory_space<vmem>>, vector<1x128xf32>
    tpu.vector_store %arg5[%792, %c0_314], %785 {strides = array<i32>} : memref<32x128xf32, #tpu.memory_space<vmem>>, vector<1x128xf32>,
    %c13_i32 = arith.constant 13 : i32
    %794 = arith.index_cast %c13_i32 : i32 to index
    %c0_315 = arith.constant 0 : index
    %795 = vector.load %arg1[%794, %c0_315] : memref<32x128xf32, #tpu.memory_space<vmem>>, vector<1x128xf32>
    %cst_316 = arith.constant 0.995012462 : f32
    %796 = vector.broadcast %cst_316 : f32 to vector<1x128xf32>
    %797 = arith.mulf %796, %745 : vector<1x128xf32>
    %798 = arith.addf %797, %795 : vector<1x128xf32>
    %cst_317 = arith.constant dense<0.000000e+00> : vector<1x128xf32>
    %799 = tpu.matmul %779, %6, %cst_317 {dimension_numbers = #tpu.dot_dimension_numbers<[1], [0], [0], [1], [0, 0, 1, 1], [], []>} : vector<1x128xf32>, vector<128x128xf32>, vector<1x128xf32> -> vector<1x128xf32>
    %800 = arith.addf %798, %799 : vector<1x128xf32>
    %cst_318 = arith.constant 1.000000e+00 : f32
    %801 = vector.broadcast %cst_318 : f32 to vector<1x128xf32>
    %802 = arith.cmpf oeq, %779, %801 : vector<1x128xf32>
    %cst_319 = arith.constant 6.000000e-01 : f32
    %803 = vector.broadcast %cst_319 : f32 to vector<1x128xf32>
    %804 = arith.subf %800, %803 : vector<1x128xf32>
    %805 = arith.select %802, %804, %800 : vector<1x128xi1>, vector<1x128xf32>
    %cst_320 = arith.constant 0.995012462 : f32
    %806 = vector.broadcast %cst_320 : f32 to vector<1x128xf32>
    %807 = arith.mulf %806, %748 : vector<1x128xf32>
    %808 = arith.addf %807, %779 : vector<1x128xf32>
    %cst_321 = arith.constant 2.000000e+00 : f32
    %809 = vector.broadcast %cst_321 : f32 to vector<1x128xf32>
    %810 = arith.cmpf olt, %780, %809 : vector<1x128xf32>
    %811 = arith.andi %810, %5 : vector<1x128xi1>
    %cst_322 = arith.constant 1.000000e+00 : f32
    %cst_323 = arith.constant 0.000000e+00 : f32
    %812 = vector.broadcast %cst_322 : f32 to vector<1x128xf32>
    %813 = vector.broadcast %cst_323 : f32 to vector<1x128xf32>
    %814 = arith.select %811, %812, %813 : vector<1x128xi1>, vector<1x128xf32>
    %815 = vector.shape_cast %814 : vector<1x128xf32> to vector<1x1x128xf32>
    %cst_324 = arith.constant dense<0xFF800000> : vector<1xf32>
    %816 = vector.multi_reduction <maximumf>, %815, %cst_324 [1, 2] : vector<1x1x128xf32> to vector<1xf32>
    %817 = vector.shape_cast %816 : vector<1xf32> to vector<1x1x1xf32>
    %818 = vector.extract %817[0, 0, 0] : f32 from vector<1x1x1xf32>
    %cst_325 = arith.constant 0.000000e+00 : f32
    %819 = arith.cmpf ogt, %818, %cst_325 : f32
    %cst_326 = arith.constant 1.000000e+00 : f32
    %820 = vector.broadcast %cst_326 : f32 to vector<1x128xf32>
    %821 = arith.addf %780, %820 : vector<1x128xf32>
    %822 = arith.select %811, %821, %780 : vector<1x128xi1>, vector<1x128xf32>
    %cst_327 = arith.constant 2.000000e+00 : f32
    %823 = vector.broadcast %cst_327 : f32 to vector<1x128xf32>
    %824 = arith.cmpf ogt, %822, %823 : vector<1x128xf32>
    %825 = arith.extui %824 : vector<1x128xi1> to vector<1x128xi32>
    %826 = arith.sitofp %825 : vector<1x128xi32> to vector<1x128xf32>
    %cst_328 = arith.constant 7.000000e-02 : f32
    %827 = vector.broadcast %cst_328 : f32 to vector<1x128xf32>
    %828 = arith.mulf %827, %808 : vector<1x128xf32>
    %cst_329 = arith.constant 6.000000e-01 : f32
    %829 = vector.broadcast %cst_329 : f32 to vector<1x128xf32>
    %830 = arith.addf %829, %828 : vector<1x128xf32>
    %831 = arith.cmpf oge, %805, %830 : vector<1x128xf32>
    %832 = arith.andi %831, %5 : vector<1x128xi1>
    %833 = arith.extui %832 : vector<1x128xi1> to vector<1x128xi32>
    %834 = arith.sitofp %833 : vector<1x128xi32> to vector<1x128xf32>
    %cst_330 = arith.constant 1.000000e+00 : f32
    %835 = vector.broadcast %cst_330 : f32 to vector<1x128xf32>
    %836 = arith.cmpf oeq, %834, %835 : vector<1x128xf32>
    %cst_331 = arith.constant 0.000000e+00 : f32
    %837 = vector.broadcast %cst_331 : f32 to vector<1x128xf32>
    %838 = arith.select %836, %837, %780 : vector<1x128xi1>, vector<1x128xf32>
    %839 = arith.select %819, %826, %834 : vector<1x128xf32>
    %840 = arith.select %819, %822, %838 : vector<1x128xf32>
    %cst_332 = arith.constant 0.951229453 : f32
    %841 = vector.broadcast %cst_332 : f32 to vector<1x128xf32>
    %842 = arith.mulf %841, %785 : vector<1x128xf32>
    %cst_333 = arith.constant dense<0.000000e+00> : vector<1x128xf32>
    %843 = tpu.matmul %839, %7, %cst_333 {dimension_numbers = #tpu.dot_dimension_numbers<[1], [0], [0], [1], [0, 0, 1, 1], [], []>} : vector<1x128xf32>, vector<128x128xf32>, vector<1x128xf32> -> vector<1x128xf32>
    %844 = arith.addf %842, %843 : vector<1x128xf32>
    %845 = arith.addf %844, %8 : vector<1x128xf32>
    %846 = arith.index_cast %c13_i32 : i32 to index
    %c0_334 = arith.constant 0 : index
    %847 = vector.load %arg6[%846, %c0_334] : memref<32x128xf32, #tpu.memory_space<vmem>>, vector<1x128xf32>
    tpu.vector_store %arg6[%846, %c0_334], %805 {strides = array<i32>} : memref<32x128xf32, #tpu.memory_space<vmem>>, vector<1x128xf32>,
    %848 = arith.index_cast %c13_i32 : i32 to index
    %c0_335 = arith.constant 0 : index
    %849 = vector.load %arg7[%848, %c0_335] : memref<32x128xf32, #tpu.memory_space<vmem>>, vector<1x128xf32>
    tpu.vector_store %arg7[%848, %c0_335], %839 {strides = array<i32>} : memref<32x128xf32, #tpu.memory_space<vmem>>, vector<1x128xf32>,
    %850 = arith.index_cast %c13_i32 : i32 to index
    %c0_336 = arith.constant 0 : index
    %851 = vector.load %arg8[%850, %c0_336] : memref<32x128xf32, #tpu.memory_space<vmem>>, vector<1x128xf32>
    tpu.vector_store %arg8[%850, %c0_336], %808 {strides = array<i32>} : memref<32x128xf32, #tpu.memory_space<vmem>>, vector<1x128xf32>,
    %852 = arith.index_cast %c13_i32 : i32 to index
    %c0_337 = arith.constant 0 : index
    %853 = vector.load %arg5[%852, %c0_337] : memref<32x128xf32, #tpu.memory_space<vmem>>, vector<1x128xf32>
    tpu.vector_store %arg5[%852, %c0_337], %845 {strides = array<i32>} : memref<32x128xf32, #tpu.memory_space<vmem>>, vector<1x128xf32>,
    %c14_i32 = arith.constant 14 : i32
    %854 = arith.index_cast %c14_i32 : i32 to index
    %c0_338 = arith.constant 0 : index
    %855 = vector.load %arg1[%854, %c0_338] : memref<32x128xf32, #tpu.memory_space<vmem>>, vector<1x128xf32>
    %cst_339 = arith.constant 0.995012462 : f32
    %856 = vector.broadcast %cst_339 : f32 to vector<1x128xf32>
    %857 = arith.mulf %856, %805 : vector<1x128xf32>
    %858 = arith.addf %857, %855 : vector<1x128xf32>
    %cst_340 = arith.constant dense<0.000000e+00> : vector<1x128xf32>
    %859 = tpu.matmul %839, %6, %cst_340 {dimension_numbers = #tpu.dot_dimension_numbers<[1], [0], [0], [1], [0, 0, 1, 1], [], []>} : vector<1x128xf32>, vector<128x128xf32>, vector<1x128xf32> -> vector<1x128xf32>
    %860 = arith.addf %858, %859 : vector<1x128xf32>
    %cst_341 = arith.constant 1.000000e+00 : f32
    %861 = vector.broadcast %cst_341 : f32 to vector<1x128xf32>
    %862 = arith.cmpf oeq, %839, %861 : vector<1x128xf32>
    %cst_342 = arith.constant 6.000000e-01 : f32
    %863 = vector.broadcast %cst_342 : f32 to vector<1x128xf32>
    %864 = arith.subf %860, %863 : vector<1x128xf32>
    %865 = arith.select %862, %864, %860 : vector<1x128xi1>, vector<1x128xf32>
    %cst_343 = arith.constant 0.995012462 : f32
    %866 = vector.broadcast %cst_343 : f32 to vector<1x128xf32>
    %867 = arith.mulf %866, %808 : vector<1x128xf32>
    %868 = arith.addf %867, %839 : vector<1x128xf32>
    %cst_344 = arith.constant 2.000000e+00 : f32
    %869 = vector.broadcast %cst_344 : f32 to vector<1x128xf32>
    %870 = arith.cmpf olt, %840, %869 : vector<1x128xf32>
    %871 = arith.andi %870, %5 : vector<1x128xi1>
    %cst_345 = arith.constant 1.000000e+00 : f32
    %cst_346 = arith.constant 0.000000e+00 : f32
    %872 = vector.broadcast %cst_345 : f32 to vector<1x128xf32>
    %873 = vector.broadcast %cst_346 : f32 to vector<1x128xf32>
    %874 = arith.select %871, %872, %873 : vector<1x128xi1>, vector<1x128xf32>
    %875 = vector.shape_cast %874 : vector<1x128xf32> to vector<1x1x128xf32>
    %cst_347 = arith.constant dense<0xFF800000> : vector<1xf32>
    %876 = vector.multi_reduction <maximumf>, %875, %cst_347 [1, 2] : vector<1x1x128xf32> to vector<1xf32>
    %877 = vector.shape_cast %876 : vector<1xf32> to vector<1x1x1xf32>
    %878 = vector.extract %877[0, 0, 0] : f32 from vector<1x1x1xf32>
    %cst_348 = arith.constant 0.000000e+00 : f32
    %879 = arith.cmpf ogt, %878, %cst_348 : f32
    %cst_349 = arith.constant 1.000000e+00 : f32
    %880 = vector.broadcast %cst_349 : f32 to vector<1x128xf32>
    %881 = arith.addf %840, %880 : vector<1x128xf32>
    %882 = arith.select %871, %881, %840 : vector<1x128xi1>, vector<1x128xf32>
    %cst_350 = arith.constant 2.000000e+00 : f32
    %883 = vector.broadcast %cst_350 : f32 to vector<1x128xf32>
    %884 = arith.cmpf ogt, %882, %883 : vector<1x128xf32>
    %885 = arith.extui %884 : vector<1x128xi1> to vector<1x128xi32>
    %886 = arith.sitofp %885 : vector<1x128xi32> to vector<1x128xf32>
    %cst_351 = arith.constant 7.000000e-02 : f32
    %887 = vector.broadcast %cst_351 : f32 to vector<1x128xf32>
    %888 = arith.mulf %887, %868 : vector<1x128xf32>
    %cst_352 = arith.constant 6.000000e-01 : f32
    %889 = vector.broadcast %cst_352 : f32 to vector<1x128xf32>
    %890 = arith.addf %889, %888 : vector<1x128xf32>
    %891 = arith.cmpf oge, %865, %890 : vector<1x128xf32>
    %892 = arith.andi %891, %5 : vector<1x128xi1>
    %893 = arith.extui %892 : vector<1x128xi1> to vector<1x128xi32>
    %894 = arith.sitofp %893 : vector<1x128xi32> to vector<1x128xf32>
    %cst_353 = arith.constant 1.000000e+00 : f32
    %895 = vector.broadcast %cst_353 : f32 to vector<1x128xf32>
    %896 = arith.cmpf oeq, %894, %895 : vector<1x128xf32>
    %cst_354 = arith.constant 0.000000e+00 : f32
    %897 = vector.broadcast %cst_354 : f32 to vector<1x128xf32>
    %898 = arith.select %896, %897, %840 : vector<1x128xi1>, vector<1x128xf32>
    %899 = arith.select %879, %886, %894 : vector<1x128xf32>
    %900 = arith.select %879, %882, %898 : vector<1x128xf32>
    %cst_355 = arith.constant 0.951229453 : f32
    %901 = vector.broadcast %cst_355 : f32 to vector<1x128xf32>
    %902 = arith.mulf %901, %845 : vector<1x128xf32>
    %cst_356 = arith.constant dense<0.000000e+00> : vector<1x128xf32>
    %903 = tpu.matmul %899, %7, %cst_356 {dimension_numbers = #tpu.dot_dimension_numbers<[1], [0], [0], [1], [0, 0, 1, 1], [], []>} : vector<1x128xf32>, vector<128x128xf32>, vector<1x128xf32> -> vector<1x128xf32>
    %904 = arith.addf %902, %903 : vector<1x128xf32>
    %905 = arith.addf %904, %8 : vector<1x128xf32>
    %906 = arith.index_cast %c14_i32 : i32 to index
    %c0_357 = arith.constant 0 : index
    %907 = vector.load %arg6[%906, %c0_357] : memref<32x128xf32, #tpu.memory_space<vmem>>, vector<1x128xf32>
    tpu.vector_store %arg6[%906, %c0_357], %865 {strides = array<i32>} : memref<32x128xf32, #tpu.memory_space<vmem>>, vector<1x128xf32>,
    %908 = arith.index_cast %c14_i32 : i32 to index
    %c0_358 = arith.constant 0 : index
    %909 = vector.load %arg7[%908, %c0_358] : memref<32x128xf32, #tpu.memory_space<vmem>>, vector<1x128xf32>
    tpu.vector_store %arg7[%908, %c0_358], %899 {strides = array<i32>} : memref<32x128xf32, #tpu.memory_space<vmem>>, vector<1x128xf32>,
    %910 = arith.index_cast %c14_i32 : i32 to index
    %c0_359 = arith.constant 0 : index
    %911 = vector.load %arg8[%910, %c0_359] : memref<32x128xf32, #tpu.memory_space<vmem>>, vector<1x128xf32>
    tpu.vector_store %arg8[%910, %c0_359], %868 {strides = array<i32>} : memref<32x128xf32, #tpu.memory_space<vmem>>, vector<1x128xf32>,
    %912 = arith.index_cast %c14_i32 : i32 to index
    %c0_360 = arith.constant 0 : index
    %913 = vector.load %arg5[%912, %c0_360] : memref<32x128xf32, #tpu.memory_space<vmem>>, vector<1x128xf32>
    tpu.vector_store %arg5[%912, %c0_360], %905 {strides = array<i32>} : memref<32x128xf32, #tpu.memory_space<vmem>>, vector<1x128xf32>,
    %c15_i32 = arith.constant 15 : i32
    %914 = arith.index_cast %c15_i32 : i32 to index
    %c0_361 = arith.constant 0 : index
    %915 = vector.load %arg1[%914, %c0_361] : memref<32x128xf32, #tpu.memory_space<vmem>>, vector<1x128xf32>
    %cst_362 = arith.constant 0.995012462 : f32
    %916 = vector.broadcast %cst_362 : f32 to vector<1x128xf32>
    %917 = arith.mulf %916, %865 : vector<1x128xf32>
    %918 = arith.addf %917, %915 : vector<1x128xf32>
    %cst_363 = arith.constant dense<0.000000e+00> : vector<1x128xf32>
    %919 = tpu.matmul %899, %6, %cst_363 {dimension_numbers = #tpu.dot_dimension_numbers<[1], [0], [0], [1], [0, 0, 1, 1], [], []>} : vector<1x128xf32>, vector<128x128xf32>, vector<1x128xf32> -> vector<1x128xf32>
    %920 = arith.addf %918, %919 : vector<1x128xf32>
    %cst_364 = arith.constant 1.000000e+00 : f32
    %921 = vector.broadcast %cst_364 : f32 to vector<1x128xf32>
    %922 = arith.cmpf oeq, %899, %921 : vector<1x128xf32>
    %cst_365 = arith.constant 6.000000e-01 : f32
    %923 = vector.broadcast %cst_365 : f32 to vector<1x128xf32>
    %924 = arith.subf %920, %923 : vector<1x128xf32>
    %925 = arith.select %922, %924, %920 : vector<1x128xi1>, vector<1x128xf32>
    %cst_366 = arith.constant 0.995012462 : f32
    %926 = vector.broadcast %cst_366 : f32 to vector<1x128xf32>
    %927 = arith.mulf %926, %868 : vector<1x128xf32>
    %928 = arith.addf %927, %899 : vector<1x128xf32>
    %cst_367 = arith.constant 2.000000e+00 : f32
    %929 = vector.broadcast %cst_367 : f32 to vector<1x128xf32>
    %930 = arith.cmpf olt, %900, %929 : vector<1x128xf32>
    %931 = arith.andi %930, %5 : vector<1x128xi1>
    %cst_368 = arith.constant 1.000000e+00 : f32
    %cst_369 = arith.constant 0.000000e+00 : f32
    %932 = vector.broadcast %cst_368 : f32 to vector<1x128xf32>
    %933 = vector.broadcast %cst_369 : f32 to vector<1x128xf32>
    %934 = arith.select %931, %932, %933 : vector<1x128xi1>, vector<1x128xf32>
    %935 = vector.shape_cast %934 : vector<1x128xf32> to vector<1x1x128xf32>
    %cst_370 = arith.constant dense<0xFF800000> : vector<1xf32>
    %936 = vector.multi_reduction <maximumf>, %935, %cst_370 [1, 2] : vector<1x1x128xf32> to vector<1xf32>
    %937 = vector.shape_cast %936 : vector<1xf32> to vector<1x1x1xf32>
    %938 = vector.extract %937[0, 0, 0] : f32 from vector<1x1x1xf32>
    %cst_371 = arith.constant 0.000000e+00 : f32
    %939 = arith.cmpf ogt, %938, %cst_371 : f32
    %cst_372 = arith.constant 1.000000e+00 : f32
    %940 = vector.broadcast %cst_372 : f32 to vector<1x128xf32>
    %941 = arith.addf %900, %940 : vector<1x128xf32>
    %942 = arith.select %931, %941, %900 : vector<1x128xi1>, vector<1x128xf32>
    %cst_373 = arith.constant 2.000000e+00 : f32
    %943 = vector.broadcast %cst_373 : f32 to vector<1x128xf32>
    %944 = arith.cmpf ogt, %942, %943 : vector<1x128xf32>
    %945 = arith.extui %944 : vector<1x128xi1> to vector<1x128xi32>
    %946 = arith.sitofp %945 : vector<1x128xi32> to vector<1x128xf32>
    %cst_374 = arith.constant 7.000000e-02 : f32
    %947 = vector.broadcast %cst_374 : f32 to vector<1x128xf32>
    %948 = arith.mulf %947, %928 : vector<1x128xf32>
    %cst_375 = arith.constant 6.000000e-01 : f32
    %949 = vector.broadcast %cst_375 : f32 to vector<1x128xf32>
    %950 = arith.addf %949, %948 : vector<1x128xf32>
    %951 = arith.cmpf oge, %925, %950 : vector<1x128xf32>
    %952 = arith.andi %951, %5 : vector<1x128xi1>
    %953 = arith.extui %952 : vector<1x128xi1> to vector<1x128xi32>
    %954 = arith.sitofp %953 : vector<1x128xi32> to vector<1x128xf32>
    %cst_376 = arith.constant 1.000000e+00 : f32
    %955 = vector.broadcast %cst_376 : f32 to vector<1x128xf32>
    %956 = arith.cmpf oeq, %954, %955 : vector<1x128xf32>
    %cst_377 = arith.constant 0.000000e+00 : f32
    %957 = vector.broadcast %cst_377 : f32 to vector<1x128xf32>
    %958 = arith.select %956, %957, %900 : vector<1x128xi1>, vector<1x128xf32>
    %959 = arith.select %939, %946, %954 : vector<1x128xf32>
    %960 = arith.select %939, %942, %958 : vector<1x128xf32>
    %cst_378 = arith.constant 0.951229453 : f32
    %961 = vector.broadcast %cst_378 : f32 to vector<1x128xf32>
    %962 = arith.mulf %961, %905 : vector<1x128xf32>
    %cst_379 = arith.constant dense<0.000000e+00> : vector<1x128xf32>
    %963 = tpu.matmul %959, %7, %cst_379 {dimension_numbers = #tpu.dot_dimension_numbers<[1], [0], [0], [1], [0, 0, 1, 1], [], []>} : vector<1x128xf32>, vector<128x128xf32>, vector<1x128xf32> -> vector<1x128xf32>
    %964 = arith.addf %962, %963 : vector<1x128xf32>
    %965 = arith.addf %964, %8 : vector<1x128xf32>
    %966 = arith.index_cast %c15_i32 : i32 to index
    %c0_380 = arith.constant 0 : index
    %967 = vector.load %arg6[%966, %c0_380] : memref<32x128xf32, #tpu.memory_space<vmem>>, vector<1x128xf32>
    tpu.vector_store %arg6[%966, %c0_380], %925 {strides = array<i32>} : memref<32x128xf32, #tpu.memory_space<vmem>>, vector<1x128xf32>,
    %968 = arith.index_cast %c15_i32 : i32 to index
    %c0_381 = arith.constant 0 : index
    %969 = vector.load %arg7[%968, %c0_381] : memref<32x128xf32, #tpu.memory_space<vmem>>, vector<1x128xf32>
    tpu.vector_store %arg7[%968, %c0_381], %959 {strides = array<i32>} : memref<32x128xf32, #tpu.memory_space<vmem>>, vector<1x128xf32>,
    %970 = arith.index_cast %c15_i32 : i32 to index
    %c0_382 = arith.constant 0 : index
    %971 = vector.load %arg8[%970, %c0_382] : memref<32x128xf32, #tpu.memory_space<vmem>>, vector<1x128xf32>
    tpu.vector_store %arg8[%970, %c0_382], %928 {strides = array<i32>} : memref<32x128xf32, #tpu.memory_space<vmem>>, vector<1x128xf32>,
    %972 = arith.index_cast %c15_i32 : i32 to index
    %c0_383 = arith.constant 0 : index
    %973 = vector.load %arg5[%972, %c0_383] : memref<32x128xf32, #tpu.memory_space<vmem>>, vector<1x128xf32>
    tpu.vector_store %arg5[%972, %c0_383], %965 {strides = array<i32>} : memref<32x128xf32, #tpu.memory_space<vmem>>, vector<1x128xf32>,
    %c16_i32 = arith.constant 16 : i32
    %974 = arith.index_cast %c16_i32 : i32 to index
    %c0_384 = arith.constant 0 : index
    %975 = vector.load %arg1[%974, %c0_384] : memref<32x128xf32, #tpu.memory_space<vmem>>, vector<1x128xf32>
    %cst_385 = arith.constant 0.995012462 : f32
    %976 = vector.broadcast %cst_385 : f32 to vector<1x128xf32>
    %977 = arith.mulf %976, %925 : vector<1x128xf32>
    %978 = arith.addf %977, %975 : vector<1x128xf32>
    %cst_386 = arith.constant dense<0.000000e+00> : vector<1x128xf32>
    %979 = tpu.matmul %959, %6, %cst_386 {dimension_numbers = #tpu.dot_dimension_numbers<[1], [0], [0], [1], [0, 0, 1, 1], [], []>} : vector<1x128xf32>, vector<128x128xf32>, vector<1x128xf32> -> vector<1x128xf32>
    %980 = arith.addf %978, %979 : vector<1x128xf32>
    %cst_387 = arith.constant 1.000000e+00 : f32
    %981 = vector.broadcast %cst_387 : f32 to vector<1x128xf32>
    %982 = arith.cmpf oeq, %959, %981 : vector<1x128xf32>
    %cst_388 = arith.constant 6.000000e-01 : f32
    %983 = vector.broadcast %cst_388 : f32 to vector<1x128xf32>
    %984 = arith.subf %980, %983 : vector<1x128xf32>
    %985 = arith.select %982, %984, %980 : vector<1x128xi1>, vector<1x128xf32>
    %cst_389 = arith.constant 0.995012462 : f32
    %986 = vector.broadcast %cst_389 : f32 to vector<1x128xf32>
    %987 = arith.mulf %986, %928 : vector<1x128xf32>
    %988 = arith.addf %987, %959 : vector<1x128xf32>
    %cst_390 = arith.constant 2.000000e+00 : f32
    %989 = vector.broadcast %cst_390 : f32 to vector<1x128xf32>
    %990 = arith.cmpf olt, %960, %989 : vector<1x128xf32>
    %991 = arith.andi %990, %5 : vector<1x128xi1>
    %cst_391 = arith.constant 1.000000e+00 : f32
    %cst_392 = arith.constant 0.000000e+00 : f32
    %992 = vector.broadcast %cst_391 : f32 to vector<1x128xf32>
    %993 = vector.broadcast %cst_392 : f32 to vector<1x128xf32>
    %994 = arith.select %991, %992, %993 : vector<1x128xi1>, vector<1x128xf32>
    %995 = vector.shape_cast %994 : vector<1x128xf32> to vector<1x1x128xf32>
    %cst_393 = arith.constant dense<0xFF800000> : vector<1xf32>
    %996 = vector.multi_reduction <maximumf>, %995, %cst_393 [1, 2] : vector<1x1x128xf32> to vector<1xf32>
    %997 = vector.shape_cast %996 : vector<1xf32> to vector<1x1x1xf32>
    %998 = vector.extract %997[0, 0, 0] : f32 from vector<1x1x1xf32>
    %cst_394 = arith.constant 0.000000e+00 : f32
    %999 = arith.cmpf ogt, %998, %cst_394 : f32
    %cst_395 = arith.constant 1.000000e+00 : f32
    %1000 = vector.broadcast %cst_395 : f32 to vector<1x128xf32>
    %1001 = arith.addf %960, %1000 : vector<1x128xf32>
    %1002 = arith.select %991, %1001, %960 : vector<1x128xi1>, vector<1x128xf32>
    %cst_396 = arith.constant 2.000000e+00 : f32
    %1003 = vector.broadcast %cst_396 : f32 to vector<1x128xf32>
    %1004 = arith.cmpf ogt, %1002, %1003 : vector<1x128xf32>
    %1005 = arith.extui %1004 : vector<1x128xi1> to vector<1x128xi32>
    %1006 = arith.sitofp %1005 : vector<1x128xi32> to vector<1x128xf32>
    %cst_397 = arith.constant 7.000000e-02 : f32
    %1007 = vector.broadcast %cst_397 : f32 to vector<1x128xf32>
    %1008 = arith.mulf %1007, %988 : vector<1x128xf32>
    %cst_398 = arith.constant 6.000000e-01 : f32
    %1009 = vector.broadcast %cst_398 : f32 to vector<1x128xf32>
    %1010 = arith.addf %1009, %1008 : vector<1x128xf32>
    %1011 = arith.cmpf oge, %985, %1010 : vector<1x128xf32>
    %1012 = arith.andi %1011, %5 : vector<1x128xi1>
    %1013 = arith.extui %1012 : vector<1x128xi1> to vector<1x128xi32>
    %1014 = arith.sitofp %1013 : vector<1x128xi32> to vector<1x128xf32>
    %cst_399 = arith.constant 1.000000e+00 : f32
    %1015 = vector.broadcast %cst_399 : f32 to vector<1x128xf32>
    %1016 = arith.cmpf oeq, %1014, %1015 : vector<1x128xf32>
    %cst_400 = arith.constant 0.000000e+00 : f32
    %1017 = vector.broadcast %cst_400 : f32 to vector<1x128xf32>
    %1018 = arith.select %1016, %1017, %960 : vector<1x128xi1>, vector<1x128xf32>
    %1019 = arith.select %999, %1006, %1014 : vector<1x128xf32>
    %1020 = arith.select %999, %1002, %1018 : vector<1x128xf32>
    %cst_401 = arith.constant 0.951229453 : f32
    %1021 = vector.broadcast %cst_401 : f32 to vector<1x128xf32>
    %1022 = arith.mulf %1021, %965 : vector<1x128xf32>
    %cst_402 = arith.constant dense<0.000000e+00> : vector<1x128xf32>
    %1023 = tpu.matmul %1019, %7, %cst_402 {dimension_numbers = #tpu.dot_dimension_numbers<[1], [0], [0], [1], [0, 0, 1, 1], [], []>} : vector<1x128xf32>, vector<128x128xf32>, vector<1x128xf32> -> vector<1x128xf32>
    %1024 = arith.addf %1022, %1023 : vector<1x128xf32>
    %1025 = arith.addf %1024, %8 : vector<1x128xf32>
    %1026 = arith.index_cast %c16_i32 : i32 to index
    %c0_403 = arith.constant 0 : index
    %1027 = vector.load %arg6[%1026, %c0_403] : memref<32x128xf32, #tpu.memory_space<vmem>>, vector<1x128xf32>
    tpu.vector_store %arg6[%1026, %c0_403], %985 {strides = array<i32>} : memref<32x128xf32, #tpu.memory_space<vmem>>, vector<1x128xf32>,
    %1028 = arith.index_cast %c16_i32 : i32 to index
    %c0_404 = arith.constant 0 : index
    %1029 = vector.load %arg7[%1028, %c0_404] : memref<32x128xf32, #tpu.memory_space<vmem>>, vector<1x128xf32>
    tpu.vector_store %arg7[%1028, %c0_404], %1019 {strides = array<i32>} : memref<32x128xf32, #tpu.memory_space<vmem>>, vector<1x128xf32>,
    %1030 = arith.index_cast %c16_i32 : i32 to index
    %c0_405 = arith.constant 0 : index
    %1031 = vector.load %arg8[%1030, %c0_405] : memref<32x128xf32, #tpu.memory_space<vmem>>, vector<1x128xf32>
    tpu.vector_store %arg8[%1030, %c0_405], %988 {strides = array<i32>} : memref<32x128xf32, #tpu.memory_space<vmem>>, vector<1x128xf32>,
    %1032 = arith.index_cast %c16_i32 : i32 to index
    %c0_406 = arith.constant 0 : index
    %1033 = vector.load %arg5[%1032, %c0_406] : memref<32x128xf32, #tpu.memory_space<vmem>>, vector<1x128xf32>
    tpu.vector_store %arg5[%1032, %c0_406], %1025 {strides = array<i32>} : memref<32x128xf32, #tpu.memory_space<vmem>>, vector<1x128xf32>,
    %c17_i32 = arith.constant 17 : i32
    %1034 = arith.index_cast %c17_i32 : i32 to index
    %c0_407 = arith.constant 0 : index
    %1035 = vector.load %arg1[%1034, %c0_407] : memref<32x128xf32, #tpu.memory_space<vmem>>, vector<1x128xf32>
    %cst_408 = arith.constant 0.995012462 : f32
    %1036 = vector.broadcast %cst_408 : f32 to vector<1x128xf32>
    %1037 = arith.mulf %1036, %985 : vector<1x128xf32>
    %1038 = arith.addf %1037, %1035 : vector<1x128xf32>
    %cst_409 = arith.constant dense<0.000000e+00> : vector<1x128xf32>
    %1039 = tpu.matmul %1019, %6, %cst_409 {dimension_numbers = #tpu.dot_dimension_numbers<[1], [0], [0], [1], [0, 0, 1, 1], [], []>} : vector<1x128xf32>, vector<128x128xf32>, vector<1x128xf32> -> vector<1x128xf32>
    %1040 = arith.addf %1038, %1039 : vector<1x128xf32>
    %cst_410 = arith.constant 1.000000e+00 : f32
    %1041 = vector.broadcast %cst_410 : f32 to vector<1x128xf32>
    %1042 = arith.cmpf oeq, %1019, %1041 : vector<1x128xf32>
    %cst_411 = arith.constant 6.000000e-01 : f32
    %1043 = vector.broadcast %cst_411 : f32 to vector<1x128xf32>
    %1044 = arith.subf %1040, %1043 : vector<1x128xf32>
    %1045 = arith.select %1042, %1044, %1040 : vector<1x128xi1>, vector<1x128xf32>
    %cst_412 = arith.constant 0.995012462 : f32
    %1046 = vector.broadcast %cst_412 : f32 to vector<1x128xf32>
    %1047 = arith.mulf %1046, %988 : vector<1x128xf32>
    %1048 = arith.addf %1047, %1019 : vector<1x128xf32>
    %cst_413 = arith.constant 2.000000e+00 : f32
    %1049 = vector.broadcast %cst_413 : f32 to vector<1x128xf32>
    %1050 = arith.cmpf olt, %1020, %1049 : vector<1x128xf32>
    %1051 = arith.andi %1050, %5 : vector<1x128xi1>
    %cst_414 = arith.constant 1.000000e+00 : f32
    %cst_415 = arith.constant 0.000000e+00 : f32
    %1052 = vector.broadcast %cst_414 : f32 to vector<1x128xf32>
    %1053 = vector.broadcast %cst_415 : f32 to vector<1x128xf32>
    %1054 = arith.select %1051, %1052, %1053 : vector<1x128xi1>, vector<1x128xf32>
    %1055 = vector.shape_cast %1054 : vector<1x128xf32> to vector<1x1x128xf32>
    %cst_416 = arith.constant dense<0xFF800000> : vector<1xf32>
    %1056 = vector.multi_reduction <maximumf>, %1055, %cst_416 [1, 2] : vector<1x1x128xf32> to vector<1xf32>
    %1057 = vector.shape_cast %1056 : vector<1xf32> to vector<1x1x1xf32>
    %1058 = vector.extract %1057[0, 0, 0] : f32 from vector<1x1x1xf32>
    %cst_417 = arith.constant 0.000000e+00 : f32
    %1059 = arith.cmpf ogt, %1058, %cst_417 : f32
    %cst_418 = arith.constant 1.000000e+00 : f32
    %1060 = vector.broadcast %cst_418 : f32 to vector<1x128xf32>
    %1061 = arith.addf %1020, %1060 : vector<1x128xf32>
    %1062 = arith.select %1051, %1061, %1020 : vector<1x128xi1>, vector<1x128xf32>
    %cst_419 = arith.constant 2.000000e+00 : f32
    %1063 = vector.broadcast %cst_419 : f32 to vector<1x128xf32>
    %1064 = arith.cmpf ogt, %1062, %1063 : vector<1x128xf32>
    %1065 = arith.extui %1064 : vector<1x128xi1> to vector<1x128xi32>
    %1066 = arith.sitofp %1065 : vector<1x128xi32> to vector<1x128xf32>
    %cst_420 = arith.constant 7.000000e-02 : f32
    %1067 = vector.broadcast %cst_420 : f32 to vector<1x128xf32>
    %1068 = arith.mulf %1067, %1048 : vector<1x128xf32>
    %cst_421 = arith.constant 6.000000e-01 : f32
    %1069 = vector.broadcast %cst_421 : f32 to vector<1x128xf32>
    %1070 = arith.addf %1069, %1068 : vector<1x128xf32>
    %1071 = arith.cmpf oge, %1045, %1070 : vector<1x128xf32>
    %1072 = arith.andi %1071, %5 : vector<1x128xi1>
    %1073 = arith.extui %1072 : vector<1x128xi1> to vector<1x128xi32>
    %1074 = arith.sitofp %1073 : vector<1x128xi32> to vector<1x128xf32>
    %cst_422 = arith.constant 1.000000e+00 : f32
    %1075 = vector.broadcast %cst_422 : f32 to vector<1x128xf32>
    %1076 = arith.cmpf oeq, %1074, %1075 : vector<1x128xf32>
    %cst_423 = arith.constant 0.000000e+00 : f32
    %1077 = vector.broadcast %cst_423 : f32 to vector<1x128xf32>
    %1078 = arith.select %1076, %1077, %1020 : vector<1x128xi1>, vector<1x128xf32>
    %1079 = arith.select %1059, %1066, %1074 : vector<1x128xf32>
    %1080 = arith.select %1059, %1062, %1078 : vector<1x128xf32>
    %cst_424 = arith.constant 0.951229453 : f32
    %1081 = vector.broadcast %cst_424 : f32 to vector<1x128xf32>
    %1082 = arith.mulf %1081, %1025 : vector<1x128xf32>
    %cst_425 = arith.constant dense<0.000000e+00> : vector<1x128xf32>
    %1083 = tpu.matmul %1079, %7, %cst_425 {dimension_numbers = #tpu.dot_dimension_numbers<[1], [0], [0], [1], [0, 0, 1, 1], [], []>} : vector<1x128xf32>, vector<128x128xf32>, vector<1x128xf32> -> vector<1x128xf32>
    %1084 = arith.addf %1082, %1083 : vector<1x128xf32>
    %1085 = arith.addf %1084, %8 : vector<1x128xf32>
    %1086 = arith.index_cast %c17_i32 : i32 to index
    %c0_426 = arith.constant 0 : index
    %1087 = vector.load %arg6[%1086, %c0_426] : memref<32x128xf32, #tpu.memory_space<vmem>>, vector<1x128xf32>
    tpu.vector_store %arg6[%1086, %c0_426], %1045 {strides = array<i32>} : memref<32x128xf32, #tpu.memory_space<vmem>>, vector<1x128xf32>,
    %1088 = arith.index_cast %c17_i32 : i32 to index
    %c0_427 = arith.constant 0 : index
    %1089 = vector.load %arg7[%1088, %c0_427] : memref<32x128xf32, #tpu.memory_space<vmem>>, vector<1x128xf32>
    tpu.vector_store %arg7[%1088, %c0_427], %1079 {strides = array<i32>} : memref<32x128xf32, #tpu.memory_space<vmem>>, vector<1x128xf32>,
    %1090 = arith.index_cast %c17_i32 : i32 to index
    %c0_428 = arith.constant 0 : index
    %1091 = vector.load %arg8[%1090, %c0_428] : memref<32x128xf32, #tpu.memory_space<vmem>>, vector<1x128xf32>
    tpu.vector_store %arg8[%1090, %c0_428], %1048 {strides = array<i32>} : memref<32x128xf32, #tpu.memory_space<vmem>>, vector<1x128xf32>,
    %1092 = arith.index_cast %c17_i32 : i32 to index
    %c0_429 = arith.constant 0 : index
    %1093 = vector.load %arg5[%1092, %c0_429] : memref<32x128xf32, #tpu.memory_space<vmem>>, vector<1x128xf32>
    tpu.vector_store %arg5[%1092, %c0_429], %1085 {strides = array<i32>} : memref<32x128xf32, #tpu.memory_space<vmem>>, vector<1x128xf32>,
    %c18_i32 = arith.constant 18 : i32
    %1094 = arith.index_cast %c18_i32 : i32 to index
    %c0_430 = arith.constant 0 : index
    %1095 = vector.load %arg1[%1094, %c0_430] : memref<32x128xf32, #tpu.memory_space<vmem>>, vector<1x128xf32>
    %cst_431 = arith.constant 0.995012462 : f32
    %1096 = vector.broadcast %cst_431 : f32 to vector<1x128xf32>
    %1097 = arith.mulf %1096, %1045 : vector<1x128xf32>
    %1098 = arith.addf %1097, %1095 : vector<1x128xf32>
    %cst_432 = arith.constant dense<0.000000e+00> : vector<1x128xf32>
    %1099 = tpu.matmul %1079, %6, %cst_432 {dimension_numbers = #tpu.dot_dimension_numbers<[1], [0], [0], [1], [0, 0, 1, 1], [], []>} : vector<1x128xf32>, vector<128x128xf32>, vector<1x128xf32> -> vector<1x128xf32>
    %1100 = arith.addf %1098, %1099 : vector<1x128xf32>
    %cst_433 = arith.constant 1.000000e+00 : f32
    %1101 = vector.broadcast %cst_433 : f32 to vector<1x128xf32>
    %1102 = arith.cmpf oeq, %1079, %1101 : vector<1x128xf32>
    %cst_434 = arith.constant 6.000000e-01 : f32
    %1103 = vector.broadcast %cst_434 : f32 to vector<1x128xf32>
    %1104 = arith.subf %1100, %1103 : vector<1x128xf32>
    %1105 = arith.select %1102, %1104, %1100 : vector<1x128xi1>, vector<1x128xf32>
    %cst_435 = arith.constant 0.995012462 : f32
    %1106 = vector.broadcast %cst_435 : f32 to vector<1x128xf32>
    %1107 = arith.mulf %1106, %1048 : vector<1x128xf32>
    %1108 = arith.addf %1107, %1079 : vector<1x128xf32>
    %cst_436 = arith.constant 2.000000e+00 : f32
    %1109 = vector.broadcast %cst_436 : f32 to vector<1x128xf32>
    %1110 = arith.cmpf olt, %1080, %1109 : vector<1x128xf32>
    %1111 = arith.andi %1110, %5 : vector<1x128xi1>
    %cst_437 = arith.constant 1.000000e+00 : f32
    %cst_438 = arith.constant 0.000000e+00 : f32
    %1112 = vector.broadcast %cst_437 : f32 to vector<1x128xf32>
    %1113 = vector.broadcast %cst_438 : f32 to vector<1x128xf32>
    %1114 = arith.select %1111, %1112, %1113 : vector<1x128xi1>, vector<1x128xf32>
    %1115 = vector.shape_cast %1114 : vector<1x128xf32> to vector<1x1x128xf32>
    %cst_439 = arith.constant dense<0xFF800000> : vector<1xf32>
    %1116 = vector.multi_reduction <maximumf>, %1115, %cst_439 [1, 2] : vector<1x1x128xf32> to vector<1xf32>
    %1117 = vector.shape_cast %1116 : vector<1xf32> to vector<1x1x1xf32>
    %1118 = vector.extract %1117[0, 0, 0] : f32 from vector<1x1x1xf32>
    %cst_440 = arith.constant 0.000000e+00 : f32
    %1119 = arith.cmpf ogt, %1118, %cst_440 : f32
    %cst_441 = arith.constant 1.000000e+00 : f32
    %1120 = vector.broadcast %cst_441 : f32 to vector<1x128xf32>
    %1121 = arith.addf %1080, %1120 : vector<1x128xf32>
    %1122 = arith.select %1111, %1121, %1080 : vector<1x128xi1>, vector<1x128xf32>
    %cst_442 = arith.constant 2.000000e+00 : f32
    %1123 = vector.broadcast %cst_442 : f32 to vector<1x128xf32>
    %1124 = arith.cmpf ogt, %1122, %1123 : vector<1x128xf32>
    %1125 = arith.extui %1124 : vector<1x128xi1> to vector<1x128xi32>
    %1126 = arith.sitofp %1125 : vector<1x128xi32> to vector<1x128xf32>
    %cst_443 = arith.constant 7.000000e-02 : f32
    %1127 = vector.broadcast %cst_443 : f32 to vector<1x128xf32>
    %1128 = arith.mulf %1127, %1108 : vector<1x128xf32>
    %cst_444 = arith.constant 6.000000e-01 : f32
    %1129 = vector.broadcast %cst_444 : f32 to vector<1x128xf32>
    %1130 = arith.addf %1129, %1128 : vector<1x128xf32>
    %1131 = arith.cmpf oge, %1105, %1130 : vector<1x128xf32>
    %1132 = arith.andi %1131, %5 : vector<1x128xi1>
    %1133 = arith.extui %1132 : vector<1x128xi1> to vector<1x128xi32>
    %1134 = arith.sitofp %1133 : vector<1x128xi32> to vector<1x128xf32>
    %cst_445 = arith.constant 1.000000e+00 : f32
    %1135 = vector.broadcast %cst_445 : f32 to vector<1x128xf32>
    %1136 = arith.cmpf oeq, %1134, %1135 : vector<1x128xf32>
    %cst_446 = arith.constant 0.000000e+00 : f32
    %1137 = vector.broadcast %cst_446 : f32 to vector<1x128xf32>
    %1138 = arith.select %1136, %1137, %1080 : vector<1x128xi1>, vector<1x128xf32>
    %1139 = arith.select %1119, %1126, %1134 : vector<1x128xf32>
    %1140 = arith.select %1119, %1122, %1138 : vector<1x128xf32>
    %cst_447 = arith.constant 0.951229453 : f32
    %1141 = vector.broadcast %cst_447 : f32 to vector<1x128xf32>
    %1142 = arith.mulf %1141, %1085 : vector<1x128xf32>
    %cst_448 = arith.constant dense<0.000000e+00> : vector<1x128xf32>
    %1143 = tpu.matmul %1139, %7, %cst_448 {dimension_numbers = #tpu.dot_dimension_numbers<[1], [0], [0], [1], [0, 0, 1, 1], [], []>} : vector<1x128xf32>, vector<128x128xf32>, vector<1x128xf32> -> vector<1x128xf32>
    %1144 = arith.addf %1142, %1143 : vector<1x128xf32>
    %1145 = arith.addf %1144, %8 : vector<1x128xf32>
    %1146 = arith.index_cast %c18_i32 : i32 to index
    %c0_449 = arith.constant 0 : index
    %1147 = vector.load %arg6[%1146, %c0_449] : memref<32x128xf32, #tpu.memory_space<vmem>>, vector<1x128xf32>
    tpu.vector_store %arg6[%1146, %c0_449], %1105 {strides = array<i32>} : memref<32x128xf32, #tpu.memory_space<vmem>>, vector<1x128xf32>,
    %1148 = arith.index_cast %c18_i32 : i32 to index
    %c0_450 = arith.constant 0 : index
    %1149 = vector.load %arg7[%1148, %c0_450] : memref<32x128xf32, #tpu.memory_space<vmem>>, vector<1x128xf32>
    tpu.vector_store %arg7[%1148, %c0_450], %1139 {strides = array<i32>} : memref<32x128xf32, #tpu.memory_space<vmem>>, vector<1x128xf32>,
    %1150 = arith.index_cast %c18_i32 : i32 to index
    %c0_451 = arith.constant 0 : index
    %1151 = vector.load %arg8[%1150, %c0_451] : memref<32x128xf32, #tpu.memory_space<vmem>>, vector<1x128xf32>
    tpu.vector_store %arg8[%1150, %c0_451], %1108 {strides = array<i32>} : memref<32x128xf32, #tpu.memory_space<vmem>>, vector<1x128xf32>,
    %1152 = arith.index_cast %c18_i32 : i32 to index
    %c0_452 = arith.constant 0 : index
    %1153 = vector.load %arg5[%1152, %c0_452] : memref<32x128xf32, #tpu.memory_space<vmem>>, vector<1x128xf32>
    tpu.vector_store %arg5[%1152, %c0_452], %1145 {strides = array<i32>} : memref<32x128xf32, #tpu.memory_space<vmem>>, vector<1x128xf32>,
    %c19_i32 = arith.constant 19 : i32
    %1154 = arith.index_cast %c19_i32 : i32 to index
    %c0_453 = arith.constant 0 : index
    %1155 = vector.load %arg1[%1154, %c0_453] : memref<32x128xf32, #tpu.memory_space<vmem>>, vector<1x128xf32>
    %cst_454 = arith.constant 0.995012462 : f32
    %1156 = vector.broadcast %cst_454 : f32 to vector<1x128xf32>
    %1157 = arith.mulf %1156, %1105 : vector<1x128xf32>
    %1158 = arith.addf %1157, %1155 : vector<1x128xf32>
    %cst_455 = arith.constant dense<0.000000e+00> : vector<1x128xf32>
    %1159 = tpu.matmul %1139, %6, %cst_455 {dimension_numbers = #tpu.dot_dimension_numbers<[1], [0], [0], [1], [0, 0, 1, 1], [], []>} : vector<1x128xf32>, vector<128x128xf32>, vector<1x128xf32> -> vector<1x128xf32>
    %1160 = arith.addf %1158, %1159 : vector<1x128xf32>
    %cst_456 = arith.constant 1.000000e+00 : f32
    %1161 = vector.broadcast %cst_456 : f32 to vector<1x128xf32>
    %1162 = arith.cmpf oeq, %1139, %1161 : vector<1x128xf32>
    %cst_457 = arith.constant 6.000000e-01 : f32
    %1163 = vector.broadcast %cst_457 : f32 to vector<1x128xf32>
    %1164 = arith.subf %1160, %1163 : vector<1x128xf32>
    %1165 = arith.select %1162, %1164, %1160 : vector<1x128xi1>, vector<1x128xf32>
    %cst_458 = arith.constant 0.995012462 : f32
    %1166 = vector.broadcast %cst_458 : f32 to vector<1x128xf32>
    %1167 = arith.mulf %1166, %1108 : vector<1x128xf32>
    %1168 = arith.addf %1167, %1139 : vector<1x128xf32>
    %cst_459 = arith.constant 2.000000e+00 : f32
    %1169 = vector.broadcast %cst_459 : f32 to vector<1x128xf32>
    %1170 = arith.cmpf olt, %1140, %1169 : vector<1x128xf32>
    %1171 = arith.andi %1170, %5 : vector<1x128xi1>
    %cst_460 = arith.constant 1.000000e+00 : f32
    %cst_461 = arith.constant 0.000000e+00 : f32
    %1172 = vector.broadcast %cst_460 : f32 to vector<1x128xf32>
    %1173 = vector.broadcast %cst_461 : f32 to vector<1x128xf32>
    %1174 = arith.select %1171, %1172, %1173 : vector<1x128xi1>, vector<1x128xf32>
    %1175 = vector.shape_cast %1174 : vector<1x128xf32> to vector<1x1x128xf32>
    %cst_462 = arith.constant dense<0xFF800000> : vector<1xf32>
    %1176 = vector.multi_reduction <maximumf>, %1175, %cst_462 [1, 2] : vector<1x1x128xf32> to vector<1xf32>
    %1177 = vector.shape_cast %1176 : vector<1xf32> to vector<1x1x1xf32>
    %1178 = vector.extract %1177[0, 0, 0] : f32 from vector<1x1x1xf32>
    %cst_463 = arith.constant 0.000000e+00 : f32
    %1179 = arith.cmpf ogt, %1178, %cst_463 : f32
    %cst_464 = arith.constant 1.000000e+00 : f32
    %1180 = vector.broadcast %cst_464 : f32 to vector<1x128xf32>
    %1181 = arith.addf %1140, %1180 : vector<1x128xf32>
    %1182 = arith.select %1171, %1181, %1140 : vector<1x128xi1>, vector<1x128xf32>
    %cst_465 = arith.constant 2.000000e+00 : f32
    %1183 = vector.broadcast %cst_465 : f32 to vector<1x128xf32>
    %1184 = arith.cmpf ogt, %1182, %1183 : vector<1x128xf32>
    %1185 = arith.extui %1184 : vector<1x128xi1> to vector<1x128xi32>
    %1186 = arith.sitofp %1185 : vector<1x128xi32> to vector<1x128xf32>
    %cst_466 = arith.constant 7.000000e-02 : f32
    %1187 = vector.broadcast %cst_466 : f32 to vector<1x128xf32>
    %1188 = arith.mulf %1187, %1168 : vector<1x128xf32>
    %cst_467 = arith.constant 6.000000e-01 : f32
    %1189 = vector.broadcast %cst_467 : f32 to vector<1x128xf32>
    %1190 = arith.addf %1189, %1188 : vector<1x128xf32>
    %1191 = arith.cmpf oge, %1165, %1190 : vector<1x128xf32>
    %1192 = arith.andi %1191, %5 : vector<1x128xi1>
    %1193 = arith.extui %1192 : vector<1x128xi1> to vector<1x128xi32>
    %1194 = arith.sitofp %1193 : vector<1x128xi32> to vector<1x128xf32>
    %cst_468 = arith.constant 1.000000e+00 : f32
    %1195 = vector.broadcast %cst_468 : f32 to vector<1x128xf32>
    %1196 = arith.cmpf oeq, %1194, %1195 : vector<1x128xf32>
    %cst_469 = arith.constant 0.000000e+00 : f32
    %1197 = vector.broadcast %cst_469 : f32 to vector<1x128xf32>
    %1198 = arith.select %1196, %1197, %1140 : vector<1x128xi1>, vector<1x128xf32>
    %1199 = arith.select %1179, %1186, %1194 : vector<1x128xf32>
    %1200 = arith.select %1179, %1182, %1198 : vector<1x128xf32>
    %cst_470 = arith.constant 0.951229453 : f32
    %1201 = vector.broadcast %cst_470 : f32 to vector<1x128xf32>
    %1202 = arith.mulf %1201, %1145 : vector<1x128xf32>
    %cst_471 = arith.constant dense<0.000000e+00> : vector<1x128xf32>
    %1203 = tpu.matmul %1199, %7, %cst_471 {dimension_numbers = #tpu.dot_dimension_numbers<[1], [0], [0], [1], [0, 0, 1, 1], [], []>} : vector<1x128xf32>, vector<128x128xf32>, vector<1x128xf32> -> vector<1x128xf32>
    %1204 = arith.addf %1202, %1203 : vector<1x128xf32>
    %1205 = arith.addf %1204, %8 : vector<1x128xf32>
    %1206 = arith.index_cast %c19_i32 : i32 to index
    %c0_472 = arith.constant 0 : index
    %1207 = vector.load %arg6[%1206, %c0_472] : memref<32x128xf32, #tpu.memory_space<vmem>>, vector<1x128xf32>
    tpu.vector_store %arg6[%1206, %c0_472], %1165 {strides = array<i32>} : memref<32x128xf32, #tpu.memory_space<vmem>>, vector<1x128xf32>,
    %1208 = arith.index_cast %c19_i32 : i32 to index
    %c0_473 = arith.constant 0 : index
    %1209 = vector.load %arg7[%1208, %c0_473] : memref<32x128xf32, #tpu.memory_space<vmem>>, vector<1x128xf32>
    tpu.vector_store %arg7[%1208, %c0_473], %1199 {strides = array<i32>} : memref<32x128xf32, #tpu.memory_space<vmem>>, vector<1x128xf32>,
    %1210 = arith.index_cast %c19_i32 : i32 to index
    %c0_474 = arith.constant 0 : index
    %1211 = vector.load %arg8[%1210, %c0_474] : memref<32x128xf32, #tpu.memory_space<vmem>>, vector<1x128xf32>
    tpu.vector_store %arg8[%1210, %c0_474], %1168 {strides = array<i32>} : memref<32x128xf32, #tpu.memory_space<vmem>>, vector<1x128xf32>,
    %1212 = arith.index_cast %c19_i32 : i32 to index
    %c0_475 = arith.constant 0 : index
    %1213 = vector.load %arg5[%1212, %c0_475] : memref<32x128xf32, #tpu.memory_space<vmem>>, vector<1x128xf32>
    tpu.vector_store %arg5[%1212, %c0_475], %1205 {strides = array<i32>} : memref<32x128xf32, #tpu.memory_space<vmem>>, vector<1x128xf32>,
    %c20_i32 = arith.constant 20 : i32
    %1214 = arith.index_cast %c20_i32 : i32 to index
    %c0_476 = arith.constant 0 : index
    %1215 = vector.load %arg1[%1214, %c0_476] : memref<32x128xf32, #tpu.memory_space<vmem>>, vector<1x128xf32>
    %cst_477 = arith.constant 0.995012462 : f32
    %1216 = vector.broadcast %cst_477 : f32 to vector<1x128xf32>
    %1217 = arith.mulf %1216, %1165 : vector<1x128xf32>
    %1218 = arith.addf %1217, %1215 : vector<1x128xf32>
    %cst_478 = arith.constant dense<0.000000e+00> : vector<1x128xf32>
    %1219 = tpu.matmul %1199, %6, %cst_478 {dimension_numbers = #tpu.dot_dimension_numbers<[1], [0], [0], [1], [0, 0, 1, 1], [], []>} : vector<1x128xf32>, vector<128x128xf32>, vector<1x128xf32> -> vector<1x128xf32>
    %1220 = arith.addf %1218, %1219 : vector<1x128xf32>
    %cst_479 = arith.constant 1.000000e+00 : f32
    %1221 = vector.broadcast %cst_479 : f32 to vector<1x128xf32>
    %1222 = arith.cmpf oeq, %1199, %1221 : vector<1x128xf32>
    %cst_480 = arith.constant 6.000000e-01 : f32
    %1223 = vector.broadcast %cst_480 : f32 to vector<1x128xf32>
    %1224 = arith.subf %1220, %1223 : vector<1x128xf32>
    %1225 = arith.select %1222, %1224, %1220 : vector<1x128xi1>, vector<1x128xf32>
    %cst_481 = arith.constant 0.995012462 : f32
    %1226 = vector.broadcast %cst_481 : f32 to vector<1x128xf32>
    %1227 = arith.mulf %1226, %1168 : vector<1x128xf32>
    %1228 = arith.addf %1227, %1199 : vector<1x128xf32>
    %cst_482 = arith.constant 2.000000e+00 : f32
    %1229 = vector.broadcast %cst_482 : f32 to vector<1x128xf32>
    %1230 = arith.cmpf olt, %1200, %1229 : vector<1x128xf32>
    %1231 = arith.andi %1230, %5 : vector<1x128xi1>
    %cst_483 = arith.constant 1.000000e+00 : f32
    %cst_484 = arith.constant 0.000000e+00 : f32
    %1232 = vector.broadcast %cst_483 : f32 to vector<1x128xf32>
    %1233 = vector.broadcast %cst_484 : f32 to vector<1x128xf32>
    %1234 = arith.select %1231, %1232, %1233 : vector<1x128xi1>, vector<1x128xf32>
    %1235 = vector.shape_cast %1234 : vector<1x128xf32> to vector<1x1x128xf32>
    %cst_485 = arith.constant dense<0xFF800000> : vector<1xf32>
    %1236 = vector.multi_reduction <maximumf>, %1235, %cst_485 [1, 2] : vector<1x1x128xf32> to vector<1xf32>
    %1237 = vector.shape_cast %1236 : vector<1xf32> to vector<1x1x1xf32>
    %1238 = vector.extract %1237[0, 0, 0] : f32 from vector<1x1x1xf32>
    %cst_486 = arith.constant 0.000000e+00 : f32
    %1239 = arith.cmpf ogt, %1238, %cst_486 : f32
    %cst_487 = arith.constant 1.000000e+00 : f32
    %1240 = vector.broadcast %cst_487 : f32 to vector<1x128xf32>
    %1241 = arith.addf %1200, %1240 : vector<1x128xf32>
    %1242 = arith.select %1231, %1241, %1200 : vector<1x128xi1>, vector<1x128xf32>
    %cst_488 = arith.constant 2.000000e+00 : f32
    %1243 = vector.broadcast %cst_488 : f32 to vector<1x128xf32>
    %1244 = arith.cmpf ogt, %1242, %1243 : vector<1x128xf32>
    %1245 = arith.extui %1244 : vector<1x128xi1> to vector<1x128xi32>
    %1246 = arith.sitofp %1245 : vector<1x128xi32> to vector<1x128xf32>
    %cst_489 = arith.constant 7.000000e-02 : f32
    %1247 = vector.broadcast %cst_489 : f32 to vector<1x128xf32>
    %1248 = arith.mulf %1247, %1228 : vector<1x128xf32>
    %cst_490 = arith.constant 6.000000e-01 : f32
    %1249 = vector.broadcast %cst_490 : f32 to vector<1x128xf32>
    %1250 = arith.addf %1249, %1248 : vector<1x128xf32>
    %1251 = arith.cmpf oge, %1225, %1250 : vector<1x128xf32>
    %1252 = arith.andi %1251, %5 : vector<1x128xi1>
    %1253 = arith.extui %1252 : vector<1x128xi1> to vector<1x128xi32>
    %1254 = arith.sitofp %1253 : vector<1x128xi32> to vector<1x128xf32>
    %cst_491 = arith.constant 1.000000e+00 : f32
    %1255 = vector.broadcast %cst_491 : f32 to vector<1x128xf32>
    %1256 = arith.cmpf oeq, %1254, %1255 : vector<1x128xf32>
    %cst_492 = arith.constant 0.000000e+00 : f32
    %1257 = vector.broadcast %cst_492 : f32 to vector<1x128xf32>
    %1258 = arith.select %1256, %1257, %1200 : vector<1x128xi1>, vector<1x128xf32>
    %1259 = arith.select %1239, %1246, %1254 : vector<1x128xf32>
    %1260 = arith.select %1239, %1242, %1258 : vector<1x128xf32>
    %cst_493 = arith.constant 0.951229453 : f32
    %1261 = vector.broadcast %cst_493 : f32 to vector<1x128xf32>
    %1262 = arith.mulf %1261, %1205 : vector<1x128xf32>
    %cst_494 = arith.constant dense<0.000000e+00> : vector<1x128xf32>
    %1263 = tpu.matmul %1259, %7, %cst_494 {dimension_numbers = #tpu.dot_dimension_numbers<[1], [0], [0], [1], [0, 0, 1, 1], [], []>} : vector<1x128xf32>, vector<128x128xf32>, vector<1x128xf32> -> vector<1x128xf32>
    %1264 = arith.addf %1262, %1263 : vector<1x128xf32>
    %1265 = arith.addf %1264, %8 : vector<1x128xf32>
    %1266 = arith.index_cast %c20_i32 : i32 to index
    %c0_495 = arith.constant 0 : index
    %1267 = vector.load %arg6[%1266, %c0_495] : memref<32x128xf32, #tpu.memory_space<vmem>>, vector<1x128xf32>
    tpu.vector_store %arg6[%1266, %c0_495], %1225 {strides = array<i32>} : memref<32x128xf32, #tpu.memory_space<vmem>>, vector<1x128xf32>,
    %1268 = arith.index_cast %c20_i32 : i32 to index
    %c0_496 = arith.constant 0 : index
    %1269 = vector.load %arg7[%1268, %c0_496] : memref<32x128xf32, #tpu.memory_space<vmem>>, vector<1x128xf32>
    tpu.vector_store %arg7[%1268, %c0_496], %1259 {strides = array<i32>} : memref<32x128xf32, #tpu.memory_space<vmem>>, vector<1x128xf32>,
    %1270 = arith.index_cast %c20_i32 : i32 to index
    %c0_497 = arith.constant 0 : index
    %1271 = vector.load %arg8[%1270, %c0_497] : memref<32x128xf32, #tpu.memory_space<vmem>>, vector<1x128xf32>
    tpu.vector_store %arg8[%1270, %c0_497], %1228 {strides = array<i32>} : memref<32x128xf32, #tpu.memory_space<vmem>>, vector<1x128xf32>,
    %1272 = arith.index_cast %c20_i32 : i32 to index
    %c0_498 = arith.constant 0 : index
    %1273 = vector.load %arg5[%1272, %c0_498] : memref<32x128xf32, #tpu.memory_space<vmem>>, vector<1x128xf32>
    tpu.vector_store %arg5[%1272, %c0_498], %1265 {strides = array<i32>} : memref<32x128xf32, #tpu.memory_space<vmem>>, vector<1x128xf32>,
    %c21_i32 = arith.constant 21 : i32
    %1274 = arith.index_cast %c21_i32 : i32 to index
    %c0_499 = arith.constant 0 : index
    %1275 = vector.load %arg1[%1274, %c0_499] : memref<32x128xf32, #tpu.memory_space<vmem>>, vector<1x128xf32>
    %cst_500 = arith.constant 0.995012462 : f32
    %1276 = vector.broadcast %cst_500 : f32 to vector<1x128xf32>
    %1277 = arith.mulf %1276, %1225 : vector<1x128xf32>
    %1278 = arith.addf %1277, %1275 : vector<1x128xf32>
    %cst_501 = arith.constant dense<0.000000e+00> : vector<1x128xf32>
    %1279 = tpu.matmul %1259, %6, %cst_501 {dimension_numbers = #tpu.dot_dimension_numbers<[1], [0], [0], [1], [0, 0, 1, 1], [], []>} : vector<1x128xf32>, vector<128x128xf32>, vector<1x128xf32> -> vector<1x128xf32>
    %1280 = arith.addf %1278, %1279 : vector<1x128xf32>
    %cst_502 = arith.constant 1.000000e+00 : f32
    %1281 = vector.broadcast %cst_502 : f32 to vector<1x128xf32>
    %1282 = arith.cmpf oeq, %1259, %1281 : vector<1x128xf32>
    %cst_503 = arith.constant 6.000000e-01 : f32
    %1283 = vector.broadcast %cst_503 : f32 to vector<1x128xf32>
    %1284 = arith.subf %1280, %1283 : vector<1x128xf32>
    %1285 = arith.select %1282, %1284, %1280 : vector<1x128xi1>, vector<1x128xf32>
    %cst_504 = arith.constant 0.995012462 : f32
    %1286 = vector.broadcast %cst_504 : f32 to vector<1x128xf32>
    %1287 = arith.mulf %1286, %1228 : vector<1x128xf32>
    %1288 = arith.addf %1287, %1259 : vector<1x128xf32>
    %cst_505 = arith.constant 2.000000e+00 : f32
    %1289 = vector.broadcast %cst_505 : f32 to vector<1x128xf32>
    %1290 = arith.cmpf olt, %1260, %1289 : vector<1x128xf32>
    %1291 = arith.andi %1290, %5 : vector<1x128xi1>
    %cst_506 = arith.constant 1.000000e+00 : f32
    %cst_507 = arith.constant 0.000000e+00 : f32
    %1292 = vector.broadcast %cst_506 : f32 to vector<1x128xf32>
    %1293 = vector.broadcast %cst_507 : f32 to vector<1x128xf32>
    %1294 = arith.select %1291, %1292, %1293 : vector<1x128xi1>, vector<1x128xf32>
    %1295 = vector.shape_cast %1294 : vector<1x128xf32> to vector<1x1x128xf32>
    %cst_508 = arith.constant dense<0xFF800000> : vector<1xf32>
    %1296 = vector.multi_reduction <maximumf>, %1295, %cst_508 [1, 2] : vector<1x1x128xf32> to vector<1xf32>
    %1297 = vector.shape_cast %1296 : vector<1xf32> to vector<1x1x1xf32>
    %1298 = vector.extract %1297[0, 0, 0] : f32 from vector<1x1x1xf32>
    %cst_509 = arith.constant 0.000000e+00 : f32
    %1299 = arith.cmpf ogt, %1298, %cst_509 : f32
    %cst_510 = arith.constant 1.000000e+00 : f32
    %1300 = vector.broadcast %cst_510 : f32 to vector<1x128xf32>
    %1301 = arith.addf %1260, %1300 : vector<1x128xf32>
    %1302 = arith.select %1291, %1301, %1260 : vector<1x128xi1>, vector<1x128xf32>
    %cst_511 = arith.constant 2.000000e+00 : f32
    %1303 = vector.broadcast %cst_511 : f32 to vector<1x128xf32>
    %1304 = arith.cmpf ogt, %1302, %1303 : vector<1x128xf32>
    %1305 = arith.extui %1304 : vector<1x128xi1> to vector<1x128xi32>
    %1306 = arith.sitofp %1305 : vector<1x128xi32> to vector<1x128xf32>
    %cst_512 = arith.constant 7.000000e-02 : f32
    %1307 = vector.broadcast %cst_512 : f32 to vector<1x128xf32>
    %1308 = arith.mulf %1307, %1288 : vector<1x128xf32>
    %cst_513 = arith.constant 6.000000e-01 : f32
    %1309 = vector.broadcast %cst_513 : f32 to vector<1x128xf32>
    %1310 = arith.addf %1309, %1308 : vector<1x128xf32>
    %1311 = arith.cmpf oge, %1285, %1310 : vector<1x128xf32>
    %1312 = arith.andi %1311, %5 : vector<1x128xi1>
    %1313 = arith.extui %1312 : vector<1x128xi1> to vector<1x128xi32>
    %1314 = arith.sitofp %1313 : vector<1x128xi32> to vector<1x128xf32>
    %cst_514 = arith.constant 1.000000e+00 : f32
    %1315 = vector.broadcast %cst_514 : f32 to vector<1x128xf32>
    %1316 = arith.cmpf oeq, %1314, %1315 : vector<1x128xf32>
    %cst_515 = arith.constant 0.000000e+00 : f32
    %1317 = vector.broadcast %cst_515 : f32 to vector<1x128xf32>
    %1318 = arith.select %1316, %1317, %1260 : vector<1x128xi1>, vector<1x128xf32>
    %1319 = arith.select %1299, %1306, %1314 : vector<1x128xf32>
    %1320 = arith.select %1299, %1302, %1318 : vector<1x128xf32>
    %cst_516 = arith.constant 0.951229453 : f32
    %1321 = vector.broadcast %cst_516 : f32 to vector<1x128xf32>
    %1322 = arith.mulf %1321, %1265 : vector<1x128xf32>
    %cst_517 = arith.constant dense<0.000000e+00> : vector<1x128xf32>
    %1323 = tpu.matmul %1319, %7, %cst_517 {dimension_numbers = #tpu.dot_dimension_numbers<[1], [0], [0], [1], [0, 0, 1, 1], [], []>} : vector<1x128xf32>, vector<128x128xf32>, vector<1x128xf32> -> vector<1x128xf32>
    %1324 = arith.addf %1322, %1323 : vector<1x128xf32>
    %1325 = arith.addf %1324, %8 : vector<1x128xf32>
    %1326 = arith.index_cast %c21_i32 : i32 to index
    %c0_518 = arith.constant 0 : index
    %1327 = vector.load %arg6[%1326, %c0_518] : memref<32x128xf32, #tpu.memory_space<vmem>>, vector<1x128xf32>
    tpu.vector_store %arg6[%1326, %c0_518], %1285 {strides = array<i32>} : memref<32x128xf32, #tpu.memory_space<vmem>>, vector<1x128xf32>,
    %1328 = arith.index_cast %c21_i32 : i32 to index
    %c0_519 = arith.constant 0 : index
    %1329 = vector.load %arg7[%1328, %c0_519] : memref<32x128xf32, #tpu.memory_space<vmem>>, vector<1x128xf32>
    tpu.vector_store %arg7[%1328, %c0_519], %1319 {strides = array<i32>} : memref<32x128xf32, #tpu.memory_space<vmem>>, vector<1x128xf32>,
    %1330 = arith.index_cast %c21_i32 : i32 to index
    %c0_520 = arith.constant 0 : index
    %1331 = vector.load %arg8[%1330, %c0_520] : memref<32x128xf32, #tpu.memory_space<vmem>>, vector<1x128xf32>
    tpu.vector_store %arg8[%1330, %c0_520], %1288 {strides = array<i32>} : memref<32x128xf32, #tpu.memory_space<vmem>>, vector<1x128xf32>,
    %1332 = arith.index_cast %c21_i32 : i32 to index
    %c0_521 = arith.constant 0 : index
    %1333 = vector.load %arg5[%1332, %c0_521] : memref<32x128xf32, #tpu.memory_space<vmem>>, vector<1x128xf32>
    tpu.vector_store %arg5[%1332, %c0_521], %1325 {strides = array<i32>} : memref<32x128xf32, #tpu.memory_space<vmem>>, vector<1x128xf32>,
    %c22_i32 = arith.constant 22 : i32
    %1334 = arith.index_cast %c22_i32 : i32 to index
    %c0_522 = arith.constant 0 : index
    %1335 = vector.load %arg1[%1334, %c0_522] : memref<32x128xf32, #tpu.memory_space<vmem>>, vector<1x128xf32>
    %cst_523 = arith.constant 0.995012462 : f32
    %1336 = vector.broadcast %cst_523 : f32 to vector<1x128xf32>
    %1337 = arith.mulf %1336, %1285 : vector<1x128xf32>
    %1338 = arith.addf %1337, %1335 : vector<1x128xf32>
    %cst_524 = arith.constant dense<0.000000e+00> : vector<1x128xf32>
    %1339 = tpu.matmul %1319, %6, %cst_524 {dimension_numbers = #tpu.dot_dimension_numbers<[1], [0], [0], [1], [0, 0, 1, 1], [], []>} : vector<1x128xf32>, vector<128x128xf32>, vector<1x128xf32> -> vector<1x128xf32>
    %1340 = arith.addf %1338, %1339 : vector<1x128xf32>
    %cst_525 = arith.constant 1.000000e+00 : f32
    %1341 = vector.broadcast %cst_525 : f32 to vector<1x128xf32>
    %1342 = arith.cmpf oeq, %1319, %1341 : vector<1x128xf32>
    %cst_526 = arith.constant 6.000000e-01 : f32
    %1343 = vector.broadcast %cst_526 : f32 to vector<1x128xf32>
    %1344 = arith.subf %1340, %1343 : vector<1x128xf32>
    %1345 = arith.select %1342, %1344, %1340 : vector<1x128xi1>, vector<1x128xf32>
    %cst_527 = arith.constant 0.995012462 : f32
    %1346 = vector.broadcast %cst_527 : f32 to vector<1x128xf32>
    %1347 = arith.mulf %1346, %1288 : vector<1x128xf32>
    %1348 = arith.addf %1347, %1319 : vector<1x128xf32>
    %cst_528 = arith.constant 2.000000e+00 : f32
    %1349 = vector.broadcast %cst_528 : f32 to vector<1x128xf32>
    %1350 = arith.cmpf olt, %1320, %1349 : vector<1x128xf32>
    %1351 = arith.andi %1350, %5 : vector<1x128xi1>
    %cst_529 = arith.constant 1.000000e+00 : f32
    %cst_530 = arith.constant 0.000000e+00 : f32
    %1352 = vector.broadcast %cst_529 : f32 to vector<1x128xf32>
    %1353 = vector.broadcast %cst_530 : f32 to vector<1x128xf32>
    %1354 = arith.select %1351, %1352, %1353 : vector<1x128xi1>, vector<1x128xf32>
    %1355 = vector.shape_cast %1354 : vector<1x128xf32> to vector<1x1x128xf32>
    %cst_531 = arith.constant dense<0xFF800000> : vector<1xf32>
    %1356 = vector.multi_reduction <maximumf>, %1355, %cst_531 [1, 2] : vector<1x1x128xf32> to vector<1xf32>
    %1357 = vector.shape_cast %1356 : vector<1xf32> to vector<1x1x1xf32>
    %1358 = vector.extract %1357[0, 0, 0] : f32 from vector<1x1x1xf32>
    %cst_532 = arith.constant 0.000000e+00 : f32
    %1359 = arith.cmpf ogt, %1358, %cst_532 : f32
    %cst_533 = arith.constant 1.000000e+00 : f32
    %1360 = vector.broadcast %cst_533 : f32 to vector<1x128xf32>
    %1361 = arith.addf %1320, %1360 : vector<1x128xf32>
    %1362 = arith.select %1351, %1361, %1320 : vector<1x128xi1>, vector<1x128xf32>
    %cst_534 = arith.constant 2.000000e+00 : f32
    %1363 = vector.broadcast %cst_534 : f32 to vector<1x128xf32>
    %1364 = arith.cmpf ogt, %1362, %1363 : vector<1x128xf32>
    %1365 = arith.extui %1364 : vector<1x128xi1> to vector<1x128xi32>
    %1366 = arith.sitofp %1365 : vector<1x128xi32> to vector<1x128xf32>
    %cst_535 = arith.constant 7.000000e-02 : f32
    %1367 = vector.broadcast %cst_535 : f32 to vector<1x128xf32>
    %1368 = arith.mulf %1367, %1348 : vector<1x128xf32>
    %cst_536 = arith.constant 6.000000e-01 : f32
    %1369 = vector.broadcast %cst_536 : f32 to vector<1x128xf32>
    %1370 = arith.addf %1369, %1368 : vector<1x128xf32>
    %1371 = arith.cmpf oge, %1345, %1370 : vector<1x128xf32>
    %1372 = arith.andi %1371, %5 : vector<1x128xi1>
    %1373 = arith.extui %1372 : vector<1x128xi1> to vector<1x128xi32>
    %1374 = arith.sitofp %1373 : vector<1x128xi32> to vector<1x128xf32>
    %cst_537 = arith.constant 1.000000e+00 : f32
    %1375 = vector.broadcast %cst_537 : f32 to vector<1x128xf32>
    %1376 = arith.cmpf oeq, %1374, %1375 : vector<1x128xf32>
    %cst_538 = arith.constant 0.000000e+00 : f32
    %1377 = vector.broadcast %cst_538 : f32 to vector<1x128xf32>
    %1378 = arith.select %1376, %1377, %1320 : vector<1x128xi1>, vector<1x128xf32>
    %1379 = arith.select %1359, %1366, %1374 : vector<1x128xf32>
    %1380 = arith.select %1359, %1362, %1378 : vector<1x128xf32>
    %cst_539 = arith.constant 0.951229453 : f32
    %1381 = vector.broadcast %cst_539 : f32 to vector<1x128xf32>
    %1382 = arith.mulf %1381, %1325 : vector<1x128xf32>
    %cst_540 = arith.constant dense<0.000000e+00> : vector<1x128xf32>
    %1383 = tpu.matmul %1379, %7, %cst_540 {dimension_numbers = #tpu.dot_dimension_numbers<[1], [0], [0], [1], [0, 0, 1, 1], [], []>} : vector<1x128xf32>, vector<128x128xf32>, vector<1x128xf32> -> vector<1x128xf32>
    %1384 = arith.addf %1382, %1383 : vector<1x128xf32>
    %1385 = arith.addf %1384, %8 : vector<1x128xf32>
    %1386 = arith.index_cast %c22_i32 : i32 to index
    %c0_541 = arith.constant 0 : index
    %1387 = vector.load %arg6[%1386, %c0_541] : memref<32x128xf32, #tpu.memory_space<vmem>>, vector<1x128xf32>
    tpu.vector_store %arg6[%1386, %c0_541], %1345 {strides = array<i32>} : memref<32x128xf32, #tpu.memory_space<vmem>>, vector<1x128xf32>,
    %1388 = arith.index_cast %c22_i32 : i32 to index
    %c0_542 = arith.constant 0 : index
    %1389 = vector.load %arg7[%1388, %c0_542] : memref<32x128xf32, #tpu.memory_space<vmem>>, vector<1x128xf32>
    tpu.vector_store %arg7[%1388, %c0_542], %1379 {strides = array<i32>} : memref<32x128xf32, #tpu.memory_space<vmem>>, vector<1x128xf32>,
    %1390 = arith.index_cast %c22_i32 : i32 to index
    %c0_543 = arith.constant 0 : index
    %1391 = vector.load %arg8[%1390, %c0_543] : memref<32x128xf32, #tpu.memory_space<vmem>>, vector<1x128xf32>
    tpu.vector_store %arg8[%1390, %c0_543], %1348 {strides = array<i32>} : memref<32x128xf32, #tpu.memory_space<vmem>>, vector<1x128xf32>,
    %1392 = arith.index_cast %c22_i32 : i32 to index
    %c0_544 = arith.constant 0 : index
    %1393 = vector.load %arg5[%1392, %c0_544] : memref<32x128xf32, #tpu.memory_space<vmem>>, vector<1x128xf32>
    tpu.vector_store %arg5[%1392, %c0_544], %1385 {strides = array<i32>} : memref<32x128xf32, #tpu.memory_space<vmem>>, vector<1x128xf32>,
    %c23_i32 = arith.constant 23 : i32
    %1394 = arith.index_cast %c23_i32 : i32 to index
    %c0_545 = arith.constant 0 : index
    %1395 = vector.load %arg1[%1394, %c0_545] : memref<32x128xf32, #tpu.memory_space<vmem>>, vector<1x128xf32>
    %cst_546 = arith.constant 0.995012462 : f32
    %1396 = vector.broadcast %cst_546 : f32 to vector<1x128xf32>
    %1397 = arith.mulf %1396, %1345 : vector<1x128xf32>
    %1398 = arith.addf %1397, %1395 : vector<1x128xf32>
    %cst_547 = arith.constant dense<0.000000e+00> : vector<1x128xf32>
    %1399 = tpu.matmul %1379, %6, %cst_547 {dimension_numbers = #tpu.dot_dimension_numbers<[1], [0], [0], [1], [0, 0, 1, 1], [], []>} : vector<1x128xf32>, vector<128x128xf32>, vector<1x128xf32> -> vector<1x128xf32>
    %1400 = arith.addf %1398, %1399 : vector<1x128xf32>
    %cst_548 = arith.constant 1.000000e+00 : f32
    %1401 = vector.broadcast %cst_548 : f32 to vector<1x128xf32>
    %1402 = arith.cmpf oeq, %1379, %1401 : vector<1x128xf32>
    %cst_549 = arith.constant 6.000000e-01 : f32
    %1403 = vector.broadcast %cst_549 : f32 to vector<1x128xf32>
    %1404 = arith.subf %1400, %1403 : vector<1x128xf32>
    %1405 = arith.select %1402, %1404, %1400 : vector<1x128xi1>, vector<1x128xf32>
    %cst_550 = arith.constant 0.995012462 : f32
    %1406 = vector.broadcast %cst_550 : f32 to vector<1x128xf32>
    %1407 = arith.mulf %1406, %1348 : vector<1x128xf32>
    %1408 = arith.addf %1407, %1379 : vector<1x128xf32>
    %cst_551 = arith.constant 2.000000e+00 : f32
    %1409 = vector.broadcast %cst_551 : f32 to vector<1x128xf32>
    %1410 = arith.cmpf olt, %1380, %1409 : vector<1x128xf32>
    %1411 = arith.andi %1410, %5 : vector<1x128xi1>
    %cst_552 = arith.constant 1.000000e+00 : f32
    %cst_553 = arith.constant 0.000000e+00 : f32
    %1412 = vector.broadcast %cst_552 : f32 to vector<1x128xf32>
    %1413 = vector.broadcast %cst_553 : f32 to vector<1x128xf32>
    %1414 = arith.select %1411, %1412, %1413 : vector<1x128xi1>, vector<1x128xf32>
    %1415 = vector.shape_cast %1414 : vector<1x128xf32> to vector<1x1x128xf32>
    %cst_554 = arith.constant dense<0xFF800000> : vector<1xf32>
    %1416 = vector.multi_reduction <maximumf>, %1415, %cst_554 [1, 2] : vector<1x1x128xf32> to vector<1xf32>
    %1417 = vector.shape_cast %1416 : vector<1xf32> to vector<1x1x1xf32>
    %1418 = vector.extract %1417[0, 0, 0] : f32 from vector<1x1x1xf32>
    %cst_555 = arith.constant 0.000000e+00 : f32
    %1419 = arith.cmpf ogt, %1418, %cst_555 : f32
    %cst_556 = arith.constant 1.000000e+00 : f32
    %1420 = vector.broadcast %cst_556 : f32 to vector<1x128xf32>
    %1421 = arith.addf %1380, %1420 : vector<1x128xf32>
    %1422 = arith.select %1411, %1421, %1380 : vector<1x128xi1>, vector<1x128xf32>
    %cst_557 = arith.constant 2.000000e+00 : f32
    %1423 = vector.broadcast %cst_557 : f32 to vector<1x128xf32>
    %1424 = arith.cmpf ogt, %1422, %1423 : vector<1x128xf32>
    %1425 = arith.extui %1424 : vector<1x128xi1> to vector<1x128xi32>
    %1426 = arith.sitofp %1425 : vector<1x128xi32> to vector<1x128xf32>
    %cst_558 = arith.constant 7.000000e-02 : f32
    %1427 = vector.broadcast %cst_558 : f32 to vector<1x128xf32>
    %1428 = arith.mulf %1427, %1408 : vector<1x128xf32>
    %cst_559 = arith.constant 6.000000e-01 : f32
    %1429 = vector.broadcast %cst_559 : f32 to vector<1x128xf32>
    %1430 = arith.addf %1429, %1428 : vector<1x128xf32>
    %1431 = arith.cmpf oge, %1405, %1430 : vector<1x128xf32>
    %1432 = arith.andi %1431, %5 : vector<1x128xi1>
    %1433 = arith.extui %1432 : vector<1x128xi1> to vector<1x128xi32>
    %1434 = arith.sitofp %1433 : vector<1x128xi32> to vector<1x128xf32>
    %cst_560 = arith.constant 1.000000e+00 : f32
    %1435 = vector.broadcast %cst_560 : f32 to vector<1x128xf32>
    %1436 = arith.cmpf oeq, %1434, %1435 : vector<1x128xf32>
    %cst_561 = arith.constant 0.000000e+00 : f32
    %1437 = vector.broadcast %cst_561 : f32 to vector<1x128xf32>
    %1438 = arith.select %1436, %1437, %1380 : vector<1x128xi1>, vector<1x128xf32>
    %1439 = arith.select %1419, %1426, %1434 : vector<1x128xf32>
    %1440 = arith.select %1419, %1422, %1438 : vector<1x128xf32>
    %cst_562 = arith.constant 0.951229453 : f32
    %1441 = vector.broadcast %cst_562 : f32 to vector<1x128xf32>
    %1442 = arith.mulf %1441, %1385 : vector<1x128xf32>
    %cst_563 = arith.constant dense<0.000000e+00> : vector<1x128xf32>
    %1443 = tpu.matmul %1439, %7, %cst_563 {dimension_numbers = #tpu.dot_dimension_numbers<[1], [0], [0], [1], [0, 0, 1, 1], [], []>} : vector<1x128xf32>, vector<128x128xf32>, vector<1x128xf32> -> vector<1x128xf32>
    %1444 = arith.addf %1442, %1443 : vector<1x128xf32>
    %1445 = arith.addf %1444, %8 : vector<1x128xf32>
    %1446 = arith.index_cast %c23_i32 : i32 to index
    %c0_564 = arith.constant 0 : index
    %1447 = vector.load %arg6[%1446, %c0_564] : memref<32x128xf32, #tpu.memory_space<vmem>>, vector<1x128xf32>
    tpu.vector_store %arg6[%1446, %c0_564], %1405 {strides = array<i32>} : memref<32x128xf32, #tpu.memory_space<vmem>>, vector<1x128xf32>,
    %1448 = arith.index_cast %c23_i32 : i32 to index
    %c0_565 = arith.constant 0 : index
    %1449 = vector.load %arg7[%1448, %c0_565] : memref<32x128xf32, #tpu.memory_space<vmem>>, vector<1x128xf32>
    tpu.vector_store %arg7[%1448, %c0_565], %1439 {strides = array<i32>} : memref<32x128xf32, #tpu.memory_space<vmem>>, vector<1x128xf32>,
    %1450 = arith.index_cast %c23_i32 : i32 to index
    %c0_566 = arith.constant 0 : index
    %1451 = vector.load %arg8[%1450, %c0_566] : memref<32x128xf32, #tpu.memory_space<vmem>>, vector<1x128xf32>
    tpu.vector_store %arg8[%1450, %c0_566], %1408 {strides = array<i32>} : memref<32x128xf32, #tpu.memory_space<vmem>>, vector<1x128xf32>,
    %1452 = arith.index_cast %c23_i32 : i32 to index
    %c0_567 = arith.constant 0 : index
    %1453 = vector.load %arg5[%1452, %c0_567] : memref<32x128xf32, #tpu.memory_space<vmem>>, vector<1x128xf32>
    tpu.vector_store %arg5[%1452, %c0_567], %1445 {strides = array<i32>} : memref<32x128xf32, #tpu.memory_space<vmem>>, vector<1x128xf32>,
    %c24_i32 = arith.constant 24 : i32
    %1454 = arith.index_cast %c24_i32 : i32 to index
    %c0_568 = arith.constant 0 : index
    %1455 = vector.load %arg1[%1454, %c0_568] : memref<32x128xf32, #tpu.memory_space<vmem>>, vector<1x128xf32>
    %cst_569 = arith.constant 0.995012462 : f32
    %1456 = vector.broadcast %cst_569 : f32 to vector<1x128xf32>
    %1457 = arith.mulf %1456, %1405 : vector<1x128xf32>
    %1458 = arith.addf %1457, %1455 : vector<1x128xf32>
    %cst_570 = arith.constant dense<0.000000e+00> : vector<1x128xf32>
    %1459 = tpu.matmul %1439, %6, %cst_570 {dimension_numbers = #tpu.dot_dimension_numbers<[1], [0], [0], [1], [0, 0, 1, 1], [], []>} : vector<1x128xf32>, vector<128x128xf32>, vector<1x128xf32> -> vector<1x128xf32>
    %1460 = arith.addf %1458, %1459 : vector<1x128xf32>
    %cst_571 = arith.constant 1.000000e+00 : f32
    %1461 = vector.broadcast %cst_571 : f32 to vector<1x128xf32>
    %1462 = arith.cmpf oeq, %1439, %1461 : vector<1x128xf32>
    %cst_572 = arith.constant 6.000000e-01 : f32
    %1463 = vector.broadcast %cst_572 : f32 to vector<1x128xf32>
    %1464 = arith.subf %1460, %1463 : vector<1x128xf32>
    %1465 = arith.select %1462, %1464, %1460 : vector<1x128xi1>, vector<1x128xf32>
    %cst_573 = arith.constant 0.995012462 : f32
    %1466 = vector.broadcast %cst_573 : f32 to vector<1x128xf32>
    %1467 = arith.mulf %1466, %1408 : vector<1x128xf32>
    %1468 = arith.addf %1467, %1439 : vector<1x128xf32>
    %cst_574 = arith.constant 2.000000e+00 : f32
    %1469 = vector.broadcast %cst_574 : f32 to vector<1x128xf32>
    %1470 = arith.cmpf olt, %1440, %1469 : vector<1x128xf32>
    %1471 = arith.andi %1470, %5 : vector<1x128xi1>
    %cst_575 = arith.constant 1.000000e+00 : f32
    %cst_576 = arith.constant 0.000000e+00 : f32
    %1472 = vector.broadcast %cst_575 : f32 to vector<1x128xf32>
    %1473 = vector.broadcast %cst_576 : f32 to vector<1x128xf32>
    %1474 = arith.select %1471, %1472, %1473 : vector<1x128xi1>, vector<1x128xf32>
    %1475 = vector.shape_cast %1474 : vector<1x128xf32> to vector<1x1x128xf32>
    %cst_577 = arith.constant dense<0xFF800000> : vector<1xf32>
    %1476 = vector.multi_reduction <maximumf>, %1475, %cst_577 [1, 2] : vector<1x1x128xf32> to vector<1xf32>
    %1477 = vector.shape_cast %1476 : vector<1xf32> to vector<1x1x1xf32>
    %1478 = vector.extract %1477[0, 0, 0] : f32 from vector<1x1x1xf32>
    %cst_578 = arith.constant 0.000000e+00 : f32
    %1479 = arith.cmpf ogt, %1478, %cst_578 : f32
    %cst_579 = arith.constant 1.000000e+00 : f32
    %1480 = vector.broadcast %cst_579 : f32 to vector<1x128xf32>
    %1481 = arith.addf %1440, %1480 : vector<1x128xf32>
    %1482 = arith.select %1471, %1481, %1440 : vector<1x128xi1>, vector<1x128xf32>
    %cst_580 = arith.constant 2.000000e+00 : f32
    %1483 = vector.broadcast %cst_580 : f32 to vector<1x128xf32>
    %1484 = arith.cmpf ogt, %1482, %1483 : vector<1x128xf32>
    %1485 = arith.extui %1484 : vector<1x128xi1> to vector<1x128xi32>
    %1486 = arith.sitofp %1485 : vector<1x128xi32> to vector<1x128xf32>
    %cst_581 = arith.constant 7.000000e-02 : f32
    %1487 = vector.broadcast %cst_581 : f32 to vector<1x128xf32>
    %1488 = arith.mulf %1487, %1468 : vector<1x128xf32>
    %cst_582 = arith.constant 6.000000e-01 : f32
    %1489 = vector.broadcast %cst_582 : f32 to vector<1x128xf32>
    %1490 = arith.addf %1489, %1488 : vector<1x128xf32>
    %1491 = arith.cmpf oge, %1465, %1490 : vector<1x128xf32>
    %1492 = arith.andi %1491, %5 : vector<1x128xi1>
    %1493 = arith.extui %1492 : vector<1x128xi1> to vector<1x128xi32>
    %1494 = arith.sitofp %1493 : vector<1x128xi32> to vector<1x128xf32>
    %cst_583 = arith.constant 1.000000e+00 : f32
    %1495 = vector.broadcast %cst_583 : f32 to vector<1x128xf32>
    %1496 = arith.cmpf oeq, %1494, %1495 : vector<1x128xf32>
    %cst_584 = arith.constant 0.000000e+00 : f32
    %1497 = vector.broadcast %cst_584 : f32 to vector<1x128xf32>
    %1498 = arith.select %1496, %1497, %1440 : vector<1x128xi1>, vector<1x128xf32>
    %1499 = arith.select %1479, %1486, %1494 : vector<1x128xf32>
    %1500 = arith.select %1479, %1482, %1498 : vector<1x128xf32>
    %cst_585 = arith.constant 0.951229453 : f32
    %1501 = vector.broadcast %cst_585 : f32 to vector<1x128xf32>
    %1502 = arith.mulf %1501, %1445 : vector<1x128xf32>
    %cst_586 = arith.constant dense<0.000000e+00> : vector<1x128xf32>
    %1503 = tpu.matmul %1499, %7, %cst_586 {dimension_numbers = #tpu.dot_dimension_numbers<[1], [0], [0], [1], [0, 0, 1, 1], [], []>} : vector<1x128xf32>, vector<128x128xf32>, vector<1x128xf32> -> vector<1x128xf32>
    %1504 = arith.addf %1502, %1503 : vector<1x128xf32>
    %1505 = arith.addf %1504, %8 : vector<1x128xf32>
    %1506 = arith.index_cast %c24_i32 : i32 to index
    %c0_587 = arith.constant 0 : index
    %1507 = vector.load %arg6[%1506, %c0_587] : memref<32x128xf32, #tpu.memory_space<vmem>>, vector<1x128xf32>
    tpu.vector_store %arg6[%1506, %c0_587], %1465 {strides = array<i32>} : memref<32x128xf32, #tpu.memory_space<vmem>>, vector<1x128xf32>,
    %1508 = arith.index_cast %c24_i32 : i32 to index
    %c0_588 = arith.constant 0 : index
    %1509 = vector.load %arg7[%1508, %c0_588] : memref<32x128xf32, #tpu.memory_space<vmem>>, vector<1x128xf32>
    tpu.vector_store %arg7[%1508, %c0_588], %1499 {strides = array<i32>} : memref<32x128xf32, #tpu.memory_space<vmem>>, vector<1x128xf32>,
    %1510 = arith.index_cast %c24_i32 : i32 to index
    %c0_589 = arith.constant 0 : index
    %1511 = vector.load %arg8[%1510, %c0_589] : memref<32x128xf32, #tpu.memory_space<vmem>>, vector<1x128xf32>
    tpu.vector_store %arg8[%1510, %c0_589], %1468 {strides = array<i32>} : memref<32x128xf32, #tpu.memory_space<vmem>>, vector<1x128xf32>,
    %1512 = arith.index_cast %c24_i32 : i32 to index
    %c0_590 = arith.constant 0 : index
    %1513 = vector.load %arg5[%1512, %c0_590] : memref<32x128xf32, #tpu.memory_space<vmem>>, vector<1x128xf32>
    tpu.vector_store %arg5[%1512, %c0_590], %1505 {strides = array<i32>} : memref<32x128xf32, #tpu.memory_space<vmem>>, vector<1x128xf32>,
    %c25_i32 = arith.constant 25 : i32
    %1514 = arith.index_cast %c25_i32 : i32 to index
    %c0_591 = arith.constant 0 : index
    %1515 = vector.load %arg1[%1514, %c0_591] : memref<32x128xf32, #tpu.memory_space<vmem>>, vector<1x128xf32>
    %cst_592 = arith.constant 0.995012462 : f32
    %1516 = vector.broadcast %cst_592 : f32 to vector<1x128xf32>
    %1517 = arith.mulf %1516, %1465 : vector<1x128xf32>
    %1518 = arith.addf %1517, %1515 : vector<1x128xf32>
    %cst_593 = arith.constant dense<0.000000e+00> : vector<1x128xf32>
    %1519 = tpu.matmul %1499, %6, %cst_593 {dimension_numbers = #tpu.dot_dimension_numbers<[1], [0], [0], [1], [0, 0, 1, 1], [], []>} : vector<1x128xf32>, vector<128x128xf32>, vector<1x128xf32> -> vector<1x128xf32>
    %1520 = arith.addf %1518, %1519 : vector<1x128xf32>
    %cst_594 = arith.constant 1.000000e+00 : f32
    %1521 = vector.broadcast %cst_594 : f32 to vector<1x128xf32>
    %1522 = arith.cmpf oeq, %1499, %1521 : vector<1x128xf32>
    %cst_595 = arith.constant 6.000000e-01 : f32
    %1523 = vector.broadcast %cst_595 : f32 to vector<1x128xf32>
    %1524 = arith.subf %1520, %1523 : vector<1x128xf32>
    %1525 = arith.select %1522, %1524, %1520 : vector<1x128xi1>, vector<1x128xf32>
    %cst_596 = arith.constant 0.995012462 : f32
    %1526 = vector.broadcast %cst_596 : f32 to vector<1x128xf32>
    %1527 = arith.mulf %1526, %1468 : vector<1x128xf32>
    %1528 = arith.addf %1527, %1499 : vector<1x128xf32>
    %cst_597 = arith.constant 2.000000e+00 : f32
    %1529 = vector.broadcast %cst_597 : f32 to vector<1x128xf32>
    %1530 = arith.cmpf olt, %1500, %1529 : vector<1x128xf32>
    %1531 = arith.andi %1530, %5 : vector<1x128xi1>
    %cst_598 = arith.constant 1.000000e+00 : f32
    %cst_599 = arith.constant 0.000000e+00 : f32
    %1532 = vector.broadcast %cst_598 : f32 to vector<1x128xf32>
    %1533 = vector.broadcast %cst_599 : f32 to vector<1x128xf32>
    %1534 = arith.select %1531, %1532, %1533 : vector<1x128xi1>, vector<1x128xf32>
    %1535 = vector.shape_cast %1534 : vector<1x128xf32> to vector<1x1x128xf32>
    %cst_600 = arith.constant dense<0xFF800000> : vector<1xf32>
    %1536 = vector.multi_reduction <maximumf>, %1535, %cst_600 [1, 2] : vector<1x1x128xf32> to vector<1xf32>
    %1537 = vector.shape_cast %1536 : vector<1xf32> to vector<1x1x1xf32>
    %1538 = vector.extract %1537[0, 0, 0] : f32 from vector<1x1x1xf32>
    %cst_601 = arith.constant 0.000000e+00 : f32
    %1539 = arith.cmpf ogt, %1538, %cst_601 : f32
    %cst_602 = arith.constant 1.000000e+00 : f32
    %1540 = vector.broadcast %cst_602 : f32 to vector<1x128xf32>
    %1541 = arith.addf %1500, %1540 : vector<1x128xf32>
    %1542 = arith.select %1531, %1541, %1500 : vector<1x128xi1>, vector<1x128xf32>
    %cst_603 = arith.constant 2.000000e+00 : f32
    %1543 = vector.broadcast %cst_603 : f32 to vector<1x128xf32>
    %1544 = arith.cmpf ogt, %1542, %1543 : vector<1x128xf32>
    %1545 = arith.extui %1544 : vector<1x128xi1> to vector<1x128xi32>
    %1546 = arith.sitofp %1545 : vector<1x128xi32> to vector<1x128xf32>
    %cst_604 = arith.constant 7.000000e-02 : f32
    %1547 = vector.broadcast %cst_604 : f32 to vector<1x128xf32>
    %1548 = arith.mulf %1547, %1528 : vector<1x128xf32>
    %cst_605 = arith.constant 6.000000e-01 : f32
    %1549 = vector.broadcast %cst_605 : f32 to vector<1x128xf32>
    %1550 = arith.addf %1549, %1548 : vector<1x128xf32>
    %1551 = arith.cmpf oge, %1525, %1550 : vector<1x128xf32>
    %1552 = arith.andi %1551, %5 : vector<1x128xi1>
    %1553 = arith.extui %1552 : vector<1x128xi1> to vector<1x128xi32>
    %1554 = arith.sitofp %1553 : vector<1x128xi32> to vector<1x128xf32>
    %cst_606 = arith.constant 1.000000e+00 : f32
    %1555 = vector.broadcast %cst_606 : f32 to vector<1x128xf32>
    %1556 = arith.cmpf oeq, %1554, %1555 : vector<1x128xf32>
    %cst_607 = arith.constant 0.000000e+00 : f32
    %1557 = vector.broadcast %cst_607 : f32 to vector<1x128xf32>
    %1558 = arith.select %1556, %1557, %1500 : vector<1x128xi1>, vector<1x128xf32>
    %1559 = arith.select %1539, %1546, %1554 : vector<1x128xf32>
    %1560 = arith.select %1539, %1542, %1558 : vector<1x128xf32>
    %cst_608 = arith.constant 0.951229453 : f32
    %1561 = vector.broadcast %cst_608 : f32 to vector<1x128xf32>
    %1562 = arith.mulf %1561, %1505 : vector<1x128xf32>
    %cst_609 = arith.constant dense<0.000000e+00> : vector<1x128xf32>
    %1563 = tpu.matmul %1559, %7, %cst_609 {dimension_numbers = #tpu.dot_dimension_numbers<[1], [0], [0], [1], [0, 0, 1, 1], [], []>} : vector<1x128xf32>, vector<128x128xf32>, vector<1x128xf32> -> vector<1x128xf32>
    %1564 = arith.addf %1562, %1563 : vector<1x128xf32>
    %1565 = arith.addf %1564, %8 : vector<1x128xf32>
    %1566 = arith.index_cast %c25_i32 : i32 to index
    %c0_610 = arith.constant 0 : index
    %1567 = vector.load %arg6[%1566, %c0_610] : memref<32x128xf32, #tpu.memory_space<vmem>>, vector<1x128xf32>
    tpu.vector_store %arg6[%1566, %c0_610], %1525 {strides = array<i32>} : memref<32x128xf32, #tpu.memory_space<vmem>>, vector<1x128xf32>,
    %1568 = arith.index_cast %c25_i32 : i32 to index
    %c0_611 = arith.constant 0 : index
    %1569 = vector.load %arg7[%1568, %c0_611] : memref<32x128xf32, #tpu.memory_space<vmem>>, vector<1x128xf32>
    tpu.vector_store %arg7[%1568, %c0_611], %1559 {strides = array<i32>} : memref<32x128xf32, #tpu.memory_space<vmem>>, vector<1x128xf32>,
    %1570 = arith.index_cast %c25_i32 : i32 to index
    %c0_612 = arith.constant 0 : index
    %1571 = vector.load %arg8[%1570, %c0_612] : memref<32x128xf32, #tpu.memory_space<vmem>>, vector<1x128xf32>
    tpu.vector_store %arg8[%1570, %c0_612], %1528 {strides = array<i32>} : memref<32x128xf32, #tpu.memory_space<vmem>>, vector<1x128xf32>,
    %1572 = arith.index_cast %c25_i32 : i32 to index
    %c0_613 = arith.constant 0 : index
    %1573 = vector.load %arg5[%1572, %c0_613] : memref<32x128xf32, #tpu.memory_space<vmem>>, vector<1x128xf32>
    tpu.vector_store %arg5[%1572, %c0_613], %1565 {strides = array<i32>} : memref<32x128xf32, #tpu.memory_space<vmem>>, vector<1x128xf32>,
    %c26_i32 = arith.constant 26 : i32
    %1574 = arith.index_cast %c26_i32 : i32 to index
    %c0_614 = arith.constant 0 : index
    %1575 = vector.load %arg1[%1574, %c0_614] : memref<32x128xf32, #tpu.memory_space<vmem>>, vector<1x128xf32>
    %cst_615 = arith.constant 0.995012462 : f32
    %1576 = vector.broadcast %cst_615 : f32 to vector<1x128xf32>
    %1577 = arith.mulf %1576, %1525 : vector<1x128xf32>
    %1578 = arith.addf %1577, %1575 : vector<1x128xf32>
    %cst_616 = arith.constant dense<0.000000e+00> : vector<1x128xf32>
    %1579 = tpu.matmul %1559, %6, %cst_616 {dimension_numbers = #tpu.dot_dimension_numbers<[1], [0], [0], [1], [0, 0, 1, 1], [], []>} : vector<1x128xf32>, vector<128x128xf32>, vector<1x128xf32> -> vector<1x128xf32>
    %1580 = arith.addf %1578, %1579 : vector<1x128xf32>
    %cst_617 = arith.constant 1.000000e+00 : f32
    %1581 = vector.broadcast %cst_617 : f32 to vector<1x128xf32>
    %1582 = arith.cmpf oeq, %1559, %1581 : vector<1x128xf32>
    %cst_618 = arith.constant 6.000000e-01 : f32
    %1583 = vector.broadcast %cst_618 : f32 to vector<1x128xf32>
    %1584 = arith.subf %1580, %1583 : vector<1x128xf32>
    %1585 = arith.select %1582, %1584, %1580 : vector<1x128xi1>, vector<1x128xf32>
    %cst_619 = arith.constant 0.995012462 : f32
    %1586 = vector.broadcast %cst_619 : f32 to vector<1x128xf32>
    %1587 = arith.mulf %1586, %1528 : vector<1x128xf32>
    %1588 = arith.addf %1587, %1559 : vector<1x128xf32>
    %cst_620 = arith.constant 2.000000e+00 : f32
    %1589 = vector.broadcast %cst_620 : f32 to vector<1x128xf32>
    %1590 = arith.cmpf olt, %1560, %1589 : vector<1x128xf32>
    %1591 = arith.andi %1590, %5 : vector<1x128xi1>
    %cst_621 = arith.constant 1.000000e+00 : f32
    %cst_622 = arith.constant 0.000000e+00 : f32
    %1592 = vector.broadcast %cst_621 : f32 to vector<1x128xf32>
    %1593 = vector.broadcast %cst_622 : f32 to vector<1x128xf32>
    %1594 = arith.select %1591, %1592, %1593 : vector<1x128xi1>, vector<1x128xf32>
    %1595 = vector.shape_cast %1594 : vector<1x128xf32> to vector<1x1x128xf32>
    %cst_623 = arith.constant dense<0xFF800000> : vector<1xf32>
    %1596 = vector.multi_reduction <maximumf>, %1595, %cst_623 [1, 2] : vector<1x1x128xf32> to vector<1xf32>
    %1597 = vector.shape_cast %1596 : vector<1xf32> to vector<1x1x1xf32>
    %1598 = vector.extract %1597[0, 0, 0] : f32 from vector<1x1x1xf32>
    %cst_624 = arith.constant 0.000000e+00 : f32
    %1599 = arith.cmpf ogt, %1598, %cst_624 : f32
    %cst_625 = arith.constant 1.000000e+00 : f32
    %1600 = vector.broadcast %cst_625 : f32 to vector<1x128xf32>
    %1601 = arith.addf %1560, %1600 : vector<1x128xf32>
    %1602 = arith.select %1591, %1601, %1560 : vector<1x128xi1>, vector<1x128xf32>
    %cst_626 = arith.constant 2.000000e+00 : f32
    %1603 = vector.broadcast %cst_626 : f32 to vector<1x128xf32>
    %1604 = arith.cmpf ogt, %1602, %1603 : vector<1x128xf32>
    %1605 = arith.extui %1604 : vector<1x128xi1> to vector<1x128xi32>
    %1606 = arith.sitofp %1605 : vector<1x128xi32> to vector<1x128xf32>
    %cst_627 = arith.constant 7.000000e-02 : f32
    %1607 = vector.broadcast %cst_627 : f32 to vector<1x128xf32>
    %1608 = arith.mulf %1607, %1588 : vector<1x128xf32>
    %cst_628 = arith.constant 6.000000e-01 : f32
    %1609 = vector.broadcast %cst_628 : f32 to vector<1x128xf32>
    %1610 = arith.addf %1609, %1608 : vector<1x128xf32>
    %1611 = arith.cmpf oge, %1585, %1610 : vector<1x128xf32>
    %1612 = arith.andi %1611, %5 : vector<1x128xi1>
    %1613 = arith.extui %1612 : vector<1x128xi1> to vector<1x128xi32>
    %1614 = arith.sitofp %1613 : vector<1x128xi32> to vector<1x128xf32>
    %cst_629 = arith.constant 1.000000e+00 : f32
    %1615 = vector.broadcast %cst_629 : f32 to vector<1x128xf32>
    %1616 = arith.cmpf oeq, %1614, %1615 : vector<1x128xf32>
    %cst_630 = arith.constant 0.000000e+00 : f32
    %1617 = vector.broadcast %cst_630 : f32 to vector<1x128xf32>
    %1618 = arith.select %1616, %1617, %1560 : vector<1x128xi1>, vector<1x128xf32>
    %1619 = arith.select %1599, %1606, %1614 : vector<1x128xf32>
    %1620 = arith.select %1599, %1602, %1618 : vector<1x128xf32>
    %cst_631 = arith.constant 0.951229453 : f32
    %1621 = vector.broadcast %cst_631 : f32 to vector<1x128xf32>
    %1622 = arith.mulf %1621, %1565 : vector<1x128xf32>
    %cst_632 = arith.constant dense<0.000000e+00> : vector<1x128xf32>
    %1623 = tpu.matmul %1619, %7, %cst_632 {dimension_numbers = #tpu.dot_dimension_numbers<[1], [0], [0], [1], [0, 0, 1, 1], [], []>} : vector<1x128xf32>, vector<128x128xf32>, vector<1x128xf32> -> vector<1x128xf32>
    %1624 = arith.addf %1622, %1623 : vector<1x128xf32>
    %1625 = arith.addf %1624, %8 : vector<1x128xf32>
    %1626 = arith.index_cast %c26_i32 : i32 to index
    %c0_633 = arith.constant 0 : index
    %1627 = vector.load %arg6[%1626, %c0_633] : memref<32x128xf32, #tpu.memory_space<vmem>>, vector<1x128xf32>
    tpu.vector_store %arg6[%1626, %c0_633], %1585 {strides = array<i32>} : memref<32x128xf32, #tpu.memory_space<vmem>>, vector<1x128xf32>,
    %1628 = arith.index_cast %c26_i32 : i32 to index
    %c0_634 = arith.constant 0 : index
    %1629 = vector.load %arg7[%1628, %c0_634] : memref<32x128xf32, #tpu.memory_space<vmem>>, vector<1x128xf32>
    tpu.vector_store %arg7[%1628, %c0_634], %1619 {strides = array<i32>} : memref<32x128xf32, #tpu.memory_space<vmem>>, vector<1x128xf32>,
    %1630 = arith.index_cast %c26_i32 : i32 to index
    %c0_635 = arith.constant 0 : index
    %1631 = vector.load %arg8[%1630, %c0_635] : memref<32x128xf32, #tpu.memory_space<vmem>>, vector<1x128xf32>
    tpu.vector_store %arg8[%1630, %c0_635], %1588 {strides = array<i32>} : memref<32x128xf32, #tpu.memory_space<vmem>>, vector<1x128xf32>,
    %1632 = arith.index_cast %c26_i32 : i32 to index
    %c0_636 = arith.constant 0 : index
    %1633 = vector.load %arg5[%1632, %c0_636] : memref<32x128xf32, #tpu.memory_space<vmem>>, vector<1x128xf32>
    tpu.vector_store %arg5[%1632, %c0_636], %1625 {strides = array<i32>} : memref<32x128xf32, #tpu.memory_space<vmem>>, vector<1x128xf32>,
    %c27_i32 = arith.constant 27 : i32
    %1634 = arith.index_cast %c27_i32 : i32 to index
    %c0_637 = arith.constant 0 : index
    %1635 = vector.load %arg1[%1634, %c0_637] : memref<32x128xf32, #tpu.memory_space<vmem>>, vector<1x128xf32>
    %cst_638 = arith.constant 0.995012462 : f32
    %1636 = vector.broadcast %cst_638 : f32 to vector<1x128xf32>
    %1637 = arith.mulf %1636, %1585 : vector<1x128xf32>
    %1638 = arith.addf %1637, %1635 : vector<1x128xf32>
    %cst_639 = arith.constant dense<0.000000e+00> : vector<1x128xf32>
    %1639 = tpu.matmul %1619, %6, %cst_639 {dimension_numbers = #tpu.dot_dimension_numbers<[1], [0], [0], [1], [0, 0, 1, 1], [], []>} : vector<1x128xf32>, vector<128x128xf32>, vector<1x128xf32> -> vector<1x128xf32>
    %1640 = arith.addf %1638, %1639 : vector<1x128xf32>
    %cst_640 = arith.constant 1.000000e+00 : f32
    %1641 = vector.broadcast %cst_640 : f32 to vector<1x128xf32>
    %1642 = arith.cmpf oeq, %1619, %1641 : vector<1x128xf32>
    %cst_641 = arith.constant 6.000000e-01 : f32
    %1643 = vector.broadcast %cst_641 : f32 to vector<1x128xf32>
    %1644 = arith.subf %1640, %1643 : vector<1x128xf32>
    %1645 = arith.select %1642, %1644, %1640 : vector<1x128xi1>, vector<1x128xf32>
    %cst_642 = arith.constant 0.995012462 : f32
    %1646 = vector.broadcast %cst_642 : f32 to vector<1x128xf32>
    %1647 = arith.mulf %1646, %1588 : vector<1x128xf32>
    %1648 = arith.addf %1647, %1619 : vector<1x128xf32>
    %cst_643 = arith.constant 2.000000e+00 : f32
    %1649 = vector.broadcast %cst_643 : f32 to vector<1x128xf32>
    %1650 = arith.cmpf olt, %1620, %1649 : vector<1x128xf32>
    %1651 = arith.andi %1650, %5 : vector<1x128xi1>
    %cst_644 = arith.constant 1.000000e+00 : f32
    %cst_645 = arith.constant 0.000000e+00 : f32
    %1652 = vector.broadcast %cst_644 : f32 to vector<1x128xf32>
    %1653 = vector.broadcast %cst_645 : f32 to vector<1x128xf32>
    %1654 = arith.select %1651, %1652, %1653 : vector<1x128xi1>, vector<1x128xf32>
    %1655 = vector.shape_cast %1654 : vector<1x128xf32> to vector<1x1x128xf32>
    %cst_646 = arith.constant dense<0xFF800000> : vector<1xf32>
    %1656 = vector.multi_reduction <maximumf>, %1655, %cst_646 [1, 2] : vector<1x1x128xf32> to vector<1xf32>
    %1657 = vector.shape_cast %1656 : vector<1xf32> to vector<1x1x1xf32>
    %1658 = vector.extract %1657[0, 0, 0] : f32 from vector<1x1x1xf32>
    %cst_647 = arith.constant 0.000000e+00 : f32
    %1659 = arith.cmpf ogt, %1658, %cst_647 : f32
    %cst_648 = arith.constant 1.000000e+00 : f32
    %1660 = vector.broadcast %cst_648 : f32 to vector<1x128xf32>
    %1661 = arith.addf %1620, %1660 : vector<1x128xf32>
    %1662 = arith.select %1651, %1661, %1620 : vector<1x128xi1>, vector<1x128xf32>
    %cst_649 = arith.constant 2.000000e+00 : f32
    %1663 = vector.broadcast %cst_649 : f32 to vector<1x128xf32>
    %1664 = arith.cmpf ogt, %1662, %1663 : vector<1x128xf32>
    %1665 = arith.extui %1664 : vector<1x128xi1> to vector<1x128xi32>
    %1666 = arith.sitofp %1665 : vector<1x128xi32> to vector<1x128xf32>
    %cst_650 = arith.constant 7.000000e-02 : f32
    %1667 = vector.broadcast %cst_650 : f32 to vector<1x128xf32>
    %1668 = arith.mulf %1667, %1648 : vector<1x128xf32>
    %cst_651 = arith.constant 6.000000e-01 : f32
    %1669 = vector.broadcast %cst_651 : f32 to vector<1x128xf32>
    %1670 = arith.addf %1669, %1668 : vector<1x128xf32>
    %1671 = arith.cmpf oge, %1645, %1670 : vector<1x128xf32>
    %1672 = arith.andi %1671, %5 : vector<1x128xi1>
    %1673 = arith.extui %1672 : vector<1x128xi1> to vector<1x128xi32>
    %1674 = arith.sitofp %1673 : vector<1x128xi32> to vector<1x128xf32>
    %cst_652 = arith.constant 1.000000e+00 : f32
    %1675 = vector.broadcast %cst_652 : f32 to vector<1x128xf32>
    %1676 = arith.cmpf oeq, %1674, %1675 : vector<1x128xf32>
    %cst_653 = arith.constant 0.000000e+00 : f32
    %1677 = vector.broadcast %cst_653 : f32 to vector<1x128xf32>
    %1678 = arith.select %1676, %1677, %1620 : vector<1x128xi1>, vector<1x128xf32>
    %1679 = arith.select %1659, %1666, %1674 : vector<1x128xf32>
    %1680 = arith.select %1659, %1662, %1678 : vector<1x128xf32>
    %cst_654 = arith.constant 0.951229453 : f32
    %1681 = vector.broadcast %cst_654 : f32 to vector<1x128xf32>
    %1682 = arith.mulf %1681, %1625 : vector<1x128xf32>
    %cst_655 = arith.constant dense<0.000000e+00> : vector<1x128xf32>
    %1683 = tpu.matmul %1679, %7, %cst_655 {dimension_numbers = #tpu.dot_dimension_numbers<[1], [0], [0], [1], [0, 0, 1, 1], [], []>} : vector<1x128xf32>, vector<128x128xf32>, vector<1x128xf32> -> vector<1x128xf32>
    %1684 = arith.addf %1682, %1683 : vector<1x128xf32>
    %1685 = arith.addf %1684, %8 : vector<1x128xf32>
    %1686 = arith.index_cast %c27_i32 : i32 to index
    %c0_656 = arith.constant 0 : index
    %1687 = vector.load %arg6[%1686, %c0_656] : memref<32x128xf32, #tpu.memory_space<vmem>>, vector<1x128xf32>
    tpu.vector_store %arg6[%1686, %c0_656], %1645 {strides = array<i32>} : memref<32x128xf32, #tpu.memory_space<vmem>>, vector<1x128xf32>,
    %1688 = arith.index_cast %c27_i32 : i32 to index
    %c0_657 = arith.constant 0 : index
    %1689 = vector.load %arg7[%1688, %c0_657] : memref<32x128xf32, #tpu.memory_space<vmem>>, vector<1x128xf32>
    tpu.vector_store %arg7[%1688, %c0_657], %1679 {strides = array<i32>} : memref<32x128xf32, #tpu.memory_space<vmem>>, vector<1x128xf32>,
    %1690 = arith.index_cast %c27_i32 : i32 to index
    %c0_658 = arith.constant 0 : index
    %1691 = vector.load %arg8[%1690, %c0_658] : memref<32x128xf32, #tpu.memory_space<vmem>>, vector<1x128xf32>
    tpu.vector_store %arg8[%1690, %c0_658], %1648 {strides = array<i32>} : memref<32x128xf32, #tpu.memory_space<vmem>>, vector<1x128xf32>,
    %1692 = arith.index_cast %c27_i32 : i32 to index
    %c0_659 = arith.constant 0 : index
    %1693 = vector.load %arg5[%1692, %c0_659] : memref<32x128xf32, #tpu.memory_space<vmem>>, vector<1x128xf32>
    tpu.vector_store %arg5[%1692, %c0_659], %1685 {strides = array<i32>} : memref<32x128xf32, #tpu.memory_space<vmem>>, vector<1x128xf32>,
    %c28_i32 = arith.constant 28 : i32
    %1694 = arith.index_cast %c28_i32 : i32 to index
    %c0_660 = arith.constant 0 : index
    %1695 = vector.load %arg1[%1694, %c0_660] : memref<32x128xf32, #tpu.memory_space<vmem>>, vector<1x128xf32>
    %cst_661 = arith.constant 0.995012462 : f32
    %1696 = vector.broadcast %cst_661 : f32 to vector<1x128xf32>
    %1697 = arith.mulf %1696, %1645 : vector<1x128xf32>
    %1698 = arith.addf %1697, %1695 : vector<1x128xf32>
    %cst_662 = arith.constant dense<0.000000e+00> : vector<1x128xf32>
    %1699 = tpu.matmul %1679, %6, %cst_662 {dimension_numbers = #tpu.dot_dimension_numbers<[1], [0], [0], [1], [0, 0, 1, 1], [], []>} : vector<1x128xf32>, vector<128x128xf32>, vector<1x128xf32> -> vector<1x128xf32>
    %1700 = arith.addf %1698, %1699 : vector<1x128xf32>
    %cst_663 = arith.constant 1.000000e+00 : f32
    %1701 = vector.broadcast %cst_663 : f32 to vector<1x128xf32>
    %1702 = arith.cmpf oeq, %1679, %1701 : vector<1x128xf32>
    %cst_664 = arith.constant 6.000000e-01 : f32
    %1703 = vector.broadcast %cst_664 : f32 to vector<1x128xf32>
    %1704 = arith.subf %1700, %1703 : vector<1x128xf32>
    %1705 = arith.select %1702, %1704, %1700 : vector<1x128xi1>, vector<1x128xf32>
    %cst_665 = arith.constant 0.995012462 : f32
    %1706 = vector.broadcast %cst_665 : f32 to vector<1x128xf32>
    %1707 = arith.mulf %1706, %1648 : vector<1x128xf32>
    %1708 = arith.addf %1707, %1679 : vector<1x128xf32>
    %cst_666 = arith.constant 2.000000e+00 : f32
    %1709 = vector.broadcast %cst_666 : f32 to vector<1x128xf32>
    %1710 = arith.cmpf olt, %1680, %1709 : vector<1x128xf32>
    %1711 = arith.andi %1710, %5 : vector<1x128xi1>
    %cst_667 = arith.constant 1.000000e+00 : f32
    %cst_668 = arith.constant 0.000000e+00 : f32
    %1712 = vector.broadcast %cst_667 : f32 to vector<1x128xf32>
    %1713 = vector.broadcast %cst_668 : f32 to vector<1x128xf32>
    %1714 = arith.select %1711, %1712, %1713 : vector<1x128xi1>, vector<1x128xf32>
    %1715 = vector.shape_cast %1714 : vector<1x128xf32> to vector<1x1x128xf32>
    %cst_669 = arith.constant dense<0xFF800000> : vector<1xf32>
    %1716 = vector.multi_reduction <maximumf>, %1715, %cst_669 [1, 2] : vector<1x1x128xf32> to vector<1xf32>
    %1717 = vector.shape_cast %1716 : vector<1xf32> to vector<1x1x1xf32>
    %1718 = vector.extract %1717[0, 0, 0] : f32 from vector<1x1x1xf32>
    %cst_670 = arith.constant 0.000000e+00 : f32
    %1719 = arith.cmpf ogt, %1718, %cst_670 : f32
    %cst_671 = arith.constant 1.000000e+00 : f32
    %1720 = vector.broadcast %cst_671 : f32 to vector<1x128xf32>
    %1721 = arith.addf %1680, %1720 : vector<1x128xf32>
    %1722 = arith.select %1711, %1721, %1680 : vector<1x128xi1>, vector<1x128xf32>
    %cst_672 = arith.constant 2.000000e+00 : f32
    %1723 = vector.broadcast %cst_672 : f32 to vector<1x128xf32>
    %1724 = arith.cmpf ogt, %1722, %1723 : vector<1x128xf32>
    %1725 = arith.extui %1724 : vector<1x128xi1> to vector<1x128xi32>
    %1726 = arith.sitofp %1725 : vector<1x128xi32> to vector<1x128xf32>
    %cst_673 = arith.constant 7.000000e-02 : f32
    %1727 = vector.broadcast %cst_673 : f32 to vector<1x128xf32>
    %1728 = arith.mulf %1727, %1708 : vector<1x128xf32>
    %cst_674 = arith.constant 6.000000e-01 : f32
    %1729 = vector.broadcast %cst_674 : f32 to vector<1x128xf32>
    %1730 = arith.addf %1729, %1728 : vector<1x128xf32>
    %1731 = arith.cmpf oge, %1705, %1730 : vector<1x128xf32>
    %1732 = arith.andi %1731, %5 : vector<1x128xi1>
    %1733 = arith.extui %1732 : vector<1x128xi1> to vector<1x128xi32>
    %1734 = arith.sitofp %1733 : vector<1x128xi32> to vector<1x128xf32>
    %cst_675 = arith.constant 1.000000e+00 : f32
    %1735 = vector.broadcast %cst_675 : f32 to vector<1x128xf32>
    %1736 = arith.cmpf oeq, %1734, %1735 : vector<1x128xf32>
    %cst_676 = arith.constant 0.000000e+00 : f32
    %1737 = vector.broadcast %cst_676 : f32 to vector<1x128xf32>
    %1738 = arith.select %1736, %1737, %1680 : vector<1x128xi1>, vector<1x128xf32>
    %1739 = arith.select %1719, %1726, %1734 : vector<1x128xf32>
    %1740 = arith.select %1719, %1722, %1738 : vector<1x128xf32>
    %cst_677 = arith.constant 0.951229453 : f32
    %1741 = vector.broadcast %cst_677 : f32 to vector<1x128xf32>
    %1742 = arith.mulf %1741, %1685 : vector<1x128xf32>
    %cst_678 = arith.constant dense<0.000000e+00> : vector<1x128xf32>
    %1743 = tpu.matmul %1739, %7, %cst_678 {dimension_numbers = #tpu.dot_dimension_numbers<[1], [0], [0], [1], [0, 0, 1, 1], [], []>} : vector<1x128xf32>, vector<128x128xf32>, vector<1x128xf32> -> vector<1x128xf32>
    %1744 = arith.addf %1742, %1743 : vector<1x128xf32>
    %1745 = arith.addf %1744, %8 : vector<1x128xf32>
    %1746 = arith.index_cast %c28_i32 : i32 to index
    %c0_679 = arith.constant 0 : index
    %1747 = vector.load %arg6[%1746, %c0_679] : memref<32x128xf32, #tpu.memory_space<vmem>>, vector<1x128xf32>
    tpu.vector_store %arg6[%1746, %c0_679], %1705 {strides = array<i32>} : memref<32x128xf32, #tpu.memory_space<vmem>>, vector<1x128xf32>,
    %1748 = arith.index_cast %c28_i32 : i32 to index
    %c0_680 = arith.constant 0 : index
    %1749 = vector.load %arg7[%1748, %c0_680] : memref<32x128xf32, #tpu.memory_space<vmem>>, vector<1x128xf32>
    tpu.vector_store %arg7[%1748, %c0_680], %1739 {strides = array<i32>} : memref<32x128xf32, #tpu.memory_space<vmem>>, vector<1x128xf32>,
    %1750 = arith.index_cast %c28_i32 : i32 to index
    %c0_681 = arith.constant 0 : index
    %1751 = vector.load %arg8[%1750, %c0_681] : memref<32x128xf32, #tpu.memory_space<vmem>>, vector<1x128xf32>
    tpu.vector_store %arg8[%1750, %c0_681], %1708 {strides = array<i32>} : memref<32x128xf32, #tpu.memory_space<vmem>>, vector<1x128xf32>,
    %1752 = arith.index_cast %c28_i32 : i32 to index
    %c0_682 = arith.constant 0 : index
    %1753 = vector.load %arg5[%1752, %c0_682] : memref<32x128xf32, #tpu.memory_space<vmem>>, vector<1x128xf32>
    tpu.vector_store %arg5[%1752, %c0_682], %1745 {strides = array<i32>} : memref<32x128xf32, #tpu.memory_space<vmem>>, vector<1x128xf32>,
    %c29_i32 = arith.constant 29 : i32
    %1754 = arith.index_cast %c29_i32 : i32 to index
    %c0_683 = arith.constant 0 : index
    %1755 = vector.load %arg1[%1754, %c0_683] : memref<32x128xf32, #tpu.memory_space<vmem>>, vector<1x128xf32>
    %cst_684 = arith.constant 0.995012462 : f32
    %1756 = vector.broadcast %cst_684 : f32 to vector<1x128xf32>
    %1757 = arith.mulf %1756, %1705 : vector<1x128xf32>
    %1758 = arith.addf %1757, %1755 : vector<1x128xf32>
    %cst_685 = arith.constant dense<0.000000e+00> : vector<1x128xf32>
    %1759 = tpu.matmul %1739, %6, %cst_685 {dimension_numbers = #tpu.dot_dimension_numbers<[1], [0], [0], [1], [0, 0, 1, 1], [], []>} : vector<1x128xf32>, vector<128x128xf32>, vector<1x128xf32> -> vector<1x128xf32>
    %1760 = arith.addf %1758, %1759 : vector<1x128xf32>
    %cst_686 = arith.constant 1.000000e+00 : f32
    %1761 = vector.broadcast %cst_686 : f32 to vector<1x128xf32>
    %1762 = arith.cmpf oeq, %1739, %1761 : vector<1x128xf32>
    %cst_687 = arith.constant 6.000000e-01 : f32
    %1763 = vector.broadcast %cst_687 : f32 to vector<1x128xf32>
    %1764 = arith.subf %1760, %1763 : vector<1x128xf32>
    %1765 = arith.select %1762, %1764, %1760 : vector<1x128xi1>, vector<1x128xf32>
    %cst_688 = arith.constant 0.995012462 : f32
    %1766 = vector.broadcast %cst_688 : f32 to vector<1x128xf32>
    %1767 = arith.mulf %1766, %1708 : vector<1x128xf32>
    %1768 = arith.addf %1767, %1739 : vector<1x128xf32>
    %cst_689 = arith.constant 2.000000e+00 : f32
    %1769 = vector.broadcast %cst_689 : f32 to vector<1x128xf32>
    %1770 = arith.cmpf olt, %1740, %1769 : vector<1x128xf32>
    %1771 = arith.andi %1770, %5 : vector<1x128xi1>
    %cst_690 = arith.constant 1.000000e+00 : f32
    %cst_691 = arith.constant 0.000000e+00 : f32
    %1772 = vector.broadcast %cst_690 : f32 to vector<1x128xf32>
    %1773 = vector.broadcast %cst_691 : f32 to vector<1x128xf32>
    %1774 = arith.select %1771, %1772, %1773 : vector<1x128xi1>, vector<1x128xf32>
    %1775 = vector.shape_cast %1774 : vector<1x128xf32> to vector<1x1x128xf32>
    %cst_692 = arith.constant dense<0xFF800000> : vector<1xf32>
    %1776 = vector.multi_reduction <maximumf>, %1775, %cst_692 [1, 2] : vector<1x1x128xf32> to vector<1xf32>
    %1777 = vector.shape_cast %1776 : vector<1xf32> to vector<1x1x1xf32>
    %1778 = vector.extract %1777[0, 0, 0] : f32 from vector<1x1x1xf32>
    %cst_693 = arith.constant 0.000000e+00 : f32
    %1779 = arith.cmpf ogt, %1778, %cst_693 : f32
    %cst_694 = arith.constant 1.000000e+00 : f32
    %1780 = vector.broadcast %cst_694 : f32 to vector<1x128xf32>
    %1781 = arith.addf %1740, %1780 : vector<1x128xf32>
    %1782 = arith.select %1771, %1781, %1740 : vector<1x128xi1>, vector<1x128xf32>
    %cst_695 = arith.constant 2.000000e+00 : f32
    %1783 = vector.broadcast %cst_695 : f32 to vector<1x128xf32>
    %1784 = arith.cmpf ogt, %1782, %1783 : vector<1x128xf32>
    %1785 = arith.extui %1784 : vector<1x128xi1> to vector<1x128xi32>
    %1786 = arith.sitofp %1785 : vector<1x128xi32> to vector<1x128xf32>
    %cst_696 = arith.constant 7.000000e-02 : f32
    %1787 = vector.broadcast %cst_696 : f32 to vector<1x128xf32>
    %1788 = arith.mulf %1787, %1768 : vector<1x128xf32>
    %cst_697 = arith.constant 6.000000e-01 : f32
    %1789 = vector.broadcast %cst_697 : f32 to vector<1x128xf32>
    %1790 = arith.addf %1789, %1788 : vector<1x128xf32>
    %1791 = arith.cmpf oge, %1765, %1790 : vector<1x128xf32>
    %1792 = arith.andi %1791, %5 : vector<1x128xi1>
    %1793 = arith.extui %1792 : vector<1x128xi1> to vector<1x128xi32>
    %1794 = arith.sitofp %1793 : vector<1x128xi32> to vector<1x128xf32>
    %cst_698 = arith.constant 1.000000e+00 : f32
    %1795 = vector.broadcast %cst_698 : f32 to vector<1x128xf32>
    %1796 = arith.cmpf oeq, %1794, %1795 : vector<1x128xf32>
    %cst_699 = arith.constant 0.000000e+00 : f32
    %1797 = vector.broadcast %cst_699 : f32 to vector<1x128xf32>
    %1798 = arith.select %1796, %1797, %1740 : vector<1x128xi1>, vector<1x128xf32>
    %1799 = arith.select %1779, %1786, %1794 : vector<1x128xf32>
    %1800 = arith.select %1779, %1782, %1798 : vector<1x128xf32>
    %cst_700 = arith.constant 0.951229453 : f32
    %1801 = vector.broadcast %cst_700 : f32 to vector<1x128xf32>
    %1802 = arith.mulf %1801, %1745 : vector<1x128xf32>
    %cst_701 = arith.constant dense<0.000000e+00> : vector<1x128xf32>
    %1803 = tpu.matmul %1799, %7, %cst_701 {dimension_numbers = #tpu.dot_dimension_numbers<[1], [0], [0], [1], [0, 0, 1, 1], [], []>} : vector<1x128xf32>, vector<128x128xf32>, vector<1x128xf32> -> vector<1x128xf32>
    %1804 = arith.addf %1802, %1803 : vector<1x128xf32>
    %1805 = arith.addf %1804, %8 : vector<1x128xf32>
    %1806 = arith.index_cast %c29_i32 : i32 to index
    %c0_702 = arith.constant 0 : index
    %1807 = vector.load %arg6[%1806, %c0_702] : memref<32x128xf32, #tpu.memory_space<vmem>>, vector<1x128xf32>
    tpu.vector_store %arg6[%1806, %c0_702], %1765 {strides = array<i32>} : memref<32x128xf32, #tpu.memory_space<vmem>>, vector<1x128xf32>,
    %1808 = arith.index_cast %c29_i32 : i32 to index
    %c0_703 = arith.constant 0 : index
    %1809 = vector.load %arg7[%1808, %c0_703] : memref<32x128xf32, #tpu.memory_space<vmem>>, vector<1x128xf32>
    tpu.vector_store %arg7[%1808, %c0_703], %1799 {strides = array<i32>} : memref<32x128xf32, #tpu.memory_space<vmem>>, vector<1x128xf32>,
    %1810 = arith.index_cast %c29_i32 : i32 to index
    %c0_704 = arith.constant 0 : index
    %1811 = vector.load %arg8[%1810, %c0_704] : memref<32x128xf32, #tpu.memory_space<vmem>>, vector<1x128xf32>
    tpu.vector_store %arg8[%1810, %c0_704], %1768 {strides = array<i32>} : memref<32x128xf32, #tpu.memory_space<vmem>>, vector<1x128xf32>,
    %1812 = arith.index_cast %c29_i32 : i32 to index
    %c0_705 = arith.constant 0 : index
    %1813 = vector.load %arg5[%1812, %c0_705] : memref<32x128xf32, #tpu.memory_space<vmem>>, vector<1x128xf32>
    tpu.vector_store %arg5[%1812, %c0_705], %1805 {strides = array<i32>} : memref<32x128xf32, #tpu.memory_space<vmem>>, vector<1x128xf32>,
    %c30_i32 = arith.constant 30 : i32
    %1814 = arith.index_cast %c30_i32 : i32 to index
    %c0_706 = arith.constant 0 : index
    %1815 = vector.load %arg1[%1814, %c0_706] : memref<32x128xf32, #tpu.memory_space<vmem>>, vector<1x128xf32>
    %cst_707 = arith.constant 0.995012462 : f32
    %1816 = vector.broadcast %cst_707 : f32 to vector<1x128xf32>
    %1817 = arith.mulf %1816, %1765 : vector<1x128xf32>
    %1818 = arith.addf %1817, %1815 : vector<1x128xf32>
    %cst_708 = arith.constant dense<0.000000e+00> : vector<1x128xf32>
    %1819 = tpu.matmul %1799, %6, %cst_708 {dimension_numbers = #tpu.dot_dimension_numbers<[1], [0], [0], [1], [0, 0, 1, 1], [], []>} : vector<1x128xf32>, vector<128x128xf32>, vector<1x128xf32> -> vector<1x128xf32>
    %1820 = arith.addf %1818, %1819 : vector<1x128xf32>
    %cst_709 = arith.constant 1.000000e+00 : f32
    %1821 = vector.broadcast %cst_709 : f32 to vector<1x128xf32>
    %1822 = arith.cmpf oeq, %1799, %1821 : vector<1x128xf32>
    %cst_710 = arith.constant 6.000000e-01 : f32
    %1823 = vector.broadcast %cst_710 : f32 to vector<1x128xf32>
    %1824 = arith.subf %1820, %1823 : vector<1x128xf32>
    %1825 = arith.select %1822, %1824, %1820 : vector<1x128xi1>, vector<1x128xf32>
    %cst_711 = arith.constant 0.995012462 : f32
    %1826 = vector.broadcast %cst_711 : f32 to vector<1x128xf32>
    %1827 = arith.mulf %1826, %1768 : vector<1x128xf32>
    %1828 = arith.addf %1827, %1799 : vector<1x128xf32>
    %cst_712 = arith.constant 2.000000e+00 : f32
    %1829 = vector.broadcast %cst_712 : f32 to vector<1x128xf32>
    %1830 = arith.cmpf olt, %1800, %1829 : vector<1x128xf32>
    %1831 = arith.andi %1830, %5 : vector<1x128xi1>
    %cst_713 = arith.constant 1.000000e+00 : f32
    %cst_714 = arith.constant 0.000000e+00 : f32
    %1832 = vector.broadcast %cst_713 : f32 to vector<1x128xf32>
    %1833 = vector.broadcast %cst_714 : f32 to vector<1x128xf32>
    %1834 = arith.select %1831, %1832, %1833 : vector<1x128xi1>, vector<1x128xf32>
    %1835 = vector.shape_cast %1834 : vector<1x128xf32> to vector<1x1x128xf32>
    %cst_715 = arith.constant dense<0xFF800000> : vector<1xf32>
    %1836 = vector.multi_reduction <maximumf>, %1835, %cst_715 [1, 2] : vector<1x1x128xf32> to vector<1xf32>
    %1837 = vector.shape_cast %1836 : vector<1xf32> to vector<1x1x1xf32>
    %1838 = vector.extract %1837[0, 0, 0] : f32 from vector<1x1x1xf32>
    %cst_716 = arith.constant 0.000000e+00 : f32
    %1839 = arith.cmpf ogt, %1838, %cst_716 : f32
    %cst_717 = arith.constant 1.000000e+00 : f32
    %1840 = vector.broadcast %cst_717 : f32 to vector<1x128xf32>
    %1841 = arith.addf %1800, %1840 : vector<1x128xf32>
    %1842 = arith.select %1831, %1841, %1800 : vector<1x128xi1>, vector<1x128xf32>
    %cst_718 = arith.constant 2.000000e+00 : f32
    %1843 = vector.broadcast %cst_718 : f32 to vector<1x128xf32>
    %1844 = arith.cmpf ogt, %1842, %1843 : vector<1x128xf32>
    %1845 = arith.extui %1844 : vector<1x128xi1> to vector<1x128xi32>
    %1846 = arith.sitofp %1845 : vector<1x128xi32> to vector<1x128xf32>
    %cst_719 = arith.constant 7.000000e-02 : f32
    %1847 = vector.broadcast %cst_719 : f32 to vector<1x128xf32>
    %1848 = arith.mulf %1847, %1828 : vector<1x128xf32>
    %cst_720 = arith.constant 6.000000e-01 : f32
    %1849 = vector.broadcast %cst_720 : f32 to vector<1x128xf32>
    %1850 = arith.addf %1849, %1848 : vector<1x128xf32>
    %1851 = arith.cmpf oge, %1825, %1850 : vector<1x128xf32>
    %1852 = arith.andi %1851, %5 : vector<1x128xi1>
    %1853 = arith.extui %1852 : vector<1x128xi1> to vector<1x128xi32>
    %1854 = arith.sitofp %1853 : vector<1x128xi32> to vector<1x128xf32>
    %cst_721 = arith.constant 1.000000e+00 : f32
    %1855 = vector.broadcast %cst_721 : f32 to vector<1x128xf32>
    %1856 = arith.cmpf oeq, %1854, %1855 : vector<1x128xf32>
    %cst_722 = arith.constant 0.000000e+00 : f32
    %1857 = vector.broadcast %cst_722 : f32 to vector<1x128xf32>
    %1858 = arith.select %1856, %1857, %1800 : vector<1x128xi1>, vector<1x128xf32>
    %1859 = arith.select %1839, %1846, %1854 : vector<1x128xf32>
    %1860 = arith.select %1839, %1842, %1858 : vector<1x128xf32>
    %cst_723 = arith.constant 0.951229453 : f32
    %1861 = vector.broadcast %cst_723 : f32 to vector<1x128xf32>
    %1862 = arith.mulf %1861, %1805 : vector<1x128xf32>
    %cst_724 = arith.constant dense<0.000000e+00> : vector<1x128xf32>
    %1863 = tpu.matmul %1859, %7, %cst_724 {dimension_numbers = #tpu.dot_dimension_numbers<[1], [0], [0], [1], [0, 0, 1, 1], [], []>} : vector<1x128xf32>, vector<128x128xf32>, vector<1x128xf32> -> vector<1x128xf32>
    %1864 = arith.addf %1862, %1863 : vector<1x128xf32>
    %1865 = arith.addf %1864, %8 : vector<1x128xf32>
    %1866 = arith.index_cast %c30_i32 : i32 to index
    %c0_725 = arith.constant 0 : index
    %1867 = vector.load %arg6[%1866, %c0_725] : memref<32x128xf32, #tpu.memory_space<vmem>>, vector<1x128xf32>
    tpu.vector_store %arg6[%1866, %c0_725], %1825 {strides = array<i32>} : memref<32x128xf32, #tpu.memory_space<vmem>>, vector<1x128xf32>,
    %1868 = arith.index_cast %c30_i32 : i32 to index
    %c0_726 = arith.constant 0 : index
    %1869 = vector.load %arg7[%1868, %c0_726] : memref<32x128xf32, #tpu.memory_space<vmem>>, vector<1x128xf32>
    tpu.vector_store %arg7[%1868, %c0_726], %1859 {strides = array<i32>} : memref<32x128xf32, #tpu.memory_space<vmem>>, vector<1x128xf32>,
    %1870 = arith.index_cast %c30_i32 : i32 to index
    %c0_727 = arith.constant 0 : index
    %1871 = vector.load %arg8[%1870, %c0_727] : memref<32x128xf32, #tpu.memory_space<vmem>>, vector<1x128xf32>
    tpu.vector_store %arg8[%1870, %c0_727], %1828 {strides = array<i32>} : memref<32x128xf32, #tpu.memory_space<vmem>>, vector<1x128xf32>,
    %1872 = arith.index_cast %c30_i32 : i32 to index
    %c0_728 = arith.constant 0 : index
    %1873 = vector.load %arg5[%1872, %c0_728] : memref<32x128xf32, #tpu.memory_space<vmem>>, vector<1x128xf32>
    tpu.vector_store %arg5[%1872, %c0_728], %1865 {strides = array<i32>} : memref<32x128xf32, #tpu.memory_space<vmem>>, vector<1x128xf32>,
    %c31_i32 = arith.constant 31 : i32
    %1874 = arith.index_cast %c31_i32 : i32 to index
    %c0_729 = arith.constant 0 : index
    %1875 = vector.load %arg1[%1874, %c0_729] : memref<32x128xf32, #tpu.memory_space<vmem>>, vector<1x128xf32>
    %cst_730 = arith.constant 0.995012462 : f32
    %1876 = vector.broadcast %cst_730 : f32 to vector<1x128xf32>
    %1877 = arith.mulf %1876, %1825 : vector<1x128xf32>
    %1878 = arith.addf %1877, %1875 : vector<1x128xf32>
    %cst_731 = arith.constant dense<0.000000e+00> : vector<1x128xf32>
    %1879 = tpu.matmul %1859, %6, %cst_731 {dimension_numbers = #tpu.dot_dimension_numbers<[1], [0], [0], [1], [0, 0, 1, 1], [], []>} : vector<1x128xf32>, vector<128x128xf32>, vector<1x128xf32> -> vector<1x128xf32>
    %1880 = arith.addf %1878, %1879 : vector<1x128xf32>
    %cst_732 = arith.constant 1.000000e+00 : f32
    %1881 = vector.broadcast %cst_732 : f32 to vector<1x128xf32>
    %1882 = arith.cmpf oeq, %1859, %1881 : vector<1x128xf32>
    %cst_733 = arith.constant 6.000000e-01 : f32
    %1883 = vector.broadcast %cst_733 : f32 to vector<1x128xf32>
    %1884 = arith.subf %1880, %1883 : vector<1x128xf32>
    %1885 = arith.select %1882, %1884, %1880 : vector<1x128xi1>, vector<1x128xf32>
    %cst_734 = arith.constant 0.995012462 : f32
    %1886 = vector.broadcast %cst_734 : f32 to vector<1x128xf32>
    %1887 = arith.mulf %1886, %1828 : vector<1x128xf32>
    %1888 = arith.addf %1887, %1859 : vector<1x128xf32>
    %cst_735 = arith.constant 2.000000e+00 : f32
    %1889 = vector.broadcast %cst_735 : f32 to vector<1x128xf32>
    %1890 = arith.cmpf olt, %1860, %1889 : vector<1x128xf32>
    %1891 = arith.andi %1890, %5 : vector<1x128xi1>
    %cst_736 = arith.constant 1.000000e+00 : f32
    %cst_737 = arith.constant 0.000000e+00 : f32
    %1892 = vector.broadcast %cst_736 : f32 to vector<1x128xf32>
    %1893 = vector.broadcast %cst_737 : f32 to vector<1x128xf32>
    %1894 = arith.select %1891, %1892, %1893 : vector<1x128xi1>, vector<1x128xf32>
    %1895 = vector.shape_cast %1894 : vector<1x128xf32> to vector<1x1x128xf32>
    %cst_738 = arith.constant dense<0xFF800000> : vector<1xf32>
    %1896 = vector.multi_reduction <maximumf>, %1895, %cst_738 [1, 2] : vector<1x1x128xf32> to vector<1xf32>
    %1897 = vector.shape_cast %1896 : vector<1xf32> to vector<1x1x1xf32>
    %1898 = vector.extract %1897[0, 0, 0] : f32 from vector<1x1x1xf32>
    %cst_739 = arith.constant 0.000000e+00 : f32
    %1899 = arith.cmpf ogt, %1898, %cst_739 : f32
    %cst_740 = arith.constant 1.000000e+00 : f32
    %1900 = vector.broadcast %cst_740 : f32 to vector<1x128xf32>
    %1901 = arith.addf %1860, %1900 : vector<1x128xf32>
    %1902 = arith.select %1891, %1901, %1860 : vector<1x128xi1>, vector<1x128xf32>
    %cst_741 = arith.constant 2.000000e+00 : f32
    %1903 = vector.broadcast %cst_741 : f32 to vector<1x128xf32>
    %1904 = arith.cmpf ogt, %1902, %1903 : vector<1x128xf32>
    %1905 = arith.extui %1904 : vector<1x128xi1> to vector<1x128xi32>
    %1906 = arith.sitofp %1905 : vector<1x128xi32> to vector<1x128xf32>
    %cst_742 = arith.constant 7.000000e-02 : f32
    %1907 = vector.broadcast %cst_742 : f32 to vector<1x128xf32>
    %1908 = arith.mulf %1907, %1888 : vector<1x128xf32>
    %cst_743 = arith.constant 6.000000e-01 : f32
    %1909 = vector.broadcast %cst_743 : f32 to vector<1x128xf32>
    %1910 = arith.addf %1909, %1908 : vector<1x128xf32>
    %1911 = arith.cmpf oge, %1885, %1910 : vector<1x128xf32>
    %1912 = arith.andi %1911, %5 : vector<1x128xi1>
    %1913 = arith.extui %1912 : vector<1x128xi1> to vector<1x128xi32>
    %1914 = arith.sitofp %1913 : vector<1x128xi32> to vector<1x128xf32>
    %cst_744 = arith.constant 1.000000e+00 : f32
    %1915 = vector.broadcast %cst_744 : f32 to vector<1x128xf32>
    %1916 = arith.cmpf oeq, %1914, %1915 : vector<1x128xf32>
    %cst_745 = arith.constant 0.000000e+00 : f32
    %1917 = vector.broadcast %cst_745 : f32 to vector<1x128xf32>
    %1918 = arith.select %1916, %1917, %1860 : vector<1x128xi1>, vector<1x128xf32>
    %1919 = arith.select %1899, %1906, %1914 : vector<1x128xf32>
    %1920 = arith.select %1899, %1902, %1918 : vector<1x128xf32>
    %cst_746 = arith.constant 0.951229453 : f32
    %1921 = vector.broadcast %cst_746 : f32 to vector<1x128xf32>
    %1922 = arith.mulf %1921, %1865 : vector<1x128xf32>
    %cst_747 = arith.constant dense<0.000000e+00> : vector<1x128xf32>
    %1923 = tpu.matmul %1919, %7, %cst_747 {dimension_numbers = #tpu.dot_dimension_numbers<[1], [0], [0], [1], [0, 0, 1, 1], [], []>} : vector<1x128xf32>, vector<128x128xf32>, vector<1x128xf32> -> vector<1x128xf32>
    %1924 = arith.addf %1922, %1923 : vector<1x128xf32>
    %1925 = arith.addf %1924, %8 : vector<1x128xf32>
    %1926 = arith.index_cast %c31_i32 : i32 to index
    %c0_748 = arith.constant 0 : index
    %1927 = vector.load %arg6[%1926, %c0_748] : memref<32x128xf32, #tpu.memory_space<vmem>>, vector<1x128xf32>
    tpu.vector_store %arg6[%1926, %c0_748], %1885 {strides = array<i32>} : memref<32x128xf32, #tpu.memory_space<vmem>>, vector<1x128xf32>,
    %1928 = arith.index_cast %c31_i32 : i32 to index
    %c0_749 = arith.constant 0 : index
    %1929 = vector.load %arg7[%1928, %c0_749] : memref<32x128xf32, #tpu.memory_space<vmem>>, vector<1x128xf32>
    tpu.vector_store %arg7[%1928, %c0_749], %1919 {strides = array<i32>} : memref<32x128xf32, #tpu.memory_space<vmem>>, vector<1x128xf32>,
    %1930 = arith.index_cast %c31_i32 : i32 to index
    %c0_750 = arith.constant 0 : index
    %1931 = vector.load %arg8[%1930, %c0_750] : memref<32x128xf32, #tpu.memory_space<vmem>>, vector<1x128xf32>
    tpu.vector_store %arg8[%1930, %c0_750], %1888 {strides = array<i32>} : memref<32x128xf32, #tpu.memory_space<vmem>>, vector<1x128xf32>,
    %1932 = arith.index_cast %c31_i32 : i32 to index
    %c0_751 = arith.constant 0 : index
    %1933 = vector.load %arg5[%1932, %c0_751] : memref<32x128xf32, #tpu.memory_space<vmem>>, vector<1x128xf32>
    tpu.vector_store %arg5[%1932, %c0_751], %1925 {strides = array<i32>} : memref<32x128xf32, #tpu.memory_space<vmem>>, vector<1x128xf32>,
    %c32_i32_752 = arith.constant 32 : i32
    %c0_753 = arith.constant 0 : index
    %c0_754 = arith.constant 0 : index
    %1934 = vector.load %arg9[%c0_753, %c0_754] : memref<1x128xf32, #tpu.memory_space<vmem>>, vector<1x128xf32>
    tpu.vector_store %arg9[%c0_753, %c0_754], %1885 {strides = array<i32>} : memref<1x128xf32, #tpu.memory_space<vmem>>, vector<1x128xf32>,
    %c0_755 = arith.constant 0 : index
    %c0_756 = arith.constant 0 : index
    %1935 = vector.load %arg10[%c0_755, %c0_756] : memref<1x128xf32, #tpu.memory_space<vmem>>, vector<1x128xf32>
    tpu.vector_store %arg10[%c0_755, %c0_756], %1888 {strides = array<i32>} : memref<1x128xf32, #tpu.memory_space<vmem>>, vector<1x128xf32>,
    %c0_757 = arith.constant 0 : index
    %c0_758 = arith.constant 0 : index
    %1936 = vector.load %arg11[%c0_757, %c0_758] : memref<1x128xf32, #tpu.memory_space<vmem>>, vector<1x128xf32>
    tpu.vector_store %arg11[%c0_757, %c0_758], %1919 {strides = array<i32>} : memref<1x128xf32, #tpu.memory_space<vmem>>, vector<1x128xf32>,
    %c0_759 = arith.constant 0 : index
    %c0_760 = arith.constant 0 : index
    %1937 = vector.load %arg12[%c0_759, %c0_760] : memref<1x128xf32, #tpu.memory_space<vmem>>, vector<1x128xf32>
    tpu.vector_store %arg12[%c0_759, %c0_760], %1925 {strides = array<i32>} : memref<1x128xf32, #tpu.memory_space<vmem>>, vector<1x128xf32>,
    %c0_761 = arith.constant 0 : index
    %c0_762 = arith.constant 0 : index
    %1938 = vector.load %arg13[%c0_761, %c0_762] : memref<1x128xf32, #tpu.memory_space<vmem>>, vector<1x128xf32>
    tpu.vector_store %arg13[%c0_761, %c0_762], %1920 {strides = array<i32>} : memref<1x128xf32, #tpu.memory_space<vmem>>, vector<1x128xf32>,
    return
  }
  func.func @transform_0(%arg0: i32) -> (i32, i32) {
    %c0_i32 = arith.constant 0 : i32
    %c0_i32_0 = arith.constant 0 : i32
    return %arg0, %c0_i32 : i32, i32
  }
  func.func @transform_1(%arg0: i32) -> (i32, i32) {
    %c0_i32 = arith.constant 0 : i32
    %c0_i32_0 = arith.constant 0 : i32
    %c0_i32_1 = arith.constant 0 : i32
    return %c0_i32, %c0_i32_0 : i32, i32
  }
  func.func @transform_2(%arg0: i32) -> (i32, i32) {
    %c0_i32 = arith.constant 0 : i32
    %c0_i32_0 = arith.constant 0 : i32
    %c0_i32_1 = arith.constant 0 : i32
    return %c0_i32, %c0_i32_0 : i32, i32
  }
  func.func @transform_3(%arg0: i32) -> (i32, i32) {
    %c0_i32 = arith.constant 0 : i32
    %c0_i32_0 = arith.constant 0 : i32
    %c0_i32_1 = arith.constant 0 : i32
    return %c0_i32, %c0_i32_0 : i32, i32
  }
  func.func @transform_4(%arg0: i32) -> (i32, i32) {
    %c0_i32 = arith.constant 0 : i32
    %c0_i32_0 = arith.constant 0 : i32
    return %arg0, %c0_i32 : i32, i32
  }
  func.func @transform_5(%arg0: i32) -> (i32, i32) {
    %c0_i32 = arith.constant 0 : i32
    %c0_i32_0 = arith.constant 0 : i32
    return %arg0, %c0_i32 : i32, i32
  }
  func.func @transform_6(%arg0: i32) -> (i32, i32) {
    %c0_i32 = arith.constant 0 : i32
    %c0_i32_0 = arith.constant 0 : i32
    return %arg0, %c0_i32 : i32, i32
  }
  func.func @transform_7(%arg0: i32) -> (i32, i32) {
    %c0_i32 = arith.constant 0 : i32
    %c0_i32_0 = arith.constant 0 : i32
    return %arg0, %c0_i32 : i32, i32
  }
}

</mosaic_0001>

<bundles_post_ra>
// kernel: tpu_custom_call.1
= control target key start
LH: loop header
LB: loop body
LE: loop exit
PB: predicated region body
PF: predicated region fallthrough
CT: control target
= control target key end

     0   :  { %s7187_s0 = inlined_call_operand.hbm [shape: f32[64,128], index: 0, kind: input, shape index: {}]   ;;  %s7188_s1 = inlined_call_operand.hbm [shape: f32[128,128], index: 1, kind: input, shape index: {}]   ;;  %s7189_s2 = inlined_call_operand.hbm [shape: f32[128,128], index: 2, kind: input, shape index: {}]   ;;  %s7190_s3 = inlined_call_operand.vmem [shape: f32[1,128], index: 3, kind: input, shape index: {}]   ;;  %s7191_s4 = inlined_call_operand.hbm [shape: f32[64,128], index: 4, kind: output, shape index: {0}]   ;;  %s7192_s5 = inlined_call_operand.hbm [shape: f32[64,128], index: 5, kind: output, shape index: {1}]   ;;  %s7193_s6 = inlined_call_operand.hbm [shape: f32[64,128], index: 6, kind: output, shape index: {2}]   ;;  %s7194_s7 = inlined_call_operand.hbm [shape: f32[64,128], index: 7, kind: output, shape index: {3}]  }
   0x1   :  { %7198 = sst [smem:[#allocation25_spill]] %s7187_s0 }
   0x2   :  { %7199 = sst [smem:[#allocation26_spill]] %s7188_s1 }
   0x3   :  { %7200 = sst [smem:[#allocation27_spill]] %s7189_s2 }
   0x4   :  { %7201 = sst [smem:[#allocation28_spill]] %s7190_s3 }
   0x5   :  { %13 = vsyncpa [#allocation8], 0 }
   0x6   :  { %15 = vsyncpa [#allocation8 + $0x1], 0 }
   0x7   :  { %16 = vsyncpa [#allocation11], 0 }
   0x8   :  { %17 = vsyncpa [#allocation9], 0 }
   0x9   :  { %19 = vsyncpa [#allocation9 + $0x1], 0 }
   0xa   :  { %20 = vsyncpa [#allocation15], 0 }
   0xb   :  { %22 = vsyncpa [#allocation15 + $0x1], 0 }
   0xc   :  { %23 = vsyncpa [#allocation18], 0 }
   0xd   :  { %25 = vsyncpa [#allocation18 + $0x1], 0  ;;  %s4227_s24 = smov 0   ;;  %s4229_s25 = smov 0  }
   0xe   :  { %s4231_s26 = smov 0   ;;  %s4233_s27 = smov 0  }
   0xf LB: > { %s4248_s28 = sadd.s32 4294967295, %s4176_s27   ;;  %s7195_s29 = sadd.s32 4294967294, %s4176_s27   ;;  %s4176_s27 = sphi %s4233_s27, %s7285_s27   ;;  %s4172_s26 = sphi %s4231_s26, %s7284_s26   ;;  %s4168_s25 = sphi %s4229_s25, %s7283_s25   ;;  %s4164_s24 = sphi %s4227_s24, %s7282_s24  }
  0x10   : > { %p51_p0 = scmp.ne.s32.totalorder %s4168_s25, %s4164_s24  ;;  %p52_p1 = scmp.eq.s32.totalorder %s4248_s28, 0 }
  0x11   : > { %p138_p2 = scmp.eq.s32.totalorder %s4248_s28, 1  ;;  %p144_p3 = scmp.eq.s32.totalorder %s7195_s29, 1 }
  0x12   : > { %p4259_p4 = por %p52_p1, %p51_p0  ;;  %p3508_p5 = scmp.ge.s32.totalorder %s4176_s27, 1 }
  0x13   : > { %p4264_p6 = por %p144_p3, %p51_p0  ;;  %p229_p7 = scmp.lt.s32.totalorder %s4176_s27, 3 }
  0x14   : > { %s7204_s1 = sld [smem:[#allocation26_spill]]  ;;  %s4178_s13 = smov [#allocation10]  }
  0x15   : > { %p4273_p9 = pnand %p3508_p5, %p229_p7  ;;  %s242_s14 = sshll.u32 %s4178_s13, 4  ;;  %s243_s14 = int_to_ptr.vmem [resolvable:$true] %s242_s14 }
  0x16   : > { %s7206_s2 = sld [smem:[#allocation27_spill]]  ;;  %s7196_s18 = smov 128  }
  0x17   : > { %p3721_p10 = pneg %p4273_p9  ;;  %s7197_s19 = smov 8  }
  0x18   : > { %s4181_s20 = smov [#allocation12]   ;;  %s4292_s22 = sadd.s32 1, %s4176_s27  }
  0x19   : > { %p3722_p11 = pnand %p3721_p10, %p52_p1  ;;  %s256_s21 = sshll.u32 %s4181_s20, 4  ;;  %s257_s21 = int_to_ptr.vmem [resolvable:$true] %s256_s21 }
  0x1a   : > { %s240_s11 = sshll.u32 %s7204_s1, 4  ;;  %s38_s23 = sadd.s32 1, %s4172_s26  ;;  %s241_s11 = int_to_ptr.hbm [resolvable:$true] %s240_s11 }
  0x1b   : > { %3724 = dma.hbm_to_vmem [thread:$0]  (!%p3722_p11), %s241_s11, 2048, %s243_s14, [#allocation11], %s7196_s18, %s7196_s18, %s7197_s19  }
  0x1c   : > { %s254_s17 = sshll.u32 %s7206_s2, 4  ;;  %s35_s9 = ssub.s32 %s4176_s27, %s4292_s22  ;;  %s255_s17 = int_to_ptr.hbm [resolvable:$true] %s254_s17 }
  0x1d   : > { %3727 = dma.hbm_to_vmem [thread:$0]  (!%p3722_p11), %s255_s17, 2048, %s257_s21, [#allocation11], %s7196_s18, %s7196_s18, %s7197_s19  }
  0x1e   : > { %p45_p13 = scmp.ne.s32.totalorder %s4172_s26, %s4168_s25  ;;  %p36_p0 = scmp.eq.s32.totalorder %s35_s9, 0 }
  0x1f   : > { %p46_p3 = scmp.eq.s32.totalorder %s4176_s27, 0  ;;  %p3747_p7 = scmp.lt.s32.totalorder %s4176_s27, 2 }
  0x20   : > { %p4302_p5 = por %p138_p2, %p45_p13  ;;  %s273_s13 = sand.u32 1, %s4172_s26  }
  0x21   : > { %s4308_s11 = scalar_select %p36_p0, %s4172_s26, %s38_s23  }
  0x22   : > { %p47_p10 = por %p46_p3, %p45_p13  ;;  %s3512_s14 = sshll.u32 %s273_s13, 5 }
  0x23   : > { %7208 = sst [smem:[#allocation24_spill]] %s4308_s11  ;;  %s3634_s15 = sshll.u32 %s4176_s27, 5 }
  0x24   : > { %s7209_s0 = sld [smem:[#allocation25_spill]]  ;;  %s277_s21 = scalar_lea.vmem [#allocation7], %s3512_s14 }
  0x25   : > { %s285_s29 = sshll.u32 %s277_s21, 4  ;;  %p4315_p2 = pnand %p3747_p7, %p47_p10  ;;  %s286_s29 = int_to_ptr.vmem [resolvable:$true] %s285_s29 }
  0x26   : > { %s274_s23 = scalar_lea.sflag [#allocation8], %s273_s13 }
  0x27   : > { %p3988_p13 = pneg %p4315_p2 }
  0x2a   : > { %s282_s20 = scalar_lea.hbm %s7209_s0, %s3634_s15  ;;  %s3991_s16 = scalar_lea.hbm %s7209_s0, 64 }
  0x2b   : > { %s283_s9 = sshll.u32 %s282_s20, 4  ;;  %s284_s9 = int_to_ptr.hbm [resolvable:$true] %s283_s9 }
  0x2c   : > { %s3984_s19 = sshra.s32 %s284_s9, 4  ;;  %s3985_s19 = int_to_ptr.hbm [resolvable:$true] %s3984_s19 }
  0x2d   : > { %s3986_s1 = scalar_lea.hbm %s3985_s19, 32  ;;  %p3992_p7 = scmp.lt.s32.totalorder %s3985_s19, %s7209_s0 }
  0x2e   : > { %p3987_p11 = scmp.ne.s32.totalorder %s3985_s19, %s3986_s1  ;;  %p3993_p10 = scmp.lt.s32.totalorder %s3991_s16, %s3986_s1 }
  0x30   : > { %p3989_p0 = pnand %p3988_p13, %p3987_p11  ;;  %p3994_p12 = por %p3993_p10, %p3992_p7 }
  0x32   : > { %p3990_p3 = pneg %p3989_p0 }
  0x34   : > { %p3995_p8 = pnand %p3994_p12, %p3990_p3 }
  0x36   : > { %3998 = shalt.err (!%p3995_p8)
}
  0x37   : > { %s7211_s13 = smov 8   ;;  %s7212_s21 = smov 128  }
  0x38   : > { %3731 = dma.hbm_to_vmem [thread:$0]  (!%p4315_p2), %s284_s9, 512, %s286_s29, %s274_s23, %s7212_s21, %s7212_s21, %s7211_s13  }
  0x39   : > { %297 = sbr.rel (%p4273_p9) target bundleno = 6275 (0x1883), region = 36  ;;  %s4335_s15 = sand.u32 (!%p4273_p9), 1, %s4168_s25  }
  0x3a   : > { %s3516_s19 = sshll.u32 (!%p4273_p9), %s4335_s15, 5  ;;  %s300_s1 = scalar_lea.sflag (!%p4273_p9), [#allocation8], %s4335_s15 }
  0x3b   : > { %s4339_s14 = scalar_lea.vmem (!%p4273_p9), [#allocation7], %s3516_s19 }
  0x3e   : > { %4143 = dma.done.wait (%p4259_p4), %s300_s1, 512  }
  0x3f   : > { %4145 = vsyncadd (%p4259_p4), %s300_s1, 4294966784 }
  0x40   : > { %4147 = dma.done.wait (%p52_p1), [#allocation11], 4096  }
  0x41   : > { %4149 = vsyncadd (%p52_p1), [#allocation11], 4294963200  ;;  %s4349_s29 = scalar_lea.vmem [#allocation13], %s3516_s19  ;;  %s4351_s12 = scalar_lea.vmem [#allocation14], %s3516_s19 }
  0x42   : > { %s4353_s18 = scalar_lea.vmem [#allocation16], %s3516_s19  ;;  %s4355_s9 = scalar_lea.vmem [#allocation17], %s3516_s19 }
  0x43   : > { %p7213_p8 = scmp.ne.s32.totalorder %s4248_s28, 0 }
  0x45   : > { %368 = sbr.rel (%p7213_p8) target bundleno = 80 (0x50), region = 52 }
  0x4a   : > { %v4182_v0 = vmov 0.0   ;;  %v4183_v1 = vmov 2.0  }
  0x4b   : > { %369 = vst [vmem:[#allocation2] sm:$0x1] %v4182_v0 }
  0x4c   : > { %370 = vst [vmem:[#allocation3] sm:$0x1] %v4182_v0 }
  0x4d   : > { %371 = vst [vmem:[#allocation4] sm:$0x1] %v4182_v0 }
  0x4e   : > { %372 = vst [vmem:[#allocation5] sm:$0x1] %v4182_v0 }
  0x4f   : > { %373 = vst [vmem:[#allocation6] sm:$0x1] %v4183_v1 }
  0x50 PF: > { %v374_v2 = vlaneseq  ;;  %v4361_v4 = vld [vmem:[#allocation10 + $0x78] sm:$0xff]  ;;  %v4363_v5 = vld [vmem:[#allocation10 + $0x70] sm:$0xff]  ;;  %v4370_v7 = vld [vmem:[#allocation10 + $0x68] sm:$0xff]  ;;  %vm447_vm2 = vcmask 1040384   ;;  %v4184_v10 = vmov 0.0   ;;  %s7218_s3 = sld [smem:[#allocation28_spill]] }
  0x51   : > { %418 = vmatpush.msra.mxu0 %v4361_v4  ;;  %507 = vmatpush.msra.mxu2 %v4361_v4  ;;  %v4375_v8 = vld [vmem:[#allocation10 + $0x60] sm:$0xff]  ;;  %v4388_v12 = vld [vmem:[#allocation10 + $0x58] sm:$0xff]  ;;  %v4393_v16 = vld [vmem:[#allocation10 + $0x50] sm:$0xff] }
  0x52   : > { %v4367_v6 = vand.u32 127, %v374_v2  ;;  %v4402_v19 = vld [vmem:[#allocation10 + $0x48] sm:$0xff]  ;;  %v4408_v20 = vld [vmem:[#allocation10 + $0x40] sm:$0xff]  ;;  %v4412_v21 = vld [vmem:[#allocation10 + $0x38] sm:$0xff] }
  0x53   : > { %419 = vmatpush.msra.mxu0 %v4363_v5  ;;  %508 = vmatpush.msra.mxu2 %v4363_v5  ;;  %v411_v13 = vld [vmem:[#allocation3] sm:$0x1]  ;;  %v4416_v22 = vld [vmem:[#allocation10 + $0x30] sm:$0xff]  ;;  %v4420_v23 = vld [vmem:[#allocation10 + $0x28] sm:$0xff] }
  0x54   : > { %vm376_vm1 = vcmp.lt.s32.totalorder %v4367_v6, 32  ;;  %v442_v15 = vmul.f32 0.99501246, %v411_v13  ;;  %v4395_v17 = vld [vmem:[#allocation4] sm:$0x1]  ;;  %v4424_v24 = vld [vmem:[#allocation10 + $0x20] sm:$0xff] }
  0x55   : > { %420 = vmatpush.msra.mxu0 %v4370_v7  ;;  %509 = vmatpush.msra.mxu2 %v4370_v7  ;;  %v4428_v25 = vld [vmem:[#allocation10 + $0x18] sm:$0xff]  ;;  %v4432_v26 = vld [vmem:[#allocation10 + $0x10] sm:$0xff]  ;;  %v4436_v27 = vld [vmem:[#allocation10 + $0x8] sm:$0xff]  ;;  %vm439_vm4 = vcmp.eq.f32.partialorder %v4395_v17, 1.0 }
  0x56   : > { %v4359_v3 = vld [vmem:[#allocation6] sm:$0x1]  ;;  %v4399_v18 = vadd.f32 %v442_v15, %v4395_v17  ;;  %v4440_v28 = vld [vmem:[#allocation10] sm:$0xff]  ;;  %v4497_v30 = vld [vmem:[#allocation12 + $0x70] sm:$0xff] }
  0x57   : > { %vm444_vm0 = vcmp.lt.f32.partialorder %v4359_v3, 2.0  ;;  %421 = vmatpush.msra.mxu0 %v4375_v8  ;;  %510 = vmatpush.msra.mxu2 %v4375_v8  ;;  %v4495_v29 = vld [vmem:[#allocation12 + $0x78] sm:$0xff]  ;;  %v4501_v31 = vld [vmem:[#allocation12 + $0x68] sm:$0xff]  ;;  %v4505_v32 = vld [vmem:[#allocation12 + $0x60] sm:$0xff]  ;;  %v459_v62 = vadd.f32 1.0, %v4359_v3 }
  0x58   : > { %vm4379_vm3 = vmand %vm444_vm0, %vm376_vm1  ;;  %502 = vst [vmem:[%s4355_s9] sm:$0x1] %v4399_v18  ;;  %478 = vmatpush.msra.mxu1 %v4495_v29  ;;  %566 = vmatpush.msra.mxu3 %v4495_v29  ;;  %v4509_v33 = vld [vmem:[#allocation12 + $0x58] sm:$0xff]  ;;  %v4513_v34 = vld [vmem:[#allocation12 + $0x50] sm:$0xff]  ;;  %v464_v60 = vmul.f32 0.07, %v4399_v18 }
  0x59   : > { %v446_v11 = vsel %vm4379_vm3, 1.0, %v4184_v10  ;;  %422 = vmatpush.msra.mxu0 %v4388_v12  ;;  %511 = vmatpush.msra.mxu2 %v4388_v12  ;;  %v4517_v35 = vld [vmem:[#allocation12 + $0x48] sm:$0xff]  ;;  %v4521_v36 = vld [vmem:[#allocation12 + $0x40] sm:$0xff]  ;;  %v4525_v37 = vld [vmem:[#allocation12 + $0x38] sm:$0xff]  ;;  %v460_v63 = vsel %vm4379_vm3, %v459_v62, %v4359_v3  ;;  %v531_v2 = vmul.f32 0.99501246, %v4399_v18 }
  0x5a   : > { %v448_v14 = vsel %vm447_vm2, %v446_v11, -inf  ;;  %479 = vmatpush.msra.mxu1 %v4497_v30  ;;  %567 = vmatpush.msra.mxu3 %v4497_v30  ;;  %v4531_v43 = vld [vmem:[#allocation12 + $0x30] sm:$0xff]  ;;  %v4533_v44 = vld [vmem:[#allocation12 + $0x28] sm:$0xff]  ;;  %v4537_v46 = vld [vmem:[#allocation12 + $0x20] sm:$0xff]  ;;  %v465_v61 = vadd.f32 0.6, %v464_v60 }
  0x5b   : > { %449 = vmax.xlane.f32.xlu0 %v448_v14  ;;  %423 = vmatpush.msra.mxu0 %v4393_v16  ;;  %v410_v48 = vld [vmem:[#allocation2] sm:$0x1]  ;;  %v415_v50 = vld [vmem:[%s4339_s14] sm:$0x1]  ;;  %v4548_v53 = vld [vmem:[#allocation12 + $0x10] sm:$0xff]  ;;  %vm461_vm7 = vcmp.gt.f32.partialorder %v460_v63, 2.0 }
  0x5c   : > { %512 = vmatpush.msra.mxu2 %v4393_v16  ;;  %480 = vmatpush.msra.mxu1 %v4501_v31  ;;  %v416_v49 = vmul.f32 0.99501246, %v410_v48  ;;  %v4544_v51 = vld [vmem:[#allocation12 + $0x18] sm:$0xff]  ;;  %v4552_v55 = vld [vmem:[#allocation12 + $0x8] sm:$0xff]  ;;  %v4557_v57 = vld [vmem:[#allocation12] sm:$0xff]  ;;  %v3525_v1 = vsel %vm461_vm7, 1.0, %v4184_v10 }
  0x5d   : > { %424 = vmatpush.msra.mxu0 %v4402_v19  ;;  %568 = vmatpush.msra.mxu3 %v4501_v31 }
  0x5e   : > { %513 = vmatpush.msra.mxu2 %v4402_v19  ;;  %481 = vmatpush.msra.mxu1 %v4505_v32  ;;  %v417_v52 = vadd.f32 %v416_v49, %v415_v50 }
  0x5f   : > { %425 = vmatpush.msra.mxu0 %v4408_v20  ;;  %569 = vmatpush.msra.mxu3 %v4505_v32 }
  0x60   : > { %514 = vmatpush.msra.mxu2 %v4408_v20  ;;  %482 = vmatpush.msra.mxu1 %v4509_v33 }
  0x61   : > { %426 = vmatpush.msra.mxu0 %v4412_v21  ;;  %570 = vmatpush.msra.mxu3 %v4509_v33 }
  0x62   : > { %515 = vmatpush.msra.mxu2 %v4412_v21  ;;  %483 = vmatpush.msra.mxu1 %v4513_v34 }
  0x63   : > { %427 = vmatpush.msra.mxu0 %v4416_v22  ;;  %571 = vmatpush.msra.mxu3 %v4513_v34 }
  0x64   : > { %516 = vmatpush.msra.mxu2 %v4416_v22  ;;  %484 = vmatpush.msra.mxu1 %v4517_v35 }
  0x65   : > { %428 = vmatpush.msra.mxu0 %v4420_v23  ;;  %572 = vmatpush.msra.mxu3 %v4517_v35 }
  0x66   : > { %517 = vmatpush.msra.mxu2 %v4420_v23  ;;  %485 = vmatpush.msra.mxu1 %v4521_v36 }
  0x67   : > { %429 = vmatpush.msra.mxu0 %v4424_v24  ;;  %573 = vmatpush.msra.mxu3 %v4521_v36 }
  0x68   : > { %518 = vmatpush.msra.mxu2 %v4424_v24  ;;  %486 = vmatpush.msra.mxu1 %v4525_v37 }
  0x69   : > { %430 = vmatpush.msra.mxu0 %v4428_v25  ;;  %574 = vmatpush.msra.mxu3 %v4525_v37 }
  0x6a   : > { %519 = vmatpush.msra.mxu2 %v4428_v25  ;;  %487 = vmatpush.msra.mxu1 %v4531_v43 }
  0x6b   : > { %431 = vmatpush.msra.mxu0 %v4432_v26  ;;  %575 = vmatpush.msra.mxu3 %v4531_v43 }
  0x6c   : > { %520 = vmatpush.msra.mxu2 %v4432_v26  ;;  %488 = vmatpush.msra.mxu1 %v4533_v44 }
  0x6d   : > { %432 = vmatpush.msra.mxu0 %v4436_v27  ;;  %576 = vmatpush.msra.mxu3 %v4533_v44 }
  0x6e   : > { %521 = vmatpush.msra.mxu2 %v4436_v27  ;;  %489 = vmatpush.msra.mxu1 %v4537_v46 }
  0x6f   : > { %433 = vmatpush.msra.mxu0 %v4440_v28  ;;  %577 = vmatpush.msra.mxu3 %v4537_v46 }
  0x70   : > { %522 = vmatpush.msra.mxu2 %v4440_v28  ;;  %434 = vmatmul.f32.vlgmr.msra.gmra.mxu0 %v4395_v17 }
  0x71   : > { %595 = vmatpush.msrb.mxu0 %v4361_v4  ;;  %490 = vmatpush.msra.mxu1 %v4544_v51 }
  0x72   : > { %683 = vmatpush.msrb.mxu2 %v4361_v4  ;;  %578 = vmatpush.msra.mxu3 %v4544_v51 }
  0x73   : > { %596 = vmatpush.msrb.mxu0 %v4363_v5  ;;  %491 = vmatpush.msra.mxu1 %v4548_v53 }
  0x74   : > { %684 = vmatpush.msrb.mxu2 %v4363_v5  ;;  %579 = vmatpush.msra.mxu3 %v4548_v53 }
  0x75   : > { %597 = vmatpush.msrb.mxu0 %v4370_v7  ;;  %492 = vmatpush.msra.mxu1 %v4552_v55 }
  0x76   : > { %685 = vmatpush.msrb.mxu2 %v4370_v7  ;;  %580 = vmatpush.msra.mxu3 %v4552_v55 }
  0x77   : > { %598 = vmatpush.msrb.mxu0 %v4375_v8  ;;  %493 = vmatpush.msra.mxu1 %v4557_v57 }
  0x78   : > { %686 = vmatpush.msrb.mxu2 %v4375_v8  ;;  %581 = vmatpush.msra.mxu3 %v4557_v57 }
  0x79   : > { %599 = vmatpush.msrb.mxu0 %v4388_v12  ;;  %654 = vmatpush.msrb.mxu1 %v4495_v29 }
  0x7a   : > { %687 = vmatpush.msrb.mxu2 %v4388_v12  ;;  %742 = vmatpush.msrb.mxu3 %v4495_v29 }
  0x7b   : > { %600 = vmatpush.msrb.mxu0 %v4393_v16  ;;  %655 = vmatpush.msrb.mxu1 %v4497_v30 }
  0x7c   : > { %688 = vmatpush.msrb.mxu2 %v4393_v16  ;;  %743 = vmatpush.msrb.mxu3 %v4497_v30 }
  0x7d   : > { %601 = vmatpush.msrb.mxu0 %v4402_v19  ;;  %656 = vmatpush.msrb.mxu1 %v4501_v31 }
  0x7e   : > { %689 = vmatpush.msrb.mxu2 %v4402_v19  ;;  %744 = vmatpush.msrb.mxu3 %v4501_v31 }
  0x7f   : > { %602 = vmatpush.msrb.mxu0 %v4408_v20  ;;  %657 = vmatpush.msrb.mxu1 %v4505_v32 }
  0x80   : > { %690 = vmatpush.msrb.mxu2 %v4408_v20  ;;  %745 = vmatpush.msrb.mxu3 %v4505_v32 }
  0x81   : > { %603 = vmatpush.msrb.mxu0 %v4412_v21  ;;  %658 = vmatpush.msrb.mxu1 %v4509_v33 }
  0x82   : > { %691 = vmatpush.msrb.mxu2 %v4412_v21  ;;  %746 = vmatpush.msrb.mxu3 %v4509_v33 }
  0x83   : > { %604 = vmatpush.msrb.mxu0 %v4416_v22  ;;  %659 = vmatpush.msrb.mxu1 %v4513_v34 }
  0x84   : > { %692 = vmatpush.msrb.mxu2 %v4416_v22  ;;  %747 = vmatpush.msrb.mxu3 %v4513_v34 }
  0x85   : > { %605 = vmatpush.msrb.mxu0 %v4420_v23  ;;  %660 = vmatpush.msrb.mxu1 %v4517_v35 }
  0x86   : > { %693 = vmatpush.msrb.mxu2 %v4420_v23  ;;  %748 = vmatpush.msrb.mxu3 %v4517_v35 }
  0x87   : > { %606 = vmatpush.msrb.mxu0 %v4424_v24  ;;  %661 = vmatpush.msrb.mxu1 %v4521_v36 }
  0x88   : > { %694 = vmatpush.msrb.mxu2 %v4424_v24  ;;  %749 = vmatpush.msrb.mxu3 %v4521_v36 }
  0x89   : > { %607 = vmatpush.msrb.mxu0 %v4428_v25  ;;  %662 = vmatpush.msrb.mxu1 %v4525_v37 }
  0x8a   : > { %695 = vmatpush.msrb.mxu2 %v4428_v25  ;;  %750 = vmatpush.msrb.mxu3 %v4525_v37 }
  0x8b   : > { %608 = vmatpush.msrb.mxu0 %v4432_v26  ;;  %663 = vmatpush.msrb.mxu1 %v4531_v43 }
  0x8c   : > { %696 = vmatpush.msrb.mxu2 %v4432_v26  ;;  %751 = vmatpush.msrb.mxu3 %v4531_v43 }
  0x8d   : > { %609 = vmatpush.msrb.mxu0 %v4436_v27  ;;  %664 = vmatpush.msrb.mxu1 %v4533_v44 }
  0x8e   : > { %697 = vmatpush.msrb.mxu2 %v4436_v27  ;;  %752 = vmatpush.msrb.mxu3 %v4533_v44 }
  0x8f   : > { %610 = vmatpush.msrb.mxu0 %v4440_v28  ;;  %665 = vmatpush.msrb.mxu1 %v4537_v46 }
  0x90   : > { %698 = vmatpush.msrb.mxu2 %v4440_v28  ;;  %753 = vmatpush.msrb.mxu3 %v4537_v46 }
  0x91   : > { %771 = vmatpush.msra.mxu0 %v4361_v4  ;;  %666 = vmatpush.msrb.mxu1 %v4544_v51 }
  0x92   : > { %754 = vmatpush.msrb.mxu3 %v4544_v51 }
  0x93   : > { %772 = vmatpush.msra.mxu0 %v4363_v5  ;;  %667 = vmatpush.msrb.mxu1 %v4548_v53 }
  0x94   : > { %755 = vmatpush.msrb.mxu3 %v4548_v53 }
  0x95   : > { %773 = vmatpush.msra.mxu0 %v4370_v7  ;;  %668 = vmatpush.msrb.mxu1 %v4552_v55 }
  0x96   : > { %756 = vmatpush.msrb.mxu3 %v4552_v55 }
  0x97   : > { %774 = vmatpush.msra.mxu0 %v4375_v8  ;;  %669 = vmatpush.msrb.mxu1 %v4557_v57 }
  0x98   : > { %757 = vmatpush.msrb.mxu3 %v4557_v57 }
  0x99   : > { %775 = vmatpush.msra.mxu0 %v4388_v12 }
  0x9b   : > { %776 = vmatpush.msra.mxu0 %v4393_v16 }
  0x9d   : > { %777 = vmatpush.msra.mxu0 %v4402_v19 }
  0x9f   : > { %778 = vmatpush.msra.mxu0 %v4408_v20 }
  0xa1   : > { %779 = vmatpush.msra.mxu0 %v4412_v21 }
  0xa3   : > { %780 = vmatpush.msra.mxu0 %v4416_v22 }
  0xa5   : > { %781 = vmatpush.msra.mxu0 %v4420_v23 }
  0xa7   : > { %782 = vmatpush.msra.mxu0 %v4424_v24 }
  0xa9   : > { %783 = vmatpush.msra.mxu0 %v4428_v25 }
  0xab   : > { %784 = vmatpush.msra.mxu0 %v4432_v26 }
  0xad   : > { %785 = vmatpush.msra.mxu0 %v4436_v27 }
  0xaf   : > { %786 = vmatpush.msra.mxu0 %v4440_v28 }
  0xce   : > { %v450_v38 = vpop.xlane.xlu0 %449 }
  0xcf   : > { %v451_v39 = vrot.slane %v450_v38, 4 }
  0xd1   : > { %v452_v40 = vmax.f32 %v450_v38, %v451_v39  ;;  %v413_v39 = vld [vmem:[#allocation5] sm:$0x1] }
  0xd3   : > { %v453_v41 = vrot.slane %v452_v40, 2 }
  0xd5   : > { %v454_v42 = vmax.f32 %v452_v40, %v453_v41 }
  0xd7   : > { %v455_v45 = vrot.slane %v454_v42, 1 }
  0xd9   : > { %v456_v47 = vmax.f32 %v454_v42, %v455_v45  ;;  %v477_v42 = vmul.f32 0.95122945, %v413_v39 }
  0xdb   : > { %3639 = vpush %v456_v47  ;;  %v4668_v47 = vld [vmem:[%s7218_s3] sm:$0x1] }
  0xed   : > { %v435_v54 = vpop.f32.mrf.mxu0 }
  0xee   : > { %v438_v56 = vadd.f32 %v435_v54, %v417_v52  ;;  %v504_v54 = vld [vmem:[%s4339_s14 + $0x1] sm:$0x1] }
  0xf0   : > { %v3524_v58 = vadd.f32 -0.6, %v438_v56 }
  0xf2   : > { %v4563_v59 = vsel %vm439_vm4, %v3524_v58, %v438_v56 }
  0xf3   : > { %500 = vst [vmem:[%s4351_s12] sm:$0x1] %v4563_v59  ;;  %vm466_vm5 = vcmp.ge.f32.partialorder %v4563_v59, %v465_v61  ;;  %v505_v50 = vmul.f32 0.99501246, %v4563_v59 }
  0xf4   : > { %vm467_vm6 = vmand %vm466_vm5, %vm376_vm1 }
  0xf5   : > { %v3526_v0 = vsel %vm467_vm6, 1.0, %v4184_v10  ;;  %v506_v60 = vadd.f32 %v505_v50, %v504_v54  ;;  %v592_v50 = vld [vmem:[%s4339_s14 + $0x2] sm:$0x1] }
  0xf6   : > { %vm470_vm8 = vcmp.eq.f32.partialorder %v3526_v0, 1.0 }
  0xf7   : > { %v471_v11 = vsel %vm470_vm8, 0.0, %v4359_v3 }
 0x10c   : > { %s3640_s30 = spop %3639 }
 0x10d   : > { %p458_p1 = scmp.gt.f32.partialorder %s3640_s30, 0.0 }
 0x10f   : > { %s472_s23 = scalar_select %p458_p1, 1, 0 }
 0x111   : > { %v473_v9 = vstv %s472_s23 }
 0x112   : > { %vm474_vm9 = vcmp.eq.s32.totalorder %v473_v9, 1 }
 0x113   : > { %v4609_v13 = vsel %vm474_vm9, %v3525_v1, %v3526_v0  ;;  %v4611_v14 = vsel %vm474_vm9, %v460_v63, %v471_v11 }
 0x114   : > { %501 = vst [vmem:[%s4353_s18] sm:$0x1] %v4609_v13  ;;  %v4616_v15 = vadd.f32 %v531_v2, %v4609_v13  ;;  %494 = vmatmul.f32.vlgmr.msra.gmra.mxu1 %v4609_v13  ;;  %523 = vmatmul.f32.vlgmr.msra.gmra.mxu2 %v4609_v13  ;;  %vm533_vm10 = vcmp.lt.f32.partialorder %v4611_v14, 2.0  ;;  %vm528_vm12 = vcmp.eq.f32.partialorder %v4609_v13, 1.0  ;;  %v547_v9 = vadd.f32 1.0, %v4611_v14 }
 0x115   : > { %vm4623_vm11 = vmand %vm533_vm10, %vm376_vm1  ;;  %830 = vmatpush.msra.mxu1 %v4495_v29  ;;  %859 = vmatpush.msra.mxu2 %v4361_v4 }
 0x116   : > { %590 = vst [vmem:[%s4355_s9 + $0x1] sm:$0x1] %v4616_v15  ;;  %v535_v17 = vsel %vm4623_vm11, 1.0, %v4184_v10  ;;  %v552_v63 = vmul.f32 0.07, %v4616_v15  ;;  %v548_v11 = vsel %vm4623_vm11, %v547_v9, %v4611_v14 }
 0x117   : > { %v536_v18 = vsel %vm447_vm2, %v535_v17, -inf  ;;  %831 = vmatpush.msra.mxu1 %v4497_v30  ;;  %860 = vmatpush.msra.mxu2 %v4363_v5  ;;  %vm549_vm15 = vcmp.gt.f32.partialorder %v548_v11, 2.0  ;;  %v619_v39 = vmul.f32 0.99501246, %v4616_v15 }
 0x118   : > { %537 = vmax.xlane.f32.xlu0 %v536_v18  ;;  %v553_v59 = vadd.f32 0.6, %v552_v63  ;;  %v3528_v18 = vsel %vm549_vm15, 1.0, %v4184_v10 }
 0x119   : > { %832 = vmatpush.msra.mxu1 %v4501_v31  ;;  %861 = vmatpush.msra.mxu2 %v4370_v7 }
 0x11b   : > { %833 = vmatpush.msra.mxu1 %v4505_v32  ;;  %862 = vmatpush.msra.mxu2 %v4375_v8 }
 0x11d   : > { %834 = vmatpush.msra.mxu1 %v4509_v33  ;;  %863 = vmatpush.msra.mxu2 %v4388_v12 }
 0x11f   : > { %835 = vmatpush.msra.mxu1 %v4513_v34  ;;  %864 = vmatpush.msra.mxu2 %v4393_v16 }
 0x121   : > { %836 = vmatpush.msra.mxu1 %v4517_v35  ;;  %865 = vmatpush.msra.mxu2 %v4402_v19 }
 0x123   : > { %837 = vmatpush.msra.mxu1 %v4521_v36  ;;  %866 = vmatpush.msra.mxu2 %v4408_v20 }
 0x125   : > { %838 = vmatpush.msra.mxu1 %v4525_v37  ;;  %867 = vmatpush.msra.mxu2 %v4412_v21 }
 0x127   : > { %839 = vmatpush.msra.mxu1 %v4531_v43  ;;  %868 = vmatpush.msra.mxu2 %v4416_v22 }
 0x129   : > { %840 = vmatpush.msra.mxu1 %v4533_v44  ;;  %869 = vmatpush.msra.mxu2 %v4420_v23 }
 0x12b   : > { %841 = vmatpush.msra.mxu1 %v4537_v46  ;;  %870 = vmatpush.msra.mxu2 %v4424_v24 }
 0x12d   : > { %842 = vmatpush.msra.mxu1 %v4544_v51  ;;  %871 = vmatpush.msra.mxu2 %v4428_v25 }
 0x12f   : > { %843 = vmatpush.msra.mxu1 %v4548_v53  ;;  %872 = vmatpush.msra.mxu2 %v4432_v26 }
 0x131   : > { %844 = vmatpush.msra.mxu1 %v4552_v55  ;;  %873 = vmatpush.msra.mxu2 %v4436_v27 }
 0x133   : > { %845 = vmatpush.msra.mxu1 %v4557_v57  ;;  %874 = vmatpush.msra.mxu2 %v4440_v28 }
 0x18b   : > { %v538_v38 = vpop.xlane.xlu0 %537 }
 0x18c   : > { %v539_v40 = vrot.slane %v538_v38, 4 }
 0x18e   : > { %v540_v41 = vmax.f32 %v538_v38, %v539_v40 }
 0x190   : > { %v541_v45 = vrot.slane %v540_v41, 2 }
 0x191   : > { %v495_v48 = vpop.f32.mrf.mxu1 }
 0x192   : > { %v498_v49 = vadd.f32 %v495_v48, %v477_v42  ;;  %v542_v52 = vmax.f32 %v540_v41, %v541_v45 }
 0x194   : > { %v4673_v56 = vadd.f32 %v498_v49, %v4668_v47  ;;  %v543_v58 = vrot.slane %v542_v52, 1 }
 0x196   : > { %503 = vst [vmem:[%s4349_s29] sm:$0x1] %v4673_v56  ;;  %v544_v61 = vmax.f32 %v542_v52, %v543_v58  ;;  %v565_v9 = vmul.f32 0.95122945, %v4673_v56 }
 0x197   : > { %v524_v62 = vpop.f32.mrf.mxu2 }
 0x198   : > { %v527_v0 = vadd.f32 %v524_v62, %v506_v60  ;;  %3641 = vpush %v544_v61 }
 0x19a   : > { %v3527_v1 = vadd.f32 -0.6, %v527_v0 }
 0x19c   : > { %v530_v2 = vsel %vm528_vm12, %v3527_v1, %v527_v0 }
 0x19d   : > { %vm554_vm13 = vcmp.ge.f32.partialorder %v530_v2, %v553_v59  ;;  %588 = vst [vmem:[%s4351_s12 + $0x1] sm:$0x1] %v530_v2  ;;  %v593_v49 = vmul.f32 0.99501246, %v530_v2 }
 0x19e   : > { %vm555_vm14 = vmand %vm554_vm13, %vm376_vm1 }
 0x19f   : > { %v3529_v17 = vsel %vm555_vm14, 1.0, %v4184_v10  ;;  %v594_v58 = vadd.f32 %v593_v49, %v592_v50 }
 0x1a0   : > { %vm558_vm0 = vcmp.eq.f32.partialorder %v3529_v17, 1.0 }
 0x1a1   : > { %v559_v38 = vsel %vm558_vm0, 0.0, %v4611_v14 }
 0x1c9   : > { %s3642_s20 = spop %3641 }
 0x1ca   : > { %p546_p4 = scmp.gt.f32.partialorder %s3642_s20, 0.0 }
 0x1cc   : > { %s560_s13 = scalar_select %p546_p4, 1, 0 }
 0x1ce   : > { %v561_v13 = vstv %s560_s13 }
 0x1cf   : > { %vm562_vm3 = vcmp.eq.s32.totalorder %v561_v13, 1 }
 0x1d0   : > { %v563_v40 = vsel %vm562_vm3, %v3528_v18, %v3529_v17  ;;  %v4690_v41 = vsel %vm562_vm3, %v548_v11, %v559_v38 }
 0x1d1   : > { %589 = vst [vmem:[%s4353_s18 + $0x1] sm:$0x1] %v563_v40  ;;  %v4693_v3 = vadd.f32 %v619_v39, %v563_v40  ;;  %582 = vmatmul.f32.vlgmr.msra.gmra.mxu3 %v563_v40  ;;  %611 = vmatmul.f32.vlgmr.msrb.gmra.mxu0 %v563_v40  ;;  %vm621_vm4 = vcmp.lt.f32.partialorder %v4690_v41, 2.0  ;;  %vm616_vm6 = vcmp.eq.f32.partialorder %v563_v40, 1.0  ;;  %v635_v38 = vadd.f32 1.0, %v4690_v41 }
 0x1d2   : > { %vm4698_vm5 = vmand %vm621_vm4, %vm376_vm1  ;;  %918 = vmatpush.msra.mxu3 %v4495_v29  ;;  %947 = vmatpush.msrb.mxu0 %v4361_v4 }
 0x1d3   : > { %678 = vst [vmem:[%s4355_s9 + $0x2] sm:$0x1] %v4693_v3  ;;  %v623_v14 = vsel %vm4698_vm5, 1.0, %v4184_v10  ;;  %v640_v61 = vmul.f32 0.07, %v4693_v3  ;;  %v636_v56 = vsel %vm4698_vm5, %v635_v38, %v4690_v41 }
 0x1d4   : > { %v624_v15 = vsel %vm447_vm2, %v623_v14, -inf  ;;  %919 = vmatpush.msra.mxu3 %v4497_v30  ;;  %948 = vmatpush.msrb.mxu0 %v4363_v5  ;;  %vm637_vm9 = vcmp.gt.f32.partialorder %v636_v56, 2.0 }
 0x1d5   : > { %625 = vmax.xlane.f32.xlu1 %v624_v15  ;;  %v641_v59 = vadd.f32 0.6, %v640_v61  ;;  %v3531_v14 = vsel %vm637_vm9, 1.0, %v4184_v10 }
 0x1d6   : > { %920 = vmatpush.msra.mxu3 %v4501_v31  ;;  %949 = vmatpush.msrb.mxu0 %v4370_v7 }
 0x1d8   : > { %921 = vmatpush.msra.mxu3 %v4505_v32  ;;  %950 = vmatpush.msrb.mxu0 %v4375_v8 }
 0x1da   : > { %922 = vmatpush.msra.mxu3 %v4509_v33  ;;  %951 = vmatpush.msrb.mxu0 %v4388_v12 }
 0x1dc   : > { %923 = vmatpush.msra.mxu3 %v4513_v34  ;;  %952 = vmatpush.msrb.mxu0 %v4393_v16 }
 0x1de   : > { %924 = vmatpush.msra.mxu3 %v4517_v35  ;;  %953 = vmatpush.msrb.mxu0 %v4402_v19 }
 0x1e0   : > { %925 = vmatpush.msra.mxu3 %v4521_v36  ;;  %954 = vmatpush.msrb.mxu0 %v4408_v20 }
 0x1e2   : > { %926 = vmatpush.msra.mxu3 %v4525_v37  ;;  %955 = vmatpush.msrb.mxu0 %v4412_v21 }
 0x1e4   : > { %927 = vmatpush.msra.mxu3 %v4531_v43  ;;  %956 = vmatpush.msrb.mxu0 %v4416_v22 }
 0x1e6   : > { %928 = vmatpush.msra.mxu3 %v4533_v44  ;;  %957 = vmatpush.msrb.mxu0 %v4420_v23 }
 0x1e8   : > { %929 = vmatpush.msra.mxu3 %v4537_v46  ;;  %958 = vmatpush.msrb.mxu0 %v4424_v24 }
 0x1ea   : > { %930 = vmatpush.msra.mxu3 %v4544_v51  ;;  %959 = vmatpush.msrb.mxu0 %v4428_v25 }
 0x1ec   : > { %931 = vmatpush.msra.mxu3 %v4548_v53  ;;  %960 = vmatpush.msrb.mxu0 %v4432_v26 }
 0x1ee   : > { %932 = vmatpush.msra.mxu3 %v4552_v55  ;;  %961 = vmatpush.msrb.mxu0 %v4436_v27 }
 0x1f0   : > { %933 = vmatpush.msra.mxu3 %v4557_v57  ;;  %962 = vmatpush.msrb.mxu0 %v4440_v28 }
 0x248   : > { %v626_v45 = vpop.xlane.xlu1 %625 }
 0x249   : > { %v627_v48 = vrot.slane %v626_v45, 4 }
 0x24b   : > { %v628_v52 = vmax.f32 %v626_v45, %v627_v48  ;;  %v707_v45 = vmul.f32 0.99501246, %v4693_v3 }
 0x24d   : > { %v629_v54 = vrot.slane %v628_v52, 2 }
 0x24e   : > { %v612_v60 = vpop.f32.mrf.mxu0 }
 0x24f   : > { %v615_v62 = vadd.f32 %v612_v60, %v594_v58  ;;  %v630_v63 = vmax.f32 %v628_v52, %v629_v54 }
 0x251   : > { %v3530_v0 = vadd.f32 -0.6, %v615_v62  ;;  %v631_v1 = vrot.slane %v630_v63, 1 }
 0x253   : > { %v4743_v11 = vsel %vm616_vm6, %v3530_v0, %v615_v62  ;;  %v632_v2 = vmax.f32 %v630_v63, %v631_v1 }
 0x254   : > { %vm642_vm7 = vcmp.ge.f32.partialorder %v4743_v11, %v641_v59  ;;  %676 = vst [vmem:[%s4351_s12 + $0x2] sm:$0x1] %v4743_v11  ;;  %v583_v17 = vpop.f32.mrf.mxu3  ;;  %v681_v0 = vmul.f32 0.99501246, %v4743_v11  ;;  %v680_v59 = vld [vmem:[%s4339_s14 + $0x3] sm:$0x1] }
 0x255   : > { %v586_v13 = vadd.f32 %v583_v17, %v565_v9  ;;  %3643 = vpush %v632_v2  ;;  %vm643_vm8 = vmand %vm642_vm7, %vm376_vm1 }
 0x256   : > { %v3532_v39 = vsel %vm643_vm8, 1.0, %v4184_v10  ;;  %v682_v17 = vadd.f32 %v681_v0, %v680_v59 }
 0x257   : > { %v4749_v18 = vadd.f32 %v586_v13, %v4668_v47  ;;  %vm646_vm10 = vcmp.eq.f32.partialorder %v3532_v39, 1.0 }
 0x258   : > { %v647_v15 = vsel %vm646_vm10, 0.0, %v4690_v41 }
 0x259   : > { %591 = vst [vmem:[%s4349_s29 + $0x1] sm:$0x1] %v4749_v18  ;;  %v653_v60 = vmul.f32 0.95122945, %v4749_v18 }
 0x286   : > { %s3644_s21 = spop %3643 }
 0x287   : > { %p634_p9 = scmp.gt.f32.partialorder %s3644_s21, 0.0 }
 0x289   : > { %s648_s19 = scalar_select %p634_p9, 1, 0 }
 0x28b   : > { %v649_v40 = vstv %s648_s19 }
 0x28c   : > { %vm650_vm11 = vcmp.eq.s32.totalorder %v649_v40, 1 }
 0x28d   : > { %v4763_v48 = vsel %vm650_vm11, %v3531_v14, %v3532_v39  ;;  %v4765_v42 = vsel %vm650_vm11, %v636_v56, %v647_v15 }
 0x28e   : > { %677 = vst [vmem:[%s4353_s18 + $0x2] sm:$0x1] %v4763_v48  ;;  %v4770_v49 = vadd.f32 %v707_v45, %v4763_v48  ;;  %670 = vmatmul.f32.vlgmr.msrb.gmra.mxu1 %v4763_v48  ;;  %699 = vmatmul.f32.vlgmr.msrb.gmra.mxu2 %v4763_v48  ;;  %vm709_vm12 = vcmp.lt.f32.partialorder %v4765_v42, 2.0  ;;  %vm704_vm14 = vcmp.eq.f32.partialorder %v4763_v48, 1.0  ;;  %v723_v14 = vadd.f32 1.0, %v4765_v42 }
 0x28f   : > { %vm4777_vm13 = vmand %vm709_vm12, %vm376_vm1  ;;  %1006 = vmatpush.msrb.mxu1 %v4495_v29  ;;  %1035 = vmatpush.msrb.mxu2 %v4361_v4 }
 0x290   : > { %766 = vst [vmem:[%s4355_s9 + $0x3] sm:$0x1] %v4770_v49  ;;  %v711_v3 = vsel %vm4777_vm13, 1.0, %v4184_v10  ;;  %v728_v56 = vmul.f32 0.07, %v4770_v49  ;;  %v724_v15 = vsel %vm4777_vm13, %v723_v14, %v4765_v42 }
 0x291   : > { %v712_v50 = vsel %vm447_vm2, %v711_v3, -inf  ;;  %1007 = vmatpush.msrb.mxu1 %v4497_v30  ;;  %1036 = vmatpush.msrb.mxu2 %v4363_v5  ;;  %vm725_vm3 = vcmp.gt.f32.partialorder %v724_v15, 2.0 }
 0x292   : > { %713 = vmax.xlane.f32.xlu1 %v712_v50  ;;  %v729_v11 = vadd.f32 0.6, %v728_v56  ;;  %v3534_v3 = vsel %vm725_vm3, 1.0, %v4184_v10 }
 0x293   : > { %1008 = vmatpush.msrb.mxu1 %v4501_v31  ;;  %1037 = vmatpush.msrb.mxu2 %v4370_v7 }
 0x295   : > { %1009 = vmatpush.msrb.mxu1 %v4505_v32  ;;  %1038 = vmatpush.msrb.mxu2 %v4375_v8 }
 0x297   : > { %1010 = vmatpush.msrb.mxu1 %v4509_v33  ;;  %1039 = vmatpush.msrb.mxu2 %v4388_v12 }
 0x299   : > { %1011 = vmatpush.msrb.mxu1 %v4513_v34  ;;  %1040 = vmatpush.msrb.mxu2 %v4393_v16 }
 0x29b   : > { %1012 = vmatpush.msrb.mxu1 %v4517_v35  ;;  %1041 = vmatpush.msrb.mxu2 %v4402_v19 }
 0x29d   : > { %1013 = vmatpush.msrb.mxu1 %v4521_v36  ;;  %1042 = vmatpush.msrb.mxu2 %v4408_v20 }
 0x29f   : > { %1014 = vmatpush.msrb.mxu1 %v4525_v37  ;;  %1043 = vmatpush.msrb.mxu2 %v4412_v21 }
 0x2a1   : > { %1015 = vmatpush.msrb.mxu1 %v4531_v43  ;;  %1044 = vmatpush.msrb.mxu2 %v4416_v22 }
 0x2a3   : > { %1016 = vmatpush.msrb.mxu1 %v4533_v44  ;;  %1045 = vmatpush.msrb.mxu2 %v4420_v23 }
 0x2a5   : > { %1017 = vmatpush.msrb.mxu1 %v4537_v46  ;;  %1046 = vmatpush.msrb.mxu2 %v4424_v24 }
 0x2a7   : > { %1018 = vmatpush.msrb.mxu1 %v4544_v51  ;;  %1047 = vmatpush.msrb.mxu2 %v4428_v25 }
 0x2a9   : > { %1019 = vmatpush.msrb.mxu1 %v4548_v53  ;;  %1048 = vmatpush.msrb.mxu2 %v4432_v26 }
 0x2ab   : > { %1020 = vmatpush.msrb.mxu1 %v4552_v55  ;;  %1049 = vmatpush.msrb.mxu2 %v4436_v27 }
 0x2ad   : > { %1021 = vmatpush.msrb.mxu1 %v4557_v57  ;;  %1050 = vmatpush.msrb.mxu2 %v4440_v28 }
 0x305   : > { %v714_v52 = vpop.xlane.xlu1 %713 }
 0x306   : > { %v715_v54 = vrot.slane %v714_v52, 4 }
 0x308   : > { %v716_v58 = vmax.f32 %v714_v52, %v715_v54  ;;  %v795_v52 = vmul.f32 0.99501246, %v4770_v49 }
 0x30a   : > { %v717_v61 = vrot.slane %v716_v58, 2 }
 0x30b   : > { %v671_v62 = vpop.f32.mrf.mxu1 }
 0x30c   : > { %v674_v63 = vadd.f32 %v671_v62, %v653_v60  ;;  %v718_v1 = vmax.f32 %v716_v58, %v717_v61 }
 0x30e   : > { %v4823_v9 = vadd.f32 %v674_v63, %v4668_v47  ;;  %v719_v2 = vrot.slane %v718_v1, 1 }
 0x310   : > { %679 = vst [vmem:[%s4349_s29 + $0x2] sm:$0x1] %v4823_v9  ;;  %v720_v13 = vmax.f32 %v718_v1, %v719_v2 }
 0x311   : > { %v700_v38 = vpop.f32.mrf.mxu2 }
 0x312   : > { %v703_v18 = vadd.f32 %v700_v38, %v682_v17  ;;  %3645 = vpush %v720_v13 }
 0x314   : > { %v3533_v39 = vadd.f32 -0.6, %v703_v18 }
 0x316   : > { %v706_v40 = vsel %vm704_vm14, %v3533_v39, %v703_v18 }
 0x317   : > { %vm730_vm15 = vcmp.ge.f32.partialorder %v706_v40, %v729_v11  ;;  %764 = vst [vmem:[%s4351_s12 + $0x3] sm:$0x1] %v706_v40  ;;  %v5086_v11 = vld [vmem:[#allocation12 + $0x30] sm:$0xff] }
 0x318   : > { %vm731_vm0 = vmand %vm730_vm15, %vm376_vm1 }
 0x319   : > { %v3535_v45 = vsel %vm731_vm0, 1.0, %v4184_v10 }
 0x31a   : > { %vm734_vm4 = vcmp.eq.f32.partialorder %v3535_v45, 1.0 }
 0x31b   : > { %v735_v50 = vsel %vm734_vm4, 0.0, %v4765_v42 }
 0x343   : > { %s3646_s1 = spop %3645 }
 0x344   : > { %p722_p12 = scmp.gt.f32.partialorder %s3646_s1, 0.0 }
 0x346   : > { %s736_s30 = scalar_select %p722_p12, 1, 0 }
 0x348   : > { %v737_v48 = vstv %s736_s30 }
 0x349   : > { %vm738_vm5 = vcmp.eq.s32.totalorder %v737_v48, 1  ;;  %v4950_v48 = vld [vmem:[#allocation10 + $0x60] sm:$0xff] }
 0x34a   : > { %v739_v54 = vsel %vm738_vm5, %v3534_v3, %v3535_v45  ;;  %v4840_v58 = vsel %vm738_vm5, %v724_v15, %v735_v50  ;;  %v4942_v45 = vld [vmem:[#allocation10 + $0x70] sm:$0xff] }
 0x34b   : > { %765 = vst [vmem:[%s4353_s18 + $0x3] sm:$0x1] %v739_v54  ;;  %v4843_v41 = vadd.f32 %v795_v52, %v739_v54  ;;  %758 = vmatmul.f32.vlgmr.msrb.gmra.mxu3 %v739_v54  ;;  %787 = vmatmul.f32.vlgmr.msra.gmra.mxu0 %v739_v54  ;;  %vm797_vm6 = vcmp.lt.f32.partialorder %v4840_v58, 2.0  ;;  %vm792_vm8 = vcmp.eq.f32.partialorder %v739_v54, 1.0  ;;  %v811_v1 = vadd.f32 1.0, %v4840_v58  ;;  %v4958_v3 = vld [vmem:[#allocation10 + $0x50] sm:$0xff] }
 0x34c   : > { %vm4848_vm7 = vmand %vm797_vm6, %vm376_vm1  ;;  %1094 = vmatpush.msrb.mxu3 %v4495_v29  ;;  %1123 = vmatpush.msra.mxu0 %v4361_v4 }
 0x34d   : > { %854 = vst [vmem:[%s4355_s9 + $0x4] sm:$0x1] %v4843_v41  ;;  %v799_v42 = vsel %vm4848_vm7, 1.0, %v4184_v10  ;;  %v812_v59 = vsel %vm4848_vm7, %v811_v1, %v4840_v58  ;;  %v883_v38 = vmul.f32 0.99501246, %v4843_v41 }
 0x34e   : > { %v800_v49 = vsel %vm447_vm2, %v799_v42, -inf  ;;  %1095 = vmatpush.msrb.mxu3 %v4497_v30  ;;  %1124 = vmatpush.msra.mxu0 %v4363_v5  ;;  %vm813_vm11 = vcmp.gt.f32.partialorder %v812_v59, 2.0  ;;  %v856_v42 = vld [vmem:[%s4339_s14 + $0x5] sm:$0x1] }
 0x34f   : > { %801 = vmax.xlane.f32.xlu2 %v800_v49  ;;  %v3537_v17 = vsel %vm813_vm11, 1.0, %v4184_v10 }
 0x350   : > { %1096 = vmatpush.msrb.mxu3 %v4501_v31  ;;  %1125 = vmatpush.msra.mxu0 %v4370_v7  ;;  %v769_v7 = vmul.f32 0.99501246, %v706_v40  ;;  %v4932_v40 = vld [vmem:[#allocation10 + $0x78] sm:$0xff] }
 0x352   : > { %1097 = vmatpush.msrb.mxu3 %v4505_v32  ;;  %1126 = vmatpush.msra.mxu0 %v4375_v8  ;;  %v768_v8 = vld [vmem:[%s4339_s14 + $0x4] sm:$0x1] }
 0x354   : > { %1098 = vmatpush.msrb.mxu3 %v4509_v33  ;;  %1127 = vmatpush.msra.mxu0 %v4388_v12 }
 0x356   : > { %1099 = vmatpush.msrb.mxu3 %v4513_v34  ;;  %1128 = vmatpush.msra.mxu0 %v4393_v16 }
 0x358   : > { %1100 = vmatpush.msrb.mxu3 %v4517_v35  ;;  %1129 = vmatpush.msra.mxu0 %v4402_v19  ;;  %v770_v19 = vadd.f32 %v769_v7, %v768_v8 }
 0x35a   : > { %1101 = vmatpush.msrb.mxu3 %v4521_v36  ;;  %1130 = vmatpush.msra.mxu0 %v4408_v20 }
 0x35c   : > { %1102 = vmatpush.msrb.mxu3 %v4525_v37  ;;  %1131 = vmatpush.msra.mxu0 %v4412_v21  ;;  %v816_v21 = vmul.f32 0.07, %v4843_v41 }
 0x35e   : > { %1103 = vmatpush.msrb.mxu3 %v4531_v43  ;;  %1132 = vmatpush.msra.mxu0 %v4416_v22 }
 0x360   : > { %1104 = vmatpush.msrb.mxu3 %v4533_v44  ;;  %1133 = vmatpush.msra.mxu0 %v4420_v23 }
 0x362   : > { %1105 = vmatpush.msrb.mxu3 %v4537_v46  ;;  %1134 = vmatpush.msra.mxu0 %v4424_v24 }
 0x364   : > { %1106 = vmatpush.msrb.mxu3 %v4544_v51  ;;  %1135 = vmatpush.msra.mxu0 %v4428_v25 }
 0x366   : > { %1107 = vmatpush.msrb.mxu3 %v4548_v53  ;;  %1136 = vmatpush.msra.mxu0 %v4432_v26  ;;  %v817_v26 = vadd.f32 0.6, %v816_v21 }
 0x368   : > { %1108 = vmatpush.msrb.mxu3 %v4552_v55  ;;  %1137 = vmatpush.msra.mxu0 %v4436_v27 }
 0x36a   : > { %1109 = vmatpush.msrb.mxu3 %v4557_v57  ;;  %1138 = vmatpush.msra.mxu0 %v4440_v28  ;;  %v741_v28 = vmul.f32 0.95122945, %v4823_v9 }
 0x3c2   : > { %v802_v4 = vpop.xlane.xlu2 %801 }
 0x3c3   : > { %v803_v5 = vrot.slane %v802_v4, 4 }
 0x3c5   : > { %v804_v12 = vmax.f32 %v802_v4, %v803_v5 }
 0x3c7   : > { %v805_v16 = vrot.slane %v804_v12, 2 }
 0x3c8   : > { %v788_v20 = vpop.f32.mrf.mxu0 }
 0x3c9   : > { %v791_v22 = vadd.f32 %v788_v20, %v770_v19  ;;  %v806_v23 = vmax.f32 %v804_v12, %v805_v16 }
 0x3cb   : > { %v3536_v24 = vadd.f32 -0.6, %v791_v22  ;;  %v807_v25 = vrot.slane %v806_v23, 1 }
 0x3cd   : > { %v4892_v27 = vsel %vm792_vm8, %v3536_v24, %v791_v22  ;;  %v808_v61 = vmax.f32 %v806_v23, %v807_v25 }
 0x3ce   : > { %vm818_vm9 = vcmp.ge.f32.partialorder %v4892_v27, %v817_v26  ;;  %852 = vst [vmem:[%s4351_s12 + $0x4] sm:$0x1] %v4892_v27  ;;  %v759_v62 = vpop.f32.mrf.mxu3 }
 0x3cf   : > { %v762_v63 = vadd.f32 %v759_v62, %v741_v28  ;;  %3647 = vpush %v808_v61  ;;  %vm819_vm10 = vmand %vm818_vm9, %vm376_vm1 }
 0x3d0   : > { %v3538_v9 = vsel %vm819_vm10, 1.0, %v4184_v10 }
 0x3d1   : > { %v4899_v0 = vadd.f32 %v762_v63, %v4668_v47  ;;  %vm822_vm12 = vcmp.eq.f32.partialorder %v3538_v9, 1.0 }
 0x3d2   : > { %v823_v13 = vsel %vm822_vm12, 0.0, %v4840_v58 }
 0x3d3   : > { %767 = vst [vmem:[%s4349_s29 + $0x3] sm:$0x1] %v4899_v0  ;;  %v829_v54 = vmul.f32 0.95122945, %v4899_v0  ;;  %v5044_v0 = vld [vmem:[#allocation12 + $0x78] sm:$0xff] }
 0x400   : > { %s3648_s23 = spop %3647 }
 0x401   : > { %p810_p2 = scmp.gt.f32.partialorder %s3648_s23, 0.0 }
 0x403   : > { %s824_s16 = scalar_select %p810_p2, 1, 0 }
 0x405   : > { %v825_v2 = vstv %s824_s16 }
 0x406   : > { %vm826_vm13 = vcmp.eq.s32.totalorder %v825_v2, 1  ;;  %v5058_v2 = vld [vmem:[#allocation12 + $0x68] sm:$0xff] }
 0x407   : > { %v4913_v56 = vsel %vm826_vm13, %v3537_v17, %v3538_v9  ;;  %v4915_v18 = vsel %vm826_vm13, %v812_v59, %v823_v13  ;;  %v5054_v9 = vld [vmem:[#allocation12 + $0x70] sm:$0xff]  ;;  %v5062_v17 = vld [vmem:[#allocation12 + $0x60] sm:$0xff]  ;;  %v5066_v13 = vld [vmem:[#allocation12 + $0x58] sm:$0xff] }
 0x408   : > { %853 = vst [vmem:[%s4353_s18 + $0x4] sm:$0x1] %v4913_v56  ;;  %v4920_v39 = vadd.f32 %v883_v38, %v4913_v56  ;;  %846 = vmatmul.f32.vlgmr.msra.gmra.mxu1 %v4913_v56  ;;  %875 = vmatmul.f32.vlgmr.msra.gmra.mxu2 %v4913_v56  ;;  %vm885_vm14 = vcmp.lt.f32.partialorder %v4915_v18, 2.0  ;;  %vm880_vm0 = vcmp.eq.f32.partialorder %v4913_v56, 1.0  ;;  %v899_v21 = vadd.f32 1.0, %v4915_v18  ;;  %v5070_v38 = vld [vmem:[#allocation12 + $0x50] sm:$0xff] }
 0x409   : > { %vm4927_vm15 = vmand %vm885_vm14, %vm376_vm1  ;;  %1182 = vmatpush.msra.mxu1 %v4495_v29  ;;  %1211 = vmatpush.msra.mxu2 %v4932_v40  ;;  %v4946_v29 = vld [vmem:[#allocation10 + $0x68] sm:$0xff] }
 0x40a   : > { %942 = vst [vmem:[%s4355_s9 + $0x5] sm:$0x1] %v4920_v39  ;;  %v887_v14 = vsel %vm4927_vm15, 1.0, %v4184_v10  ;;  %v904_v8 = vmul.f32 0.07, %v4920_v39  ;;  %v900_v22 = vsel %vm4927_vm15, %v899_v21, %v4915_v18  ;;  %v5074_v56 = vld [vmem:[#allocation12 + $0x48] sm:$0xff] }
 0x40b   : > { %v888_v15 = vsel %vm447_vm2, %v887_v14, -inf  ;;  %1183 = vmatpush.msra.mxu1 %v4497_v30  ;;  %1212 = vmatpush.msra.mxu2 %v4942_v45  ;;  %v4954_v30 = vld [vmem:[#allocation10 + $0x58] sm:$0xff]  ;;  %vm901_vm5 = vcmp.gt.f32.partialorder %v900_v22, 2.0  ;;  %v5090_v14 = vld [vmem:[#allocation12 + $0x28] sm:$0xff] }
 0x40c   : > { %889 = vmax.xlane.f32.xlu2 %v888_v15  ;;  %v905_v19 = vadd.f32 0.6, %v904_v8  ;;  %v3540_v25 = vsel %vm901_vm5, 1.0, %v4184_v10  ;;  %v5094_v15 = vld [vmem:[#allocation12 + $0x20] sm:$0xff] }
 0x40d   : > { %1184 = vmatpush.msra.mxu1 %v4501_v31  ;;  %1213 = vmatpush.msra.mxu2 %v4946_v29  ;;  %v4962_v31 = vld [vmem:[#allocation10 + $0x48] sm:$0xff] }
 0x40f   : > { %1185 = vmatpush.msra.mxu1 %v4505_v32  ;;  %1214 = vmatpush.msra.mxu2 %v4950_v48  ;;  %v4966_v32 = vld [vmem:[#allocation10 + $0x40] sm:$0xff] }
 0x411   : > { %1186 = vmatpush.msra.mxu1 %v4509_v33  ;;  %1215 = vmatpush.msra.mxu2 %v4954_v30  ;;  %v4970_v33 = vld [vmem:[#allocation10 + $0x38] sm:$0xff] }
 0x413   : > { %1187 = vmatpush.msra.mxu1 %v4513_v34  ;;  %1216 = vmatpush.msra.mxu2 %v4958_v3  ;;  %v4974_v34 = vld [vmem:[#allocation10 + $0x30] sm:$0xff] }
 0x415   : > { %1188 = vmatpush.msra.mxu1 %v4517_v35  ;;  %1217 = vmatpush.msra.mxu2 %v4962_v31  ;;  %v4978_v35 = vld [vmem:[#allocation10 + $0x28] sm:$0xff] }
 0x417   : > { %1189 = vmatpush.msra.mxu1 %v4521_v36  ;;  %1218 = vmatpush.msra.mxu2 %v4966_v32  ;;  %v4982_v36 = vld [vmem:[#allocation10 + $0x20] sm:$0xff] }
 0x419   : > { %1190 = vmatpush.msra.mxu1 %v4525_v37  ;;  %1219 = vmatpush.msra.mxu2 %v4970_v33  ;;  %v4986_v37 = vld [vmem:[#allocation10 + $0x18] sm:$0xff] }
 0x41b   : > { %1191 = vmatpush.msra.mxu1 %v4531_v43  ;;  %1220 = vmatpush.msra.mxu2 %v4974_v34  ;;  %v4990_v43 = vld [vmem:[#allocation10 + $0x10] sm:$0xff] }
 0x41d   : > { %1192 = vmatpush.msra.mxu1 %v4533_v44  ;;  %1221 = vmatpush.msra.mxu2 %v4978_v35  ;;  %v4994_v44 = vld [vmem:[#allocation10 + $0x8] sm:$0xff] }
 0x41f   : > { %1193 = vmatpush.msra.mxu1 %v4537_v46  ;;  %1222 = vmatpush.msra.mxu2 %v4982_v36  ;;  %v4998_v46 = vld [vmem:[#allocation10] sm:$0xff] }
 0x421   : > { %1194 = vmatpush.msra.mxu1 %v4544_v51  ;;  %1223 = vmatpush.msra.mxu2 %v4986_v37 }
 0x423   : > { %1195 = vmatpush.msra.mxu1 %v4548_v53  ;;  %1224 = vmatpush.msra.mxu2 %v4990_v43 }
 0x425   : > { %1196 = vmatpush.msra.mxu1 %v4552_v55  ;;  %1225 = vmatpush.msra.mxu2 %v4994_v44  ;;  %v857_v55 = vmul.f32 0.99501246, %v4892_v27  ;;  %v971_v27 = vmul.f32 0.99501246, %v4920_v39  ;;  %v5082_v39 = vld [vmem:[#allocation12 + $0x38] sm:$0xff] }
 0x427   : > { %1197 = vmatpush.msra.mxu1 %v4557_v57  ;;  %1226 = vmatpush.msra.mxu2 %v4998_v46  ;;  %v858_v4 = vadd.f32 %v857_v55, %v856_v42  ;;  %v944_v55 = vld [vmem:[%s4339_s14 + $0x6] sm:$0x1] }
 0x47f   : > { %v890_v51 = vpop.xlane.xlu2 %889 }
 0x480   : > { %v891_v53 = vrot.slane %v890_v51, 4 }
 0x482   : > { %v892_v50 = vmax.f32 %v890_v51, %v891_v53  ;;  %v5098_v51 = vld [vmem:[#allocation12 + $0x18] sm:$0xff]  ;;  %v5102_v53 = vld [vmem:[#allocation12 + $0x10] sm:$0xff] }
 0x484   : > { %v893_v52 = vrot.slane %v892_v50, 2 }
 0x485   : > { %v847_v58 = vpop.f32.mrf.mxu1 }
 0x486   : > { %v850_v41 = vadd.f32 %v847_v58, %v829_v54  ;;  %v894_v60 = vmax.f32 %v892_v50, %v893_v52  ;;  %v5106_v50 = vld [vmem:[#allocation12 + $0x8] sm:$0xff]  ;;  %v5110_v52 = vld [vmem:[#allocation12] sm:$0xff] }
 0x488   : > { %v5005_v49 = vadd.f32 %v850_v41, %v4668_v47  ;;  %v895_v57 = vrot.slane %v894_v60, 1 }
 0x48a   : > { %855 = vst [vmem:[%s4349_s29 + $0x4] sm:$0x1] %v5005_v49  ;;  %v896_v5 = vmax.f32 %v894_v60, %v895_v57 }
 0x48b   : > { %v876_v7 = vpop.f32.mrf.mxu2 }
 0x48c   : > { %v879_v12 = vadd.f32 %v876_v7, %v858_v4  ;;  %3649 = vpush %v896_v5 }
 0x48e   : > { %v3539_v16 = vadd.f32 -0.6, %v879_v12 }
 0x490   : > { %v5011_v20 = vsel %vm880_vm0, %v3539_v16, %v879_v12 }
 0x491   : > { %vm906_vm3 = vcmp.ge.f32.partialorder %v5011_v20, %v905_v19  ;;  %940 = vst [vmem:[%s4351_s12 + $0x5] sm:$0x1] %v5011_v20  ;;  %v945_v41 = vmul.f32 0.99501246, %v5011_v20  ;;  %v917_v20 = vmul.f32 0.95122945, %v5005_v49 }
 0x492   : > { %vm907_vm4 = vmand %vm906_vm3, %vm376_vm1 }
 0x493   : > { %v3541_v23 = vsel %vm907_vm4, 1.0, %v4184_v10  ;;  %v946_v57 = vadd.f32 %v945_v41, %v944_v55 }
 0x494   : > { %vm910_vm6 = vcmp.eq.f32.partialorder %v3541_v23, 1.0 }
 0x495   : > { %v911_v26 = vsel %vm910_vm6, 0.0, %v4915_v18  ;;  %v5078_v18 = vld [vmem:[#allocation12 + $0x40] sm:$0xff] }
 0x4bd   : > { %s3650_s17 = spop %3649 }
 0x4be   : > { %p898_p11 = scmp.gt.f32.partialorder %s3650_s17, 0.0 }
 0x4c0   : > { %s912_s20 = scalar_select %p898_p11, 1, 0 }
 0x4c2   : > { %v913_v24 = vstv %s912_s20 }
 0x4c3   : > { %vm914_vm7 = vcmp.eq.s32.totalorder %v913_v24, 1 }
 0x4c4   : > { %v5026_v28 = vsel %vm914_vm7, %v3540_v25, %v3541_v23  ;;  %v5028_v61 = vsel %vm914_vm7, %v900_v22, %v911_v26 }
 0x4c5   : > { %941 = vst [vmem:[%s4353_s18 + $0x5] sm:$0x1] %v5026_v28  ;;  %v5033_v62 = vadd.f32 %v971_v27, %v5026_v28  ;;  %934 = vmatmul.f32.vlgmr.msra.gmra.mxu3 %v5026_v28  ;;  %963 = vmatmul.f32.vlgmr.msrb.gmra.mxu0 %v5026_v28  ;;  %vm973_vm8 = vcmp.lt.f32.partialorder %v5028_v61, 2.0  ;;  %vm968_vm10 = vcmp.eq.f32.partialorder %v5026_v28, 1.0  ;;  %v987_v26 = vadd.f32 1.0, %v5028_v61 }
 0x4c6   : > { %vm5040_vm9 = vmand %vm973_vm8, %vm376_vm1  ;;  %1270 = vmatpush.msra.mxu3 %v5044_v0  ;;  %1299 = vmatpush.msrb.mxu0 %v4932_v40 }
 0x4c7   : > { %1030 = vst [vmem:[%s4355_s9 + $0x6] sm:$0x1] %v5033_v62  ;;  %v975_v1 = vsel %vm5040_vm9, 1.0, %v4184_v10  ;;  %v992_v5 = vmul.f32 0.07, %v5033_v62  ;;  %v988_v49 = vsel %vm5040_vm9, %v987_v26, %v5028_v61 }
 0x4c8   : > { %v976_v59 = vsel %vm447_vm2, %v975_v1, -inf  ;;  %1271 = vmatpush.msra.mxu3 %v5054_v9  ;;  %1300 = vmatpush.msrb.mxu0 %v4942_v45  ;;  %vm989_vm13 = vcmp.gt.f32.partialorder %v988_v49, 2.0 }
 0x4c9   : > { %977 = vmax.xlane.f32.xlu0 %v976_v59  ;;  %v993_v19 = vadd.f32 0.6, %v992_v5  ;;  %v3543_v1 = vsel %vm989_vm13, 1.0, %v4184_v10 }
 0x4ca   : > { %1272 = vmatpush.msra.mxu3 %v5058_v2  ;;  %1301 = vmatpush.msrb.mxu0 %v4946_v29 }
 0x4cc   : > { %1273 = vmatpush.msra.mxu3 %v5062_v17  ;;  %1302 = vmatpush.msrb.mxu0 %v4950_v48 }
 0x4ce   : > { %1274 = vmatpush.msra.mxu3 %v5066_v13  ;;  %1303 = vmatpush.msrb.mxu0 %v4954_v30 }
 0x4d0   : > { %1275 = vmatpush.msra.mxu3 %v5070_v38  ;;  %1304 = vmatpush.msrb.mxu0 %v4958_v3 }
 0x4d2   : > { %1276 = vmatpush.msra.mxu3 %v5074_v56  ;;  %1305 = vmatpush.msrb.mxu0 %v4962_v31 }
 0x4d4   : > { %1277 = vmatpush.msra.mxu3 %v5078_v18  ;;  %1306 = vmatpush.msrb.mxu0 %v4966_v32 }
 0x4d6   : > { %1278 = vmatpush.msra.mxu3 %v5082_v39  ;;  %1307 = vmatpush.msrb.mxu0 %v4970_v33 }
 0x4d8   : > { %1279 = vmatpush.msra.mxu3 %v5086_v11  ;;  %1308 = vmatpush.msrb.mxu0 %v4974_v34 }
 0x4da   : > { %1280 = vmatpush.msra.mxu3 %v5090_v14  ;;  %1309 = vmatpush.msrb.mxu0 %v4978_v35 }
 0x4dc   : > { %1281 = vmatpush.msra.mxu3 %v5094_v15  ;;  %1310 = vmatpush.msrb.mxu0 %v4982_v36 }
 0x4de   : > { %1282 = vmatpush.msra.mxu3 %v5098_v51  ;;  %1311 = vmatpush.msrb.mxu0 %v4986_v37 }
 0x4e0   : > { %1283 = vmatpush.msra.mxu3 %v5102_v53  ;;  %1312 = vmatpush.msrb.mxu0 %v4990_v43 }
 0x4e2   : > { %1284 = vmatpush.msra.mxu3 %v5106_v50  ;;  %1313 = vmatpush.msrb.mxu0 %v4994_v44 }
 0x4e4   : > { %1285 = vmatpush.msra.mxu3 %v5110_v52  ;;  %1314 = vmatpush.msrb.mxu0 %v4998_v46 }
 0x53c   : > { %v978_v54 = vpop.xlane.xlu0 %977 }
 0x53d   : > { %v979_v58 = vrot.slane %v978_v54, 4 }
 0x53f   : > { %v980_v60 = vmax.f32 %v978_v54, %v979_v58  ;;  %v1059_v54 = vmul.f32 0.99501246, %v5033_v62 }
 0x541   : > { %v981_v42 = vrot.slane %v980_v60, 2 }
 0x542   : > { %v964_v4 = vpop.f32.mrf.mxu0 }
 0x543   : > { %v967_v7 = vadd.f32 %v964_v4, %v946_v57  ;;  %v982_v8 = vmax.f32 %v980_v60, %v981_v42 }
 0x545   : > { %v3542_v12 = vadd.f32 -0.6, %v967_v7  ;;  %v983_v16 = vrot.slane %v982_v8, 1 }
 0x547   : > { %v5118_v21 = vsel %vm968_vm10, %v3542_v12, %v967_v7  ;;  %v984_v22 = vmax.f32 %v982_v8, %v983_v16 }
 0x548   : > { %vm994_vm11 = vcmp.ge.f32.partialorder %v5118_v21, %v993_v19  ;;  %1028 = vst [vmem:[%s4351_s12 + $0x6] sm:$0x1] %v5118_v21  ;;  %v935_v23 = vpop.f32.mrf.mxu3  ;;  %v1033_v12 = vmul.f32 0.99501246, %v5118_v21  ;;  %v1032_v19 = vld [vmem:[%s4339_s14 + $0x7] sm:$0x1] }
 0x549   : > { %v938_v24 = vadd.f32 %v935_v23, %v917_v20  ;;  %3651 = vpush %v984_v22  ;;  %vm995_vm12 = vmand %vm994_vm11, %vm376_vm1 }
 0x54a   : > { %v3544_v27 = vsel %vm995_vm12, 1.0, %v4184_v10  ;;  %v1034_v23 = vadd.f32 %v1033_v12, %v1032_v19 }
 0x54b   : > { %v5125_v25 = vadd.f32 %v938_v24, %v4668_v47  ;;  %vm998_vm14 = vcmp.eq.f32.partialorder %v3544_v27, 1.0 }
 0x54c   : > { %v999_v59 = vsel %vm998_vm14, 0.0, %v5028_v61 }
 0x54d   : > { %943 = vst [vmem:[%s4349_s29 + $0x5] sm:$0x1] %v5125_v25  ;;  %v1005_v5 = vmul.f32 0.95122945, %v5125_v25 }
 0x57a   : > { %s3652_s13 = spop %3651 }
 0x57b   : > { %p986_p13 = scmp.gt.f32.partialorder %s3652_s13, 0.0 }
 0x57d   : > { %s1000_s21 = scalar_select %p986_p13, 1, 0 }
 0x57f   : > { %v1001_v28 = vstv %s1000_s21 }
 0x580   : > { %vm1002_vm15 = vcmp.eq.s32.totalorder %v1001_v28, 1 }
 0x581   : > { %v5139_v58 = vsel %vm1002_vm15, %v3543_v1, %v3544_v27  ;;  %v5141_v63 = vsel %vm1002_vm15, %v988_v49, %v999_v59 }
 0x582   : > { %1029 = vst [vmem:[%s4353_s18 + $0x6] sm:$0x1] %v5139_v58  ;;  %v5146_v41 = vadd.f32 %v1059_v54, %v5139_v58  ;;  %1022 = vmatmul.f32.vlgmr.msrb.gmra.mxu1 %v5139_v58  ;;  %1051 = vmatmul.f32.vlgmr.msrb.gmra.mxu2 %v5139_v58  ;;  %vm1061_vm0 = vcmp.lt.f32.partialorder %v5141_v63, 2.0  ;;  %vm1056_vm4 = vcmp.eq.f32.partialorder %v5139_v58, 1.0 }
 0x583   : > { %vm5153_vm3 = vmand %vm1061_vm0, %vm376_vm1  ;;  %1358 = vmatpush.msrb.mxu1 %v5044_v0  ;;  %1387 = vmatpush.msrb.mxu2 %v4932_v40 }
 0x584   : > { %1118 = vst [vmem:[%s4355_s9 + $0x7] sm:$0x1] %v5146_v41  ;;  %v1063_v62 = vsel %vm5153_vm3, 1.0, %v4184_v10  ;;  %v1080_v49 = vmul.f32 0.07, %v5146_v41 }
 0x585   : > { %v1064_v55 = vsel %vm447_vm2, %v1063_v62, -inf  ;;  %1359 = vmatpush.msrb.mxu1 %v5054_v9  ;;  %1388 = vmatpush.msrb.mxu2 %v4942_v45 }
 0x586   : > { %1065 = vmax.xlane.f32.xlu1 %v1064_v55  ;;  %v1081_v21 = vadd.f32 0.6, %v1080_v49  ;;  %v1147_v55 = vmul.f32 0.99501246, %v5146_v41 }
 0x587   : > { %1360 = vmatpush.msrb.mxu1 %v5058_v2  ;;  %1389 = vmatpush.msrb.mxu2 %v4946_v29 }
 0x589   : > { %1361 = vmatpush.msrb.mxu1 %v5062_v17  ;;  %1390 = vmatpush.msrb.mxu2 %v4950_v48 }
 0x58b   : > { %1362 = vmatpush.msrb.mxu1 %v5066_v13  ;;  %1391 = vmatpush.msrb.mxu2 %v4954_v30 }
 0x58d   : > { %1363 = vmatpush.msrb.mxu1 %v5070_v38  ;;  %1392 = vmatpush.msrb.mxu2 %v4958_v3 }
 0x58f   : > { %1364 = vmatpush.msrb.mxu1 %v5074_v56  ;;  %1393 = vmatpush.msrb.mxu2 %v4962_v31 }
 0x591   : > { %1365 = vmatpush.msrb.mxu1 %v5078_v18  ;;  %1394 = vmatpush.msrb.mxu2 %v4966_v32 }
 0x593   : > { %1366 = vmatpush.msrb.mxu1 %v5082_v39  ;;  %1395 = vmatpush.msrb.mxu2 %v4970_v33 }
 0x595   : > { %1367 = vmatpush.msrb.mxu1 %v5086_v11  ;;  %1396 = vmatpush.msrb.mxu2 %v4974_v34 }
 0x597   : > { %1368 = vmatpush.msrb.mxu1 %v5090_v14  ;;  %1397 = vmatpush.msrb.mxu2 %v4978_v35 }
 0x599   : > { %1369 = vmatpush.msrb.mxu1 %v5094_v15  ;;  %1398 = vmatpush.msrb.mxu2 %v4982_v36 }
 0x59b   : > { %1370 = vmatpush.msrb.mxu1 %v5098_v51  ;;  %1399 = vmatpush.msrb.mxu2 %v4986_v37 }
 0x59d   : > { %1371 = vmatpush.msrb.mxu1 %v5102_v53  ;;  %1400 = vmatpush.msrb.mxu2 %v4990_v43 }
 0x59f   : > { %1372 = vmatpush.msrb.mxu1 %v5106_v50  ;;  %1401 = vmatpush.msrb.mxu2 %v4994_v44 }
 0x5a1   : > { %1373 = vmatpush.msrb.mxu1 %v5110_v52  ;;  %1402 = vmatpush.msrb.mxu2 %v4998_v46 }
 0x5f9   : > { %v1066_v60 = vpop.xlane.xlu1 %1065 }
 0x5fa   : > { %v1067_v42 = vrot.slane %v1066_v60, 4 }
 0x5fc   : > { %v1068_v57 = vmax.f32 %v1066_v60, %v1067_v42 }
 0x5fe   : > { %v1069_v4 = vrot.slane %v1068_v57, 2 }
 0x5ff   : > { %v1023_v7 = vpop.f32.mrf.mxu1 }
 0x600   : > { %v1026_v8 = vadd.f32 %v1023_v7, %v1005_v5  ;;  %v1070_v16 = vmax.f32 %v1068_v57, %v1069_v4 }
 0x602   : > { %v5199_v20 = vadd.f32 %v1026_v8, %v4668_v47  ;;  %v1071_v22 = vrot.slane %v1070_v16, 1  ;;  %v1075_v47 = vadd.f32 1.0, %v5141_v63  ;;  %v1120_v8 = vld [vmem:[%s4339_s14 + $0x8] sm:$0x1] }
 0x604   : > { %1031 = vst [vmem:[%s4349_s29 + $0x6] sm:$0x1] %v5199_v20  ;;  %v1072_v24 = vmax.f32 %v1070_v16, %v1071_v22  ;;  %v1076_v1 = vsel %vm5153_vm3, %v1075_v47, %v5141_v63  ;;  %v1093_v47 = vmul.f32 0.95122945, %v5199_v20 }
 0x605   : > { %v1052_v26 = vpop.f32.mrf.mxu2  ;;  %vm1077_vm7 = vcmp.gt.f32.partialorder %v1076_v1, 2.0 }
 0x606   : > { %v1055_v27 = vadd.f32 %v1052_v26, %v1034_v23  ;;  %3653 = vpush %v1072_v24  ;;  %v3546_v58 = vsel %vm1077_vm7, 1.0, %v4184_v10 }
 0x608   : > { %v3545_v25 = vadd.f32 -0.6, %v1055_v27 }
 0x60a   : > { %v1058_v28 = vsel %vm1056_vm4, %v3545_v25, %v1055_v27 }
 0x60b   : > { %vm1082_vm5 = vcmp.ge.f32.partialorder %v1058_v28, %v1081_v21  ;;  %1116 = vst [vmem:[%s4351_s12 + $0x7] sm:$0x1] %v1058_v28  ;;  %v1121_v7 = vmul.f32 0.99501246, %v1058_v28 }
 0x60c   : > { %vm1083_vm6 = vmand %vm1082_vm5, %vm376_vm1 }
 0x60d   : > { %v3547_v59 = vsel %vm1083_vm6, 1.0, %v4184_v10  ;;  %v1122_v19 = vadd.f32 %v1121_v7, %v1120_v8 }
 0x60e   : > { %vm1086_vm8 = vcmp.eq.f32.partialorder %v3547_v59, 1.0 }
 0x60f   : > { %v1087_v62 = vsel %vm1086_vm8, 0.0, %v5141_v63 }
 0x637   : > { %s3654_s19 = spop %3653 }
 0x638   : > { %p1074_p0 = scmp.gt.f32.partialorder %s3654_s19, 0.0 }
 0x63a   : > { %s1088_s1 = scalar_select %p1074_p0, 1, 0 }
 0x63c   : > { %v1089_v54 = vstv %s1088_s1 }
 0x63d   : > { %vm1090_vm9 = vcmp.eq.s32.totalorder %v1089_v54, 1  ;;  %v5277_v54 = vld [vmem:[%s7218_s3] sm:$0x1] }
 0x63e   : > { %v1091_v60 = vsel %vm1090_vm9, %v3546_v58, %v3547_v59  ;;  %v5216_v42 = vsel %vm1090_vm9, %v1076_v1, %v1087_v62 }
 0x63f   : > { %1117 = vst [vmem:[%s4353_s18 + $0x7] sm:$0x1] %v1091_v60  ;;  %v5219_v61 = vadd.f32 %v1147_v55, %v1091_v60  ;;  %1110 = vmatmul.f32.vlgmr.msrb.gmra.mxu3 %v1091_v60  ;;  %1139 = vmatmul.f32.vlgmr.msra.gmra.mxu0 %v1091_v60  ;;  %vm1149_vm10 = vcmp.lt.f32.partialorder %v5216_v42, 2.0  ;;  %vm1144_vm12 = vcmp.eq.f32.partialorder %v1091_v60, 1.0  ;;  %v1163_v20 = vadd.f32 1.0, %v5216_v42 }
 0x640   : > { %vm5224_vm11 = vmand %vm1149_vm10, %vm376_vm1  ;;  %1446 = vmatpush.msrb.mxu3 %v5044_v0  ;;  %1475 = vmatpush.msra.mxu0 %v4932_v40 }
 0x641   : > { %1206 = vst [vmem:[%s4355_s9 + $0x8] sm:$0x1] %v5219_v61  ;;  %v1151_v63 = vsel %vm5224_vm11, 1.0, %v4184_v10  ;;  %v1168_v23 = vmul.f32 0.07, %v5219_v61  ;;  %v1164_v62 = vsel %vm5224_vm11, %v1163_v20, %v5216_v42 }
 0x642   : > { %v1152_v41 = vsel %vm447_vm2, %v1151_v63, -inf  ;;  %1447 = vmatpush.msrb.mxu3 %v5054_v9  ;;  %1476 = vmatpush.msra.mxu0 %v4942_v45  ;;  %vm1165_vm15 = vcmp.gt.f32.partialorder %v1164_v62, 2.0 }
 0x643   : > { %1153 = vmax.xlane.f32.xlu2 %v1152_v41  ;;  %v1169_v25 = vadd.f32 0.6, %v1168_v23  ;;  %v3549_v63 = vsel %vm1165_vm15, 1.0, %v4184_v10 }
 0x644   : > { %1448 = vmatpush.msrb.mxu3 %v5058_v2  ;;  %1477 = vmatpush.msra.mxu0 %v4946_v29 }
 0x646   : > { %1449 = vmatpush.msrb.mxu3 %v5062_v17  ;;  %1478 = vmatpush.msra.mxu0 %v4950_v48 }
 0x648   : > { %1450 = vmatpush.msrb.mxu3 %v5066_v13  ;;  %1479 = vmatpush.msra.mxu0 %v4954_v30 }
 0x64a   : > { %1451 = vmatpush.msrb.mxu3 %v5070_v38  ;;  %1480 = vmatpush.msra.mxu0 %v4958_v3 }
 0x64c   : > { %1452 = vmatpush.msrb.mxu3 %v5074_v56  ;;  %1481 = vmatpush.msra.mxu0 %v4962_v31 }
 0x64e   : > { %1453 = vmatpush.msrb.mxu3 %v5078_v18  ;;  %1482 = vmatpush.msra.mxu0 %v4966_v32 }
 0x650   : > { %1454 = vmatpush.msrb.mxu3 %v5082_v39  ;;  %1483 = vmatpush.msra.mxu0 %v4970_v33 }
 0x652   : > { %1455 = vmatpush.msrb.mxu3 %v5086_v11  ;;  %1484 = vmatpush.msra.mxu0 %v4974_v34 }
 0x654   : > { %1456 = vmatpush.msrb.mxu3 %v5090_v14  ;;  %1485 = vmatpush.msra.mxu0 %v4978_v35 }
 0x656   : > { %1457 = vmatpush.msrb.mxu3 %v5094_v15  ;;  %1486 = vmatpush.msra.mxu0 %v4982_v36 }
 0x658   : > { %1458 = vmatpush.msrb.mxu3 %v5098_v51  ;;  %1487 = vmatpush.msra.mxu0 %v4986_v37 }
 0x65a   : > { %1459 = vmatpush.msrb.mxu3 %v5102_v53  ;;  %1488 = vmatpush.msra.mxu0 %v4990_v43 }
 0x65c   : > { %1460 = vmatpush.msrb.mxu3 %v5106_v50  ;;  %1489 = vmatpush.msra.mxu0 %v4994_v44 }
 0x65e   : > { %1461 = vmatpush.msrb.mxu3 %v5110_v52  ;;  %1490 = vmatpush.msra.mxu0 %v4998_v46 }
 0x6b6   : > { %v1154_v4 = vpop.xlane.xlu2 %1153 }
 0x6b7   : > { %v1155_v5 = vrot.slane %v1154_v4, 4 }
 0x6b9   : > { %v1156_v12 = vmax.f32 %v1154_v4, %v1155_v5  ;;  %v1235_v4 = vmul.f32 0.99501246, %v5219_v61 }
 0x6bb   : > { %v1157_v16 = vrot.slane %v1156_v12, 2 }
 0x6bc   : > { %v1140_v22 = vpop.f32.mrf.mxu0 }
 0x6bd   : > { %v1143_v24 = vadd.f32 %v1140_v22, %v1122_v19  ;;  %v1158_v26 = vmax.f32 %v1156_v12, %v1157_v16 }
 0x6bf   : > { %v3548_v49 = vadd.f32 -0.6, %v1143_v24  ;;  %v1159_v27 = vrot.slane %v1158_v26, 1 }
 0x6c1   : > { %v5268_v21 = vsel %vm1144_vm12, %v3548_v49, %v1143_v24  ;;  %v1160_v28 = vmax.f32 %v1158_v26, %v1159_v27 }
 0x6c2   : > { %vm1170_vm13 = vcmp.ge.f32.partialorder %v5268_v21, %v1169_v25  ;;  %1204 = vst [vmem:[%s4351_s12 + $0x8] sm:$0x1] %v5268_v21  ;;  %v1111_v1 = vpop.f32.mrf.mxu3  ;;  %v1209_v49 = vmul.f32 0.99501246, %v5268_v21  ;;  %v1208_v25 = vld [vmem:[%s4339_s14 + $0x9] sm:$0x1] }
 0x6c3   : > { %v1114_v59 = vadd.f32 %v1111_v1, %v1093_v47  ;;  %3655 = vpush %v1160_v28  ;;  %vm1171_vm14 = vmand %vm1170_vm13, %vm376_vm1 }
 0x6c4   : > { %v3550_v55 = vsel %vm1171_vm14, 1.0, %v4184_v10  ;;  %v1210_v1 = vadd.f32 %v1209_v49, %v1208_v25  ;;  %v1296_v49 = vld [vmem:[%s4339_s14 + $0xa] sm:$0x1] }
 0x6c5   : > { %v5280_v58 = vadd.f32 %v5277_v54, %v1114_v59  ;;  %vm1174_vm0 = vcmp.eq.f32.partialorder %v3550_v55, 1.0 }
 0x6c6   : > { %v1175_v41 = vsel %vm1174_vm0, 0.0, %v5216_v42 }
 0x6c7   : > { %1119 = vst [vmem:[%s4349_s29 + $0x7] sm:$0x1] %v5280_v58  ;;  %v1181_v23 = vmul.f32 0.95122945, %v5280_v58 }
 0x6f4   : > { %s3656_s16 = spop %3655 }
 0x6f5   : > { %p1162_p3 = scmp.gt.f32.partialorder %s3656_s16, 0.0 }
 0x6f7   : > { %s1176_s17 = scalar_select %p1162_p3, 1, 0 }
 0x6f9   : > { %v1177_v60 = vstv %s1176_s17 }
 0x6fa   : > { %vm1178_vm3 = vcmp.eq.s32.totalorder %v1177_v60, 1 }
 0x6fb   : > { %v5294_v5 = vsel %vm1178_vm3, %v3549_v63, %v3550_v55  ;;  %v5296_v57 = vsel %vm1178_vm3, %v1164_v62, %v1175_v41 }
 0x6fc   : > { %1205 = vst [vmem:[%s4353_s18 + $0x8] sm:$0x1] %v5294_v5  ;;  %v5301_v7 = vadd.f32 %v1235_v4, %v5294_v5  ;;  %1198 = vmatmul.f32.vlgmr.msra.gmra.mxu1 %v5294_v5  ;;  %1227 = vmatmul.f32.vlgmr.msra.gmra.mxu2 %v5294_v5  ;;  %vm1237_vm4 = vcmp.lt.f32.partialorder %v5296_v57, 2.0  ;;  %vm1232_vm6 = vcmp.eq.f32.partialorder %v5294_v5, 1.0  ;;  %v1251_v63 = vadd.f32 1.0, %v5296_v57 }
 0x6fd   : > { %vm5308_vm5 = vmand %vm1237_vm4, %vm376_vm1  ;;  %1534 = vmatpush.msra.mxu1 %v5044_v0  ;;  %1563 = vmatpush.msra.mxu2 %v4932_v40 }
 0x6fe   : > { %1294 = vst [vmem:[%s4355_s9 + $0x9] sm:$0x1] %v5301_v7  ;;  %v1239_v61 = vsel %vm5308_vm5, 1.0, %v4184_v10  ;;  %v1256_v62 = vmul.f32 0.07, %v5301_v7  ;;  %v1252_v41 = vsel %vm5308_vm5, %v1251_v63, %v5296_v57 }
 0x6ff   : > { %v1240_v8 = vsel %vm447_vm2, %v1239_v61, -inf  ;;  %1535 = vmatpush.msra.mxu1 %v5054_v9  ;;  %1564 = vmatpush.msra.mxu2 %v4942_v45  ;;  %vm1253_vm9 = vcmp.gt.f32.partialorder %v1252_v41, 2.0 }
 0x700   : > { %1241 = vmax.xlane.f32.xlu0 %v1240_v8  ;;  %v1257_v21 = vadd.f32 0.6, %v1256_v62  ;;  %v3552_v61 = vsel %vm1253_vm9, 1.0, %v4184_v10 }
 0x701   : > { %1536 = vmatpush.msra.mxu1 %v5058_v2  ;;  %1565 = vmatpush.msra.mxu2 %v4946_v29 }
 0x703   : > { %1537 = vmatpush.msra.mxu1 %v5062_v17  ;;  %1566 = vmatpush.msra.mxu2 %v4950_v48 }
 0x705   : > { %1538 = vmatpush.msra.mxu1 %v5066_v13  ;;  %1567 = vmatpush.msra.mxu2 %v4954_v30 }
 0x707   : > { %1539 = vmatpush.msra.mxu1 %v5070_v38  ;;  %1568 = vmatpush.msra.mxu2 %v4958_v3 }
 0x709   : > { %1540 = vmatpush.msra.mxu1 %v5074_v56  ;;  %1569 = vmatpush.msra.mxu2 %v4962_v31 }
 0x70b   : > { %1541 = vmatpush.msra.mxu1 %v5078_v18  ;;  %1570 = vmatpush.msra.mxu2 %v4966_v32 }
 0x70d   : > { %1542 = vmatpush.msra.mxu1 %v5082_v39  ;;  %1571 = vmatpush.msra.mxu2 %v4970_v33 }
 0x70f   : > { %1543 = vmatpush.msra.mxu1 %v5086_v11  ;;  %1572 = vmatpush.msra.mxu2 %v4974_v34 }
 0x711   : > { %1544 = vmatpush.msra.mxu1 %v5090_v14  ;;  %1573 = vmatpush.msra.mxu2 %v4978_v35 }
 0x713   : > { %1545 = vmatpush.msra.mxu1 %v5094_v15  ;;  %1574 = vmatpush.msra.mxu2 %v4982_v36 }
 0x715   : > { %1546 = vmatpush.msra.mxu1 %v5098_v51  ;;  %1575 = vmatpush.msra.mxu2 %v4986_v37 }
 0x717   : > { %1547 = vmatpush.msra.mxu1 %v5102_v53  ;;  %1576 = vmatpush.msra.mxu2 %v4990_v43 }
 0x719   : > { %1548 = vmatpush.msra.mxu1 %v5106_v50  ;;  %1577 = vmatpush.msra.mxu2 %v4994_v44 }
 0x71b   : > { %1549 = vmatpush.msra.mxu1 %v5110_v52  ;;  %1578 = vmatpush.msra.mxu2 %v4998_v46 }
 0x773   : > { %v1242_v12 = vpop.xlane.xlu0 %1241 }
 0x774   : > { %v1243_v16 = vrot.slane %v1242_v12, 4 }
 0x776   : > { %v1244_v19 = vmax.f32 %v1242_v12, %v1243_v16  ;;  %v1323_v12 = vmul.f32 0.99501246, %v5301_v7 }
 0x778   : > { %v1245_v22 = vrot.slane %v1244_v19, 2 }
 0x779   : > { %v1199_v24 = vpop.f32.mrf.mxu1 }
 0x77a   : > { %v1202_v26 = vadd.f32 %v1199_v24, %v1181_v23  ;;  %v1246_v27 = vmax.f32 %v1244_v19, %v1245_v22 }
 0x77c   : > { %v5354_v47 = vadd.f32 %v5277_v54, %v1202_v26  ;;  %v1247_v28 = vrot.slane %v1246_v27, 1 }
 0x77e   : > { %1207 = vst [vmem:[%s4349_s29 + $0x8] sm:$0x1] %v5354_v47  ;;  %v1248_v59 = vmax.f32 %v1246_v27, %v1247_v28 }
 0x77f   : > { %v1228_v20 = vpop.f32.mrf.mxu2 }
 0x780   : > { %v1231_v55 = vadd.f32 %v1228_v20, %v1210_v1  ;;  %3657 = vpush %v1248_v59 }
 0x782   : > { %v3551_v58 = vadd.f32 -0.6, %v1231_v55 }
 0x784   : > { %v1234_v60 = vsel %vm1232_vm6, %v3551_v58, %v1231_v55 }
 0x785   : > { %vm1258_vm7 = vcmp.ge.f32.partialorder %v1234_v60, %v1257_v21  ;;  %1292 = vst [vmem:[%s4351_s12 + $0x9] sm:$0x1] %v1234_v60  ;;  %v1297_v26 = vmul.f32 0.99501246, %v1234_v60 }
 0x786   : > { %vm1259_vm8 = vmand %vm1258_vm7, %vm376_vm1 }
 0x787   : > { %v3553_v4 = vsel %vm1259_vm8, 1.0, %v4184_v10  ;;  %v1298_v28 = vadd.f32 %v1297_v26, %v1296_v49 }
 0x788   : > { %vm1262_vm10 = vcmp.eq.f32.partialorder %v3553_v4, 1.0 }
 0x789   : > { %v1263_v8 = vsel %vm1262_vm10, 0.0, %v5296_v57 }
 0x7b1   : > { %s3658_s20 = spop %3657 }
 0x7b2   : > { %p1250_p7 = scmp.gt.f32.partialorder %s3658_s20, 0.0 }
 0x7b4   : > { %s1264_s13 = scalar_select %p1250_p7, 1, 0 }
 0x7b6   : > { %v1265_v5 = vstv %s1264_s13 }
 0x7b7   : > { %vm1266_vm11 = vcmp.eq.s32.totalorder %v1265_v5, 1 }
 0x7b8   : > { %v1267_v16 = vsel %vm1266_vm11, %v3552_v61, %v3553_v4  ;;  %v5371_v19 = vsel %vm1266_vm11, %v1252_v41, %v1263_v8  ;;  %v1269_v41 = vmul.f32 0.95122945, %v5354_v47 }
 0x7b9   : > { %1293 = vst [vmem:[%s4353_s18 + $0x9] sm:$0x1] %v1267_v16  ;;  %v5374_v42 = vadd.f32 %v1323_v12, %v1267_v16  ;;  %1286 = vmatmul.f32.vlgmr.msra.gmra.mxu3 %v1267_v16  ;;  %1315 = vmatmul.f32.vlgmr.msrb.gmra.mxu0 %v1267_v16  ;;  %vm1325_vm12 = vcmp.lt.f32.partialorder %v5371_v19, 2.0  ;;  %vm1320_vm14 = vcmp.eq.f32.partialorder %v1267_v16, 1.0  ;;  %v1339_v8 = vadd.f32 1.0, %v5371_v19 }
 0x7ba   : > { %vm5379_vm13 = vmand %vm1325_vm12, %vm376_vm1  ;;  %1622 = vmatpush.msra.mxu3 %v5044_v0  ;;  %1651 = vmatpush.msrb.mxu0 %v4932_v40 }
 0x7bb   : > { %1382 = vst [vmem:[%s4355_s9 + $0xa] sm:$0x1] %v5374_v42  ;;  %v1327_v57 = vsel %vm5379_vm13, 1.0, %v4184_v10  ;;  %v1344_v59 = vmul.f32 0.07, %v5374_v42  ;;  %v1340_v47 = vsel %vm5379_vm13, %v1339_v8, %v5371_v19 }
 0x7bc   : > { %v1328_v7 = vsel %vm447_vm2, %v1327_v57, -inf  ;;  %1623 = vmatpush.msra.mxu3 %v5054_v9  ;;  %1652 = vmatpush.msrb.mxu0 %v4942_v45  ;;  %vm1341_vm3 = vcmp.gt.f32.partialorder %v1340_v47, 2.0 }
 0x7bd   : > { %1329 = vmax.xlane.f32.xlu1 %v1328_v7  ;;  %v1345_v21 = vadd.f32 0.6, %v1344_v59  ;;  %v3555_v57 = vsel %vm1341_vm3, 1.0, %v4184_v10 }
 0x7be   : > { %1624 = vmatpush.msra.mxu3 %v5058_v2  ;;  %1653 = vmatpush.msrb.mxu0 %v4946_v29 }
 0x7c0   : > { %1625 = vmatpush.msra.mxu3 %v5062_v17  ;;  %1654 = vmatpush.msrb.mxu0 %v4950_v48 }
 0x7c2   : > { %1626 = vmatpush.msra.mxu3 %v5066_v13  ;;  %1655 = vmatpush.msrb.mxu0 %v4954_v30 }
 0x7c4   : > { %1627 = vmatpush.msra.mxu3 %v5070_v38  ;;  %1656 = vmatpush.msrb.mxu0 %v4958_v3 }
 0x7c6   : > { %1628 = vmatpush.msra.mxu3 %v5074_v56  ;;  %1657 = vmatpush.msrb.mxu0 %v4962_v31 }
 0x7c8   : > { %1629 = vmatpush.msra.mxu3 %v5078_v18  ;;  %1658 = vmatpush.msrb.mxu0 %v4966_v32 }
 0x7ca   : > { %1630 = vmatpush.msra.mxu3 %v5082_v39  ;;  %1659 = vmatpush.msrb.mxu0 %v4970_v33 }
 0x7cc   : > { %1631 = vmatpush.msra.mxu3 %v5086_v11  ;;  %1660 = vmatpush.msrb.mxu0 %v4974_v34 }
 0x7ce   : > { %1632 = vmatpush.msra.mxu3 %v5090_v14  ;;  %1661 = vmatpush.msrb.mxu0 %v4978_v35 }
 0x7d0   : > { %1633 = vmatpush.msra.mxu3 %v5094_v15  ;;  %1662 = vmatpush.msrb.mxu0 %v4982_v36 }
 0x7d2   : > { %1634 = vmatpush.msra.mxu3 %v5098_v51  ;;  %1663 = vmatpush.msrb.mxu0 %v4986_v37 }
 0x7d4   : > { %1635 = vmatpush.msra.mxu3 %v5102_v53  ;;  %1664 = vmatpush.msrb.mxu0 %v4990_v43 }
 0x7d6   : > { %1636 = vmatpush.msra.mxu3 %v5106_v50  ;;  %1665 = vmatpush.msrb.mxu0 %v4994_v44 }
 0x7d8   : > { %1637 = vmatpush.msra.mxu3 %v5110_v52  ;;  %1666 = vmatpush.msrb.mxu0 %v4998_v46 }
 0x830   : > { %v1330_v23 = vpop.xlane.xlu1 %1329 }
 0x831   : > { %v1331_v24 = vrot.slane %v1330_v23, 4 }
 0x833   : > { %v1332_v27 = vmax.f32 %v1330_v23, %v1331_v24  ;;  %v1411_v23 = vmul.f32 0.99501246, %v5374_v42 }
 0x835   : > { %v1333_v25 = vrot.slane %v1332_v27, 2 }
 0x836   : > { %v1316_v1 = vpop.f32.mrf.mxu0 }
 0x837   : > { %v1319_v20 = vadd.f32 %v1316_v1, %v1298_v28  ;;  %v1334_v62 = vmax.f32 %v1332_v27, %v1333_v25 }
 0x839   : > { %v3554_v55 = vadd.f32 -0.6, %v1319_v20  ;;  %v1335_v58 = vrot.slane %v1334_v62, 1 }
 0x83b   : > { %v5423_v63 = vsel %vm1320_vm14, %v3554_v55, %v1319_v20  ;;  %v1336_v60 = vmax.f32 %v1334_v62, %v1335_v58 }
 0x83c   : > { %vm1346_vm15 = vcmp.ge.f32.partialorder %v5423_v63, %v1345_v21  ;;  %1380 = vst [vmem:[%s4351_s12 + $0xa] sm:$0x1] %v5423_v63  ;;  %v1287_v4 = vpop.f32.mrf.mxu3 }
 0x83d   : > { %v1290_v5 = vadd.f32 %v1287_v4, %v1269_v41  ;;  %3659 = vpush %v1336_v60  ;;  %vm1347_vm0 = vmand %vm1346_vm15, %vm376_vm1 }
 0x83e   : > { %v3556_v12 = vsel %vm1347_vm0, 1.0, %v4184_v10 }
 0x83f   : > { %v5430_v61 = vadd.f32 %v5277_v54, %v1290_v5  ;;  %vm1350_vm4 = vcmp.eq.f32.partialorder %v3556_v12, 1.0  ;;  %v5698_v5 = vld [vmem:[#allocation12 + $0x30] sm:$0xff] }
 0x840   : > { %v1351_v7 = vsel %vm1350_vm4, 0.0, %v5371_v19 }
 0x841   : > { %1295 = vst [vmem:[%s4349_s29 + $0x9] sm:$0x1] %v5430_v61 }
 0x86e   : > { %s3660_s21 = spop %3659 }
 0x86f   : > { %p1338_p10 = scmp.gt.f32.partialorder %s3660_s21, 0.0 }
 0x871   : > { %s1352_s19 = scalar_select %p1338_p10, 1, 0 }
 0x873   : > { %v1353_v16 = vstv %s1352_s19 }
 0x874   : > { %vm1354_vm5 = vcmp.eq.s32.totalorder %v1353_v16, 1  ;;  %v5562_v16 = vld [vmem:[#allocation10 + $0x60] sm:$0xff] }
 0x875   : > { %v5444_v24 = vsel %vm1354_vm5, %v3555_v57, %v3556_v12  ;;  %v5446_v22 = vsel %vm1354_vm5, %v1340_v47, %v1351_v7  ;;  %v5554_v12 = vld [vmem:[#allocation10 + $0x70] sm:$0xff] }
 0x876   : > { %1381 = vst [vmem:[%s4353_s18 + $0xa] sm:$0x1] %v5444_v24  ;;  %v5451_v26 = vadd.f32 %v1411_v23, %v5444_v24  ;;  %1374 = vmatmul.f32.vlgmr.msrb.gmra.mxu1 %v5444_v24  ;;  %1403 = vmatmul.f32.vlgmr.msrb.gmra.mxu2 %v5444_v24  ;;  %vm1413_vm6 = vcmp.lt.f32.partialorder %v5446_v22, 2.0  ;;  %vm1408_vm8 = vcmp.eq.f32.partialorder %v5444_v24, 1.0  ;;  %v1427_v59 = vadd.f32 1.0, %v5446_v22  ;;  %v5570_v57 = vld [vmem:[#allocation10 + $0x50] sm:$0xff] }
 0x877   : > { %vm5458_vm7 = vmand %vm1413_vm6, %vm376_vm1  ;;  %1710 = vmatpush.msrb.mxu1 %v5044_v0  ;;  %1739 = vmatpush.msrb.mxu2 %v4932_v40  ;;  %v1472_v23 = vld [vmem:[%s4339_s14 + $0xc] sm:$0x1] }
 0x878   : > { %1470 = vst [vmem:[%s4355_s9 + $0xb] sm:$0x1] %v5451_v26  ;;  %v1415_v42 = vsel %vm5458_vm7, 1.0, %v4184_v10  ;;  %v1428_v20 = vsel %vm5458_vm7, %v1427_v59, %v5446_v22 }
 0x879   : > { %v1416_v49 = vsel %vm447_vm2, %v1415_v42, -inf  ;;  %1711 = vmatpush.msrb.mxu1 %v5054_v9  ;;  %1740 = vmatpush.msrb.mxu2 %v4942_v45  ;;  %vm1429_vm11 = vcmp.gt.f32.partialorder %v1428_v20, 2.0 }
 0x87a   : > { %1417 = vmax.xlane.f32.xlu2 %v1416_v49  ;;  %v3558_v58 = vsel %vm1429_vm11, 1.0, %v4184_v10 }
 0x87b   : > { %1712 = vmatpush.msrb.mxu1 %v5058_v2  ;;  %1741 = vmatpush.msrb.mxu2 %v4946_v29 }
 0x87d   : > { %1713 = vmatpush.msrb.mxu1 %v5062_v17  ;;  %1742 = vmatpush.msrb.mxu2 %v4950_v48 }
 0x87f   : > { %1714 = vmatpush.msrb.mxu1 %v5066_v13  ;;  %1743 = vmatpush.msrb.mxu2 %v4954_v30  ;;  %v1357_v30 = vmul.f32 0.95122945, %v5430_v61  ;;  %v5544_v61 = vld [vmem:[#allocation10 + $0x78] sm:$0xff] }
 0x881   : > { %1715 = vmatpush.msrb.mxu1 %v5070_v38  ;;  %1744 = vmatpush.msrb.mxu2 %v4958_v3 }
 0x883   : > { %1716 = vmatpush.msrb.mxu1 %v5074_v56  ;;  %1745 = vmatpush.msrb.mxu2 %v4962_v31 }
 0x885   : > { %1717 = vmatpush.msrb.mxu1 %v5078_v18  ;;  %1746 = vmatpush.msrb.mxu2 %v4966_v32  ;;  %v1385_v32 = vmul.f32 0.99501246, %v5423_v63  ;;  %v1499_v63 = vmul.f32 0.99501246, %v5451_v26 }
 0x887   : > { %1718 = vmatpush.msrb.mxu1 %v5082_v39  ;;  %1747 = vmatpush.msrb.mxu2 %v4970_v33 }
 0x889   : > { %1719 = vmatpush.msrb.mxu1 %v5086_v11  ;;  %1748 = vmatpush.msrb.mxu2 %v4974_v34  ;;  %v1384_v34 = vld [vmem:[%s4339_s14 + $0xb] sm:$0x1] }
 0x88b   : > { %1720 = vmatpush.msrb.mxu1 %v5090_v14  ;;  %1749 = vmatpush.msrb.mxu2 %v4978_v35 }
 0x88d   : > { %1721 = vmatpush.msrb.mxu1 %v5094_v15  ;;  %1750 = vmatpush.msrb.mxu2 %v4982_v36 }
 0x88f   : > { %1722 = vmatpush.msrb.mxu1 %v5098_v51  ;;  %1751 = vmatpush.msrb.mxu2 %v4986_v37  ;;  %v1386_v37 = vadd.f32 %v1385_v32, %v1384_v34 }
 0x891   : > { %1723 = vmatpush.msrb.mxu1 %v5102_v53  ;;  %1752 = vmatpush.msrb.mxu2 %v4990_v43 }
 0x893   : > { %1724 = vmatpush.msrb.mxu1 %v5106_v50  ;;  %1753 = vmatpush.msrb.mxu2 %v4994_v44 }
 0x895   : > { %1725 = vmatpush.msrb.mxu1 %v5110_v52  ;;  %1754 = vmatpush.msrb.mxu2 %v4998_v46  ;;  %v1432_v46 = vmul.f32 0.07, %v5451_v26 }
 0x897   : > { %v1433_v28 = vadd.f32 0.6, %v1432_v46 }
 0x8ed   : > { %v1418_v40 = vpop.xlane.xlu2 %1417 }
 0x8ee   : > { %v1419_v45 = vrot.slane %v1418_v40, 4 }
 0x8f0   : > { %v1420_v29 = vmax.f32 %v1418_v40, %v1419_v45 }
 0x8f2   : > { %v1421_v48 = vrot.slane %v1420_v29, 2 }
 0x8f3   : > { %v1375_v3 = vpop.f32.mrf.mxu1 }
 0x8f4   : > { %v1378_v31 = vadd.f32 %v1375_v3, %v1357_v30  ;;  %v1422_v33 = vmax.f32 %v1420_v29, %v1421_v48 }
 0x8f6   : > { %v5504_v35 = vadd.f32 %v5277_v54, %v1378_v31  ;;  %v1423_v36 = vrot.slane %v1422_v33, 1 }
 0x8f8   : > { %1383 = vst [vmem:[%s4349_s29 + $0xa] sm:$0x1] %v5504_v35  ;;  %v1424_v43 = vmax.f32 %v1422_v33, %v1423_v36  ;;  %v1445_v48 = vmul.f32 0.95122945, %v5504_v35 }
 0x8f9   : > { %v1404_v44 = vpop.f32.mrf.mxu2 }
 0x8fa   : > { %v1407_v27 = vadd.f32 %v1404_v44, %v1386_v37  ;;  %3661 = vpush %v1424_v43 }
 0x8fc   : > { %v3557_v25 = vadd.f32 -0.6, %v1407_v27 }
 0x8fe   : > { %v5510_v1 = vsel %vm1408_vm8, %v3557_v25, %v1407_v27 }
 0x8ff   : > { %vm1434_vm9 = vcmp.ge.f32.partialorder %v5510_v1, %v1433_v28  ;;  %1468 = vst [vmem:[%s4351_s12 + $0xb] sm:$0x1] %v5510_v1 }
 0x900   : > { %vm1435_vm10 = vmand %vm1434_vm9, %vm376_vm1 }
 0x901   : > { %v3559_v62 = vsel %vm1435_vm10, 1.0, %v4184_v10 }
 0x902   : > { %vm1438_vm12 = vcmp.eq.f32.partialorder %v3559_v62, 1.0 }
 0x903   : > { %v1439_v21 = vsel %vm1438_vm12, 0.0, %v5446_v22 }
 0x92b   : > { %s3662_s1 = spop %3661 }
 0x92c   : > { %p1426_p8 = scmp.gt.f32.partialorder %s3662_s1, 0.0 }
 0x92e   : > { %s1440_s30 = scalar_select %p1426_p8, 1, 0 }
 0x930   : > { %v1441_v55 = vstv %s1440_s30 }
 0x931   : > { %vm1442_vm13 = vcmp.eq.s32.totalorder %v1441_v55, 1  ;;  %v5670_v55 = vld [vmem:[#allocation12 + $0x68] sm:$0xff] }
 0x932   : > { %v5525_v41 = vsel %vm1442_vm13, %v3558_v58, %v3559_v62  ;;  %v5527_v60 = vsel %vm1442_vm13, %v1428_v20, %v1439_v21  ;;  %v5666_v62 = vld [vmem:[#allocation12 + $0x70] sm:$0xff]  ;;  %v5674_v58 = vld [vmem:[#allocation12 + $0x60] sm:$0xff]  ;;  %v5678_v21 = vld [vmem:[#allocation12 + $0x58] sm:$0xff] }
 0x933   : > { %1469 = vst [vmem:[%s4353_s18 + $0xb] sm:$0x1] %v5525_v41  ;;  %v5532_v4 = vadd.f32 %v1499_v63, %v5525_v41  ;;  %1462 = vmatmul.f32.vlgmr.msrb.gmra.mxu3 %v5525_v41  ;;  %1491 = vmatmul.f32.vlgmr.msra.gmra.mxu0 %v5525_v41  ;;  %vm1501_vm14 = vcmp.lt.f32.partialorder %v5527_v60, 2.0  ;;  %vm1496_vm0 = vcmp.eq.f32.partialorder %v5525_v41, 1.0  ;;  %v1515_v33 = vadd.f32 1.0, %v5527_v60  ;;  %v5682_v63 = vld [vmem:[#allocation12 + $0x50] sm:$0xff] }
 0x934   : > { %vm5539_vm15 = vmand %vm1501_vm14, %vm376_vm1  ;;  %1798 = vmatpush.msrb.mxu3 %v5044_v0  ;;  %1827 = vmatpush.msra.mxu0 %v5544_v61  ;;  %v5558_v0 = vld [vmem:[#allocation10 + $0x68] sm:$0xff] }
 0x935   : > { %1558 = vst [vmem:[%s4355_s9 + $0xc] sm:$0x1] %v5532_v4  ;;  %v1503_v8 = vsel %vm5539_vm15, 1.0, %v4184_v10  ;;  %v1520_v19 = vmul.f32 0.07, %v5532_v4  ;;  %v1516_v34 = vsel %vm5539_vm15, %v1515_v33, %v5527_v60  ;;  %v5686_v41 = vld [vmem:[#allocation12 + $0x48] sm:$0xff] }
 0x936   : > { %v1504_v47 = vsel %vm447_vm2, %v1503_v8, -inf  ;;  %1799 = vmatpush.msrb.mxu3 %v5054_v9  ;;  %1828 = vmatpush.msra.mxu0 %v5554_v12  ;;  %v5566_v9 = vld [vmem:[#allocation10 + $0x58] sm:$0xff]  ;;  %vm1517_vm5 = vcmp.gt.f32.partialorder %v1516_v34, 2.0  ;;  %v1587_v44 = vmul.f32 0.99501246, %v5532_v4  ;;  %v5702_v8 = vld [vmem:[#allocation12 + $0x28] sm:$0xff] }
 0x937   : > { %1505 = vmax.xlane.f32.xlu0 %v1504_v47  ;;  %v1521_v45 = vadd.f32 0.6, %v1520_v19  ;;  %v3561_v37 = vsel %vm1517_vm5, 1.0, %v4184_v10  ;;  %v5694_v4 = vld [vmem:[#allocation12 + $0x38] sm:$0xff]  ;;  %v5706_v47 = vld [vmem:[#allocation12 + $0x20] sm:$0xff] }
 0x938   : > { %1800 = vmatpush.msrb.mxu3 %v5058_v2  ;;  %1829 = vmatpush.msra.mxu0 %v5558_v0  ;;  %v5574_v2 = vld [vmem:[#allocation10 + $0x48] sm:$0xff] }
 0x93a   : > { %1801 = vmatpush.msrb.mxu3 %v5062_v17  ;;  %1830 = vmatpush.msra.mxu0 %v5562_v16  ;;  %v5578_v17 = vld [vmem:[#allocation10 + $0x40] sm:$0xff] }
 0x93c   : > { %1802 = vmatpush.msrb.mxu3 %v5066_v13  ;;  %1831 = vmatpush.msra.mxu0 %v5566_v9  ;;  %v5582_v13 = vld [vmem:[#allocation10 + $0x38] sm:$0xff] }
 0x93e   : > { %1803 = vmatpush.msrb.mxu3 %v5070_v38  ;;  %1832 = vmatpush.msra.mxu0 %v5570_v57  ;;  %v5586_v38 = vld [vmem:[#allocation10 + $0x30] sm:$0xff] }
 0x940   : > { %1804 = vmatpush.msrb.mxu3 %v5074_v56  ;;  %1833 = vmatpush.msra.mxu0 %v5574_v2  ;;  %v5590_v56 = vld [vmem:[#allocation10 + $0x28] sm:$0xff] }
 0x942   : > { %1805 = vmatpush.msrb.mxu3 %v5078_v18  ;;  %1834 = vmatpush.msra.mxu0 %v5578_v17  ;;  %v5594_v18 = vld [vmem:[#allocation10 + $0x20] sm:$0xff] }
 0x944   : > { %1806 = vmatpush.msrb.mxu3 %v5082_v39  ;;  %1835 = vmatpush.msra.mxu0 %v5582_v13  ;;  %v5598_v39 = vld [vmem:[#allocation10 + $0x18] sm:$0xff] }
 0x946   : > { %1807 = vmatpush.msrb.mxu3 %v5086_v11  ;;  %1836 = vmatpush.msra.mxu0 %v5586_v38  ;;  %v5602_v11 = vld [vmem:[#allocation10 + $0x10] sm:$0xff] }
 0x948   : > { %1808 = vmatpush.msrb.mxu3 %v5090_v14  ;;  %1837 = vmatpush.msra.mxu0 %v5590_v56  ;;  %v5606_v14 = vld [vmem:[#allocation10 + $0x8] sm:$0xff] }
 0x94a   : > { %1809 = vmatpush.msrb.mxu3 %v5094_v15  ;;  %1838 = vmatpush.msra.mxu0 %v5594_v18  ;;  %v5610_v15 = vld [vmem:[#allocation10] sm:$0xff] }
 0x94c   : > { %1810 = vmatpush.msrb.mxu3 %v5098_v51  ;;  %1839 = vmatpush.msra.mxu0 %v5598_v39 }
 0x94e   : > { %1811 = vmatpush.msrb.mxu3 %v5102_v53  ;;  %1840 = vmatpush.msra.mxu0 %v5602_v11  ;;  %v1473_v53 = vmul.f32 0.99501246, %v5510_v1  ;;  %v5656_v1 = vld [vmem:[#allocation12 + $0x78] sm:$0xff] }
 0x950   : > { %1812 = vmatpush.msrb.mxu3 %v5106_v50  ;;  %1841 = vmatpush.msra.mxu0 %v5606_v14  ;;  %v1474_v26 = vadd.f32 %v1473_v53, %v1472_v23  ;;  %v5718_v53 = vld [vmem:[#allocation12 + $0x8] sm:$0xff]  ;;  %v5722_v23 = vld [vmem:[#allocation12] sm:$0xff] }
 0x952   : > { %1813 = vmatpush.msrb.mxu3 %v5110_v52  ;;  %1842 = vmatpush.msra.mxu0 %v5610_v15 }
 0x9aa   : > { %v1506_v51 = vpop.xlane.xlu0 %1505 }
 0x9ab   : > { %v1507_v7 = vrot.slane %v1506_v51, 4 }
 0x9ad   : > { %v1508_v24 = vmax.f32 %v1506_v51, %v1507_v7  ;;  %v5710_v51 = vld [vmem:[#allocation12 + $0x18] sm:$0xff]  ;;  %v5714_v7 = vld [vmem:[#allocation12 + $0x10] sm:$0xff] }
 0x9af   : > { %v1509_v22 = vrot.slane %v1508_v24, 2 }
 0x9b0   : > { %v1492_v50 = vpop.f32.mrf.mxu0 }
 0x9b1   : > { %v1495_v42 = vadd.f32 %v1492_v50, %v1474_v26  ;;  %v1510_v49 = vmax.f32 %v1508_v24, %v1509_v22 }
 0x9b3   : > { %v3560_v52 = vadd.f32 -0.6, %v1495_v42  ;;  %v1511_v40 = vrot.slane %v1510_v49, 1 }
 0x9b5   : > { %v5617_v29 = vsel %vm1496_vm0, %v3560_v52, %v1495_v42  ;;  %v1512_v30 = vmax.f32 %v1510_v49, %v1511_v40 }
 0x9b6   : > { %vm1522_vm3 = vcmp.ge.f32.partialorder %v5617_v29, %v1521_v45  ;;  %1556 = vst [vmem:[%s4351_s12 + $0xc] sm:$0x1] %v5617_v29  ;;  %v1463_v3 = vpop.f32.mrf.mxu3  ;;  %v1561_v52 = vmul.f32 0.99501246, %v5617_v29  ;;  %v1560_v45 = vld [vmem:[%s4339_s14 + $0xd] sm:$0x1] }
 0x9b7   : > { %v1466_v31 = vadd.f32 %v1463_v3, %v1445_v48  ;;  %3663 = vpush %v1512_v30  ;;  %vm1523_vm4 = vmand %vm1522_vm3, %vm376_vm1 }
 0x9b8   : > { %v3562_v35 = vsel %vm1523_vm4, 1.0, %v4184_v10  ;;  %v1562_v3 = vadd.f32 %v1561_v52, %v1560_v45  ;;  %v1648_v52 = vld [vmem:[%s4339_s14 + $0xe] sm:$0x1] }
 0x9b9   : > { %v5624_v32 = vadd.f32 %v5277_v54, %v1466_v31  ;;  %vm1526_vm6 = vcmp.eq.f32.partialorder %v3562_v35, 1.0 }
 0x9ba   : > { %v1527_v43 = vsel %vm1526_vm6, 0.0, %v5527_v60  ;;  %v5690_v60 = vld [vmem:[#allocation12 + $0x40] sm:$0xff] }
 0x9bb   : > { %1471 = vst [vmem:[%s4349_s29 + $0xb] sm:$0x1] %v5624_v32  ;;  %v1533_v19 = vmul.f32 0.95122945, %v5624_v32 }
 0x9e8   : > { %s3664_s23 = spop %3663 }
 0x9e9   : > { %p1514_p1 = scmp.gt.f32.partialorder %s3664_s23, 0.0 }
 0x9eb   : > { %s1528_s16 = scalar_select %p1514_p1, 1, 0 }
 0x9ed   : > { %v1529_v36 = vstv %s1528_s16 }
 0x9ee   : > { %vm1530_vm7 = vcmp.eq.s32.totalorder %v1529_v36, 1 }
 0x9ef   : > { %v5638_v46 = vsel %vm1530_vm7, %v3561_v37, %v3562_v35  ;;  %v5640_v27 = vsel %vm1530_vm7, %v1516_v34, %v1527_v43 }
 0x9f0   : > { %1557 = vst [vmem:[%s4353_s18 + $0xc] sm:$0x1] %v5638_v46  ;;  %v5645_v25 = vadd.f32 %v1587_v44, %v5638_v46  ;;  %1550 = vmatmul.f32.vlgmr.msra.gmra.mxu1 %v5638_v46  ;;  %1579 = vmatmul.f32.vlgmr.msra.gmra.mxu2 %v5638_v46  ;;  %vm1589_vm8 = vcmp.lt.f32.partialorder %v5640_v27, 2.0  ;;  %vm1584_vm10 = vcmp.eq.f32.partialorder %v5638_v46, 1.0  ;;  %v1603_v37 = vadd.f32 1.0, %v5640_v27 }
 0x9f1   : > { %vm5652_vm9 = vmand %vm1589_vm8, %vm376_vm1  ;;  %1886 = vmatpush.msra.mxu1 %v5656_v1  ;;  %1915 = vmatpush.msra.mxu2 %v5544_v61 }
 0x9f2   : > { %1646 = vst [vmem:[%s4355_s9 + $0xd] sm:$0x1] %v5645_v25  ;;  %v1591_v59 = vsel %vm5652_vm9, 1.0, %v4184_v10  ;;  %v1608_v34 = vmul.f32 0.07, %v5645_v25  ;;  %v1604_v43 = vsel %vm5652_vm9, %v1603_v37, %v5640_v27 }
 0x9f3   : > { %v1592_v20 = vsel %vm447_vm2, %v1591_v59, -inf  ;;  %1887 = vmatpush.msra.mxu1 %v5666_v62  ;;  %1916 = vmatpush.msra.mxu2 %v5554_v12  ;;  %vm1605_vm13 = vcmp.gt.f32.partialorder %v1604_v43, 2.0 }
 0x9f4   : > { %1593 = vmax.xlane.f32.xlu1 %v1592_v20  ;;  %v1609_v29 = vadd.f32 0.6, %v1608_v34  ;;  %v3564_v59 = vsel %vm1605_vm13, 1.0, %v4184_v10 }
 0x9f5   : > { %1888 = vmatpush.msra.mxu1 %v5670_v55  ;;  %1917 = vmatpush.msra.mxu2 %v5558_v0 }
 0x9f7   : > { %1889 = vmatpush.msra.mxu1 %v5674_v58  ;;  %1918 = vmatpush.msra.mxu2 %v5562_v16 }
 0x9f9   : > { %1890 = vmatpush.msra.mxu1 %v5678_v21  ;;  %1919 = vmatpush.msra.mxu2 %v5566_v9 }
 0x9fb   : > { %1891 = vmatpush.msra.mxu1 %v5682_v63  ;;  %1920 = vmatpush.msra.mxu2 %v5570_v57 }
 0x9fd   : > { %1892 = vmatpush.msra.mxu1 %v5686_v41  ;;  %1921 = vmatpush.msra.mxu2 %v5574_v2 }
 0x9ff   : > { %1893 = vmatpush.msra.mxu1 %v5690_v60  ;;  %1922 = vmatpush.msra.mxu2 %v5578_v17 }
 0xa01   : > { %1894 = vmatpush.msra.mxu1 %v5694_v4  ;;  %1923 = vmatpush.msra.mxu2 %v5582_v13 }
 0xa03   : > { %1895 = vmatpush.msra.mxu1 %v5698_v5  ;;  %1924 = vmatpush.msra.mxu2 %v5586_v38 }
 0xa05   : > { %1896 = vmatpush.msra.mxu1 %v5702_v8  ;;  %1925 = vmatpush.msra.mxu2 %v5590_v56 }
 0xa07   : > { %1897 = vmatpush.msra.mxu1 %v5706_v47  ;;  %1926 = vmatpush.msra.mxu2 %v5594_v18 }
 0xa09   : > { %1898 = vmatpush.msra.mxu1 %v5710_v51  ;;  %1927 = vmatpush.msra.mxu2 %v5598_v39 }
 0xa0b   : > { %1899 = vmatpush.msra.mxu1 %v5714_v7  ;;  %1928 = vmatpush.msra.mxu2 %v5602_v11 }
 0xa0d   : > { %1900 = vmatpush.msra.mxu1 %v5718_v53  ;;  %1929 = vmatpush.msra.mxu2 %v5606_v14 }
 0xa0f   : > { %1901 = vmatpush.msra.mxu1 %v5722_v23  ;;  %1930 = vmatpush.msra.mxu2 %v5610_v15 }
 0xa67   : > { %v1594_v24 = vpop.xlane.xlu1 %1593 }
 0xa68   : > { %v1595_v22 = vrot.slane %v1594_v24, 4 }
 0xa6a   : > { %v1596_v26 = vmax.f32 %v1594_v24, %v1595_v22  ;;  %v1675_v24 = vmul.f32 0.99501246, %v5645_v25 }
 0xa6c   : > { %v1597_v50 = vrot.slane %v1596_v26, 2 }
 0xa6d   : > { %v1551_v42 = vpop.f32.mrf.mxu1 }
 0xa6e   : > { %v1554_v49 = vadd.f32 %v1551_v42, %v1533_v19  ;;  %v1598_v40 = vmax.f32 %v1596_v26, %v1597_v50 }
 0xa70   : > { %v5730_v48 = vadd.f32 %v5277_v54, %v1554_v49  ;;  %v1599_v30 = vrot.slane %v1598_v40, 1 }
 0xa72   : > { %1559 = vst [vmem:[%s4349_s29 + $0xc] sm:$0x1] %v5730_v48  ;;  %v1600_v31 = vmax.f32 %v1598_v40, %v1599_v30 }
 0xa73   : > { %v1580_v33 = vpop.f32.mrf.mxu2 }
 0xa74   : > { %v1583_v35 = vadd.f32 %v1580_v33, %v1562_v3  ;;  %3665 = vpush %v1600_v31 }
 0xa76   : > { %v3563_v32 = vadd.f32 -0.6, %v1583_v35 }
 0xa78   : > { %v1586_v36 = vsel %vm1584_vm10, %v3563_v32, %v1583_v35 }
 0xa79   : > { %vm1610_vm11 = vcmp.ge.f32.partialorder %v1586_v36, %v1609_v29  ;;  %1644 = vst [vmem:[%s4351_s12 + $0xd] sm:$0x1] %v1586_v36  ;;  %v1649_v49 = vmul.f32 0.99501246, %v1586_v36 }
 0xa7a   : > { %vm1611_vm12 = vmand %vm1610_vm11, %vm376_vm1 }
 0xa7b   : > { %v3565_v44 = vsel %vm1611_vm12, 1.0, %v4184_v10  ;;  %v1650_v30 = vadd.f32 %v1649_v49, %v1648_v52 }
 0xa7c   : > { %vm1614_vm14 = vcmp.eq.f32.partialorder %v3565_v44, 1.0 }
 0xa7d   : > { %v1615_v20 = vsel %vm1614_vm14, 0.0, %v5640_v27 }
 0xaa5   : > { %s3666_s17 = spop %3665 }
 0xaa6   : > { %p1602_p4 = scmp.gt.f32.partialorder %s3666_s17, 0.0 }
 0xaa8   : > { %s1616_s20 = scalar_select %p1602_p4, 1, 0 }
 0xaaa   : > { %v1617_v46 = vstv %s1616_s20 }
 0xaab   : > { %vm1618_vm15 = vcmp.eq.s32.totalorder %v1617_v46, 1 }
 0xaac   : > { %v1619_v22 = vsel %vm1618_vm15, %v3564_v59, %v3565_v44  ;;  %v5747_v26 = vsel %vm1618_vm15, %v1604_v43, %v1615_v20  ;;  %v1621_v43 = vmul.f32 0.95122945, %v5730_v48 }
 0xaad   : > { %1645 = vst [vmem:[%s4353_s18 + $0xd] sm:$0x1] %v1619_v22  ;;  %v5750_v28 = vadd.f32 %v1675_v24, %v1619_v22  ;;  %1638 = vmatmul.f32.vlgmr.msra.gmra.mxu3 %v1619_v22  ;;  %1667 = vmatmul.f32.vlgmr.msrb.gmra.mxu0 %v1619_v22  ;;  %vm1677_vm0 = vcmp.lt.f32.partialorder %v5747_v26, 2.0  ;;  %vm1672_vm4 = vcmp.eq.f32.partialorder %v1619_v22, 1.0  ;;  %v1691_v20 = vadd.f32 1.0, %v5747_v26 }
 0xaae   : > { %vm5755_vm3 = vmand %vm1677_vm0, %vm376_vm1  ;;  %1974 = vmatpush.msra.mxu3 %v5656_v1  ;;  %2003 = vmatpush.msrb.mxu0 %v5544_v61 }
 0xaaf   : > { %1734 = vst [vmem:[%s4355_s9 + $0xe] sm:$0x1] %v5750_v28  ;;  %v1679_v27 = vsel %vm5755_vm3, 1.0, %v4184_v10  ;;  %v1696_v31 = vmul.f32 0.07, %v5750_v28  ;;  %v1692_v48 = vsel %vm5755_vm3, %v1691_v20, %v5747_v26 }
 0xab0   : > { %v1680_v25 = vsel %vm447_vm2, %v1679_v27, -inf  ;;  %1975 = vmatpush.msra.mxu3 %v5666_v62  ;;  %2004 = vmatpush.msrb.mxu0 %v5554_v12  ;;  %vm1693_vm7 = vcmp.gt.f32.partialorder %v1692_v48, 2.0 }
 0xab1   : > { %1681 = vmax.xlane.f32.xlu2 %v1680_v25  ;;  %v1697_v29 = vadd.f32 0.6, %v1696_v31  ;;  %v3567_v22 = vsel %vm1693_vm7, 1.0, %v4184_v10  ;;  %v1763_v25 = vmul.f32 0.99501246, %v5750_v28 }
 0xab2   : > { %1976 = vmatpush.msra.mxu3 %v5670_v55  ;;  %2005 = vmatpush.msrb.mxu0 %v5558_v0 }
 0xab4   : > { %1977 = vmatpush.msra.mxu3 %v5674_v58  ;;  %2006 = vmatpush.msrb.mxu0 %v5562_v16 }
 0xab6   : > { %1978 = vmatpush.msra.mxu3 %v5678_v21  ;;  %2007 = vmatpush.msrb.mxu0 %v5566_v9 }
 0xab8   : > { %1979 = vmatpush.msra.mxu3 %v5682_v63  ;;  %2008 = vmatpush.msrb.mxu0 %v5570_v57 }
 0xaba   : > { %1980 = vmatpush.msra.mxu3 %v5686_v41  ;;  %2009 = vmatpush.msrb.mxu0 %v5574_v2 }
 0xabc   : > { %1981 = vmatpush.msra.mxu3 %v5690_v60  ;;  %2010 = vmatpush.msrb.mxu0 %v5578_v17 }
 0xabe   : > { %1982 = vmatpush.msra.mxu3 %v5694_v4  ;;  %2011 = vmatpush.msrb.mxu0 %v5582_v13 }
 0xac0   : > { %1983 = vmatpush.msra.mxu3 %v5698_v5  ;;  %2012 = vmatpush.msrb.mxu0 %v5586_v38 }
 0xac2   : > { %1984 = vmatpush.msra.mxu3 %v5702_v8  ;;  %2013 = vmatpush.msrb.mxu0 %v5590_v56 }
 0xac4   : > { %1985 = vmatpush.msra.mxu3 %v5706_v47  ;;  %2014 = vmatpush.msrb.mxu0 %v5594_v18 }
 0xac6   : > { %1986 = vmatpush.msra.mxu3 %v5710_v51  ;;  %2015 = vmatpush.msrb.mxu0 %v5598_v39 }
 0xac8   : > { %1987 = vmatpush.msra.mxu3 %v5714_v7  ;;  %2016 = vmatpush.msrb.mxu0 %v5602_v11 }
 0xaca   : > { %1988 = vmatpush.msra.mxu3 %v5718_v53  ;;  %2017 = vmatpush.msrb.mxu0 %v5606_v14 }
 0xacc   : > { %1989 = vmatpush.msra.mxu3 %v5722_v23  ;;  %2018 = vmatpush.msrb.mxu0 %v5610_v15 }
 0xb24   : > { %v1682_v19 = vpop.xlane.xlu2 %1681 }
 0xb25   : > { %v1683_v42 = vrot.slane %v1682_v19, 4 }
 0xb27   : > { %v1684_v40 = vmax.f32 %v1682_v19, %v1683_v42 }
 0xb29   : > { %v1685_v45 = vrot.slane %v1684_v40, 2 }
 0xb2a   : > { %v1668_v3 = vpop.f32.mrf.mxu0 }
 0xb2b   : > { %v1671_v33 = vadd.f32 %v1668_v3, %v1650_v30  ;;  %v1686_v34 = vmax.f32 %v1684_v40, %v1685_v45 }
 0xb2d   : > { %v3566_v35 = vadd.f32 -0.6, %v1671_v33  ;;  %v1687_v32 = vrot.slane %v1686_v34, 1 }
 0xb2f   : > { %v5799_v37 = vsel %vm1672_vm4, %v3566_v35, %v1671_v33  ;;  %v1688_v36 = vmax.f32 %v1686_v34, %v1687_v32  ;;  %v1736_v32 = vld [vmem:[%s4339_s14 + $0xf] sm:$0x1] }
 0xb30   : > { %vm1698_vm5 = vcmp.ge.f32.partialorder %v5799_v37, %v1697_v29  ;;  %1732 = vst [vmem:[%s4351_s12 + $0xe] sm:$0x1] %v5799_v37  ;;  %v1639_v44 = vpop.f32.mrf.mxu3  ;;  %v1737_v34 = vmul.f32 0.99501246, %v5799_v37  ;;  %v5882_v29 = vld [vmem:[%s7218_s3] sm:$0x1] }
 0xb31   : > { %v1642_v46 = vadd.f32 %v1639_v44, %v1621_v43  ;;  %3667 = vpush %v1688_v36  ;;  %vm1699_vm6 = vmand %vm1698_vm5, %vm376_vm1 }
 0xb32   : > { %v3568_v24 = vsel %vm1699_vm6, 1.0, %v4184_v10  ;;  %v1738_v44 = vadd.f32 %v1737_v34, %v1736_v32  ;;  %v1824_v34 = vld [vmem:[%s4339_s14 + $0x10] sm:$0x1] }
 0xb33   : > { %v5806_v59 = vadd.f32 %v5277_v54, %v1642_v46  ;;  %vm1702_vm8 = vcmp.eq.f32.partialorder %v3568_v24, 1.0 }
 0xb34   : > { %v1703_v27 = vsel %vm1702_vm8, 0.0, %v5747_v26 }
 0xb35   : > { %1647 = vst [vmem:[%s4349_s29 + $0xd] sm:$0x1] %v5806_v59  ;;  %v1709_v3 = vmul.f32 0.95122945, %v5806_v59 }
 0xb62   : > { %s3668_s13 = spop %3667 }
 0xb63   : > { %p1690_p9 = scmp.gt.f32.partialorder %s3668_s13, 0.0 }
 0xb65   : > { %s1704_s21 = scalar_select %p1690_p9, 1, 0 }
 0xb67   : > { %v1705_v54 = vstv %s1704_s21 }
 0xb68   : > { %vm1706_vm9 = vcmp.eq.s32.totalorder %v1705_v54, 1 }
 0xb69   : > { %v5820_v19 = vsel %vm1706_vm9, %v3567_v22, %v3568_v24  ;;  %v5822_v50 = vsel %vm1706_vm9, %v1692_v48, %v1703_v27 }
 0xb6a   : > { %1733 = vst [vmem:[%s4353_s18 + $0xe] sm:$0x1] %v5820_v19  ;;  %v5827_v42 = vadd.f32 %v1763_v25, %v5820_v19  ;;  %1726 = vmatmul.f32.vlgmr.msrb.gmra.mxu1 %v5820_v19  ;;  %1755 = vmatmul.f32.vlgmr.msrb.gmra.mxu2 %v5820_v19  ;;  %vm1765_vm10 = vcmp.lt.f32.partialorder %v5822_v50, 2.0  ;;  %vm1760_vm12 = vcmp.eq.f32.partialorder %v5820_v19, 1.0  ;;  %v1779_v22 = vadd.f32 1.0, %v5822_v50 }
 0xb6b   : > { %vm5834_vm11 = vmand %vm1765_vm10, %vm376_vm1  ;;  %2062 = vmatpush.msrb.mxu1 %v5656_v1  ;;  %2091 = vmatpush.msrb.mxu2 %v5544_v61 }
 0xb6c   : > { %1822 = vst [vmem:[%s4355_s9 + $0xf] sm:$0x1] %v5827_v42  ;;  %v1767_v28 = vsel %vm5834_vm11, 1.0, %v4184_v10  ;;  %v1784_v20 = vmul.f32 0.07, %v5827_v42  ;;  %v1780_v27 = vsel %vm5834_vm11, %v1779_v22, %v5822_v50 }
 0xb6d   : > { %v1768_v49 = vsel %vm447_vm2, %v1767_v28, -inf  ;;  %2063 = vmatpush.msrb.mxu1 %v5666_v62  ;;  %2092 = vmatpush.msrb.mxu2 %v5554_v12  ;;  %vm1781_vm15 = vcmp.gt.f32.partialorder %v1780_v27, 2.0 }
 0xb6e   : > { %1769 = vmax.xlane.f32.xlu0 %v1768_v49  ;;  %v1785_v24 = vadd.f32 0.6, %v1784_v20  ;;  %v3570_v28 = vsel %vm1781_vm15, 1.0, %v4184_v10 }
 0xb6f   : > { %2064 = vmatpush.msrb.mxu1 %v5670_v55  ;;  %2093 = vmatpush.msrb.mxu2 %v5558_v0 }
 0xb71   : > { %2065 = vmatpush.msrb.mxu1 %v5674_v58  ;;  %2094 = vmatpush.msrb.mxu2 %v5562_v16 }
 0xb73   : > { %2066 = vmatpush.msrb.mxu1 %v5678_v21  ;;  %2095 = vmatpush.msrb.mxu2 %v5566_v9 }
 0xb75   : > { %2067 = vmatpush.msrb.mxu1 %v5682_v63  ;;  %2096 = vmatpush.msrb.mxu2 %v5570_v57 }
 0xb77   : > { %2068 = vmatpush.msrb.mxu1 %v5686_v41  ;;  %2097 = vmatpush.msrb.mxu2 %v5574_v2 }
 0xb79   : > { %2069 = vmatpush.msrb.mxu1 %v5690_v60  ;;  %2098 = vmatpush.msrb.mxu2 %v5578_v17 }
 0xb7b   : > { %2070 = vmatpush.msrb.mxu1 %v5694_v4  ;;  %2099 = vmatpush.msrb.mxu2 %v5582_v13 }
 0xb7d   : > { %2071 = vmatpush.msrb.mxu1 %v5698_v5  ;;  %2100 = vmatpush.msrb.mxu2 %v5586_v38 }
 0xb7f   : > { %2072 = vmatpush.msrb.mxu1 %v5702_v8  ;;  %2101 = vmatpush.msrb.mxu2 %v5590_v56 }
 0xb81   : > { %2073 = vmatpush.msrb.mxu1 %v5706_v47  ;;  %2102 = vmatpush.msrb.mxu2 %v5594_v18 }
 0xb83   : > { %2074 = vmatpush.msrb.mxu1 %v5710_v51  ;;  %2103 = vmatpush.msrb.mxu2 %v5598_v39 }
 0xb85   : > { %2075 = vmatpush.msrb.mxu1 %v5714_v7  ;;  %2104 = vmatpush.msrb.mxu2 %v5602_v11 }
 0xb87   : > { %2076 = vmatpush.msrb.mxu1 %v5718_v53  ;;  %2105 = vmatpush.msrb.mxu2 %v5606_v14 }
 0xb89   : > { %2077 = vmatpush.msrb.mxu1 %v5722_v23  ;;  %2106 = vmatpush.msrb.mxu2 %v5610_v15 }
 0xbe1   : > { %v1770_v52 = vpop.xlane.xlu0 %1769 }
 0xbe2   : > { %v1771_v40 = vrot.slane %v1770_v52, 4 }
 0xbe4   : > { %v1772_v45 = vmax.f32 %v1770_v52, %v1771_v40  ;;  %v1851_v52 = vmul.f32 0.99501246, %v5827_v42 }
 0xbe6   : > { %v1773_v30 = vrot.slane %v1772_v45, 2 }
 0xbe7   : > { %v1727_v31 = vpop.f32.mrf.mxu1 }
 0xbe8   : > { %v1730_v33 = vadd.f32 %v1727_v31, %v1709_v3  ;;  %v1774_v35 = vmax.f32 %v1772_v45, %v1773_v30 }
 0xbea   : > { %v5885_v43 = vadd.f32 %v5882_v29, %v1730_v33  ;;  %v1775_v36 = vrot.slane %v1774_v35, 1 }
 0xbec   : > { %1735 = vst [vmem:[%s4349_s29 + $0xe] sm:$0x1] %v5885_v43  ;;  %v1776_v46 = vmax.f32 %v1774_v35, %v1775_v36 }
 0xbed   : > { %v1756_v59 = vpop.f32.mrf.mxu2 }
 0xbee   : > { %v1759_v37 = vadd.f32 %v1756_v59, %v1738_v44  ;;  %3669 = vpush %v1776_v46 }
 0xbf0   : > { %v3569_v48 = vadd.f32 -0.6, %v1759_v37 }
 0xbf2   : > { %v1762_v54 = vsel %vm1760_vm12, %v3569_v48, %v1759_v37 }
 0xbf3   : > { %vm1786_vm13 = vcmp.ge.f32.partialorder %v1762_v54, %v1785_v24  ;;  %1820 = vst [vmem:[%s4351_s12 + $0xf] sm:$0x1] %v1762_v54  ;;  %v1825_v33 = vmul.f32 0.99501246, %v1762_v54 }
 0xbf4   : > { %vm1787_vm14 = vmand %vm1786_vm13, %vm376_vm1 }
 0xbf5   : > { %v3571_v25 = vsel %vm1787_vm14, 1.0, %v4184_v10  ;;  %v1826_v36 = vadd.f32 %v1825_v33, %v1824_v34 }
 0xbf6   : > { %vm1790_vm0 = vcmp.eq.f32.partialorder %v3571_v25, 1.0 }
 0xbf7   : > { %v1791_v49 = vsel %vm1790_vm0, 0.0, %v5822_v50 }
 0xc1f   : > { %s3670_s30 = spop %3669 }
 0xc20   : > { %p1778_p12 = scmp.gt.f32.partialorder %s3670_s30, 0.0 }
 0xc22   : > { %s1792_s23 = scalar_select %p1778_p12, 1, 0 }
 0xc24   : > { %v1793_v19 = vstv %s1792_s23 }
 0xc25   : > { %vm1794_vm3 = vcmp.eq.s32.totalorder %v1793_v19, 1 }
 0xc26   : > { %v1795_v40 = vsel %vm1794_vm3, %v3570_v28, %v3571_v25  ;;  %v5902_v45 = vsel %vm1794_vm3, %v1780_v27, %v1791_v49  ;;  %v1797_v27 = vmul.f32 0.95122945, %v5885_v43 }
 0xc27   : > { %1821 = vst [vmem:[%s4353_s18 + $0xf] sm:$0x1] %v1795_v40  ;;  %v5905_v26 = vadd.f32 %v1851_v52, %v1795_v40  ;;  %1814 = vmatmul.f32.vlgmr.msrb.gmra.mxu3 %v1795_v40  ;;  %1843 = vmatmul.f32.vlgmr.msra.gmra.mxu0 %v1795_v40  ;;  %vm1853_vm4 = vcmp.lt.f32.partialorder %v5902_v45, 2.0  ;;  %vm1848_vm6 = vcmp.eq.f32.partialorder %v1795_v40, 1.0  ;;  %v1867_v49 = vadd.f32 1.0, %v5902_v45 }
 0xc28   : > { %vm5910_vm5 = vmand %vm1853_vm4, %vm376_vm1  ;;  %2150 = vmatpush.msrb.mxu3 %v5656_v1  ;;  %2179 = vmatpush.msra.mxu0 %v5544_v61 }
 0xc29   : > { %1910 = vst [vmem:[%s4355_s9 + $0x10] sm:$0x1] %v5905_v26  ;;  %v1855_v50 = vsel %vm5910_vm5, 1.0, %v4184_v10  ;;  %v1872_v46 = vmul.f32 0.07, %v5905_v26  ;;  %v1868_v43 = vsel %vm5910_vm5, %v1867_v49, %v5902_v45 }
 0xc2a   : > { %v1856_v42 = vsel %vm447_vm2, %v1855_v50, -inf  ;;  %2151 = vmatpush.msrb.mxu3 %v5666_v62  ;;  %2180 = vmatpush.msra.mxu0 %v5554_v12  ;;  %vm1869_vm9 = vcmp.gt.f32.partialorder %v1868_v43, 2.0 }
 0xc2b   : > { %1857 = vmax.xlane.f32.xlu1 %v1856_v42  ;;  %v1873_v24 = vadd.f32 0.6, %v1872_v46  ;;  %v3573_v50 = vsel %vm1869_vm9, 1.0, %v4184_v10 }
 0xc2c   : > { %2152 = vmatpush.msrb.mxu3 %v5670_v55  ;;  %2181 = vmatpush.msra.mxu0 %v5558_v0 }
 0xc2e   : > { %2153 = vmatpush.msrb.mxu3 %v5674_v58  ;;  %2182 = vmatpush.msra.mxu0 %v5562_v16 }
 0xc30   : > { %2154 = vmatpush.msrb.mxu3 %v5678_v21  ;;  %2183 = vmatpush.msra.mxu0 %v5566_v9 }
 0xc32   : > { %2155 = vmatpush.msrb.mxu3 %v5682_v63  ;;  %2184 = vmatpush.msra.mxu0 %v5570_v57 }
 0xc34   : > { %2156 = vmatpush.msrb.mxu3 %v5686_v41  ;;  %2185 = vmatpush.msra.mxu0 %v5574_v2 }
 0xc36   : > { %2157 = vmatpush.msrb.mxu3 %v5690_v60  ;;  %2186 = vmatpush.msra.mxu0 %v5578_v17 }
 0xc38   : > { %2158 = vmatpush.msrb.mxu3 %v5694_v4  ;;  %2187 = vmatpush.msra.mxu0 %v5582_v13 }
 0xc3a   : > { %2159 = vmatpush.msrb.mxu3 %v5698_v5  ;;  %2188 = vmatpush.msra.mxu0 %v5586_v38 }
 0xc3c   : > { %2160 = vmatpush.msrb.mxu3 %v5702_v8  ;;  %2189 = vmatpush.msra.mxu0 %v5590_v56 }
 0xc3e   : > { %2161 = vmatpush.msrb.mxu3 %v5706_v47  ;;  %2190 = vmatpush.msra.mxu0 %v5594_v18 }
 0xc40   : > { %2162 = vmatpush.msrb.mxu3 %v5710_v51  ;;  %2191 = vmatpush.msra.mxu0 %v5598_v39 }
 0xc42   : > { %2163 = vmatpush.msrb.mxu3 %v5714_v7  ;;  %2192 = vmatpush.msra.mxu0 %v5602_v11 }
 0xc44   : > { %2164 = vmatpush.msrb.mxu3 %v5718_v53  ;;  %2193 = vmatpush.msra.mxu0 %v5606_v14 }
 0xc46   : > { %2165 = vmatpush.msrb.mxu3 %v5722_v23  ;;  %2194 = vmatpush.msra.mxu0 %v5610_v15 }
 0xc9e   : > { %v1858_v3 = vpop.xlane.xlu1 %1857 }
 0xc9f   : > { %v1859_v31 = vrot.slane %v1858_v3, 4 }
 0xca1   : > { %v1860_v35 = vmax.f32 %v1858_v3, %v1859_v31  ;;  %v1939_v3 = vmul.f32 0.99501246, %v5905_v26 }
 0xca3   : > { %v1861_v32 = vrot.slane %v1860_v35, 2 }
 0xca4   : > { %v1844_v44 = vpop.f32.mrf.mxu0 }
 0xca5   : > { %v1847_v59 = vadd.f32 %v1844_v44, %v1826_v36  ;;  %v1862_v20 = vmax.f32 %v1860_v35, %v1861_v32 }
 0xca7   : > { %v3572_v37 = vadd.f32 -0.6, %v1847_v59  ;;  %v1863_v48 = vrot.slane %v1862_v20, 1 }
 0xca9   : > { %v5954_v22 = vsel %vm1848_vm6, %v3572_v37, %v1847_v59  ;;  %v1864_v54 = vmax.f32 %v1862_v20, %v1863_v48 }
 0xcaa   : > { %vm1874_vm7 = vcmp.ge.f32.partialorder %v5954_v22, %v1873_v24  ;;  %1908 = vst [vmem:[%s4351_s12 + $0x10] sm:$0x1] %v5954_v22  ;;  %v1815_v25 = vpop.f32.mrf.mxu3  ;;  %v1913_v37 = vmul.f32 0.99501246, %v5954_v22  ;;  %v1912_v24 = vld [vmem:[%s4339_s14 + $0x11] sm:$0x1] }
 0xcab   : > { %v1818_v19 = vadd.f32 %v1815_v25, %v1797_v27  ;;  %3671 = vpush %v1864_v54  ;;  %vm1875_vm8 = vmand %vm1874_vm7, %vm376_vm1 }
 0xcac   : > { %v3574_v52 = vsel %vm1875_vm8, 1.0, %v4184_v10  ;;  %v1914_v25 = vadd.f32 %v1913_v37, %v1912_v24 }
 0xcad   : > { %v5961_v28 = vadd.f32 %v5882_v29, %v1818_v19  ;;  %vm1878_vm10 = vcmp.eq.f32.partialorder %v3574_v52, 1.0 }
 0xcae   : > { %v1879_v42 = vsel %vm1878_vm10, 0.0, %v5902_v45 }
 0xcaf   : > { %1823 = vst [vmem:[%s4349_s29 + $0xf] sm:$0x1] %v5961_v28  ;;  %v1885_v46 = vmul.f32 0.95122945, %v5961_v28 }
 0xcdc   : > { %s3672_s16 = spop %3671 }
 0xcdd   : > { %p1866_p2 = scmp.gt.f32.partialorder %s3672_s16, 0.0 }
 0xcdf   : > { %s1880_s17 = scalar_select %p1866_p2, 1, 0 }
 0xce1   : > { %v1881_v40 = vstv %s1880_s17 }
 0xce2   : > { %vm1882_vm11 = vcmp.eq.s32.totalorder %v1881_v40, 1 }
 0xce3   : > { %v5975_v31 = vsel %vm1882_vm11, %v3573_v50, %v3574_v52  ;;  %v5977_v30 = vsel %vm1882_vm11, %v1868_v43, %v1879_v42 }
 0xce4   : > { %1909 = vst [vmem:[%s4353_s18 + $0x10] sm:$0x1] %v5975_v31  ;;  %v5982_v33 = vadd.f32 %v1939_v3, %v5975_v31  ;;  %1902 = vmatmul.f32.vlgmr.msra.gmra.mxu1 %v5975_v31  ;;  %1931 = vmatmul.f32.vlgmr.msra.gmra.mxu2 %v5975_v31  ;;  %vm1941_vm12 = vcmp.lt.f32.partialorder %v5977_v30, 2.0  ;;  %vm1936_vm14 = vcmp.eq.f32.partialorder %v5975_v31, 1.0  ;;  %v1955_v50 = vadd.f32 1.0, %v5977_v30 }
 0xce5   : > { %vm5989_vm13 = vmand %vm1941_vm12, %vm376_vm1  ;;  %2238 = vmatpush.msra.mxu1 %v5656_v1  ;;  %2267 = vmatpush.msra.mxu2 %v5544_v61 }
 0xce6   : > { %1998 = vst [vmem:[%s4355_s9 + $0x11] sm:$0x1] %v5982_v33  ;;  %v1943_v26 = vsel %vm5989_vm13, 1.0, %v4184_v10  ;;  %v1960_v43 = vmul.f32 0.07, %v5982_v33  ;;  %v1956_v42 = vsel %vm5989_vm13, %v1955_v50, %v5977_v30 }
 0xce7   : > { %v1944_v34 = vsel %vm447_vm2, %v1943_v26, -inf  ;;  %2239 = vmatpush.msra.mxu1 %v5666_v62  ;;  %2268 = vmatpush.msra.mxu2 %v5554_v12  ;;  %vm1957_vm3 = vcmp.gt.f32.partialorder %v1956_v42, 2.0 }
 0xce8   : > { %1945 = vmax.xlane.f32.xlu2 %v1944_v34  ;;  %v1961_v22 = vadd.f32 0.6, %v1960_v43  ;;  %v3576_v26 = vsel %vm1957_vm3, 1.0, %v4184_v10 }
 0xce9   : > { %2240 = vmatpush.msra.mxu1 %v5670_v55  ;;  %2269 = vmatpush.msra.mxu2 %v5558_v0 }
 0xceb   : > { %2241 = vmatpush.msra.mxu1 %v5674_v58  ;;  %2270 = vmatpush.msra.mxu2 %v5562_v16 }
 0xced   : > { %2242 = vmatpush.msra.mxu1 %v5678_v21  ;;  %2271 = vmatpush.msra.mxu2 %v5566_v9 }
 0xcef   : > { %2243 = vmatpush.msra.mxu1 %v5682_v63  ;;  %2272 = vmatpush.msra.mxu2 %v5570_v57 }
 0xcf1   : > { %2244 = vmatpush.msra.mxu1 %v5686_v41  ;;  %2273 = vmatpush.msra.mxu2 %v5574_v2 }
 0xcf3   : > { %2245 = vmatpush.msra.mxu1 %v5690_v60  ;;  %2274 = vmatpush.msra.mxu2 %v5578_v17 }
 0xcf5   : > { %2246 = vmatpush.msra.mxu1 %v5694_v4  ;;  %2275 = vmatpush.msra.mxu2 %v5582_v13 }
 0xcf7   : > { %2247 = vmatpush.msra.mxu1 %v5698_v5  ;;  %2276 = vmatpush.msra.mxu2 %v5586_v38 }
 0xcf9   : > { %2248 = vmatpush.msra.mxu1 %v5702_v8  ;;  %2277 = vmatpush.msra.mxu2 %v5590_v56 }
 0xcfb   : > { %2249 = vmatpush.msra.mxu1 %v5706_v47  ;;  %2278 = vmatpush.msra.mxu2 %v5594_v18 }
 0xcfd   : > { %2250 = vmatpush.msra.mxu1 %v5710_v51  ;;  %2279 = vmatpush.msra.mxu2 %v5598_v39 }
 0xcff   : > { %2251 = vmatpush.msra.mxu1 %v5714_v7  ;;  %2280 = vmatpush.msra.mxu2 %v5602_v11 }
 0xd01   : > { %2252 = vmatpush.msra.mxu1 %v5718_v53  ;;  %2281 = vmatpush.msra.mxu2 %v5606_v14 }
 0xd03   : > { %2253 = vmatpush.msra.mxu1 %v5722_v23  ;;  %2282 = vmatpush.msra.mxu2 %v5610_v15 }
 0xd5b   : > { %v1946_v35 = vpop.xlane.xlu2 %1945 }
 0xd5c   : > { %v1947_v32 = vrot.slane %v1946_v35, 4 }
 0xd5e   : > { %v1948_v36 = vmax.f32 %v1946_v35, %v1947_v32  ;;  %v2027_v35 = vmul.f32 0.99501246, %v5982_v33 }
 0xd60   : > { %v1949_v44 = vrot.slane %v1948_v36, 2 }
 0xd61   : > { %v1903_v59 = vpop.f32.mrf.mxu1 }
 0xd62   : > { %v1906_v20 = vadd.f32 %v1903_v59, %v1885_v46  ;;  %v1950_v48 = vmax.f32 %v1948_v36, %v1949_v44 }
 0xd64   : > { %v6035_v27 = vadd.f32 %v5882_v29, %v1906_v20  ;;  %v1951_v54 = vrot.slane %v1950_v48, 1 }
 0xd66   : > { %1911 = vst [vmem:[%s4349_s29 + $0x10] sm:$0x1] %v6035_v27  ;;  %v1952_v19 = vmax.f32 %v1950_v48, %v1951_v54 }
 0xd67   : > { %v1932_v49 = vpop.f32.mrf.mxu2 }
 0xd68   : > { %v1935_v52 = vadd.f32 %v1932_v49, %v1914_v25  ;;  %3673 = vpush %v1952_v19 }
 0xd6a   : > { %v3575_v28 = vadd.f32 -0.6, %v1935_v52 }
 0xd6c   : > { %v1938_v40 = vsel %vm1936_vm14, %v3575_v28, %v1935_v52 }
 0xd6d   : > { %vm1962_vm15 = vcmp.ge.f32.partialorder %v1938_v40, %v1961_v22  ;;  %1996 = vst [vmem:[%s4351_s12 + $0x11] sm:$0x1] %v1938_v40  ;;  %v6298_v22 = vld [vmem:[#allocation12 + $0x30] sm:$0xff] }
 0xd6e   : > { %vm1963_vm0 = vmand %vm1962_vm15, %vm376_vm1 }
 0xd6f   : > { %v3577_v3 = vsel %vm1963_vm0, 1.0, %v4184_v10 }
 0xd70   : > { %vm1966_vm4 = vcmp.eq.f32.partialorder %v3577_v3, 1.0 }
 0xd71   : > { %v1967_v34 = vsel %vm1966_vm4, 0.0, %v5977_v30 }
 0xd99   : > { %s3674_s20 = spop %3673 }
 0xd9a   : > { %p1954_p11 = scmp.gt.f32.partialorder %s3674_s20, 0.0 }
 0xd9c   : > { %s1968_s13 = scalar_select %p1954_p11, 1, 0 }
 0xd9e   : > { %v1969_v31 = vstv %s1968_s13 }
 0xd9f   : > { %vm1970_vm5 = vcmp.eq.s32.totalorder %v1969_v31, 1  ;;  %v6162_v31 = vld [vmem:[#allocation10 + $0x60] sm:$0xff] }
 0xda0   : > { %v1971_v32 = vsel %vm1970_vm5, %v3576_v26, %v3577_v3  ;;  %v6052_v36 = vsel %vm1970_vm5, %v1956_v42, %v1967_v34  ;;  %v6154_v3 = vld [vmem:[#allocation10 + $0x70] sm:$0xff] }
 0xda1   : > { %1997 = vst [vmem:[%s4353_s18 + $0x11] sm:$0x1] %v1971_v32  ;;  %v6055_v45 = vadd.f32 %v2027_v35, %v1971_v32  ;;  %1990 = vmatmul.f32.vlgmr.msra.gmra.mxu3 %v1971_v32  ;;  %2019 = vmatmul.f32.vlgmr.msrb.gmra.mxu0 %v1971_v32  ;;  %vm2029_vm6 = vcmp.lt.f32.partialorder %v6052_v36, 2.0  ;;  %vm2024_vm8 = vcmp.eq.f32.partialorder %v1971_v32, 1.0  ;;  %v2043_v48 = vadd.f32 1.0, %v6052_v36  ;;  %v6170_v26 = vld [vmem:[#allocation10 + $0x50] sm:$0xff] }
 0xda2   : > { %vm6060_vm7 = vmand %vm2029_vm6, %vm376_vm1  ;;  %2326 = vmatpush.msra.mxu3 %v5656_v1  ;;  %2355 = vmatpush.msrb.mxu0 %v5544_v61 }
 0xda3   : > { %2086 = vst [vmem:[%s4355_s9 + $0x12] sm:$0x1] %v6055_v45  ;;  %v2031_v30 = vsel %vm6060_vm7, 1.0, %v4184_v10  ;;  %v2044_v24 = vsel %vm6060_vm7, %v2043_v48, %v6052_v36  ;;  %v2115_v49 = vmul.f32 0.99501246, %v6055_v45 }
 0xda4   : > { %v2032_v33 = vsel %vm447_vm2, %v2031_v30, -inf  ;;  %2327 = vmatpush.msra.mxu3 %v5666_v62  ;;  %2356 = vmatpush.msrb.mxu0 %v5554_v12  ;;  %vm2045_vm11 = vcmp.gt.f32.partialorder %v2044_v24, 2.0  ;;  %v2088_v30 = vld [vmem:[%s4339_s14 + $0x13] sm:$0x1] }
 0xda5   : > { %2033 = vmax.xlane.f32.xlu0 %v2032_v33  ;;  %v3579_v25 = vsel %vm2045_vm11, 1.0, %v4184_v10 }
 0xda6   : > { %2328 = vmatpush.msra.mxu3 %v5670_v55  ;;  %2357 = vmatpush.msrb.mxu0 %v5558_v0  ;;  %v2001_v0 = vmul.f32 0.99501246, %v1938_v40  ;;  %v6144_v40 = vld [vmem:[#allocation10 + $0x78] sm:$0xff] }
 0xda8   : > { %2329 = vmatpush.msra.mxu3 %v5674_v58  ;;  %2358 = vmatpush.msrb.mxu0 %v5562_v16  ;;  %v2000_v16 = vld [vmem:[%s4339_s14 + $0x12] sm:$0x1] }
 0xdaa   : > { %2330 = vmatpush.msra.mxu3 %v5678_v21  ;;  %2359 = vmatpush.msrb.mxu0 %v5566_v9 }
 0xdac   : > { %2331 = vmatpush.msra.mxu3 %v5682_v63  ;;  %2360 = vmatpush.msrb.mxu0 %v5570_v57 }
 0xdae   : > { %2332 = vmatpush.msra.mxu3 %v5686_v41  ;;  %2361 = vmatpush.msrb.mxu0 %v5574_v2  ;;  %v2002_v2 = vadd.f32 %v2001_v0, %v2000_v16 }
 0xdb0   : > { %2333 = vmatpush.msra.mxu3 %v5690_v60  ;;  %2362 = vmatpush.msrb.mxu0 %v5578_v17 }
 0xdb2   : > { %2334 = vmatpush.msra.mxu3 %v5694_v4  ;;  %2363 = vmatpush.msrb.mxu0 %v5582_v13  ;;  %v2048_v13 = vmul.f32 0.07, %v6055_v45 }
 0xdb4   : > { %2335 = vmatpush.msra.mxu3 %v5698_v5  ;;  %2364 = vmatpush.msrb.mxu0 %v5586_v38 }
 0xdb6   : > { %2336 = vmatpush.msra.mxu3 %v5702_v8  ;;  %2365 = vmatpush.msrb.mxu0 %v5590_v56 }
 0xdb8   : > { %2337 = vmatpush.msra.mxu3 %v5706_v47  ;;  %2366 = vmatpush.msrb.mxu0 %v5594_v18 }
 0xdba   : > { %2338 = vmatpush.msra.mxu3 %v5710_v51  ;;  %2367 = vmatpush.msrb.mxu0 %v5598_v39 }
 0xdbc   : > { %2339 = vmatpush.msra.mxu3 %v5714_v7  ;;  %2368 = vmatpush.msrb.mxu0 %v5602_v11  ;;  %v2049_v11 = vadd.f32 0.6, %v2048_v13 }
 0xdbe   : > { %2340 = vmatpush.msra.mxu3 %v5718_v53  ;;  %2369 = vmatpush.msrb.mxu0 %v5606_v14 }
 0xdc0   : > { %2341 = vmatpush.msra.mxu3 %v5722_v23  ;;  %2370 = vmatpush.msrb.mxu0 %v5610_v15  ;;  %v1973_v15 = vmul.f32 0.95122945, %v6035_v27 }
 0xe18   : > { %v2034_v61 = vpop.xlane.xlu0 %2033 }
 0xe19   : > { %v2035_v12 = vrot.slane %v2034_v61, 4 }
 0xe1b   : > { %v2036_v9 = vmax.f32 %v2034_v61, %v2035_v12 }
 0xe1d   : > { %v2037_v57 = vrot.slane %v2036_v9, 2 }
 0xe1e   : > { %v2020_v17 = vpop.f32.mrf.mxu0 }
 0xe1f   : > { %v2023_v38 = vadd.f32 %v2020_v17, %v2002_v2  ;;  %v2038_v56 = vmax.f32 %v2036_v9, %v2037_v57 }
 0xe21   : > { %v3578_v18 = vadd.f32 -0.6, %v2023_v38  ;;  %v2039_v39 = vrot.slane %v2038_v56, 1 }
 0xe23   : > { %v6104_v14 = vsel %vm2024_vm8, %v3578_v18, %v2023_v38  ;;  %v2040_v46 = vmax.f32 %v2038_v56, %v2039_v39 }
 0xe24   : > { %vm2050_vm9 = vcmp.ge.f32.partialorder %v6104_v14, %v2049_v11  ;;  %2084 = vst [vmem:[%s4351_s12 + $0x12] sm:$0x1] %v6104_v14  ;;  %v1991_v59 = vpop.f32.mrf.mxu3 }
 0xe25   : > { %v1994_v20 = vadd.f32 %v1991_v59, %v1973_v15  ;;  %3675 = vpush %v2040_v46  ;;  %vm2051_vm10 = vmand %vm2050_vm9, %vm376_vm1 }
 0xe26   : > { %v3580_v27 = vsel %vm2051_vm10, 1.0, %v4184_v10 }
 0xe27   : > { %v6111_v37 = vadd.f32 %v5882_v29, %v1994_v20  ;;  %vm2054_vm12 = vcmp.eq.f32.partialorder %v3580_v27, 1.0 }
 0xe28   : > { %v2055_v19 = vsel %vm2054_vm12, 0.0, %v6052_v36 }
 0xe29   : > { %1999 = vst [vmem:[%s4349_s29 + $0x11] sm:$0x1] %v6111_v37  ;;  %v2061_v32 = vmul.f32 0.95122945, %v6111_v37  ;;  %v6256_v37 = vld [vmem:[#allocation12 + $0x78] sm:$0xff] }
 0xe56   : > { %s3676_s21 = spop %3675 }
 0xe57   : > { %p2042_p13 = scmp.gt.f32.partialorder %s3676_s21, 0.0 }
 0xe59   : > { %s2056_s19 = scalar_select %p2042_p13, 1, 0 }
 0xe5b   : > { %v2057_v54 = vstv %s2056_s19 }
 0xe5c   : > { %vm2058_vm13 = vcmp.eq.s32.totalorder %v2057_v54, 1  ;;  %v6270_v54 = vld [vmem:[#allocation12 + $0x68] sm:$0xff] }
 0xe5d   : > { %v6125_v43 = vsel %vm2058_vm13, %v3579_v25, %v3580_v27  ;;  %v6127_v52 = vsel %vm2058_vm13, %v2044_v24, %v2055_v19  ;;  %v6266_v27 = vld [vmem:[#allocation12 + $0x70] sm:$0xff]  ;;  %v6274_v25 = vld [vmem:[#allocation12 + $0x60] sm:$0xff]  ;;  %v6278_v19 = vld [vmem:[#allocation12 + $0x58] sm:$0xff] }
 0xe5e   : > { %2085 = vst [vmem:[%s4353_s18 + $0x12] sm:$0x1] %v6125_v43  ;;  %v6132_v28 = vadd.f32 %v2115_v49, %v6125_v43  ;;  %2078 = vmatmul.f32.vlgmr.msrb.gmra.mxu1 %v6125_v43  ;;  %2107 = vmatmul.f32.vlgmr.msrb.gmra.mxu2 %v6125_v43  ;;  %vm2117_vm14 = vcmp.lt.f32.partialorder %v6127_v52, 2.0  ;;  %vm2112_vm0 = vcmp.eq.f32.partialorder %v6125_v43, 1.0  ;;  %v2131_v13 = vadd.f32 1.0, %v6127_v52  ;;  %v6282_v49 = vld [vmem:[#allocation12 + $0x50] sm:$0xff] }
 0xe5f   : > { %vm6139_vm15 = vmand %vm2117_vm14, %vm376_vm1  ;;  %2414 = vmatpush.msrb.mxu1 %v5656_v1  ;;  %2443 = vmatpush.msrb.mxu2 %v6144_v40  ;;  %v6158_v1 = vld [vmem:[#allocation10 + $0x68] sm:$0xff] }
 0xe60   : > { %2174 = vst [vmem:[%s4355_s9 + $0x13] sm:$0x1] %v6132_v28  ;;  %v2119_v50 = vsel %vm6139_vm15, 1.0, %v4184_v10  ;;  %v2136_v16 = vmul.f32 0.07, %v6132_v28  ;;  %v2132_v38 = vsel %vm6139_vm15, %v2131_v13, %v6127_v52  ;;  %v6286_v43 = vld [vmem:[#allocation12 + $0x48] sm:$0xff] }
 0xe61   : > { %v2120_v42 = vsel %vm447_vm2, %v2119_v50, -inf  ;;  %2415 = vmatpush.msrb.mxu1 %v5666_v62  ;;  %2444 = vmatpush.msrb.mxu2 %v6154_v3  ;;  %v6166_v62 = vld [vmem:[#allocation10 + $0x58] sm:$0xff]  ;;  %vm2133_vm5 = vcmp.gt.f32.partialorder %v2132_v38, 2.0  ;;  %v6302_v50 = vld [vmem:[#allocation12 + $0x28] sm:$0xff] }
 0xe62   : > { %2121 = vmax.xlane.f32.xlu1 %v2120_v42  ;;  %v2137_v2 = vadd.f32 0.6, %v2136_v16  ;;  %v3582_v39 = vsel %vm2133_vm5, 1.0, %v4184_v10  ;;  %v6306_v42 = vld [vmem:[#allocation12 + $0x20] sm:$0xff] }
 0xe63   : > { %2416 = vmatpush.msrb.mxu1 %v5670_v55  ;;  %2445 = vmatpush.msrb.mxu2 %v6158_v1  ;;  %v6174_v55 = vld [vmem:[#allocation10 + $0x48] sm:$0xff] }
 0xe65   : > { %2417 = vmatpush.msrb.mxu1 %v5674_v58  ;;  %2446 = vmatpush.msrb.mxu2 %v6162_v31  ;;  %v6178_v58 = vld [vmem:[#allocation10 + $0x40] sm:$0xff] }
 0xe67   : > { %2418 = vmatpush.msrb.mxu1 %v5678_v21  ;;  %2447 = vmatpush.msrb.mxu2 %v6166_v62  ;;  %v6182_v21 = vld [vmem:[#allocation10 + $0x38] sm:$0xff] }
 0xe69   : > { %2419 = vmatpush.msrb.mxu1 %v5682_v63  ;;  %2448 = vmatpush.msrb.mxu2 %v6170_v26  ;;  %v6186_v63 = vld [vmem:[#allocation10 + $0x30] sm:$0xff] }
 0xe6b   : > { %2420 = vmatpush.msrb.mxu1 %v5686_v41  ;;  %2449 = vmatpush.msrb.mxu2 %v6174_v55  ;;  %v6190_v41 = vld [vmem:[#allocation10 + $0x28] sm:$0xff] }
 0xe6d   : > { %2421 = vmatpush.msrb.mxu1 %v5690_v60  ;;  %2450 = vmatpush.msrb.mxu2 %v6178_v58  ;;  %v6194_v60 = vld [vmem:[#allocation10 + $0x20] sm:$0xff] }
 0xe6f   : > { %2422 = vmatpush.msrb.mxu1 %v5694_v4  ;;  %2451 = vmatpush.msrb.mxu2 %v6182_v21  ;;  %v6198_v4 = vld [vmem:[#allocation10 + $0x18] sm:$0xff] }
 0xe71   : > { %2423 = vmatpush.msrb.mxu1 %v5698_v5  ;;  %2452 = vmatpush.msrb.mxu2 %v6186_v63  ;;  %v6202_v5 = vld [vmem:[#allocation10 + $0x10] sm:$0xff] }
 0xe73   : > { %2424 = vmatpush.msrb.mxu1 %v5702_v8  ;;  %2453 = vmatpush.msrb.mxu2 %v6190_v41  ;;  %v6206_v8 = vld [vmem:[#allocation10 + $0x8] sm:$0xff] }
 0xe75   : > { %2425 = vmatpush.msrb.mxu1 %v5706_v47  ;;  %2454 = vmatpush.msrb.mxu2 %v6194_v60  ;;  %v6210_v47 = vld [vmem:[#allocation10] sm:$0xff] }
 0xe77   : > { %2426 = vmatpush.msrb.mxu1 %v5710_v51  ;;  %2455 = vmatpush.msrb.mxu2 %v6198_v4 }
 0xe79   : > { %2427 = vmatpush.msrb.mxu1 %v5714_v7  ;;  %2456 = vmatpush.msrb.mxu2 %v6202_v5 }
 0xe7b   : > { %2428 = vmatpush.msrb.mxu1 %v5718_v53  ;;  %2457 = vmatpush.msrb.mxu2 %v6206_v8  ;;  %v2089_v53 = vmul.f32 0.99501246, %v6104_v14  ;;  %v2203_v14 = vmul.f32 0.99501246, %v6132_v28  ;;  %v6294_v28 = vld [vmem:[#allocation12 + $0x38] sm:$0xff] }
 0xe7d   : > { %2429 = vmatpush.msrb.mxu1 %v5722_v23  ;;  %2458 = vmatpush.msrb.mxu2 %v6210_v47  ;;  %v2090_v61 = vadd.f32 %v2089_v53, %v2088_v30  ;;  %v2176_v53 = vld [vmem:[%s4339_s14 + $0x14] sm:$0x1] }
 0xed5   : > { %v2122_v51 = vpop.xlane.xlu1 %2121 }
 0xed6   : > { %v2123_v7 = vrot.slane %v2122_v51, 4 }
 0xed8   : > { %v2124_v34 = vmax.f32 %v2122_v51, %v2123_v7  ;;  %v6310_v51 = vld [vmem:[#allocation12 + $0x18] sm:$0xff]  ;;  %v6314_v7 = vld [vmem:[#allocation12 + $0x10] sm:$0xff] }
 0xeda   : > { %v2125_v35 = vrot.slane %v2124_v34, 2 }
 0xedb   : > { %v2079_v36 = vpop.f32.mrf.mxu1 }
 0xedc   : > { %v2082_v45 = vadd.f32 %v2079_v36, %v2061_v32  ;;  %v2126_v44 = vmax.f32 %v2124_v34, %v2125_v35  ;;  %v6318_v34 = vld [vmem:[#allocation12 + $0x8] sm:$0xff]  ;;  %v6322_v35 = vld [vmem:[#allocation12] sm:$0xff] }
 0xede   : > { %v6217_v33 = vadd.f32 %v5882_v29, %v2082_v45  ;;  %v2127_v23 = vrot.slane %v2126_v44, 1 }
 0xee0   : > { %2087 = vst [vmem:[%s4349_s29 + $0x12] sm:$0x1] %v6217_v33  ;;  %v2128_v12 = vmax.f32 %v2126_v44, %v2127_v23 }
 0xee1   : > { %v2108_v0 = vpop.f32.mrf.mxu2 }
 0xee2   : > { %v2111_v9 = vadd.f32 %v2108_v0, %v2090_v61  ;;  %3677 = vpush %v2128_v12 }
 0xee4   : > { %v3581_v57 = vadd.f32 -0.6, %v2111_v9 }
 0xee6   : > { %v6223_v17 = vsel %vm2112_vm0, %v3581_v57, %v2111_v9 }
 0xee7   : > { %vm2138_vm3 = vcmp.ge.f32.partialorder %v6223_v17, %v2137_v2  ;;  %2172 = vst [vmem:[%s4351_s12 + $0x13] sm:$0x1] %v6223_v17  ;;  %v2177_v45 = vmul.f32 0.99501246, %v6223_v17  ;;  %v2149_v17 = vmul.f32 0.95122945, %v6217_v33 }
 0xee8   : > { %vm2139_vm4 = vmand %vm2138_vm3, %vm376_vm1 }
 0xee9   : > { %v3583_v56 = vsel %vm2139_vm4, 1.0, %v4184_v10  ;;  %v2178_v23 = vadd.f32 %v2177_v45, %v2176_v53 }
 0xeea   : > { %vm2142_vm6 = vcmp.eq.f32.partialorder %v3583_v56, 1.0 }
 0xeeb   : > { %v2143_v11 = vsel %vm2142_vm6, 0.0, %v6127_v52  ;;  %v6290_v52 = vld [vmem:[#allocation12 + $0x40] sm:$0xff] }
 0xf13   : > { %s3678_s1 = spop %3677 }
 0xf14   : > { %p2130_p0 = scmp.gt.f32.partialorder %s3678_s1, 0.0 }
 0xf16   : > { %s2144_s30 = scalar_select %p2130_p0, 1, 0 }
 0xf18   : > { %v2145_v18 = vstv %s2144_s30 }
 0xf19   : > { %vm2146_vm7 = vcmp.eq.s32.totalorder %v2145_v18, 1 }
 0xf1a   : > { %v6238_v15 = vsel %vm2146_vm7, %v3582_v39, %v3583_v56  ;;  %v6240_v46 = vsel %vm2146_vm7, %v2132_v38, %v2143_v11 }
 0xf1b   : > { %2173 = vst [vmem:[%s4353_s18 + $0x13] sm:$0x1] %v6238_v15  ;;  %v6245_v59 = vadd.f32 %v2203_v14, %v6238_v15  ;;  %2166 = vmatmul.f32.vlgmr.msrb.gmra.mxu3 %v6238_v15  ;;  %2195 = vmatmul.f32.vlgmr.msra.gmra.mxu0 %v6238_v15  ;;  %vm2205_vm8 = vcmp.lt.f32.partialorder %v6240_v46, 2.0  ;;  %vm2200_vm10 = vcmp.eq.f32.partialorder %v6238_v15, 1.0  ;;  %v2219_v11 = vadd.f32 1.0, %v6240_v46 }
 0xf1c   : > { %vm6252_vm9 = vmand %vm2205_vm8, %vm376_vm1  ;;  %2502 = vmatpush.msrb.mxu3 %v6256_v37  ;;  %2531 = vmatpush.msra.mxu0 %v6144_v40 }
 0xf1d   : > { %2262 = vst [vmem:[%s4355_s9 + $0x14] sm:$0x1] %v6245_v59  ;;  %v2207_v48 = vsel %vm6252_vm9, 1.0, %v4184_v10  ;;  %v2224_v12 = vmul.f32 0.07, %v6245_v59  ;;  %v2220_v33 = vsel %vm6252_vm9, %v2219_v11, %v6240_v46 }
 0xf1e   : > { %v2208_v24 = vsel %vm447_vm2, %v2207_v48, -inf  ;;  %2503 = vmatpush.msrb.mxu3 %v6266_v27  ;;  %2532 = vmatpush.msra.mxu0 %v6154_v3  ;;  %vm2221_vm13 = vcmp.gt.f32.partialorder %v2220_v33, 2.0 }
 0xf1f   : > { %2209 = vmax.xlane.f32.xlu2 %v2208_v24  ;;  %v2225_v2 = vadd.f32 0.6, %v2224_v12  ;;  %v3585_v48 = vsel %vm2221_vm13, 1.0, %v4184_v10 }
 0xf20   : > { %2504 = vmatpush.msrb.mxu3 %v6270_v54  ;;  %2533 = vmatpush.msra.mxu0 %v6158_v1 }
 0xf22   : > { %2505 = vmatpush.msrb.mxu3 %v6274_v25  ;;  %2534 = vmatpush.msra.mxu0 %v6162_v31 }
 0xf24   : > { %2506 = vmatpush.msrb.mxu3 %v6278_v19  ;;  %2535 = vmatpush.msra.mxu0 %v6166_v62 }
 0xf26   : > { %2507 = vmatpush.msrb.mxu3 %v6282_v49  ;;  %2536 = vmatpush.msra.mxu0 %v6170_v26 }
 0xf28   : > { %2508 = vmatpush.msrb.mxu3 %v6286_v43  ;;  %2537 = vmatpush.msra.mxu0 %v6174_v55 }
 0xf2a   : > { %2509 = vmatpush.msrb.mxu3 %v6290_v52  ;;  %2538 = vmatpush.msra.mxu0 %v6178_v58 }
 0xf2c   : > { %2510 = vmatpush.msrb.mxu3 %v6294_v28  ;;  %2539 = vmatpush.msra.mxu0 %v6182_v21 }
 0xf2e   : > { %2511 = vmatpush.msrb.mxu3 %v6298_v22  ;;  %2540 = vmatpush.msra.mxu0 %v6186_v63 }
 0xf30   : > { %2512 = vmatpush.msrb.mxu3 %v6302_v50  ;;  %2541 = vmatpush.msra.mxu0 %v6190_v41 }
 0xf32   : > { %2513 = vmatpush.msrb.mxu3 %v6306_v42  ;;  %2542 = vmatpush.msra.mxu0 %v6194_v60 }
 0xf34   : > { %2514 = vmatpush.msrb.mxu3 %v6310_v51  ;;  %2543 = vmatpush.msra.mxu0 %v6198_v4 }
 0xf36   : > { %2515 = vmatpush.msrb.mxu3 %v6314_v7  ;;  %2544 = vmatpush.msra.mxu0 %v6202_v5 }
 0xf38   : > { %2516 = vmatpush.msrb.mxu3 %v6318_v34  ;;  %2545 = vmatpush.msra.mxu0 %v6206_v8 }
 0xf3a   : > { %2517 = vmatpush.msrb.mxu3 %v6322_v35  ;;  %2546 = vmatpush.msra.mxu0 %v6210_v47 }
 0xf92   : > { %v2210_v32 = vpop.xlane.xlu2 %2209 }
 0xf93   : > { %v2211_v36 = vrot.slane %v2210_v32, 4 }
 0xf95   : > { %v2212_v44 = vmax.f32 %v2210_v32, %v2211_v36  ;;  %v2291_v32 = vmul.f32 0.99501246, %v6245_v59 }
 0xf97   : > { %v2213_v30 = vrot.slane %v2212_v44, 2 }
 0xf98   : > { %v2196_v61 = vpop.f32.mrf.mxu0 }
 0xf99   : > { %v2199_v0 = vadd.f32 %v2196_v61, %v2178_v23  ;;  %v2214_v16 = vmax.f32 %v2212_v44, %v2213_v30 }
 0xf9b   : > { %v3584_v9 = vadd.f32 -0.6, %v2199_v0  ;;  %v2215_v57 = vrot.slane %v2214_v16, 1 }
 0xf9d   : > { %v6330_v13 = vsel %vm2200_vm10, %v3584_v9, %v2199_v0  ;;  %v2216_v38 = vmax.f32 %v2214_v16, %v2215_v57 }
 0xf9e   : > { %vm2226_vm11 = vcmp.ge.f32.partialorder %v6330_v13, %v2225_v2  ;;  %2260 = vst [vmem:[%s4351_s12 + $0x14] sm:$0x1] %v6330_v13  ;;  %v2167_v56 = vpop.f32.mrf.mxu3  ;;  %v2265_v9 = vmul.f32 0.99501246, %v6330_v13  ;;  %v2264_v2 = vld [vmem:[%s4339_s14 + $0x15] sm:$0x1] }
 0xf9f   : > { %v2170_v18 = vadd.f32 %v2167_v56, %v2149_v17  ;;  %3679 = vpush %v2216_v38  ;;  %vm2227_vm12 = vmand %vm2226_vm11, %vm376_vm1 }
 0xfa0   : > { %v3586_v14 = vsel %vm2227_vm12, 1.0, %v4184_v10  ;;  %v2266_v56 = vadd.f32 %v2265_v9, %v2264_v2 }
 0xfa1   : > { %v6337_v39 = vadd.f32 %v5882_v29, %v2170_v18  ;;  %vm2230_vm14 = vcmp.eq.f32.partialorder %v3586_v14, 1.0 }
 0xfa2   : > { %v2231_v24 = vsel %vm2230_vm14, 0.0, %v6240_v46 }
 0xfa3   : > { %2175 = vst [vmem:[%s4349_s29 + $0x13] sm:$0x1] %v6337_v39  ;;  %v2237_v12 = vmul.f32 0.95122945, %v6337_v39 }
 0xfd0   : > { %s3680_s23 = spop %3679 }
 0xfd1   : > { %p2218_p3 = scmp.gt.f32.partialorder %s3680_s23, 0.0 }
 0xfd3   : > { %s2232_s16 = scalar_select %p2218_p3, 1, 0 }
 0xfd5   : > { %v2233_v15 = vstv %s2232_s16 }
 0xfd6   : > { %vm2234_vm15 = vcmp.eq.s32.totalorder %v2233_v15, 1 }
 0xfd7   : > { %v6351_v36 = vsel %vm2234_vm15, %v3585_v48, %v3586_v14  ;;  %v6353_v20 = vsel %vm2234_vm15, %v2220_v33, %v2231_v24 }
 0xfd8   : > { %2261 = vst [vmem:[%s4353_s18 + $0x14] sm:$0x1] %v6351_v36  ;;  %v6358_v45 = vadd.f32 %v2291_v32, %v6351_v36  ;;  %2254 = vmatmul.f32.vlgmr.msra.gmra.mxu1 %v6351_v36  ;;  %2283 = vmatmul.f32.vlgmr.msra.gmra.mxu2 %v6351_v36  ;;  %vm2293_vm0 = vcmp.lt.f32.partialorder %v6353_v20, 2.0  ;;  %vm2288_vm4 = vcmp.eq.f32.partialorder %v6351_v36, 1.0 }
 0xfd9   : > { %vm6365_vm3 = vmand %vm2293_vm0, %vm376_vm1  ;;  %2590 = vmatpush.msra.mxu1 %v6256_v37  ;;  %2619 = vmatpush.msra.mxu2 %v6144_v40 }
 0xfda   : > { %2350 = vst [vmem:[%s4355_s9 + $0x15] sm:$0x1] %v6358_v45  ;;  %v2295_v59 = vsel %vm6365_vm3, 1.0, %v4184_v10  ;;  %v2312_v33 = vmul.f32 0.07, %v6358_v45 }
 0xfdb   : > { %v2296_v53 = vsel %vm447_vm2, %v2295_v59, -inf  ;;  %2591 = vmatpush.msra.mxu1 %v6266_v27  ;;  %2620 = vmatpush.msra.mxu2 %v6154_v3 }
 0xfdc   : > { %2297 = vmax.xlane.f32.xlu0 %v2296_v53  ;;  %v2313_v13 = vadd.f32 0.6, %v2312_v33  ;;  %v2379_v53 = vmul.f32 0.99501246, %v6358_v45 }
 0xfdd   : > { %2592 = vmatpush.msra.mxu1 %v6270_v54  ;;  %2621 = vmatpush.msra.mxu2 %v6158_v1 }
 0xfdf   : > { %2593 = vmatpush.msra.mxu1 %v6274_v25  ;;  %2622 = vmatpush.msra.mxu2 %v6162_v31 }
 0xfe1   : > { %2594 = vmatpush.msra.mxu1 %v6278_v19  ;;  %2623 = vmatpush.msra.mxu2 %v6166_v62 }
 0xfe3   : > { %2595 = vmatpush.msra.mxu1 %v6282_v49  ;;  %2624 = vmatpush.msra.mxu2 %v6170_v26 }
 0xfe5   : > { %2596 = vmatpush.msra.mxu1 %v6286_v43  ;;  %2625 = vmatpush.msra.mxu2 %v6174_v55 }
 0xfe7   : > { %2597 = vmatpush.msra.mxu1 %v6290_v52  ;;  %2626 = vmatpush.msra.mxu2 %v6178_v58 }
 0xfe9   : > { %2598 = vmatpush.msra.mxu1 %v6294_v28  ;;  %2627 = vmatpush.msra.mxu2 %v6182_v21 }
 0xfeb   : > { %2599 = vmatpush.msra.mxu1 %v6298_v22  ;;  %2628 = vmatpush.msra.mxu2 %v6186_v63 }
 0xfed   : > { %2600 = vmatpush.msra.mxu1 %v6302_v50  ;;  %2629 = vmatpush.msra.mxu2 %v6190_v41 }
 0xfef   : > { %2601 = vmatpush.msra.mxu1 %v6306_v42  ;;  %2630 = vmatpush.msra.mxu2 %v6194_v60 }
 0xff1   : > { %2602 = vmatpush.msra.mxu1 %v6310_v51  ;;  %2631 = vmatpush.msra.mxu2 %v6198_v4 }
 0xff3   : > { %2603 = vmatpush.msra.mxu1 %v6314_v7  ;;  %2632 = vmatpush.msra.mxu2 %v6202_v5 }
 0xff5   : > { %2604 = vmatpush.msra.mxu1 %v6318_v34  ;;  %2633 = vmatpush.msra.mxu2 %v6206_v8 }
 0xff7   : > { %2605 = vmatpush.msra.mxu1 %v6322_v35  ;;  %2634 = vmatpush.msra.mxu2 %v6210_v47 }
0x104f   : > { %v2298_v44 = vpop.xlane.xlu0 %2297 }
0x1050   : > { %v2299_v30 = vrot.slane %v2298_v44, 4 }
0x1052   : > { %v2300_v23 = vmax.f32 %v2298_v44, %v2299_v30 }
0x1054   : > { %v2301_v61 = vrot.slane %v2300_v23, 2 }
0x1055   : > { %v2255_v0 = vpop.f32.mrf.mxu1 }
0x1056   : > { %v2258_v16 = vadd.f32 %v2255_v0, %v2237_v12  ;;  %v2302_v57 = vmax.f32 %v2300_v23, %v2301_v61 }
0x1058   : > { %v6411_v17 = vadd.f32 %v5882_v29, %v2258_v16  ;;  %v2303_v38 = vrot.slane %v2302_v57, 1  ;;  %v2307_v29 = vadd.f32 1.0, %v6353_v20  ;;  %v2352_v16 = vld [vmem:[%s4339_s14 + $0x16] sm:$0x1] }
0x105a   : > { %2263 = vst [vmem:[%s4349_s29 + $0x14] sm:$0x1] %v6411_v17  ;;  %v2304_v18 = vmax.f32 %v2302_v57, %v2303_v38  ;;  %v2308_v48 = vsel %vm6365_vm3, %v2307_v29, %v6353_v20  ;;  %v2325_v29 = vmul.f32 0.95122945, %v6411_v17 }
0x105b   : > { %v2284_v11 = vpop.f32.mrf.mxu2  ;;  %vm2309_vm7 = vcmp.gt.f32.partialorder %v2308_v48, 2.0 }
0x105c   : > { %v2287_v14 = vadd.f32 %v2284_v11, %v2266_v56  ;;  %3681 = vpush %v2304_v18  ;;  %v3588_v36 = vsel %vm2309_vm7, 1.0, %v4184_v10 }
0x105e   : > { %v3587_v39 = vadd.f32 -0.6, %v2287_v14 }
0x1060   : > { %v2290_v15 = vsel %vm2288_vm4, %v3587_v39, %v2287_v14 }
0x1061   : > { %vm2314_vm5 = vcmp.ge.f32.partialorder %v2290_v15, %v2313_v13  ;;  %2348 = vst [vmem:[%s4351_s12 + $0x15] sm:$0x1] %v2290_v15  ;;  %v2353_v0 = vmul.f32 0.99501246, %v2290_v15 }
0x1062   : > { %vm2315_vm6 = vmand %vm2314_vm5, %vm376_vm1 }
0x1063   : > { %v3589_v24 = vsel %vm2315_vm6, 1.0, %v4184_v10  ;;  %v2354_v2 = vadd.f32 %v2353_v0, %v2352_v16 }
0x1064   : > { %vm2318_vm8 = vcmp.eq.f32.partialorder %v3589_v24, 1.0 }
0x1065   : > { %v2319_v59 = vsel %vm2318_vm8, 0.0, %v6353_v20 }
0x108d   : > { %s3682_s17 = spop %3681 }
0x108e   : > { %p2306_p7 = scmp.gt.f32.partialorder %s3682_s17, 0.0 }
0x1090   : > { %s2320_s20 = scalar_select %p2306_p7, 1, 0 }
0x1092   : > { %v2321_v32 = vstv %s2320_s20 }
0x1093   : > { %vm2322_vm9 = vcmp.eq.s32.totalorder %v2321_v32, 1  ;;  %v6489_v32 = vld [vmem:[%s7218_s3] sm:$0x1] }
0x1094   : > { %v2323_v44 = vsel %vm2322_vm9, %v3588_v36, %v3589_v24  ;;  %v6428_v30 = vsel %vm2322_vm9, %v2308_v48, %v2319_v59 }
0x1095   : > { %2349 = vst [vmem:[%s4353_s18 + $0x15] sm:$0x1] %v2323_v44  ;;  %v6431_v46 = vadd.f32 %v2379_v53, %v2323_v44  ;;  %2342 = vmatmul.f32.vlgmr.msra.gmra.mxu3 %v2323_v44  ;;  %2371 = vmatmul.f32.vlgmr.msrb.gmra.mxu0 %v2323_v44  ;;  %vm2381_vm10 = vcmp.lt.f32.partialorder %v6428_v30, 2.0  ;;  %vm2376_vm12 = vcmp.eq.f32.partialorder %v2323_v44, 1.0  ;;  %v2395_v17 = vadd.f32 1.0, %v6428_v30 }
0x1096   : > { %vm6436_vm11 = vmand %vm2381_vm10, %vm376_vm1  ;;  %2678 = vmatpush.msra.mxu3 %v6256_v37  ;;  %2707 = vmatpush.msrb.mxu0 %v6144_v40 }
0x1097   : > { %2438 = vst [vmem:[%s4355_s9 + $0x16] sm:$0x1] %v6431_v46  ;;  %v2383_v20 = vsel %vm6436_vm11, 1.0, %v4184_v10  ;;  %v2400_v56 = vmul.f32 0.07, %v6431_v46  ;;  %v2396_v59 = vsel %vm6436_vm11, %v2395_v17, %v6428_v30 }
0x1098   : > { %v2384_v45 = vsel %vm447_vm2, %v2383_v20, -inf  ;;  %2679 = vmatpush.msra.mxu3 %v6266_v27  ;;  %2708 = vmatpush.msrb.mxu0 %v6154_v3  ;;  %vm2397_vm15 = vcmp.gt.f32.partialorder %v2396_v59, 2.0 }
0x1099   : > { %2385 = vmax.xlane.f32.xlu1 %v2384_v45  ;;  %v2401_v39 = vadd.f32 0.6, %v2400_v56  ;;  %v3591_v20 = vsel %vm2397_vm15, 1.0, %v4184_v10 }
0x109a   : > { %2680 = vmatpush.msra.mxu3 %v6270_v54  ;;  %2709 = vmatpush.msrb.mxu0 %v6158_v1 }
0x109c   : > { %2681 = vmatpush.msra.mxu3 %v6274_v25  ;;  %2710 = vmatpush.msrb.mxu0 %v6162_v31 }
0x109e   : > { %2682 = vmatpush.msra.mxu3 %v6278_v19  ;;  %2711 = vmatpush.msrb.mxu0 %v6166_v62 }
0x10a0   : > { %2683 = vmatpush.msra.mxu3 %v6282_v49  ;;  %2712 = vmatpush.msrb.mxu0 %v6170_v26 }
0x10a2   : > { %2684 = vmatpush.msra.mxu3 %v6286_v43  ;;  %2713 = vmatpush.msrb.mxu0 %v6174_v55 }
0x10a4   : > { %2685 = vmatpush.msra.mxu3 %v6290_v52  ;;  %2714 = vmatpush.msrb.mxu0 %v6178_v58 }
0x10a6   : > { %2686 = vmatpush.msra.mxu3 %v6294_v28  ;;  %2715 = vmatpush.msrb.mxu0 %v6182_v21 }
0x10a8   : > { %2687 = vmatpush.msra.mxu3 %v6298_v22  ;;  %2716 = vmatpush.msrb.mxu0 %v6186_v63 }
0x10aa   : > { %2688 = vmatpush.msra.mxu3 %v6302_v50  ;;  %2717 = vmatpush.msrb.mxu0 %v6190_v41 }
0x10ac   : > { %2689 = vmatpush.msra.mxu3 %v6306_v42  ;;  %2718 = vmatpush.msrb.mxu0 %v6194_v60 }
0x10ae   : > { %2690 = vmatpush.msra.mxu3 %v6310_v51  ;;  %2719 = vmatpush.msrb.mxu0 %v6198_v4 }
0x10b0   : > { %2691 = vmatpush.msra.mxu3 %v6314_v7  ;;  %2720 = vmatpush.msrb.mxu0 %v6202_v5 }
0x10b2   : > { %2692 = vmatpush.msra.mxu3 %v6318_v34  ;;  %2721 = vmatpush.msrb.mxu0 %v6206_v8 }
0x10b4   : > { %2693 = vmatpush.msra.mxu3 %v6322_v35  ;;  %2722 = vmatpush.msrb.mxu0 %v6210_v47 }
0x110c   : > { %v2386_v61 = vpop.xlane.xlu1 %2385 }
0x110d   : > { %v2387_v12 = vrot.slane %v2386_v61, 4 }
0x110f   : > { %v2388_v9 = vmax.f32 %v2386_v61, %v2387_v12  ;;  %v2467_v61 = vmul.f32 0.99501246, %v6431_v46 }
0x1111   : > { %v2389_v57 = vrot.slane %v2388_v9, 2 }
0x1112   : > { %v2372_v38 = vpop.f32.mrf.mxu0 }
0x1113   : > { %v2375_v18 = vadd.f32 %v2372_v38, %v2354_v2  ;;  %v2390_v11 = vmax.f32 %v2388_v9, %v2389_v57 }
0x1115   : > { %v3590_v33 = vadd.f32 -0.6, %v2375_v18  ;;  %v2391_v14 = vrot.slane %v2390_v11, 1 }
0x1117   : > { %v6480_v13 = vsel %vm2376_vm12, %v3590_v33, %v2375_v18  ;;  %v2392_v15 = vmax.f32 %v2390_v11, %v2391_v14 }
0x1118   : > { %vm2402_vm13 = vcmp.ge.f32.partialorder %v6480_v13, %v2401_v39  ;;  %2436 = vst [vmem:[%s4351_s12 + $0x16] sm:$0x1] %v6480_v13  ;;  %v2343_v48 = vpop.f32.mrf.mxu3  ;;  %v2441_v33 = vmul.f32 0.99501246, %v6480_v13  ;;  %v2440_v39 = vld [vmem:[%s4339_s14 + $0x17] sm:$0x1] }
0x1119   : > { %v2346_v24 = vadd.f32 %v2343_v48, %v2325_v29  ;;  %3683 = vpush %v2392_v15  ;;  %vm2403_vm14 = vmand %vm2402_vm13, %vm376_vm1 }
0x111a   : > { %v3592_v53 = vsel %vm2403_vm14, 1.0, %v4184_v10  ;;  %v2442_v48 = vadd.f32 %v2441_v33, %v2440_v39  ;;  %v2528_v33 = vld [vmem:[%s4339_s14 + $0x18] sm:$0x1] }
0x111b   : > { %v6492_v36 = vadd.f32 %v6489_v32, %v2346_v24  ;;  %vm2406_vm0 = vcmp.eq.f32.partialorder %v3592_v53, 1.0 }
0x111c   : > { %v2407_v45 = vsel %vm2406_vm0, 0.0, %v6428_v30 }
0x111d   : > { %2351 = vst [vmem:[%s4349_s29 + $0x15] sm:$0x1] %v6492_v36  ;;  %v2413_v56 = vmul.f32 0.95122945, %v6492_v36 }
0x114a   : > { %s3684_s19 = spop %3683 }
0x114b   : > { %p2394_p10 = scmp.gt.f32.partialorder %s3684_s19, 0.0 }
0x114d   : > { %s2408_s1 = scalar_select %p2394_p10, 1, 0 }
0x114f   : > { %v2409_v44 = vstv %s2408_s1 }
0x1150   : > { %vm2410_vm3 = vcmp.eq.s32.totalorder %v2409_v44, 1 }
0x1151   : > { %v6506_v12 = vsel %vm2410_vm3, %v3591_v20, %v3592_v53  ;;  %v6508_v23 = vsel %vm2410_vm3, %v2396_v59, %v2407_v45 }
0x1152   : > { %2437 = vst [vmem:[%s4353_s18 + $0x16] sm:$0x1] %v6506_v12  ;;  %v6513_v0 = vadd.f32 %v2467_v61, %v6506_v12  ;;  %2430 = vmatmul.f32.vlgmr.msrb.gmra.mxu1 %v6506_v12  ;;  %2459 = vmatmul.f32.vlgmr.msrb.gmra.mxu2 %v6506_v12  ;;  %vm2469_vm4 = vcmp.lt.f32.partialorder %v6508_v23, 2.0  ;;  %vm2464_vm6 = vcmp.eq.f32.partialorder %v6506_v12, 1.0  ;;  %v2483_v20 = vadd.f32 1.0, %v6508_v23 }
0x1153   : > { %vm6520_vm5 = vmand %vm2469_vm4, %vm376_vm1  ;;  %2766 = vmatpush.msrb.mxu1 %v6256_v37  ;;  %2795 = vmatpush.msrb.mxu2 %v6144_v40 }
0x1154   : > { %2526 = vst [vmem:[%s4355_s9 + $0x17] sm:$0x1] %v6513_v0  ;;  %v2471_v46 = vsel %vm6520_vm5, 1.0, %v4184_v10  ;;  %v2488_v59 = vmul.f32 0.07, %v6513_v0  ;;  %v2484_v45 = vsel %vm6520_vm5, %v2483_v20, %v6508_v23 }
0x1155   : > { %v2472_v16 = vsel %vm447_vm2, %v2471_v46, -inf  ;;  %2767 = vmatpush.msrb.mxu1 %v6266_v27  ;;  %2796 = vmatpush.msrb.mxu2 %v6154_v3  ;;  %vm2485_vm9 = vcmp.gt.f32.partialorder %v2484_v45, 2.0 }
0x1156   : > { %2473 = vmax.xlane.f32.xlu2 %v2472_v16  ;;  %v2489_v13 = vadd.f32 0.6, %v2488_v59  ;;  %v3594_v46 = vsel %vm2485_vm9, 1.0, %v4184_v10 }
0x1157   : > { %2768 = vmatpush.msrb.mxu1 %v6270_v54  ;;  %2797 = vmatpush.msrb.mxu2 %v6158_v1 }
0x1159   : > { %2769 = vmatpush.msrb.mxu1 %v6274_v25  ;;  %2798 = vmatpush.msrb.mxu2 %v6162_v31 }
0x115b   : > { %2770 = vmatpush.msrb.mxu1 %v6278_v19  ;;  %2799 = vmatpush.msrb.mxu2 %v6166_v62 }
0x115d   : > { %2771 = vmatpush.msrb.mxu1 %v6282_v49  ;;  %2800 = vmatpush.msrb.mxu2 %v6170_v26 }
0x115f   : > { %2772 = vmatpush.msrb.mxu1 %v6286_v43  ;;  %2801 = vmatpush.msrb.mxu2 %v6174_v55 }
0x1161   : > { %2773 = vmatpush.msrb.mxu1 %v6290_v52  ;;  %2802 = vmatpush.msrb.mxu2 %v6178_v58 }
0x1163   : > { %2774 = vmatpush.msrb.mxu1 %v6294_v28  ;;  %2803 = vmatpush.msrb.mxu2 %v6182_v21 }
0x1165   : > { %2775 = vmatpush.msrb.mxu1 %v6298_v22  ;;  %2804 = vmatpush.msrb.mxu2 %v6186_v63 }
0x1167   : > { %2776 = vmatpush.msrb.mxu1 %v6302_v50  ;;  %2805 = vmatpush.msrb.mxu2 %v6190_v41 }
0x1169   : > { %2777 = vmatpush.msrb.mxu1 %v6306_v42  ;;  %2806 = vmatpush.msrb.mxu2 %v6194_v60 }
0x116b   : > { %2778 = vmatpush.msrb.mxu1 %v6310_v51  ;;  %2807 = vmatpush.msrb.mxu2 %v6198_v4 }
0x116d   : > { %2779 = vmatpush.msrb.mxu1 %v6314_v7  ;;  %2808 = vmatpush.msrb.mxu2 %v6202_v5 }
0x116f   : > { %2780 = vmatpush.msrb.mxu1 %v6318_v34  ;;  %2809 = vmatpush.msrb.mxu2 %v6206_v8 }
0x1171   : > { %2781 = vmatpush.msrb.mxu1 %v6322_v35  ;;  %2810 = vmatpush.msrb.mxu2 %v6210_v47 }
0x11c9   : > { %v2474_v9 = vpop.xlane.xlu2 %2473 }
0x11ca   : > { %v2475_v57 = vrot.slane %v2474_v9, 4 }
0x11cc   : > { %v2476_v2 = vmax.f32 %v2474_v9, %v2475_v57  ;;  %v2555_v9 = vmul.f32 0.99501246, %v6513_v0 }
0x11ce   : > { %v2477_v38 = vrot.slane %v2476_v2, 2 }
0x11cf   : > { %v2431_v18 = vpop.f32.mrf.mxu1 }
0x11d0   : > { %v2434_v11 = vadd.f32 %v2431_v18, %v2413_v56  ;;  %v2478_v14 = vmax.f32 %v2476_v2, %v2477_v38 }
0x11d2   : > { %v6566_v29 = vadd.f32 %v6489_v32, %v2434_v11  ;;  %v2479_v15 = vrot.slane %v2478_v14, 1 }
0x11d4   : > { %2439 = vst [vmem:[%s4349_s29 + $0x16] sm:$0x1] %v6566_v29  ;;  %v2480_v24 = vmax.f32 %v2478_v14, %v2479_v15 }
0x11d5   : > { %v2460_v17 = vpop.f32.mrf.mxu2 }
0x11d6   : > { %v2463_v53 = vadd.f32 %v2460_v17, %v2442_v48  ;;  %3685 = vpush %v2480_v24 }
0x11d8   : > { %v3593_v36 = vadd.f32 -0.6, %v2463_v53 }
0x11da   : > { %v2466_v44 = vsel %vm2464_vm6, %v3593_v36, %v2463_v53 }
0x11db   : > { %vm2490_vm7 = vcmp.ge.f32.partialorder %v2466_v44, %v2489_v13  ;;  %2524 = vst [vmem:[%s4351_s12 + $0x17] sm:$0x1] %v2466_v44  ;;  %v2529_v11 = vmul.f32 0.99501246, %v2466_v44 }
0x11dc   : > { %vm2491_vm8 = vmand %vm2490_vm7, %vm376_vm1 }
0x11dd   : > { %v3595_v61 = vsel %vm2491_vm8, 1.0, %v4184_v10  ;;  %v2530_v15 = vadd.f32 %v2529_v11, %v2528_v33 }
0x11de   : > { %vm2494_vm10 = vcmp.eq.f32.partialorder %v3595_v61, 1.0 }
0x11df   : > { %v2495_v16 = vsel %vm2494_vm10, 0.0, %v6508_v23 }
0x1207   : > { %s3686_s30 = spop %3685 }
0x1208   : > { %p2482_p8 = scmp.gt.f32.partialorder %s3686_s30, 0.0 }
0x120a   : > { %s2496_s23 = scalar_select %p2482_p8, 1, 0 }
0x120c   : > { %v2497_v12 = vstv %s2496_s23 }
0x120d   : > { %vm2498_vm11 = vcmp.eq.s32.totalorder %v2497_v12, 1 }
0x120e   : > { %v2499_v57 = vsel %vm2498_vm11, %v3594_v46, %v3595_v61  ;;  %v6583_v2 = vsel %vm2498_vm11, %v2484_v45, %v2495_v16  ;;  %v2501_v45 = vmul.f32 0.95122945, %v6566_v29 }
0x120f   : > { %2525 = vst [vmem:[%s4353_s18 + $0x17] sm:$0x1] %v2499_v57  ;;  %v6586_v30 = vadd.f32 %v2555_v9, %v2499_v57  ;;  %2518 = vmatmul.f32.vlgmr.msrb.gmra.mxu3 %v2499_v57  ;;  %2547 = vmatmul.f32.vlgmr.msra.gmra.mxu0 %v2499_v57  ;;  %vm2557_vm12 = vcmp.lt.f32.partialorder %v6583_v2, 2.0  ;;  %vm2552_vm14 = vcmp.eq.f32.partialorder %v2499_v57, 1.0  ;;  %v2571_v16 = vadd.f32 1.0, %v6583_v2 }
0x1210   : > { %vm6591_vm13 = vmand %vm2557_vm12, %vm376_vm1  ;;  %2854 = vmatpush.msrb.mxu3 %v6256_v37  ;;  %2883 = vmatpush.msra.mxu0 %v6144_v40 }
0x1211   : > { %2614 = vst [vmem:[%s4355_s9 + $0x18] sm:$0x1] %v6586_v30  ;;  %v2559_v23 = vsel %vm6591_vm13, 1.0, %v4184_v10  ;;  %v2576_v24 = vmul.f32 0.07, %v6586_v30  ;;  %v2572_v29 = vsel %vm6591_vm13, %v2571_v16, %v6583_v2 }
0x1212   : > { %v2560_v0 = vsel %vm447_vm2, %v2559_v23, -inf  ;;  %2855 = vmatpush.msrb.mxu3 %v6266_v27  ;;  %2884 = vmatpush.msra.mxu0 %v6154_v3  ;;  %vm2573_vm3 = vcmp.gt.f32.partialorder %v2572_v29, 2.0 }
0x1213   : > { %2561 = vmax.xlane.f32.xlu0 %v2560_v0  ;;  %v2577_v13 = vadd.f32 0.6, %v2576_v24  ;;  %v3597_v23 = vsel %vm2573_vm3, 1.0, %v4184_v10 }
0x1214   : > { %2856 = vmatpush.msrb.mxu3 %v6270_v54  ;;  %2885 = vmatpush.msra.mxu0 %v6158_v1 }
0x1216   : > { %2857 = vmatpush.msrb.mxu3 %v6274_v25  ;;  %2886 = vmatpush.msra.mxu0 %v6162_v31 }
0x1218   : > { %2858 = vmatpush.msrb.mxu3 %v6278_v19  ;;  %2887 = vmatpush.msra.mxu0 %v6166_v62 }
0x121a   : > { %2859 = vmatpush.msrb.mxu3 %v6282_v49  ;;  %2888 = vmatpush.msra.mxu0 %v6170_v26 }
0x121c   : > { %2860 = vmatpush.msrb.mxu3 %v6286_v43  ;;  %2889 = vmatpush.msra.mxu0 %v6174_v55 }
0x121e   : > { %2861 = vmatpush.msrb.mxu3 %v6290_v52  ;;  %2890 = vmatpush.msra.mxu0 %v6178_v58 }
0x1220   : > { %2862 = vmatpush.msrb.mxu3 %v6294_v28  ;;  %2891 = vmatpush.msra.mxu0 %v6182_v21 }
0x1222   : > { %2863 = vmatpush.msrb.mxu3 %v6298_v22  ;;  %2892 = vmatpush.msra.mxu0 %v6186_v63 }
0x1224   : > { %2864 = vmatpush.msrb.mxu3 %v6302_v50  ;;  %2893 = vmatpush.msra.mxu0 %v6190_v41 }
0x1226   : > { %2865 = vmatpush.msrb.mxu3 %v6306_v42  ;;  %2894 = vmatpush.msra.mxu0 %v6194_v60 }
0x1228   : > { %2866 = vmatpush.msrb.mxu3 %v6310_v51  ;;  %2895 = vmatpush.msra.mxu0 %v6198_v4 }
0x122a   : > { %2867 = vmatpush.msrb.mxu3 %v6314_v7  ;;  %2896 = vmatpush.msra.mxu0 %v6202_v5 }
0x122c   : > { %2868 = vmatpush.msrb.mxu3 %v6318_v34  ;;  %2897 = vmatpush.msra.mxu0 %v6206_v8 }
0x122e   : > { %2869 = vmatpush.msrb.mxu3 %v6322_v35  ;;  %2898 = vmatpush.msra.mxu0 %v6210_v47 }
0x1286   : > { %v2562_v56 = vpop.xlane.xlu0 %2561 }
0x1287   : > { %v2563_v18 = vrot.slane %v2562_v56, 4 }
0x1289   : > { %v2564_v14 = vmax.f32 %v2562_v56, %v2563_v18  ;;  %v2643_v56 = vmul.f32 0.99501246, %v6586_v30 }
0x128b   : > { %v2565_v39 = vrot.slane %v2564_v14, 2 }
0x128c   : > { %v2548_v48 = vpop.f32.mrf.mxu0 }
0x128d   : > { %v2551_v17 = vadd.f32 %v2548_v48, %v2530_v15  ;;  %v2566_v59 = vmax.f32 %v2564_v14, %v2565_v39 }
0x128f   : > { %v3596_v53 = vadd.f32 -0.6, %v2551_v17  ;;  %v2567_v36 = vrot.slane %v2566_v59, 1 }
0x1291   : > { %v6635_v20 = vsel %vm2552_vm14, %v3596_v53, %v2551_v17  ;;  %v2568_v44 = vmax.f32 %v2566_v59, %v2567_v36 }
0x1292   : > { %vm2578_vm15 = vcmp.ge.f32.partialorder %v6635_v20, %v2577_v13  ;;  %2612 = vst [vmem:[%s4351_s12 + $0x18] sm:$0x1] %v6635_v20  ;;  %v2519_v61 = vpop.f32.mrf.mxu3 }
0x1293   : > { %v2522_v12 = vadd.f32 %v2519_v61, %v2501_v45  ;;  %3687 = vpush %v2568_v44  ;;  %vm2579_vm0 = vmand %vm2578_vm15, %vm376_vm1 }
0x1294   : > { %v3598_v9 = vsel %vm2579_vm0, 1.0, %v4184_v10 }
0x1295   : > { %v6642_v46 = vadd.f32 %v6489_v32, %v2522_v12  ;;  %vm2582_vm4 = vcmp.eq.f32.partialorder %v3598_v9, 1.0  ;;  %v6910_v12 = vld [vmem:[#allocation12 + $0x30] sm:$0xff] }
0x1296   : > { %v2583_v0 = vsel %vm2582_vm4, 0.0, %v6583_v2 }
0x1297   : > { %2527 = vst [vmem:[%s4349_s29 + $0x17] sm:$0x1] %v6642_v46 }
0x12c4   : > { %s3688_s16 = spop %3687 }
0x12c5   : > { %p2570_p1 = scmp.gt.f32.partialorder %s3688_s16, 0.0 }
0x12c7   : > { %s2584_s17 = scalar_select %p2570_p1, 1, 0 }
0x12c9   : > { %v2585_v57 = vstv %s2584_s17 }
0x12ca   : > { %vm2586_vm5 = vcmp.eq.s32.totalorder %v2585_v57, 1  ;;  %v6774_v57 = vld [vmem:[#allocation10 + $0x60] sm:$0xff] }
0x12cb   : > { %v6656_v18 = vsel %vm2586_vm5, %v3597_v23, %v3598_v9  ;;  %v6658_v38 = vsel %vm2586_vm5, %v2572_v29, %v2583_v0  ;;  %v6766_v9 = vld [vmem:[#allocation10 + $0x70] sm:$0xff] }
0x12cc   : > { %2613 = vst [vmem:[%s4353_s18 + $0x18] sm:$0x1] %v6656_v18  ;;  %v6663_v11 = vadd.f32 %v2643_v56, %v6656_v18  ;;  %2606 = vmatmul.f32.vlgmr.msra.gmra.mxu1 %v6656_v18  ;;  %2635 = vmatmul.f32.vlgmr.msra.gmra.mxu2 %v6656_v18  ;;  %vm2645_vm6 = vcmp.lt.f32.partialorder %v6658_v38, 2.0  ;;  %vm2640_vm8 = vcmp.eq.f32.partialorder %v6656_v18, 1.0  ;;  %v2659_v24 = vadd.f32 1.0, %v6658_v38  ;;  %v6782_v23 = vld [vmem:[#allocation10 + $0x50] sm:$0xff] }
0x12cd   : > { %vm6670_vm7 = vmand %vm2645_vm6, %vm376_vm1  ;;  %2942 = vmatpush.msra.mxu1 %v6256_v37  ;;  %2971 = vmatpush.msra.mxu2 %v6144_v40  ;;  %v2704_v56 = vld [vmem:[%s4339_s14 + $0x1a] sm:$0x1] }
0x12ce   : > { %2702 = vst [vmem:[%s4355_s9 + $0x19] sm:$0x1] %v6663_v11  ;;  %v2647_v30 = vsel %vm6670_vm7, 1.0, %v4184_v10  ;;  %v2660_v17 = vsel %vm6670_vm7, %v2659_v24, %v6658_v38 }
0x12cf   : > { %v2648_v33 = vsel %vm447_vm2, %v2647_v30, -inf  ;;  %2943 = vmatpush.msra.mxu1 %v6266_v27  ;;  %2972 = vmatpush.msra.mxu2 %v6154_v3  ;;  %vm2661_vm11 = vcmp.gt.f32.partialorder %v2660_v17, 2.0 }
0x12d0   : > { %2649 = vmax.xlane.f32.xlu1 %v2648_v33  ;;  %v3600_v36 = vsel %vm2661_vm11, 1.0, %v4184_v10 }
0x12d1   : > { %2944 = vmatpush.msra.mxu1 %v6270_v54  ;;  %2973 = vmatpush.msra.mxu2 %v6158_v1 }
0x12d3   : > { %2945 = vmatpush.msra.mxu1 %v6274_v25  ;;  %2974 = vmatpush.msra.mxu2 %v6162_v31 }
0x12d5   : > { %2946 = vmatpush.msra.mxu1 %v6278_v19  ;;  %2975 = vmatpush.msra.mxu2 %v6166_v62  ;;  %v2589_v62 = vmul.f32 0.95122945, %v6642_v46  ;;  %v6756_v46 = vld [vmem:[#allocation10 + $0x78] sm:$0xff] }
0x12d7   : > { %2947 = vmatpush.msra.mxu1 %v6282_v49  ;;  %2976 = vmatpush.msra.mxu2 %v6170_v26 }
0x12d9   : > { %2948 = vmatpush.msra.mxu1 %v6286_v43  ;;  %2977 = vmatpush.msra.mxu2 %v6174_v55 }
0x12db   : > { %2949 = vmatpush.msra.mxu1 %v6290_v52  ;;  %2978 = vmatpush.msra.mxu2 %v6178_v58  ;;  %v2617_v58 = vmul.f32 0.99501246, %v6635_v20  ;;  %v2731_v20 = vmul.f32 0.99501246, %v6663_v11 }
0x12dd   : > { %2950 = vmatpush.msra.mxu1 %v6294_v28  ;;  %2979 = vmatpush.msra.mxu2 %v6182_v21 }
0x12df   : > { %2951 = vmatpush.msra.mxu1 %v6298_v22  ;;  %2980 = vmatpush.msra.mxu2 %v6186_v63  ;;  %v2616_v63 = vld [vmem:[%s4339_s14 + $0x19] sm:$0x1] }
0x12e1   : > { %2952 = vmatpush.msra.mxu1 %v6302_v50  ;;  %2981 = vmatpush.msra.mxu2 %v6190_v41 }
0x12e3   : > { %2953 = vmatpush.msra.mxu1 %v6306_v42  ;;  %2982 = vmatpush.msra.mxu2 %v6194_v60 }
0x12e5   : > { %2954 = vmatpush.msra.mxu1 %v6310_v51  ;;  %2983 = vmatpush.msra.mxu2 %v6198_v4  ;;  %v2618_v4 = vadd.f32 %v2617_v58, %v2616_v63 }
0x12e7   : > { %2955 = vmatpush.msra.mxu1 %v6314_v7  ;;  %2984 = vmatpush.msra.mxu2 %v6202_v5 }
0x12e9   : > { %2956 = vmatpush.msra.mxu1 %v6318_v34  ;;  %2985 = vmatpush.msra.mxu2 %v6206_v8 }
0x12eb   : > { %2957 = vmatpush.msra.mxu1 %v6322_v35  ;;  %2986 = vmatpush.msra.mxu2 %v6210_v47  ;;  %v2664_v47 = vmul.f32 0.07, %v6663_v11 }
0x12ed   : > { %v2665_v15 = vadd.f32 0.6, %v2664_v47 }
0x1343   : > { %v2650_v40 = vpop.xlane.xlu1 %2649 }
0x1344   : > { %v2651_v3 = vrot.slane %v2650_v40, 4 }
0x1346   : > { %v2652_v1 = vmax.f32 %v2650_v40, %v2651_v3 }
0x1348   : > { %v2653_v31 = vrot.slane %v2652_v1, 2 }
0x1349   : > { %v2607_v26 = vpop.f32.mrf.mxu1 }
0x134a   : > { %v2610_v55 = vadd.f32 %v2607_v26, %v2589_v62  ;;  %v2654_v21 = vmax.f32 %v2652_v1, %v2653_v31 }
0x134c   : > { %v6716_v41 = vadd.f32 %v6489_v32, %v2610_v55  ;;  %v2655_v60 = vrot.slane %v2654_v21, 1 }
0x134e   : > { %2615 = vst [vmem:[%s4349_s29 + $0x18] sm:$0x1] %v6716_v41  ;;  %v2656_v5 = vmax.f32 %v2654_v21, %v2655_v60  ;;  %v2677_v31 = vmul.f32 0.95122945, %v6716_v41 }
0x134f   : > { %v2636_v8 = vpop.f32.mrf.mxu2 }
0x1350   : > { %v2639_v14 = vadd.f32 %v2636_v8, %v2618_v4  ;;  %3689 = vpush %v2656_v5 }
0x1352   : > { %v3599_v39 = vadd.f32 -0.6, %v2639_v14 }
0x1354   : > { %v6722_v48 = vsel %vm2640_vm8, %v3599_v39, %v2639_v14 }
0x1355   : > { %vm2666_vm9 = vcmp.ge.f32.partialorder %v6722_v48, %v2665_v15  ;;  %2700 = vst [vmem:[%s4351_s12 + $0x19] sm:$0x1] %v6722_v48 }
0x1356   : > { %vm2667_vm10 = vmand %vm2666_vm9, %vm376_vm1 }
0x1357   : > { %v3601_v59 = vsel %vm2667_vm10, 1.0, %v4184_v10 }
0x1358   : > { %vm2670_vm12 = vcmp.eq.f32.partialorder %v3601_v59, 1.0 }
0x1359   : > { %v2671_v13 = vsel %vm2670_vm12, 0.0, %v6658_v38 }
0x1381   : > { %s3690_s20 = spop %3689 }
0x1382   : > { %p2658_p4 = scmp.gt.f32.partialorder %s3690_s20, 0.0 }
0x1384   : > { %s2672_s13 = scalar_select %p2658_p4, 1, 0 }
0x1386   : > { %v2673_v53 = vstv %s2672_s13 }
0x1387   : > { %vm2674_vm13 = vcmp.eq.s32.totalorder %v2673_v53, 1  ;;  %v6882_v53 = vld [vmem:[#allocation12 + $0x68] sm:$0xff] }
0x1388   : > { %v6737_v45 = vsel %vm2674_vm13, %v3600_v36, %v3601_v59  ;;  %v6739_v44 = vsel %vm2674_vm13, %v2660_v17, %v2671_v13  ;;  %v6878_v59 = vld [vmem:[#allocation12 + $0x70] sm:$0xff]  ;;  %v6886_v36 = vld [vmem:[#allocation12 + $0x60] sm:$0xff]  ;;  %v6890_v13 = vld [vmem:[#allocation12 + $0x58] sm:$0xff] }
0x1389   : > { %2701 = vst [vmem:[%s4353_s18 + $0x19] sm:$0x1] %v6737_v45  ;;  %v6744_v61 = vadd.f32 %v2731_v20, %v6737_v45  ;;  %2694 = vmatmul.f32.vlgmr.msra.gmra.mxu3 %v6737_v45  ;;  %2723 = vmatmul.f32.vlgmr.msrb.gmra.mxu0 %v6737_v45  ;;  %vm2733_vm14 = vcmp.lt.f32.partialorder %v6739_v44, 2.0  ;;  %vm2728_vm0 = vcmp.eq.f32.partialorder %v6737_v45, 1.0  ;;  %v2747_v21 = vadd.f32 1.0, %v6739_v44  ;;  %v6894_v20 = vld [vmem:[#allocation12 + $0x50] sm:$0xff] }
0x138a   : > { %vm6751_vm15 = vmand %vm2733_vm14, %vm376_vm1  ;;  %3030 = vmatpush.msra.mxu3 %v6256_v37  ;;  %3059 = vmatpush.msrb.mxu0 %v6756_v46  ;;  %v6770_v37 = vld [vmem:[#allocation10 + $0x68] sm:$0xff] }
0x138b   : > { %2790 = vst [vmem:[%s4355_s9 + $0x1a] sm:$0x1] %v6744_v61  ;;  %v2735_v16 = vsel %vm6751_vm15, 1.0, %v4184_v10  ;;  %v2752_v2 = vmul.f32 0.07, %v6744_v61  ;;  %v2748_v63 = vsel %vm6751_vm15, %v2747_v21, %v6739_v44  ;;  %v6898_v45 = vld [vmem:[#allocation12 + $0x48] sm:$0xff] }
0x138c   : > { %v2736_v29 = vsel %vm447_vm2, %v2735_v16, -inf  ;;  %3031 = vmatpush.msra.mxu3 %v6266_v27  ;;  %3060 = vmatpush.msrb.mxu0 %v6766_v9  ;;  %v6778_v27 = vld [vmem:[#allocation10 + $0x58] sm:$0xff]  ;;  %vm2749_vm5 = vcmp.gt.f32.partialorder %v2748_v63, 2.0  ;;  %v2819_v8 = vmul.f32 0.99501246, %v6744_v61  ;;  %v6918_v16 = vld [vmem:[#allocation12 + $0x20] sm:$0xff] }
0x138d   : > { %2737 = vmax.xlane.f32.xlu2 %v2736_v29  ;;  %v2753_v3 = vadd.f32 0.6, %v2752_v2  ;;  %v3603_v4 = vsel %vm2749_vm5, 1.0, %v4184_v10  ;;  %v6906_v61 = vld [vmem:[#allocation12 + $0x38] sm:$0xff] }
0x138e   : > { %3032 = vmatpush.msra.mxu3 %v6270_v54  ;;  %3061 = vmatpush.msrb.mxu0 %v6770_v37  ;;  %v6786_v54 = vld [vmem:[#allocation10 + $0x48] sm:$0xff]  ;;  %v6922_v29 = vld [vmem:[#allocation12 + $0x18] sm:$0xff] }
0x1390   : > { %3033 = vmatpush.msra.mxu3 %v6274_v25  ;;  %3062 = vmatpush.msrb.mxu0 %v6774_v57  ;;  %v6790_v25 = vld [vmem:[#allocation10 + $0x40] sm:$0xff] }
0x1392   : > { %3034 = vmatpush.msra.mxu3 %v6278_v19  ;;  %3063 = vmatpush.msrb.mxu0 %v6778_v27  ;;  %v6794_v19 = vld [vmem:[#allocation10 + $0x38] sm:$0xff] }
0x1394   : > { %3035 = vmatpush.msra.mxu3 %v6282_v49  ;;  %3064 = vmatpush.msrb.mxu0 %v6782_v23  ;;  %v6798_v49 = vld [vmem:[#allocation10 + $0x30] sm:$0xff] }
0x1396   : > { %3036 = vmatpush.msra.mxu3 %v6286_v43  ;;  %3065 = vmatpush.msrb.mxu0 %v6786_v54  ;;  %v6802_v43 = vld [vmem:[#allocation10 + $0x28] sm:$0xff] }
0x1398   : > { %3037 = vmatpush.msra.mxu3 %v6290_v52  ;;  %3066 = vmatpush.msrb.mxu0 %v6790_v25  ;;  %v6806_v52 = vld [vmem:[#allocation10 + $0x20] sm:$0xff] }
0x139a   : > { %3038 = vmatpush.msra.mxu3 %v6294_v28  ;;  %3067 = vmatpush.msrb.mxu0 %v6794_v19  ;;  %v6810_v28 = vld [vmem:[#allocation10 + $0x18] sm:$0xff] }
0x139c   : > { %3039 = vmatpush.msra.mxu3 %v6298_v22  ;;  %3068 = vmatpush.msrb.mxu0 %v6798_v49  ;;  %v6814_v22 = vld [vmem:[#allocation10 + $0x10] sm:$0xff] }
0x139e   : > { %3040 = vmatpush.msra.mxu3 %v6302_v50  ;;  %3069 = vmatpush.msrb.mxu0 %v6802_v43  ;;  %v6818_v50 = vld [vmem:[#allocation10 + $0x8] sm:$0xff] }
0x13a0   : > { %3041 = vmatpush.msra.mxu3 %v6306_v42  ;;  %3070 = vmatpush.msrb.mxu0 %v6806_v52  ;;  %v6822_v42 = vld [vmem:[#allocation10] sm:$0xff] }
0x13a2   : > { %3042 = vmatpush.msra.mxu3 %v6310_v51  ;;  %3071 = vmatpush.msrb.mxu0 %v6810_v28 }
0x13a4   : > { %3043 = vmatpush.msra.mxu3 %v6314_v7  ;;  %3072 = vmatpush.msrb.mxu0 %v6814_v22  ;;  %v2705_v7 = vmul.f32 0.99501246, %v6722_v48  ;;  %v6868_v48 = vld [vmem:[#allocation12 + $0x78] sm:$0xff] }
0x13a6   : > { %3044 = vmatpush.msra.mxu3 %v6318_v34  ;;  %3073 = vmatpush.msrb.mxu0 %v6818_v50  ;;  %v2706_v11 = vadd.f32 %v2705_v7, %v2704_v56 }
0x13a8   : > { %3045 = vmatpush.msra.mxu3 %v6322_v35  ;;  %3074 = vmatpush.msrb.mxu0 %v6822_v42 }
0x1400   : > { %v2738_v51 = vpop.xlane.xlu2 %2737 }
0x1401   : > { %v2739_v0 = vrot.slane %v2738_v51, 4 }
0x1403   : > { %v2740_v18 = vmax.f32 %v2738_v51, %v2739_v0 }
0x1405   : > { %v2741_v38 = vrot.slane %v2740_v18, 2 }
0x1406   : > { %v2724_v34 = vpop.f32.mrf.mxu0 }
0x1407   : > { %v2727_v30 = vadd.f32 %v2724_v34, %v2706_v11  ;;  %v2742_v33 = vmax.f32 %v2740_v18, %v2741_v38 }
0x1409   : > { %v3602_v35 = vadd.f32 -0.6, %v2727_v30  ;;  %v2743_v40 = vrot.slane %v2742_v33, 1 }
0x140b   : > { %v6829_v1 = vsel %vm2728_vm0, %v3602_v35, %v2727_v30  ;;  %v2744_v62 = vmax.f32 %v2742_v33, %v2743_v40 }
0x140c   : > { %vm2754_vm3 = vcmp.ge.f32.partialorder %v6829_v1, %v2753_v3  ;;  %2788 = vst [vmem:[%s4351_s12 + $0x1a] sm:$0x1] %v6829_v1  ;;  %v2695_v26 = vpop.f32.mrf.mxu3 }
0x140d   : > { %v2698_v55 = vadd.f32 %v2695_v26, %v2677_v31  ;;  %3691 = vpush %v2744_v62  ;;  %vm2755_vm4 = vmand %vm2754_vm3, %vm376_vm1 }
0x140e   : > { %v3604_v41 = vsel %vm2755_vm4, 1.0, %v4184_v10 }
0x140f   : > { %v6836_v58 = vadd.f32 %v6489_v32, %v2698_v55  ;;  %vm2758_vm6 = vcmp.eq.f32.partialorder %v3604_v41, 1.0 }
0x1410   : > { %v2759_v5 = vsel %vm2758_vm6, 0.0, %v6739_v44  ;;  %v6902_v44 = vld [vmem:[#allocation12 + $0x40] sm:$0xff] }
0x1411   : > { %2703 = vst [vmem:[%s4349_s29 + $0x19] sm:$0x1] %v6836_v58 }
0x143e   : > { %s3692_s21 = spop %3691 }
0x143f   : > { %p2746_p9 = scmp.gt.f32.partialorder %s3692_s21, 0.0 }
0x1441   : > { %s2760_s19 = scalar_select %p2746_p9, 1, 0 }
0x1443   : > { %v2761_v60 = vstv %s2760_s19 }
0x1444   : > { %vm2762_vm7 = vcmp.eq.s32.totalorder %v2761_v60, 1 }
0x1445   : > { %v6850_v47 = vsel %vm2762_vm7, %v3603_v4, %v3604_v41  ;;  %v6852_v14 = vsel %vm2762_vm7, %v2748_v63, %v2759_v5  ;;  %v2880_v4 = vld [vmem:[%s4339_s14 + $0x1c] sm:$0x1] }
0x1446   : > { %2789 = vst [vmem:[%s4353_s18 + $0x1a] sm:$0x1] %v6850_v47  ;;  %v6857_v39 = vadd.f32 %v2819_v8, %v6850_v47  ;;  %2782 = vmatmul.f32.vlgmr.msrb.gmra.mxu1 %v6850_v47  ;;  %2811 = vmatmul.f32.vlgmr.msrb.gmra.mxu2 %v6850_v47  ;;  %vm2821_vm8 = vcmp.lt.f32.partialorder %v6852_v14, 2.0  ;;  %vm2816_vm10 = vcmp.eq.f32.partialorder %v6850_v47, 1.0  ;;  %v2835_v2 = vadd.f32 1.0, %v6852_v14 }
0x1447   : > { %vm6864_vm9 = vmand %vm2821_vm8, %vm376_vm1  ;;  %3118 = vmatpush.msrb.mxu1 %v6868_v48  ;;  %3147 = vmatpush.msrb.mxu2 %v6756_v46  ;;  %v6914_v46 = vld [vmem:[#allocation12 + $0x28] sm:$0xff] }
0x1448   : > { %2878 = vst [vmem:[%s4355_s9 + $0x1b] sm:$0x1] %v6857_v39  ;;  %v2823_v24 = vsel %vm6864_vm9, 1.0, %v4184_v10  ;;  %v2840_v56 = vmul.f32 0.07, %v6857_v39  ;;  %v2836_v30 = vsel %vm6864_vm9, %v2835_v2, %v6852_v14 }
0x1449   : > { %v2824_v17 = vsel %vm447_vm2, %v2823_v24, -inf  ;;  %3119 = vmatpush.msrb.mxu1 %v6878_v59  ;;  %3148 = vmatpush.msrb.mxu2 %v6766_v9  ;;  %v6926_v9 = vld [vmem:[#allocation12 + $0x10] sm:$0xff]  ;;  %vm2837_vm13 = vcmp.gt.f32.partialorder %v2836_v30, 2.0 }
0x144a   : > { %2825 = vmax.xlane.f32.xlu0 %v2824_v17  ;;  %v2841_v11 = vadd.f32 0.6, %v2840_v56  ;;  %v3606_v40 = vsel %vm2837_vm13, 1.0, %v4184_v10 }
0x144b   : > { %3120 = vmatpush.msrb.mxu1 %v6882_v53  ;;  %3149 = vmatpush.msrb.mxu2 %v6770_v37  ;;  %v6930_v37 = vld [vmem:[#allocation12 + $0x8] sm:$0xff] }
0x144d   : > { %3121 = vmatpush.msrb.mxu1 %v6886_v36  ;;  %3150 = vmatpush.msrb.mxu2 %v6774_v57  ;;  %v6934_v57 = vld [vmem:[#allocation12] sm:$0xff] }
0x144f   : > { %3122 = vmatpush.msrb.mxu1 %v6890_v13  ;;  %3151 = vmatpush.msrb.mxu2 %v6778_v27 }
0x1451   : > { %3123 = vmatpush.msrb.mxu1 %v6894_v20  ;;  %3152 = vmatpush.msrb.mxu2 %v6782_v23 }
0x1453   : > { %3124 = vmatpush.msrb.mxu1 %v6898_v45  ;;  %3153 = vmatpush.msrb.mxu2 %v6786_v54 }
0x1455   : > { %3125 = vmatpush.msrb.mxu1 %v6902_v44  ;;  %3154 = vmatpush.msrb.mxu2 %v6790_v25 }
0x1457   : > { %3126 = vmatpush.msrb.mxu1 %v6906_v61  ;;  %3155 = vmatpush.msrb.mxu2 %v6794_v19  ;;  %v2765_v19 = vmul.f32 0.95122945, %v6836_v58 }
0x1459   : > { %3127 = vmatpush.msrb.mxu1 %v6910_v12  ;;  %3156 = vmatpush.msrb.mxu2 %v6798_v49 }
0x145b   : > { %3128 = vmatpush.msrb.mxu1 %v6914_v46  ;;  %3157 = vmatpush.msrb.mxu2 %v6802_v43 }
0x145d   : > { %3129 = vmatpush.msrb.mxu1 %v6918_v16  ;;  %3158 = vmatpush.msrb.mxu2 %v6806_v52  ;;  %v2793_v52 = vmul.f32 0.99501246, %v6829_v1  ;;  %v2907_v1 = vmul.f32 0.99501246, %v6857_v39 }
0x145f   : > { %3130 = vmatpush.msrb.mxu1 %v6922_v29  ;;  %3159 = vmatpush.msrb.mxu2 %v6810_v28 }
0x1461   : > { %3131 = vmatpush.msrb.mxu1 %v6926_v9  ;;  %3160 = vmatpush.msrb.mxu2 %v6814_v22  ;;  %v2792_v22 = vld [vmem:[%s4339_s14 + $0x1b] sm:$0x1] }
0x1463   : > { %3132 = vmatpush.msrb.mxu1 %v6930_v37  ;;  %3161 = vmatpush.msrb.mxu2 %v6818_v50 }
0x1465   : > { %3133 = vmatpush.msrb.mxu1 %v6934_v57  ;;  %3162 = vmatpush.msrb.mxu2 %v6822_v42  ;;  %v2794_v42 = vadd.f32 %v2793_v52, %v2792_v22 }
0x14bd   : > { %v2826_v27 = vpop.xlane.xlu0 %2825 }
0x14be   : > { %v2827_v23 = vrot.slane %v2826_v27, 4 }
0x14c0   : > { %v2828_v54 = vmax.f32 %v2826_v27, %v2827_v23 }
0x14c2   : > { %v2829_v25 = vrot.slane %v2828_v54, 2 }
0x14c3   : > { %v2783_v49 = vpop.f32.mrf.mxu1 }
0x14c4   : > { %v2786_v43 = vadd.f32 %v2783_v49, %v2765_v19  ;;  %v2830_v28 = vmax.f32 %v2828_v54, %v2829_v25 }
0x14c6   : > { %v6942_v50 = vadd.f32 %v6489_v32, %v2786_v43  ;;  %v2831_v51 = vrot.slane %v2830_v28, 1 }
0x14c8   : > { %2791 = vst [vmem:[%s4349_s29 + $0x1a] sm:$0x1] %v6942_v50  ;;  %v2832_v0 = vmax.f32 %v2830_v28, %v2831_v51 }
0x14c9   : > { %v2812_v7 = vpop.f32.mrf.mxu2 }
0x14ca   : > { %v2815_v18 = vadd.f32 %v2812_v7, %v2794_v42  ;;  %3693 = vpush %v2832_v0  ;;  %v2968_v0 = vld [vmem:[%s4339_s14 + $0x1d] sm:$0x1]  ;;  %v7020_v7 = vld [vmem:[%s7218_s3] sm:$0x1] }
0x14cc   : > { %v3605_v38 = vadd.f32 -0.6, %v2815_v18 }
0x14ce   : > { %v2818_v34 = vsel %vm2816_vm10, %v3605_v38, %v2815_v18 }
0x14cf   : > { %vm2842_vm11 = vcmp.ge.f32.partialorder %v2818_v34, %v2841_v11  ;;  %2876 = vst [vmem:[%s4351_s12 + $0x1b] sm:$0x1] %v2818_v34  ;;  %v2881_v60 = vmul.f32 0.99501246, %v2818_v34 }
0x14d0   : > { %vm2843_vm12 = vmand %vm2842_vm11, %vm376_vm1 }
0x14d1   : > { %v3607_v33 = vsel %vm2843_vm12, 1.0, %v4184_v10  ;;  %v2882_v47 = vadd.f32 %v2881_v60, %v2880_v4 }
0x14d2   : > { %vm2846_vm14 = vcmp.eq.f32.partialorder %v3607_v33, 1.0 }
0x14d3   : > { %v2847_v3 = vsel %vm2846_vm14, 0.0, %v6852_v14 }
0x14fb   : > { %s3694_s1 = spop %3693 }
0x14fc   : > { %p2834_p12 = scmp.gt.f32.partialorder %s3694_s1, 0.0 }
0x14fe   : > { %s2848_s30 = scalar_select %p2834_p12, 1, 0 }
0x1500   : > { %v2849_v35 = vstv %s2848_s30 }
0x1501   : > { %vm2850_vm15 = vcmp.eq.s32.totalorder %v2849_v35, 1 }
0x1502   : > { %v2851_v31 = vsel %vm2850_vm15, %v3606_v40, %v3607_v33  ;;  %v6959_v62 = vsel %vm2850_vm15, %v2836_v30, %v2847_v3 }
0x1503   : > { %2877 = vst [vmem:[%s4353_s18 + $0x1b] sm:$0x1] %v2851_v31  ;;  %v2908_v26 = vadd.f32 %v2907_v1, %v2851_v31  ;;  %2870 = vmatmul.f32.vlgmr.msrb.gmra.mxu3 %v2851_v31  ;;  %2899 = vmatmul.f32.vlgmr.msra.gmra.mxu0 %v2851_v31  ;;  %vm2909_vm0 = vcmp.lt.f32.partialorder %v6959_v62, 2.0  ;;  %vm2904_vm4 = vcmp.eq.f32.partialorder %v2851_v31, 1.0 }
0x1504   : > { %vm6965_vm3 = vmand %vm2909_vm0, %vm376_vm1  ;;  %3206 = vmatpush.msrb.mxu3 %v6868_v48 }
0x1505   : > { %2966 = vst [vmem:[%s4355_s9 + $0x1c] sm:$0x1] %v2908_v26  ;;  %v2911_v58 = vsel %vm6965_vm3, 1.0, %v4184_v10  ;;  %v2928_v39 = vmul.f32 0.07, %v2908_v26 }
0x1506   : > { %v2912_v21 = vsel %vm447_vm2, %v2911_v58, -inf  ;;  %3207 = vmatpush.msrb.mxu3 %v6878_v59 }
0x1507   : > { %2913 = vmax.xlane.f32.xlu1 %v2912_v21  ;;  %v2929_v59 = vadd.f32 0.6, %v2928_v39  ;;  %v3056_v39 = vld [vmem:[%s4339_s14 + $0x1e] sm:$0x1] }
0x1508   : > { %3208 = vmatpush.msrb.mxu3 %v6882_v53 }
0x150a   : > { %3209 = vmatpush.msrb.mxu3 %v6886_v36  ;;  %v2853_v36 = vmul.f32 0.95122945, %v6942_v50 }
0x150c   : > { %3210 = vmatpush.msrb.mxu3 %v6890_v13 }
0x150e   : > { %3211 = vmatpush.msrb.mxu3 %v6894_v20 }
0x1510   : > { %3212 = vmatpush.msrb.mxu3 %v6898_v45 }
0x1512   : > { %3213 = vmatpush.msrb.mxu3 %v6902_v44 }
0x1514   : > { %3214 = vmatpush.msrb.mxu3 %v6906_v61  ;;  %v2923_v61 = vadd.f32 1.0, %v6959_v62 }
0x1516   : > { %3215 = vmatpush.msrb.mxu3 %v6910_v12  ;;  %v2924_v12 = vsel %vm6965_vm3, %v2923_v61, %v6959_v62 }
0x1517   : > { %vm2925_vm7 = vcmp.gt.f32.partialorder %v2924_v12, 2.0 }
0x1518   : > { %3216 = vmatpush.msrb.mxu3 %v6914_v46 }
0x151a   : > { %3217 = vmatpush.msrb.mxu3 %v6918_v16  ;;  %v3609_v16 = vsel %vm2925_vm7, 1.0, %v4184_v10 }
0x151c   : > { %3218 = vmatpush.msrb.mxu3 %v6922_v29 }
0x151e   : > { %3219 = vmatpush.msrb.mxu3 %v6926_v9  ;;  %v2995_v9 = vmul.f32 0.99501246, %v2908_v26 }
0x1520   : > { %3220 = vmatpush.msrb.mxu3 %v6930_v37 }
0x1522   : > { %3221 = vmatpush.msrb.mxu3 %v6934_v57 }
0x157a   : > { %v2914_v63 = vpop.xlane.xlu1 %2913 }
0x157b   : > { %v2915_v41 = vrot.slane %v2914_v63, 4 }
0x157d   : > { %v2916_v5 = vmax.f32 %v2914_v63, %v2915_v41 }
0x157f   : > { %v2917_v8 = vrot.slane %v2916_v5, 2 }
0x1580   : > { %v2900_v14 = vpop.f32.mrf.mxu0 }
0x1581   : > { %v2903_v15 = vadd.f32 %v2900_v14, %v2882_v47  ;;  %v2918_v48 = vmax.f32 %v2916_v5, %v2917_v8 }
0x1583   : > { %v3608_v24 = vadd.f32 -0.6, %v2903_v15  ;;  %v2919_v17 = vrot.slane %v2918_v48, 1 }
0x1585   : > { %v2906_v53 = vsel %vm2904_vm4, %v3608_v24, %v2903_v15  ;;  %v2920_v13 = vmax.f32 %v2918_v48, %v2919_v17 }
0x1586   : > { %vm2930_vm5 = vcmp.ge.f32.partialorder %v2906_v53, %v2929_v59  ;;  %2964 = vst [vmem:[%s4351_s12 + $0x1c] sm:$0x1] %v2906_v53  ;;  %v2871_v20 = vpop.f32.mrf.mxu3  ;;  %v2969_v42 = vmul.f32 0.99501246, %v2906_v53 }
0x1587   : > { %v2874_v45 = vadd.f32 %v2871_v20, %v2853_v36  ;;  %3695 = vpush %v2920_v13  ;;  %vm2931_vm6 = vmand %vm2930_vm5, %vm376_vm1 }
0x1588   : > { %v3610_v46 = vsel %vm2931_vm6, 1.0, %v4184_v10  ;;  %v2970_v38 = vadd.f32 %v2969_v42, %v2968_v0 }
0x1589   : > { %v2875_v44 = vadd.f32 %v6489_v32, %v2874_v45  ;;  %vm2934_vm8 = vcmp.eq.f32.partialorder %v3610_v46, 1.0 }
0x158a   : > { %v2935_v29 = vsel %vm2934_vm8, 0.0, %v6959_v62 }
0x158b   : > { %2879 = vst [vmem:[%s4349_s29 + $0x1b] sm:$0x1] %v2875_v44  ;;  %v2941_v28 = vmul.f32 0.95122945, %v2875_v44 }
0x15b8   : > { %s3696_s23 = spop %3695 }
0x15b9   : > { %p2922_p2 = scmp.gt.f32.partialorder %s3696_s23, 0.0  ;;  %s7080_s23 = sshll.u32 %s4248_s28, 5 }
0x15ba   : > { %s3281_s20 = scalar_lea.hbm %s7192_s5, %s7080_s23 }
0x15bb   : > { %s2936_s16 = scalar_select %p2922_p2, 1, 0 }
0x15bd   : > { %v2937_v32 = vstv %s2936_s16  ;;  %s4034_s16 = scalar_lea.hbm %s7192_s5, 64 }
0x15be   : > { %vm2938_vm9 = vcmp.eq.s32.totalorder %v2937_v32, 1 }
0x15bf   : > { %v2939_v37 = vsel %vm2938_vm9, %v3609_v16, %v3610_v46  ;;  %v2940_v57 = vsel %vm2938_vm9, %v2924_v12, %v2935_v29 }
0x15c0   : > { %2965 = vst [vmem:[%s4353_s18 + $0x1c] sm:$0x1] %v2939_v37  ;;  %v2996_v27 = vadd.f32 %v2995_v9, %v2939_v37  ;;  %2958 = vmatmul.f32.vlgmr.msra.gmra.mxu1 %v2939_v37  ;;  %2987 = vmatmul.f32.vlgmr.msra.gmra.mxu2 %v2939_v37  ;;  %vm2997_vm10 = vcmp.lt.f32.partialorder %v2940_v57, 2.0  ;;  %vm2992_vm12 = vcmp.eq.f32.partialorder %v2939_v37, 1.0  ;;  %v3011_v3 = vadd.f32 1.0, %v2940_v57 }
0x15c1   : > { %vm7007_vm11 = vmand %vm2997_vm10, %vm376_vm1 }
0x15c2   : > { %3054 = vst [vmem:[%s4355_s9 + $0x1d] sm:$0x1] %v2996_v27  ;;  %v2999_v54 = vsel %vm7007_vm11, 1.0, %v4184_v10  ;;  %v3016_v2 = vmul.f32 0.07, %v2996_v27  ;;  %v3012_v1 = vsel %vm7007_vm11, %v3011_v3, %v2940_v57 }
0x15c3   : > { %v3000_v25 = vsel %vm447_vm2, %v2999_v54, -inf  ;;  %vm3013_vm15 = vcmp.gt.f32.partialorder %v3012_v1, 2.0  ;;  %v3083_v58 = vmul.f32 0.99501246, %v2996_v27 }
0x15c4   : > { %3001 = vmax.xlane.f32.xlu2 %v3000_v25  ;;  %v3017_v35 = vadd.f32 0.6, %v3016_v2  ;;  %v3612_v26 = vsel %vm3013_vm15, 1.0, %v4184_v10 }
0x1637   : > { %v3002_v19 = vpop.xlane.xlu2 %3001 }
0x1638   : > { %v3003_v49 = vrot.slane %v3002_v19, 4 }
0x163a   : > { %v3004_v43 = vmax.f32 %v3002_v19, %v3003_v49 }
0x163c   : > { %v3005_v52 = vrot.slane %v3004_v43, 2 }
0x163d   : > { %v2959_v22 = vpop.f32.mrf.mxu1 }
0x163e   : > { %v3006_v50 = vmax.f32 %v3004_v43, %v3005_v52  ;;  %v2962_v51 = vadd.f32 %v2959_v22, %v2941_v28 }
0x1640   : > { %v2963_v56 = vadd.f32 %v7020_v7, %v2962_v51  ;;  %v3007_v18 = vrot.slane %v3006_v50, 1 }
0x1642   : > { %2967 = vst [vmem:[%s4349_s29 + $0x1c] sm:$0x1] %v2963_v56  ;;  %v3008_v11 = vmax.f32 %v3006_v50, %v3007_v18  ;;  %v3029_v61 = vmul.f32 0.95122945, %v2963_v56 }
0x1643   : > { %v2988_v34 = vpop.f32.mrf.mxu2 }
0x1644   : > { %v2991_v30 = vadd.f32 %v2988_v34, %v2970_v38  ;;  %3697 = vpush %v3008_v11  ;;  %v3144_v34 = vld [vmem:[%s4339_s14 + $0x1f] sm:$0x1] }
0x1646   : > { %v3611_v33 = vadd.f32 -0.6, %v2991_v30 }
0x1648   : > { %v2994_v40 = vsel %vm2992_vm12, %v3611_v33, %v2991_v30 }
0x1649   : > { %vm3018_vm13 = vcmp.ge.f32.partialorder %v2994_v40, %v3017_v35  ;;  %3052 = vst [vmem:[%s4351_s12 + $0x1d] sm:$0x1] %v2994_v40  ;;  %v3057_v14 = vmul.f32 0.99501246, %v2994_v40 }
0x164a   : > { %vm3019_vm14 = vmand %vm3018_vm13, %vm376_vm1 }
0x164b   : > { %v3613_v31 = vsel %vm3019_vm14, 1.0, %v4184_v10  ;;  %v3058_v24 = vadd.f32 %v3057_v14, %v3056_v39 }
0x164c   : > { %vm3022_vm0 = vcmp.eq.f32.partialorder %v3613_v31, 1.0 }
0x164d   : > { %v3023_v55 = vsel %vm3022_vm0, 0.0, %v2940_v57 }
0x1675   : > { %s3698_s13 = spop %3697 }
0x1676   : > { %p3010_p11 = scmp.gt.f32.partialorder %s3698_s13, 0.0  ;;  %s3242_s13 = sand.u32 1, %s4248_s28  }
0x1677   : > { %s7094_s2 = scalar_lea.sflag [#allocation15], %s3242_s13 }
0x1678   : > { %s3024_s21 = scalar_select %p3010_p11, 1, 0 }
0x167a   : > { %v3025_v62 = vstv %s3024_s21  ;;  %s3282_s21 = sshll.u32 %s4351_s12, 4  ;;  %s3283_s21 = int_to_ptr.vmem [resolvable:$true] %s3282_s21 }
0x167b   : > { %vm3026_vm3 = vcmp.eq.s32.totalorder %v3025_v62, 1 }
0x167c   : > { %v3027_v21 = vsel %vm3026_vm3, %v3612_v26, %v3613_v31  ;;  %v3028_v63 = vsel %vm3026_vm3, %v3012_v1, %v3023_v55 }
0x167d   : > { %3053 = vst [vmem:[%s4353_s18 + $0x1d] sm:$0x1] %v3027_v21  ;;  %v3084_v41 = vadd.f32 %v3083_v58, %v3027_v21  ;;  %3046 = vmatmul.f32.vlgmr.msra.gmra.mxu3 %v3027_v21  ;;  %3075 = vmatmul.f32.vlgmr.msrb.gmra.mxu0 %v3027_v21  ;;  %vm3085_vm4 = vcmp.lt.f32.partialorder %v3028_v63, 2.0  ;;  %vm3080_vm6 = vcmp.eq.f32.partialorder %v3027_v21, 1.0  ;;  %v3099_v29 = vadd.f32 1.0, %v3028_v63 }
0x167e   : > { %vm7034_vm5 = vmand %vm3085_vm4, %vm376_vm1 }
0x167f   : > { %3142 = vst [vmem:[%s4355_s9 + $0x1e] sm:$0x1] %v3084_v41  ;;  %v3087_v4 = vsel %vm7034_vm5, 1.0, %v4184_v10  ;;  %v3104_v59 = vmul.f32 0.07, %v3084_v41  ;;  %v3100_v9 = vsel %vm7034_vm5, %v3099_v29, %v3028_v63 }
0x1680   : > { %v3088_v5 = vsel %vm447_vm2, %v3087_v4, -inf  ;;  %vm3101_vm9 = vcmp.gt.f32.partialorder %v3100_v9, 2.0  ;;  %v3171_v54 = vmul.f32 0.99501246, %v3084_v41 }
0x1681   : > { %3089 = vmax.xlane.f32.xlu0 %v3088_v5  ;;  %v3105_v45 = vadd.f32 0.6, %v3104_v59  ;;  %v3615_v27 = vsel %vm3101_vm9, 1.0, %v4184_v10 }
0x16f4   : > { %v3090_v8 = vpop.xlane.xlu0 %3089 }
0x16f5   : > { %v3091_v47 = vrot.slane %v3090_v8, 4 }
0x16f7   : > { %v3092_v15 = vmax.f32 %v3090_v8, %v3091_v47 }
0x16f9   : > { %v3093_v48 = vrot.slane %v3092_v15, 2 }
0x16fa   : > { %v3076_v17 = vpop.f32.mrf.mxu0 }
0x16fb   : > { %v3094_v53 = vmax.f32 %v3092_v15, %v3093_v48  ;;  %v3079_v36 = vadd.f32 %v3076_v17, %v3058_v24 }
0x16fd   : > { %v3614_v13 = vadd.f32 -0.6, %v3079_v36  ;;  %v3095_v20 = vrot.slane %v3094_v53, 1 }
0x16ff   : > { %v3082_v44 = vsel %vm3080_vm6, %v3614_v13, %v3079_v36  ;;  %v3096_v12 = vmax.f32 %v3094_v53, %v3095_v20 }
0x1700   : > { %vm3106_vm7 = vcmp.ge.f32.partialorder %v3082_v44, %v3105_v45  ;;  %3140 = vst [vmem:[%s4351_s12 + $0x1e] sm:$0x1] %v3082_v44  ;;  %v3047_v46 = vpop.f32.mrf.mxu3  ;;  %v3145_v11 = vmul.f32 0.99501246, %v3082_v44 }
0x1701   : > { %v3050_v32 = vadd.f32 %v3047_v46, %v3029_v61  ;;  %3699 = vpush %v3096_v12  ;;  %vm3107_vm8 = vmand %vm3106_vm7, %vm376_vm1 }
0x1702   : > { %v3616_v37 = vsel %vm3107_vm8, 1.0, %v4184_v10  ;;  %v3146_v33 = vadd.f32 %v3145_v11, %v3144_v34 }
0x1703   : > { %v3051_v16 = vadd.f32 %v7020_v7, %v3050_v32  ;;  %vm3110_vm10 = vcmp.eq.f32.partialorder %v3616_v37, 1.0 }
0x1704   : > { %v3111_v23 = vsel %vm3110_vm10, 0.0, %v3028_v63 }
0x1705   : > { %3055 = vst [vmem:[%s4349_s29 + $0x1d] sm:$0x1] %v3051_v16  ;;  %v3117_v0 = vmul.f32 0.95122945, %v3051_v16 }
0x1732   : > { %s3700_s19 = spop %3699 }
0x1733   : > { %p3098_p13 = scmp.gt.f32.partialorder %s3700_s19, 0.0  ;;  %s3284_s19 = sshll.u32 %s3281_s20, 4  ;;  %s3285_s19 = int_to_ptr.hbm [resolvable:$true] %s3284_s19 }
0x1734   : > { %s4028_s3 = sshra.s32 %s3285_s19, 4  ;;  %s4029_s3 = int_to_ptr.hbm [resolvable:$true] %s4028_s3 }
0x1735   : > { %s3112_s1 = scalar_select %p3098_p13, 1, 0 }
0x1736   : > { %s4030_s11 = scalar_lea.hbm %s4029_s3, 32  ;;  %p4035_p8 = scmp.lt.s32.totalorder %s4029_s3, %s7192_s5 }
0x1737   : > { %v3113_v57 = vstv %s3112_s1  ;;  %p4031_p3 = scmp.ne.s32.totalorder %s4029_s3, %s4030_s11  ;;  %p4036_p1 = scmp.lt.s32.totalorder %s4034_s16, %s4030_s11 }
0x1738   : > { %vm3114_vm11 = vcmp.eq.s32.totalorder %v3113_v57, 1 }
0x1739   : > { %v3115_v25 = vsel %vm3114_vm11, %v3615_v27, %v3616_v37  ;;  %v3116_v19 = vsel %vm3114_vm11, %v3100_v9, %v3111_v23  ;;  %p4032_p7 = pnand %p4031_p3, %p4302_p5  ;;  %p4037_p4 = por %p4036_p1, %p4035_p8 }
0x173a   : > { %3141 = vst [vmem:[%s4353_s18 + $0x1e] sm:$0x1] %v3115_v25  ;;  %v3172_v49 = vadd.f32 %v3171_v54, %v3115_v25  ;;  %3134 = vmatmul.f32.vlgmr.msrb.gmra.mxu1 %v3115_v25  ;;  %3163 = vmatmul.f32.vlgmr.msrb.gmra.mxu2 %v3115_v25  ;;  %vm3173_vm12 = vcmp.lt.f32.partialorder %v3116_v19, 2.0  ;;  %v3187_v55 = vadd.f32 1.0, %v3116_v19 }
0x173b   : > { %vm7056_vm13 = vmand %vm3173_vm12, %vm376_vm1  ;;  %p4033_p10 = pneg %p4032_p7 }
0x173c   : > { %3230 = vst [vmem:[%s4355_s9 + $0x1f] sm:$0x1] %v3172_v49  ;;  %v3175_v52 = vsel %vm7056_vm13, 1.0, %v4184_v10  ;;  %v3192_v3 = vmul.f32 0.07, %v3172_v49  ;;  %v3188_v58 = vsel %vm7056_vm13, %v3187_v55, %v3116_v19 }
0x173d   : > { %3233 = vst [vmem:[#allocation3] sm:$0x1] %v3172_v49  ;;  %v3176_v28 = vsel %vm447_vm2, %v3175_v52, -inf  ;;  %vm3168_vm2 = vcmp.eq.f32.partialorder %v3115_v25, 1.0  ;;  %vm3189_vm0 = vcmp.gt.f32.partialorder %v3188_v58, 2.0  ;;  %p4038_p9 = pnand %p4037_p4, %p4033_p10 }
0x173e   : > { %3177 = vmax.xlane.f32.xlu1 %v3176_v28  ;;  %v3193_v62 = vadd.f32 0.6, %v3192_v3  ;;  %v3618_v41 = vsel %vm3189_vm0, 1.0, %v4184_v10 }
0x17b1   : > { %v3178_v22 = vpop.xlane.xlu1 %3177 }
0x17b2   : > { %v3179_v50 = vrot.slane %v3178_v22, 4 }
0x17b4   : > { %v3180_v51 = vmax.f32 %v3178_v22, %v3179_v50 }
0x17b6   : > { %v3181_v42 = vrot.slane %v3180_v51, 2 }
0x17b7   : > { %v3135_v56 = vpop.f32.mrf.mxu1 }
0x17b8   : > { %v3182_v18 = vmax.f32 %v3180_v51, %v3181_v42  ;;  %v3138_v38 = vadd.f32 %v3135_v56, %v3117_v0 }
0x17ba   : > { %v7067_v2 = vadd.f32 %v7020_v7, %v3138_v38  ;;  %v3183_v30 = vrot.slane %v3182_v18, 1 }
0x17bc   : > { %3143 = vst [vmem:[%s4349_s29 + $0x1e] sm:$0x1] %v7067_v2  ;;  %v3184_v35 = vmax.f32 %v3182_v18, %v3183_v30 }
0x17bd   : > { %v3164_v40 = vpop.f32.mrf.mxu2 }
0x17be   : > { %v3167_v1 = vadd.f32 %v3164_v40, %v3146_v33  ;;  %3701 = vpush %v3184_v35 }
0x17c0   : > { %v3617_v31 = vadd.f32 -0.6, %v3167_v1 }
0x17c2   : > { %v3170_v26 = vsel %vm3168_vm2, %v3617_v31, %v3167_v1 }
0x17c3   : > { %vm3194_vm14 = vcmp.ge.f32.partialorder %v3170_v26, %v3193_v62  ;;  %3228 = vst [vmem:[%s4351_s12 + $0x1f] sm:$0x1] %v3170_v26 }
0x17c4   : > { %3232 = vst [vmem:[#allocation2] sm:$0x1] %v3170_v26  ;;  %vm3195_vm15 = vmand %vm3194_vm14, %vm376_vm1 }
0x17c5   : > { %v3619_v21 = vsel %vm3195_vm15, 1.0, %v4184_v10 }
0x17c6   : > { %vm3198_vm3 = vcmp.eq.f32.partialorder %v3619_v21, 1.0 }
0x17c7   : > { %v3199_v60 = vsel %vm3198_vm3, 0.0, %v3116_v19 }
0x17ef   : > { %s3702_s14 = spop %3701 }
0x17f0   : > { %p3186_p0 = scmp.gt.f32.partialorder %s3702_s14, 0.0 }
0x17f2   : > { %s3200_s30 = scalar_select %p3186_p0, 1, 0 }
0x17f4   : > { %v3201_v63 = vstv %s3200_s30  ;;  %s3298_s30 = scalar_lea.hbm %s7193_s6, %s7080_s23 }
0x17f5   : > { %vm3202_vm4 = vcmp.eq.s32.totalorder %v3201_v63, 1  ;;  %s7092_s0 = sshll.u32 %s3298_s30, 4  ;;  %s3302_s0 = int_to_ptr.hbm [resolvable:$true] %s7092_s0 }
0x17f6   : > { %v3203_v6 = vsel %vm3202_vm4, %v3618_v41, %v3619_v21  ;;  %v3204_v4 = vsel %vm3202_vm4, %v3188_v58, %v3199_v60 }
0x17f7   : > { %3229 = vst [vmem:[%s4353_s18 + $0x1f] sm:$0x1] %v3203_v6  ;;  %3222 = vmatmul.f32.vlgmr.msrb.gmra.mxu3 %v3203_v6 }
0x17f8   : > { %3234 = vst [vmem:[#allocation4] sm:$0x1] %v3203_v6 }
0x17f9   : > { %3236 = vst [vmem:[#allocation6] sm:$0x1] %v3204_v4 }
0x17fa   : > { %4041 = shalt.err (!%p4038_p9)
}
0x17fb   : > { %s4185_s13 = smov 128   ;;  %s4186_s1 = smov 8  }
0x17fc   : > { %3714 = dma.vmem_to_hbm [thread:$0]  (%p4302_p5), %s3283_s21, 512, %s3285_s19, %s7094_s2, %s4185_s13, %s4185_s13, %s4186_s1  }
0x17fd   : > { %s3299_s14 = sshll.u32 %s4353_s18, 4  ;;  %s4056_s3 = sshra.s32 %s3302_s0, 4  ;;  %s3300_s14 = int_to_ptr.vmem [resolvable:$true] %s3299_s14  ;;  %s4057_s3 = int_to_ptr.hbm [resolvable:$true] %s4056_s3 }
0x17fe   : > { %s4058_s11 = scalar_lea.hbm %s4057_s3, 32  ;;  %s4062_s12 = scalar_lea.hbm %s7193_s6, 64 }
0x17ff   : > { %p4059_p12 = scmp.ne.s32.totalorder %s4057_s3, %s4058_s11  ;;  %p4063_p13 = scmp.lt.s32.totalorder %s4057_s3, %s7193_s6 }
0x1800   : > { %p4064_p0 = scmp.lt.s32.totalorder %s4062_s12, %s4058_s11 }
0x1801   : > { %p4060_p2 = pnand %p4059_p12, %p4302_p5 }
0x1802   : > { %p4065_p3 = por %p4064_p0, %p4063_p13 }
0x1803   : > { %p4061_p11 = pneg %p4060_p2 }
0x1805   : > { %p4066_p7 = pnand %p4065_p3, %p4061_p11 }
0x1807   : > { %4069 = shalt.err (!%p4066_p7)
}
0x1808   : > { %3715 = dma.vmem_to_hbm [thread:$0]  (%p4302_p5), %s3300_s14, 512, %s3302_s0, %s7094_s2, %s4185_s13, %s4185_s13, %s4186_s1  }
0x1809   : > { %s3315_s19 = scalar_lea.hbm %s7194_s7, %s7080_s23  ;;  %s3316_s20 = sshll.u32 %s4355_s9, 4  ;;  %s3317_s20 = int_to_ptr.vmem [resolvable:$true] %s3316_s20 }
0x180a   : > { %s3318_s3 = sshll.u32 %s3315_s19, 4  ;;  %s3253_s11 = scalar_lea.sflag [#allocation18], %s4335_s15  ;;  %s3319_s3 = int_to_ptr.hbm [resolvable:$true] %s3318_s3 }
0x180b   : > { %s4084_s30 = sshra.s32 %s3319_s3, 4  ;;  %s4090_s0 = scalar_lea.hbm %s7194_s7, 64  ;;  %s4085_s30 = int_to_ptr.hbm [resolvable:$true] %s4084_s30 }
0x180c   : > { %s4086_s28 = scalar_lea.hbm %s4085_s30, 32  ;;  %p4091_p4 = scmp.lt.s32.totalorder %s4085_s30, %s7194_s7 }
0x180d   : > { %p4087_p10 = scmp.ne.s32.totalorder %s4085_s30, %s4086_s28  ;;  %p4092_p9 = scmp.lt.s32.totalorder %s4090_s0, %s4086_s28 }
0x180f   : > { %p4088_p8 = pnand %p4087_p10, %p4302_p5  ;;  %p4093_p12 = por %p4092_p9, %p4091_p4 }
0x1811   : > { %p4089_p1 = pneg %p4088_p8 }
0x1813   : > { %p4094_p2 = pnand %p4093_p12, %p4089_p1 }
0x1815   : > { %4097 = shalt.err (!%p4094_p2)
}
0x1816   : > { %3716 = dma.vmem_to_hbm [thread:$0]  (%p4302_p5), %s3317_s20, 512, %s3319_s3, %s3253_s11, %s4185_s13, %s4185_s13, %s4186_s1   ;;  %v3205_v10 = vmul.f32 0.95122945, %v7067_v2 }
0x1817   : > { %s3264_s18 = scalar_lea.hbm %s7191_s4, %s7080_s23  ;;  %s3265_s21 = sshll.u32 %s4349_s29, 4  ;;  %s3266_s21 = int_to_ptr.vmem [resolvable:$true] %s3265_s21 }
0x1818   : > { %s3267_s19 = sshll.u32 %s3264_s18, 4  ;;  %s3238_s30 = scalar_lea.sflag [#allocation9], %s4335_s15  ;;  %s3268_s19 = int_to_ptr.hbm [resolvable:$true] %s3267_s19 }
0x1819   : > { %s4112_s28 = sshra.s32 %s3268_s19, 4  ;;  %s4118_s11 = scalar_lea.hbm %s7191_s4, 64  ;;  %s4113_s28 = int_to_ptr.hbm [resolvable:$true] %s4112_s28 }
0x181a   : > { %s4114_s20 = scalar_lea.hbm %s4113_s28, 32  ;;  %p4119_p3 = scmp.lt.s32.totalorder %s4113_s28, %s7191_s4 }
0x181b   : > { %p4115_p11 = scmp.ne.s32.totalorder %s4113_s28, %s4114_s20  ;;  %p4120_p7 = scmp.lt.s32.totalorder %s4118_s11, %s4114_s20 }
0x181d   : > { %p4116_p13 = pnand %p4115_p11, %p4302_p5  ;;  %p4121_p10 = por %p4120_p7, %p4119_p3 }
0x181f   : > { %p4117_p0 = pneg %p4116_p13 }
0x1821   : > { %p4122_p8 = pnand %p4121_p10, %p4117_p0 }
0x187a   : > { %v3223_v5 = vpop.f32.mrf.mxu3 }
0x187b   : > { %v3226_v8 = vadd.f32 %v3223_v5, %v3205_v10 }
0x187d   : > { %v3227_v47 = vadd.f32 %v7020_v7, %v3226_v8 }
0x187f   : > { %3231 = vst [vmem:[%s4349_s29 + $0x1f] sm:$0x1] %v3227_v47 }
0x1880   : > { %3235 = vst [vmem:[#allocation5] sm:$0x1] %v3227_v47 }
0x1881   : > { %4125 = shalt.err (!%p4122_p8)
}
0x1882   : > { %3713 = dma.vmem_to_hbm [thread:$0]  (%p4302_p5), %s3266_s21, 512, %s3268_s19, %s3238_s30, %s4185_s13, %s4185_s13, %s4186_s1  }
0x1883 PF: > { %s3333_s15 = sand.u32 1, %s4164_s24   ;;  %p7279_p1 = scmp.ge.s32.totalorder %s4176_s27, 2 }
0x1884   : > { %s3334_s29 = scalar_lea.sflag [#allocation9], %s3333_s15 }
0x1885   : > { %p3733_p4 = pnand %p7279_p1, %p4264_p6 }
0x1887   : > { %p3734_p9 = pneg %p3733_p4 }
0x1889   : > { %4151 = dma.done.wait (%p3734_p9), %s3334_s29, 512  }
0x188a   : > { %4153 = vsyncadd (%p3734_p9), %s3334_s29, 4294966784  ;;  %s7280_s0 = sadd.s32 4294967294, %s4176_s27  }
0x188b   : > { %s3343_s2 = sand.u32 1, %s7280_s0  }
0x188c   : > { %s3344_s10 = scalar_lea.sflag [#allocation15], %s3343_s2 }
0x188d   : > { %4155 = dma.done.wait (%p3734_p9), %s3344_s10, 1024  }
0x188e   : > { %4157 = vsyncadd (%p3734_p9), %s3344_s10, 4294966272  ;;  %s3364_s14 = scalar_lea.sflag [#allocation18], %s3333_s15 }
0x188f   : > { %4159 = dma.done.wait (%p3734_p9), %s3364_s14, 512  }
0x1890   : > { %4161 = vsyncadd (%p3734_p9), %s3364_s14, 4294966784  ;;  %s7281_s13 = sld [smem:[#allocation24_spill]]  ;;  %p28_p5 = scmp.ge.s32.totalorder %s4292_s22, 4  }
0x1891   : > { %s7282_s24 = smov %s4168_s25  ;;  %s7283_s25 = smov %s4172_s26 }
0x1892   : > { %s7285_s27 = smov %s4292_s22  ;;  %30 = sbr.rel (!%p28_p5) target bundleno = 15 (0xf), region = 142 }
0x1896   : > { %s7284_s26 = smov %s7281_s13 }
0x1897   :  { %3370 = vsyncpa [#allocation8], 1 }
0x1898   :  { %3372 = vsyncpa [#allocation8 + $0x1], 1 }
0x1899   :  { %3373 = vsyncpa [#allocation11], 1 }
0x189a   :  { %3374 = vsyncpa [#allocation9], 1 }
0x189b   :  { %3376 = vsyncpa [#allocation9 + $0x1], 1 }
0x189c   :  { %3377 = vsyncpa [#allocation15], 1 }
0x189d   :  { %3379 = vsyncpa [#allocation15 + $0x1], 1 }
0x189e   :  { %3380 = vsyncpa [#allocation18], 1 }
0x189f   :  { %3382 = vsyncpa [#allocation18 + $0x1], 1 }

</bundles_post_ra>
